<compile_context>
chip_gen: v5e
topology: v5e:2x2
jax: 0.10.0
libtpu: 0.0.40
codegen_flags: <defaults>
</compile_context>

<pallas_src>
import functools

import jax
import jax.numpy as jnp
from jax import lax
from jax.experimental import pallas as pl
from jax.experimental.pallas import tpu as pltpu

ROW_TILE = 1024                  # max FC row tile (was 128; review: 512-2048)
LANE = 128                       # lane width for lane-dense stores
BN_EPS = 1e-5
BN_SCALE = float(1.0 / (1.0 + BN_EPS) ** 0.5)   # eval-mode BN with default stats
# bf16 MXU operands on all generations (halves HBM read traffic of the
# mem-bound FC/attention inputs, 2x MXU rate on v6e/v7x); accumulation and all
# element-wise math stay f32 (required on v5e's VPU/EUP anyway).
MXU_DTYPE = jnp.bfloat16


def _vmem_limit_bytes():
    """Generation-aware VMEM cap: ~3/4 of physical VMEM (v5e/v6e 128 MiB -> 96
    MiB, v7x 64 MiB -> 48 MiB).  Falls back to the v7x-safe 48 MiB."""
    try:
        cap = pltpu.get_tpu_info().vmem_capacity_bytes
    except Exception:
        cap = 64 * 1024 * 1024
    return int(min(cap * 3 // 4, 96 * 1024 * 1024))


VMEM_LIMIT = _vmem_limit_bytes()
ATTN_GROUP_BUDGET = 8 * 1024 * 1024    # per-grid-step VMEM budget for attention


# ----------------------------------------------------------------------------
# Row-tiling helper: big tiles, >=2 grid steps (v7x megacore), pad-free when
# the shapes allow it.
# ----------------------------------------------------------------------------
def _row_block(M):
    """Return (row_block, padded_rows)."""
    if M <= 8:
        return M, M                        # too small to split legally
    if M <= 2 * ROW_TILE:
        bm = -(-M // 2)                    # ceil(M/2): exactly two row blocks
        bm = -(-bm // 8) * 8               # sublane aligned
        Mp = M if M % bm == 0 else 2 * bm
        return bm, Mp
    if M % ROW_TILE == 0:
        return ROW_TILE, M
    # TODO(synk): for very large awkward M this pad/slice pair could become an
    # in-kernel masked partial last block instead of a wrapper-side copy.
    return ROW_TILE, -(-M // ROW_TILE) * ROW_TILE


# ----------------------------------------------------------------------------
# Fused FC kernels (1x1 conv + folded BN + optional ReLU; 1 or 2 layers fused)
# ----------------------------------------------------------------------------
def _fc1_kernel(x_ref, w_ref, b_ref, o_ref, *, relu):
    y = jnp.dot(x_ref[...], w_ref[...], preferred_element_type=jnp.float32)
    y = y + b_ref[...]
    if relu:
        y = jnp.maximum(y, 0.0)
    o_ref[...] = y.astype(o_ref.dtype)


def _fc2_kernel(x_ref, w1_ref, b1_ref, w2_ref, b2_ref, o_ref, *, relu1, relu2):
    y = jnp.dot(x_ref[...], w1_ref[...], preferred_element_type=jnp.float32)
    y = y + b1_ref[...]
    if relu1:
        y = jnp.maximum(y, 0.0)
    y = jnp.dot(y.astype(w2_ref.dtype), w2_ref[...],
                preferred_element_type=jnp.float32)
    y = y + b2_ref[...]
    if relu2:
        y = jnp.maximum(y, 0.0)
    o_ref[...] = y.astype(o_ref.dtype)


def _fc_pallas(x2d, layers, pad_lanes=False, out_dtype=jnp.float32):
    """x2d: [M, Cin]; 1 or 2 fused (w, b, relu) layers -> [M, Cout]."""
    assert len(layers) in (1, 2)
    M, Cin = x2d.shape
    x2d = x2d.astype(MXU_DTYPE)
    bm, Mp = _row_block(M)
    if Mp != M:
        x2d = jnp.pad(x2d, ((0, Mp - M), (0, 0)))
    grid = (Mp // bm,)

    ws = [l["w"].astype(MXU_DTYPE) for l in layers]
    bs = [l["b"].astype(jnp.float32) for l in layers]
    relus = [bool(l["relu"]) for l in layers]
    cout = ws[-1].shape[1]
    cout_pad = cout
    if pad_lanes and cout % LANE:
        # lane-dense output slab (unmasked vst): zero-pad weight/bias columns
        cout_pad = -(-cout // LANE) * LANE
        ws[-1] = jnp.pad(ws[-1], ((0, 0), (0, cout_pad - cout)))
        bs[-1] = jnp.pad(bs[-1], ((0, cout_pad - cout),))
    bs = [b.reshape(1, -1) for b in bs]

    if len(layers) == 1:
        kernel = functools.partial(_fc1_kernel, relu=relus[0])
        in_specs = [
            pl.BlockSpec((bm, Cin), lambda i: (i, 0)),
            pl.BlockSpec(ws[0].shape, lambda i: (0, 0)),
            pl.BlockSpec(bs[0].shape, lambda i: (0, 0)),
        ]
        args = (x2d, ws[0], bs[0])
    else:
        kernel = functools.partial(_fc2_kernel, relu1=relus[0], relu2=relus[1])
        in_specs = [
            pl.BlockSpec((bm, Cin), lambda i: (i, 0)),
            pl.BlockSpec(ws[0].shape, lambda i: (0, 0)),
            pl.BlockSpec(bs[0].shape, lambda i: (0, 0)),
            pl.BlockSpec(ws[1].shape, lambda i: (0, 0)),
            pl.BlockSpec(bs[1].shape, lambda i: (0, 0)),
        ]
        args = (x2d, ws[0], bs[0], ws[1], bs[1])

    out = pl.pallas_call(
        kernel,
        out_shape=jax.ShapeDtypeStruct((Mp, cout_pad), out_dtype),
        grid=grid,
        in_specs=in_specs,
        out_specs=pl.BlockSpec((bm, cout_pad), lambda i: (i, 0)),
        compiler_params=pltpu.CompilerParams(
            dimension_semantics=("parallel",), vmem_limit_bytes=VMEM_LIMIT),
    )(*args)
    if Mp != M:
        out = out[:M]
    if cout_pad != cout:
        out = out[:, :cout]
    return out


def apply_fc(layers, x, pad_lanes=False, out_dtype=jnp.float32):
    """x: [..., Cin] channels-last -> [..., Cout]."""
    lead = x.shape[:-1]
    cout = layers[-1]["w"].shape[1]
    y = _fc_pallas(x.reshape(-1, x.shape[-1]), layers,
                   pad_lanes=pad_lanes, out_dtype=out_dtype)
    return y.reshape(lead + (cout,))


# ----------------------------------------------------------------------------
# Batched attention kernel: many groups per grid step
# ----------------------------------------------------------------------------
def _attn_kernel(q_ref, k_ref, v_ref, o_ref, *, scale, causal):
    q = q_ref[...]                                   # [Gb, Lq, d]
    k = k_ref[...]                                   # [Gb, Lk, d]
    v = v_ref[...]                                   # [Gb, Lk, d]
    s = jnp.einsum('gqd,gkd->gqk', q, k,
                   preferred_element_type=jnp.float32) * scale
    if causal:
        lq, lk = s.shape[-2], s.shape[-1]
        row = lax.broadcasted_iota(jnp.int32, (lq, lk), 0)
        col = lax.broadcasted_iota(jnp.int32, (lq, lk), 1)
        # matches torch.where(tril_mask, attn, -2**15 + 1)
        s = jnp.where((col <= row)[None, :, :], s, jnp.float32(-32767.0))
    m = jnp.max(s, axis=-1, keepdims=True)
    e = jnp.exp(s - m)
    p = e * pl.reciprocal(jnp.sum(e, axis=-1, keepdims=True), approx=True)
    o_ref[...] = jnp.einsum('gqk,gkd->gqd', p.astype(v.dtype), v,
                            preferred_element_type=jnp.float32).astype(o_ref.dtype)


def _pick_group_block(G, Lq, Lk, d):
    """Groups per grid step, sized against double-buffered q/k/v/o blocks plus
    in-kernel score/softmax intermediates; capped at ceil(G/2) so the grid has
    >=2 steps for v7x's two TensorCores."""
    isz = jnp.finfo(MXU_DTYPE).bits // 8
    per_group = (2 * (Lq + 2 * Lk) * d * isz        # double-buffered q, k, v blocks
                 + 2 * Lq * d * isz                 # double-buffered output block
                 + 3 * Lq * Lk * 4                  # s / e / p intermediates (f32)
                 + 3 * Lq * d * 4)                  # f32 compute copies
    gb = max(1, ATTN_GROUP_BUDGET // max(per_group, 1))
    gb = min(gb, max(1, -(-G // 2)))
    return min(gb, G)


def batched_attention(q, k, v, scale, causal):
    """q: [G, Lq, d], k/v: [G, Lk, d] -> [G, Lq, d] in MXU_DTYPE (feeds matmuls)."""
    G, Lq, d = q.shape
    Lk = k.shape[1]
    gb = _pick_group_block(G, Lq, Lk, d)
    Gp = -(-G // gb) * gb
    q = q.astype(MXU_DTYPE)
    k = k.astype(MXU_DTYPE)
    v = v.astype(MXU_DTYPE)
    if Gp != G:
        # pad the group axis instead of shrinking gb to a divisor of G; the
        # all-zero groups softmax to a finite uniform distribution and are
        # sliced off below.
        pad = ((0, Gp - G), (0, 0), (0, 0))
        q, k, v = jnp.pad(q, pad), jnp.pad(k, pad), jnp.pad(v, pad)
    # TODO(synk): at tiny d (4-8) a groups-in-lanes layout (group axis on the
    # 128-lane dim, d contracted on sublanes) would fill the vregs far better.
    out = pl.pallas_call(
        functools.partial(_attn_kernel, scale=scale, causal=causal),
        out_shape=jax.ShapeDtypeStruct((Gp, Lq, d), MXU_DTYPE),
        grid=(Gp // gb,),
        in_specs=[
            pl.BlockSpec((gb, Lq, d), lambda g: (g, 0, 0)),
            pl.BlockSpec((gb, Lk, d), lambda g: (g, 0, 0)),
            pl.BlockSpec((gb, Lk, d), lambda g: (g, 0, 0)),
        ],
        out_specs=pl.BlockSpec((gb, Lq, d), lambda g: (g, 0, 0)),
        compiler_params=pltpu.CompilerParams(
            dimension_semantics=("parallel",), vmem_limit_bytes=VMEM_LIMIT),
    )(q, k, v)
    return out if Gp == G else out[:G]


# ----------------------------------------------------------------------------
# Fused gated fusion: folded spatial/temporal output projections + XS/XT
# matmuls + sigmoid mix + 2-layer FC_h + residual add, all in one kernel.
# ----------------------------------------------------------------------------
def _gated_block_kernel(hs_ref, ht_ref, xres_ref,
                        wos_ref, bos_ref, wot_ref, bot_ref,
                        wxs_ref, wxt_ref, bxt_ref,
                        wh1_ref, bh1_ref, wh2_ref, bh2_ref, o_ref):
    mx = wos_ref.dtype
    # folded attention output projections (ReLU FCs)
    hs = jnp.maximum(jnp.dot(hs_ref[...], wos_ref[...],
                             preferred_element_type=jnp.float32) + bos_ref[...], 0.0)
    ht = jnp.maximum(jnp.dot(ht_ref[...], wot_ref[...],
                             preferred_element_type=jnp.float32) + bot_ref[...], 0.0)
    # gate
    xs = jnp.dot(hs.astype(mx), wxs_ref[...], preferred_element_type=jnp.float32)
    xt = jnp.dot(ht.astype(mx), wxt_ref[...],
                 preferred_element_type=jnp.float32) + bxt_ref[...]
    z = jax.nn.sigmoid(xs + xt)
    h = z * hs + (1.0 - z) * ht
    # two-layer FC_h
    h = jnp.dot(h.astype(mx), wh1_ref[...],
                preferred_element_type=jnp.float32) + bh1_ref[...]
    h = jnp.maximum(h, 0.0)
    h = jnp.dot(h.astype(mx), wh2_ref[...],
                preferred_element_type=jnp.float32) + bh2_ref[...]
    o_ref[...] = xres_ref[...] + h                      # residual add fused


def gated_fusion_residual(p, X, hs, ht):
    """Return X + FC_h(gate(FC_o_s(hs), FC_o_t(ht))) in a single pallas_call."""
    shape = X.shape
    D = shape[-1]
    hs2 = hs.reshape(-1, D).astype(MXU_DTYPE)
    ht2 = ht.reshape(-1, D).astype(MXU_DTYPE)
    x2 = X.reshape(-1, D).astype(jnp.float32)
    M = hs2.shape[0]
    bm, Mp = _row_block(M)
    if Mp != M:
        pad = ((0, Mp - M), (0, 0))
        hs2, ht2, x2 = jnp.pad(hs2, pad), jnp.pad(ht2, pad), jnp.pad(x2, pad)

    def wb(layer):
        return (layer["w"].astype(MXU_DTYPE),
                layer["b"].reshape(1, D).astype(jnp.float32))

    wos, bos = wb(p["spatial"]["o"][0])
    wot, bot = wb(p["temporal"]["o"][0])
    wxs = p["fuse_xs"][0]["w"].astype(MXU_DTYPE)        # no bias / no activation
    wxt, bxt = wb(p["fuse_xt"][0])
    wh1, bh1 = wb(p["fuse_h"][0])
    wh2, bh2 = wb(p["fuse_h"][1])

    row_spec = pl.BlockSpec((bm, D), lambda i: (i, 0))
    mat_spec = pl.BlockSpec((D, D), lambda i: (0, 0))
    vec_spec = pl.BlockSpec((1, D), lambda i: (0, 0))

    out = pl.pallas_call(
        _gated_block_kernel,
        out_shape=jax.ShapeDtypeStruct((Mp, D), jnp.float32),
        grid=(Mp // bm,),
        in_specs=[row_spec, row_spec, row_spec,
                  mat_spec, vec_spec, mat_spec, vec_spec,
                  mat_spec, mat_spec, vec_spec,
                  mat_spec, vec_spec, mat_spec, vec_spec],
        out_specs=row_spec,
        compiler_params=pltpu.CompilerParams(
            dimension_semantics=("parallel",), vmem_limit_bytes=VMEM_LIMIT),
    )(hs2, ht2, x2, wos, bos, wot, bot, wxs, wxt, bxt, wh1, bh1, wh2, bh2)
    if Mp != M:
        out = out[:M]
    return out.reshape(shape)


# ----------------------------------------------------------------------------
# Deterministic parameter construction (synthetic; no checkpoint load)
# ----------------------------------------------------------------------------
_PARAM_KEY = jax.random.PRNGKey(1234)
_PARAM_CTR = [0]


def _next_key():
    _PARAM_CTR[0] += 1
    return jax.random.fold_in(_PARAM_KEY, _PARAM_CTR[0])


def make_fc(in_dims, units, acts, use_bias=True):
    """FC = sequence of (1x1 conv + BN(eval, folded) + optional ReLU)."""
    if not isinstance(units, (list, tuple)):
        in_dims, units, acts = [in_dims], [units], [acts]
    layers = []
    for cin, cout, act in zip(in_dims, units, acts):
        w = jax.random.normal(_next_key(), (cin, cout), jnp.float32) * (1.0 / (cin ** 0.5))
        if use_bias:
            b = jax.random.normal(_next_key(), (cout,), jnp.float32) * 0.01
        else:
            b = jnp.zeros((cout,), jnp.float32)
        layers.append({"w": w * BN_SCALE, "b": b * BN_SCALE, "relu": bool(act)})
    return layers


def init_gman_params(L, K, d, steps_per_day, use_bias):
    D = K * d

    def att_params(in_dim):
        return {
            "q": make_fc(in_dim, D, True, use_bias),
            "k": make_fc(in_dim, D, True, use_bias),
            "v": make_fc(in_dim, D, True, use_bias),
            "o": make_fc(D, D, True, use_bias),
        }

    def block_params():
        spatial = att_params(2 * D)
        temporal = att_params(2 * D)
        # Fuse all six Q/K/V projections (same input concat([X, STE])) into one matmul.
        mods = [spatial["q"], spatial["k"], spatial["v"],
                temporal["q"], temporal["k"], temporal["v"]]
        qkv6 = [{
            "w": jnp.concatenate([m[0]["w"] for m in mods], axis=1),
            "b": jnp.concatenate([m[0]["b"] for m in mods], axis=0),
            "relu": True,
        }]
        return {
            "spatial": spatial,
            "temporal": temporal,
            "qkv6": qkv6,
            "fuse_xs": make_fc(D, D, False, use_bias=False),
            "fuse_xt": make_fc(D, D, False, use_bias=True),
            "fuse_h": make_fc([D, D], [D, D], [True, False], use_bias),
        }

    return {
        "FC_1": make_fc([1, D], [D, D], [True, False], use_bias),
        "FC_2": make_fc([D, D], [D, 1], [True, False], use_bias),
        "ste_se": make_fc([D, D], [D, D], [True, False], use_bias),
        "ste_te": make_fc([steps_per_day + 7, D], [D, D], [True, False], use_bias),
        "enc": [block_params() for _ in range(L)],
        "dec": [block_params() for _ in range(L)],
        "trans": att_params(D),
    }


# ----------------------------------------------------------------------------
# GMAN forward (glue around the Pallas kernels)
# ----------------------------------------------------------------------------
def split_heads(x, K, d):
    # [B, T, N, K*d] -> [K*B, T, N, d]  (== torch.cat(torch.split(x, d, -1), 0))
    B, T, N, _ = x.shape
    x = x.reshape(B, T, N, K, d)
    return jnp.transpose(x, (3, 0, 1, 2, 4)).reshape(K * B, T, N, d)


def merge_heads(x, K, B):
    # [K*B, T, N, d] -> [B, T, N, K*d]  (== torch.cat(torch.split(x, B, 0), -1))
    _, T, N, d = x.shape
    x = x.reshape(K, B, T, N, d)
    return jnp.transpose(x, (1, 2, 3, 0, 4)).reshape(B, T, N, K * d)


def st_att_block(p, X, STE, K, d, mask):
    B, T, N, D = X.shape
    scale = 1.0 / (d ** 0.5)
    x = jnp.concatenate([X, STE], axis=-1)                     # [B, T, N, 2D]
    # One matmul for all six Q/K/V projections; bf16 output (feeds attention),
    # Cout padded up to a 128-lane multiple for unmasked stores.
    qkv = apply_fc(p["qkv6"], x, pad_lanes=True, out_dtype=MXU_DTYPE)
    sq, sk, sv, tq, tk, tv = [qkv[..., i * D:(i + 1) * D] for i in range(6)]

    # --- spatial attention (over N) ---
    q = split_heads(sq, K, d).reshape(K * B * T, N, d)
    k = split_heads(sk, K, d).reshape(K * B * T, N, d)
    v = split_heads(sv, K, d).reshape(K * B * T, N, d)
    hs = batched_attention(q, k, v, scale, causal=False)
    hs = merge_heads(hs.reshape(K * B, T, N, d), K, B)         # [B,T,N,D] bf16

    # --- temporal attention (over T) ---
    # TODO(synk): the (0,2,1,3) transposes could be folded into the attention
    # BlockSpec index_map to save two full-array copies per block.
    q = jnp.transpose(split_heads(tq, K, d), (0, 2, 1, 3)).reshape(K * B * N, T, d)
    k = jnp.transpose(split_heads(tk, K, d), (0, 2, 1, 3)).reshape(K * B * N, T, d)
    v = jnp.transpose(split_heads(tv, K, d), (0, 2, 1, 3)).reshape(K * B * N, T, d)
    ht = batched_attention(q, k, v, scale, causal=mask)
    ht = jnp.transpose(ht.reshape(K * B, N, T, d), (0, 2, 1, 3))
    ht = merge_heads(ht, K, B)                                  # [B,T,N,D] bf16

    # --- output projections + gated fusion + FC_h + residual (single kernel) ---
    return gated_fusion_residual(p, X, hs, ht)


def transform_attention(p, X, STE_his, STE_pred, K, d):
    # q/k/v come from different inputs -> cannot share one matmul
    B = X.shape[0]
    q = split_heads(apply_fc(p["q"], STE_pred, out_dtype=MXU_DTYPE), K, d)  # [KB,Tp,N,d]
    k = split_heads(apply_fc(p["k"], STE_his, out_dtype=MXU_DTYPE), K, d)   # [KB,Th,N,d]
    v = split_heads(apply_fc(p["v"], X, out_dtype=MXU_DTYPE), K, d)         # [KB,Th,N,d]
    q = jnp.transpose(q, (0, 2, 1, 3))                  # [KB, N, Tp, d]
    k = jnp.transpose(k, (0, 2, 1, 3))
    v = jnp.transpose(v, (0, 2, 1, 3))
    KB, N, Tp, _ = q.shape
    Th = k.shape[2]
    out = batched_attention(q.reshape(KB * N, Tp, d), k.reshape(KB * N, Th, d),
                            v.reshape(KB * N, Th, d), 1.0 / (d ** 0.5), causal=False)
    out = jnp.transpose(out.reshape(KB, N, Tp, d), (0, 2, 1, 3))
    out = merge_heads(out, K, B)
    return apply_fc(p["o"], out)


def st_embedding(params, SE, TE, steps_per_day):
    # SE: [N, D], TE: [B, Ttot, 2] (dayofweek, timeofday)
    se = apply_fc(params["ste_se"], SE[None, None])                     # [1,1,N,D]
    dow = jax.nn.one_hot(TE[..., 0] % 7, 7, dtype=jnp.float32)
    tod = jax.nn.one_hot(TE[..., 1] % steps_per_day, steps_per_day, dtype=jnp.float32)
    te = jnp.concatenate([dow, tod], axis=-1)[:, :, None, :]            # [B,Ttot,1,7+S]
    te = apply_fc(params["ste_te"], te)                                 # [B,Ttot,1,D]
    return se + te                                                      # [B,Ttot,N,D]


def gman_traffic_forward(params, X, SE, TE, *, K, d, num_his, steps_per_day, mask):
    x = X[..., None]                                   # [B, num_his, N, 1]
    x = apply_fc(params["FC_1"], x)                    # [B, num_his, N, D]
    STE = st_embedding(params, SE, TE, steps_per_day)  # [B, 2*num_his, N, D]
    STE_his, STE_pred = STE[:, :num_his], STE[:, num_his:]
    for blk in params["enc"]:
        x = st_att_block(blk, x, STE_his, K, d, mask)
    x = transform_attention(params["trans"], x, STE_his, STE_pred, K, d)
    for blk in params["dec"]:
        x = st_att_block(blk, x, STE_pred, K, d, mask)
    x = apply_fc(params["FC_2"], x)                    # Cout=1, stored directly
    return jnp.squeeze(x, 3)                           # [B, num_pred, N]


# ----------------------------------------------------------------------------
if __name__ == "__main__":
    # small, forward-consistent config
    L, K, d = 1, 4, 4          # D = K*d = 16
    num_his = 4                # num_pred == num_his in GMAN_Traffic
    steps_per_day = 24
    B, N = 2, 16
    use_bias, mask = True, True
    D = K * d

    key = jax.random.PRNGKey(0)
    kx, kdow, ktod, kse = jax.random.split(key, 4)
    X = jax.random.normal(kx, (B, num_his, N), jnp.float32)
    SE = jax.random.normal(kse, (N, D), jnp.float32)
    TE = jnp.concatenate(
        [jax.random.randint(kdow, (B, 2 * num_his, 1), 0, 7),
         jax.random.randint(ktod, (B, 2 * num_his, 1), 0, steps_per_day)],
        axis=-1).astype(jnp.int32)

    params = init_gman_params(L, K, d, steps_per_day, use_bias)

    # params captured as closure constants so the static relu flags stay Python
    # bools; the whole forward is jitted so XLA fuses all non-kernel glue.
    fwd = jax.jit(lambda X, SE, TE: gman_traffic_forward(
        params, X, SE, TE, K=K, d=d, num_his=num_his,
        steps_per_day=steps_per_day, mask=mask))

    out = jax.block_until_ready(fwd(X, SE, TE))
    assert out.shape == (B, num_his, N), out.shape
    assert bool(jnp.all(jnp.isfinite(out)))
    print("KERNEL_OK")
</pallas_src>

<mosaic_0001>
module attributes {stable_mosaic.version = 11 : i64} {
  func.func @_fc2_kernel(%arg0: i32, %arg1: memref<8x31xbf16, #tpu.memory_space<vmem>>, %arg2: memref<31x16xbf16, #tpu.memory_space<vmem>>, %arg3: memref<1x16xf32, #tpu.memory_space<vmem>>, %arg4: memref<16x16xbf16, #tpu.memory_space<vmem>>, %arg5: memref<1x16xf32, #tpu.memory_space<vmem>>, %arg6: memref<8x16xf32, #tpu.memory_space<vmem>>) attributes {dimension_semantics = [#tpu.dimension_semantics<parallel>], iteration_bounds = array<i64: 2>, scalar_prefetch = 0 : i64, scratch_operands = 0 : i64, tpu.core_type = #tpu.core_type<tc>, window_params = [{transform_indices = @transform_0, window_bounds = array<i64: 8, 31>}, {pipeline_mode = #tpu.pipeline_mode<synchronous>, transform_indices = @transform_1, window_bounds = array<i64: 31, 16>}, {pipeline_mode = #tpu.pipeline_mode<synchronous>, transform_indices = @transform_2, window_bounds = array<i64: 1, 16>}, {pipeline_mode = #tpu.pipeline_mode<synchronous>, transform_indices = @transform_3, window_bounds = array<i64: 16, 16>}, {pipeline_mode = #tpu.pipeline_mode<synchronous>, transform_indices = @transform_4, window_bounds = array<i64: 1, 16>}, {transform_indices = @transform_5, window_bounds = array<i64: 8, 16>}]} {
    %c0 = arith.constant 0 : index
    %c0_0 = arith.constant 0 : index
    %0 = vector.load %arg1[%c0, %c0_0] : memref<8x31xbf16, #tpu.memory_space<vmem>>, vector<8x31xbf16>
    %c0_1 = arith.constant 0 : index
    %c0_2 = arith.constant 0 : index
    %1 = vector.load %arg2[%c0_1, %c0_2] : memref<31x16xbf16, #tpu.memory_space<vmem>>, vector<31x16xbf16>
    %cst = arith.constant dense<0.000000e+00> : vector<8x16xf32>
    %2 = tpu.matmul %0, %1, %cst {dimension_numbers = #tpu.dot_dimension_numbers<[1], [0], [0], [1], [0, 0, 1, 1], [], []>} : vector<8x31xbf16>, vector<31x16xbf16>, vector<8x16xf32> -> vector<8x16xf32>
    %c0_3 = arith.constant 0 : index
    %c0_4 = arith.constant 0 : index
    %3 = vector.load %arg3[%c0_3, %c0_4] : memref<1x16xf32, #tpu.memory_space<vmem>>, vector<1x16xf32>
    %4 = vector.broadcast %3 : vector<1x16xf32> to vector<8x16xf32>
    %5 = arith.addf %2, %4 : vector<8x16xf32>
    %cst_5 = arith.constant 0.000000e+00 : f32
    %6 = vector.broadcast %cst_5 : f32 to vector<8x16xf32>
    %7 = arith.maximumf %5, %6 : vector<8x16xf32>
    %8 = arith.truncf %7 : vector<8x16xf32> to vector<8x16xbf16>
    %c0_6 = arith.constant 0 : index
    %c0_7 = arith.constant 0 : index
    %9 = vector.load %arg4[%c0_6, %c0_7] : memref<16x16xbf16, #tpu.memory_space<vmem>>, vector<16x16xbf16>
    %cst_8 = arith.constant dense<0.000000e+00> : vector<8x16xf32>
    %10 = tpu.matmul %8, %9, %cst_8 {dimension_numbers = #tpu.dot_dimension_numbers<[1], [0], [0], [1], [0, 0, 1, 1], [], []>} : vector<8x16xbf16>, vector<16x16xbf16>, vector<8x16xf32> -> vector<8x16xf32>
    %c0_9 = arith.constant 0 : index
    %c0_10 = arith.constant 0 : index
    %11 = vector.load %arg5[%c0_9, %c0_10] : memref<1x16xf32, #tpu.memory_space<vmem>>, vector<1x16xf32>
    %12 = vector.broadcast %11 : vector<1x16xf32> to vector<8x16xf32>
    %13 = arith.addf %10, %12 : vector<8x16xf32>
    %c0_11 = arith.constant 0 : index
    %c0_12 = arith.constant 0 : index
    %14 = vector.load %arg6[%c0_11, %c0_12] : memref<8x16xf32, #tpu.memory_space<vmem>>, vector<8x16xf32>
    tpu.vector_store %arg6[%c0_11, %c0_12], %13 {strides = array<i32>} : memref<8x16xf32, #tpu.memory_space<vmem>>, vector<8x16xf32>,
    return
  }
  func.func @transform_0(%arg0: i32) -> (i32, i32) {
    %c0_i32 = arith.constant 0 : i32
    %c0_i32_0 = arith.constant 0 : i32
    return %arg0, %c0_i32 : i32, i32
  }
  func.func @transform_1(%arg0: i32) -> (i32, i32) {
    %c0_i32 = arith.constant 0 : i32
    %c0_i32_0 = arith.constant 0 : i32
    %c0_i32_1 = arith.constant 0 : i32
    return %c0_i32, %c0_i32_0 : i32, i32
  }
  func.func @transform_2(%arg0: i32) -> (i32, i32) {
    %c0_i32 = arith.constant 0 : i32
    %c0_i32_0 = arith.constant 0 : i32
    %c0_i32_1 = arith.constant 0 : i32
    return %c0_i32, %c0_i32_0 : i32, i32
  }
  func.func @transform_3(%arg0: i32) -> (i32, i32) {
    %c0_i32 = arith.constant 0 : i32
    %c0_i32_0 = arith.constant 0 : i32
    %c0_i32_1 = arith.constant 0 : i32
    return %c0_i32, %c0_i32_0 : i32, i32
  }
  func.func @transform_4(%arg0: i32) -> (i32, i32) {
    %c0_i32 = arith.constant 0 : i32
    %c0_i32_0 = arith.constant 0 : i32
    %c0_i32_1 = arith.constant 0 : i32
    return %c0_i32, %c0_i32_0 : i32, i32
  }
  func.func @transform_5(%arg0: i32) -> (i32, i32) {
    %c0_i32 = arith.constant 0 : i32
    %c0_i32_0 = arith.constant 0 : i32
    return %arg0, %c0_i32 : i32, i32
  }
}

module attributes {stable_mosaic.version = 11 : i64} {
  func.func @_fc2_kernel(%arg0: i32, %arg1: memref<8x16xbf16, #tpu.memory_space<vmem>>, %arg2: memref<16x16xbf16, #tpu.memory_space<vmem>>, %arg3: memref<1x16xf32, #tpu.memory_space<vmem>>, %arg4: memref<16x16xbf16, #tpu.memory_space<vmem>>, %arg5: memref<1x16xf32, #tpu.memory_space<vmem>>, %arg6: memref<8x16xf32, #tpu.memory_space<vmem>>) attributes {dimension_semantics = [#tpu.dimension_semantics<parallel>], iteration_bounds = array<i64: 2>, scalar_prefetch = 0 : i64, scratch_operands = 0 : i64, tpu.core_type = #tpu.core_type<tc>, window_params = [{transform_indices = @transform_0, window_bounds = array<i64: 8, 16>}, {pipeline_mode = #tpu.pipeline_mode<synchronous>, transform_indices = @transform_1, window_bounds = array<i64: 16, 16>}, {pipeline_mode = #tpu.pipeline_mode<synchronous>, transform_indices = @transform_2, window_bounds = array<i64: 1, 16>}, {pipeline_mode = #tpu.pipeline_mode<synchronous>, transform_indices = @transform_3, window_bounds = array<i64: 16, 16>}, {pipeline_mode = #tpu.pipeline_mode<synchronous>, transform_indices = @transform_4, window_bounds = array<i64: 1, 16>}, {transform_indices = @transform_5, window_bounds = array<i64: 8, 16>}]} {
    %c0 = arith.constant 0 : index
    %c0_0 = arith.constant 0 : index
    %0 = vector.load %arg1[%c0, %c0_0] : memref<8x16xbf16, #tpu.memory_space<vmem>>, vector<8x16xbf16>
    %c0_1 = arith.constant 0 : index
    %c0_2 = arith.constant 0 : index
    %1 = vector.load %arg2[%c0_1, %c0_2] : memref<16x16xbf16, #tpu.memory_space<vmem>>, vector<16x16xbf16>
    %cst = arith.constant dense<0.000000e+00> : vector<8x16xf32>
    %2 = tpu.matmul %0, %1, %cst {dimension_numbers = #tpu.dot_dimension_numbers<[1], [0], [0], [1], [0, 0, 1, 1], [], []>} : vector<8x16xbf16>, vector<16x16xbf16>, vector<8x16xf32> -> vector<8x16xf32>
    %c0_3 = arith.constant 0 : index
    %c0_4 = arith.constant 0 : index
    %3 = vector.load %arg3[%c0_3, %c0_4] : memref<1x16xf32, #tpu.memory_space<vmem>>, vector<1x16xf32>
    %4 = vector.broadcast %3 : vector<1x16xf32> to vector<8x16xf32>
    %5 = arith.addf %2, %4 : vector<8x16xf32>
    %cst_5 = arith.constant 0.000000e+00 : f32
    %6 = vector.broadcast %cst_5 : f32 to vector<8x16xf32>
    %7 = arith.maximumf %5, %6 : vector<8x16xf32>
    %8 = arith.truncf %7 : vector<8x16xf32> to vector<8x16xbf16>
    %c0_6 = arith.constant 0 : index
    %c0_7 = arith.constant 0 : index
    %9 = vector.load %arg4[%c0_6, %c0_7] : memref<16x16xbf16, #tpu.memory_space<vmem>>, vector<16x16xbf16>
    %cst_8 = arith.constant dense<0.000000e+00> : vector<8x16xf32>
    %10 = tpu.matmul %8, %9, %cst_8 {dimension_numbers = #tpu.dot_dimension_numbers<[1], [0], [0], [1], [0, 0, 1, 1], [], []>} : vector<8x16xbf16>, vector<16x16xbf16>, vector<8x16xf32> -> vector<8x16xf32>
    %c0_9 = arith.constant 0 : index
    %c0_10 = arith.constant 0 : index
    %11 = vector.load %arg5[%c0_9, %c0_10] : memref<1x16xf32, #tpu.memory_space<vmem>>, vector<1x16xf32>
    %12 = vector.broadcast %11 : vector<1x16xf32> to vector<8x16xf32>
    %13 = arith.addf %10, %12 : vector<8x16xf32>
    %c0_11 = arith.constant 0 : index
    %c0_12 = arith.constant 0 : index
    %14 = vector.load %arg6[%c0_11, %c0_12] : memref<8x16xf32, #tpu.memory_space<vmem>>, vector<8x16xf32>
    tpu.vector_store %arg6[%c0_11, %c0_12], %13 {strides = array<i32>} : memref<8x16xf32, #tpu.memory_space<vmem>>, vector<8x16xf32>,
    return
  }
  func.func @transform_0(%arg0: i32) -> (i32, i32) {
    %c0_i32 = arith.constant 0 : i32
    %c0_i32_0 = arith.constant 0 : i32
    return %arg0, %c0_i32 : i32, i32
  }
  func.func @transform_1(%arg0: i32) -> (i32, i32) {
    %c0_i32 = arith.constant 0 : i32
    %c0_i32_0 = arith.constant 0 : i32
    %c0_i32_1 = arith.constant 0 : i32
    return %c0_i32, %c0_i32_0 : i32, i32
  }
  func.func @transform_2(%arg0: i32) -> (i32, i32) {
    %c0_i32 = arith.constant 0 : i32
    %c0_i32_0 = arith.constant 0 : i32
    %c0_i32_1 = arith.constant 0 : i32
    return %c0_i32, %c0_i32_0 : i32, i32
  }
  func.func @transform_3(%arg0: i32) -> (i32, i32) {
    %c0_i32 = arith.constant 0 : i32
    %c0_i32_0 = arith.constant 0 : i32
    %c0_i32_1 = arith.constant 0 : i32
    return %c0_i32, %c0_i32_0 : i32, i32
  }
  func.func @transform_4(%arg0: i32) -> (i32, i32) {
    %c0_i32 = arith.constant 0 : i32
    %c0_i32_0 = arith.constant 0 : i32
    %c0_i32_1 = arith.constant 0 : i32
    return %c0_i32, %c0_i32_0 : i32, i32
  }
  func.func @transform_5(%arg0: i32) -> (i32, i32) {
    %c0_i32 = arith.constant 0 : i32
    %c0_i32_0 = arith.constant 0 : i32
    return %arg0, %c0_i32 : i32, i32
  }
}

module attributes {stable_mosaic.version = 11 : i64} {
  func.func @_fc2_kernel(%arg0: i32, %arg1: memref<64x1xbf16, #tpu.memory_space<vmem>>, %arg2: memref<1x16xbf16, #tpu.memory_space<vmem>>, %arg3: memref<1x16xf32, #tpu.memory_space<vmem>>, %arg4: memref<16x16xbf16, #tpu.memory_space<vmem>>, %arg5: memref<1x16xf32, #tpu.memory_space<vmem>>, %arg6: memref<64x16xf32, #tpu.memory_space<vmem>>) attributes {dimension_semantics = [#tpu.dimension_semantics<parallel>], iteration_bounds = array<i64: 2>, scalar_prefetch = 0 : i64, scratch_operands = 0 : i64, tpu.core_type = #tpu.core_type<tc>, window_params = [{transform_indices = @transform_0, window_bounds = array<i64: 64, 1>}, {pipeline_mode = #tpu.pipeline_mode<synchronous>, transform_indices = @transform_1, window_bounds = array<i64: 1, 16>}, {pipeline_mode = #tpu.pipeline_mode<synchronous>, transform_indices = @transform_2, window_bounds = array<i64: 1, 16>}, {pipeline_mode = #tpu.pipeline_mode<synchronous>, transform_indices = @transform_3, window_bounds = array<i64: 16, 16>}, {pipeline_mode = #tpu.pipeline_mode<synchronous>, transform_indices = @transform_4, window_bounds = array<i64: 1, 16>}, {transform_indices = @transform_5, window_bounds = array<i64: 64, 16>}]} {
    %c0 = arith.constant 0 : index
    %c0_0 = arith.constant 0 : index
    %0 = vector.load %arg1[%c0, %c0_0] : memref<64x1xbf16, #tpu.memory_space<vmem>>, vector<64x1xbf16>
    %c0_1 = arith.constant 0 : index
    %c0_2 = arith.constant 0 : index
    %1 = vector.load %arg2[%c0_1, %c0_2] : memref<1x16xbf16, #tpu.memory_space<vmem>>, vector<1x16xbf16>
    %cst = arith.constant dense<0.000000e+00> : vector<64x16xf32>
    %2 = tpu.matmul %0, %1, %cst {dimension_numbers = #tpu.dot_dimension_numbers<[1], [0], [0], [1], [0, 0, 1, 1], [], []>} : vector<64x1xbf16>, vector<1x16xbf16>, vector<64x16xf32> -> vector<64x16xf32>
    %c0_3 = arith.constant 0 : index
    %c0_4 = arith.constant 0 : index
    %3 = vector.load %arg3[%c0_3, %c0_4] : memref<1x16xf32, #tpu.memory_space<vmem>>, vector<1x16xf32>
    %4 = vector.broadcast %3 : vector<1x16xf32> to vector<64x16xf32>
    %5 = arith.addf %2, %4 : vector<64x16xf32>
    %cst_5 = arith.constant 0.000000e+00 : f32
    %6 = vector.broadcast %cst_5 : f32 to vector<64x16xf32>
    %7 = arith.maximumf %5, %6 : vector<64x16xf32>
    %8 = arith.truncf %7 : vector<64x16xf32> to vector<64x16xbf16>
    %c0_6 = arith.constant 0 : index
    %c0_7 = arith.constant 0 : index
    %9 = vector.load %arg4[%c0_6, %c0_7] : memref<16x16xbf16, #tpu.memory_space<vmem>>, vector<16x16xbf16>
    %cst_8 = arith.constant dense<0.000000e+00> : vector<64x16xf32>
    %10 = tpu.matmul %8, %9, %cst_8 {dimension_numbers = #tpu.dot_dimension_numbers<[1], [0], [0], [1], [0, 0, 1, 1], [], []>} : vector<64x16xbf16>, vector<16x16xbf16>, vector<64x16xf32> -> vector<64x16xf32>
    %c0_9 = arith.constant 0 : index
    %c0_10 = arith.constant 0 : index
    %11 = vector.load %arg5[%c0_9, %c0_10] : memref<1x16xf32, #tpu.memory_space<vmem>>, vector<1x16xf32>
    %12 = vector.broadcast %11 : vector<1x16xf32> to vector<64x16xf32>
    %13 = arith.addf %10, %12 : vector<64x16xf32>
    %c0_11 = arith.constant 0 : index
    %c0_12 = arith.constant 0 : index
    %14 = vector.load %arg6[%c0_11, %c0_12] : memref<64x16xf32, #tpu.memory_space<vmem>>, vector<64x16xf32>
    tpu.vector_store %arg6[%c0_11, %c0_12], %13 {strides = array<i32>} : memref<64x16xf32, #tpu.memory_space<vmem>>, vector<64x16xf32>,
    return
  }
  func.func @transform_0(%arg0: i32) -> (i32, i32) {
    %c0_i32 = arith.constant 0 : i32
    %c0_i32_0 = arith.constant 0 : i32
    return %arg0, %c0_i32 : i32, i32
  }
  func.func @transform_1(%arg0: i32) -> (i32, i32) {
    %c0_i32 = arith.constant 0 : i32
    %c0_i32_0 = arith.constant 0 : i32
    %c0_i32_1 = arith.constant 0 : i32
    return %c0_i32, %c0_i32_0 : i32, i32
  }
  func.func @transform_2(%arg0: i32) -> (i32, i32) {
    %c0_i32 = arith.constant 0 : i32
    %c0_i32_0 = arith.constant 0 : i32
    %c0_i32_1 = arith.constant 0 : i32
    return %c0_i32, %c0_i32_0 : i32, i32
  }
  func.func @transform_3(%arg0: i32) -> (i32, i32) {
    %c0_i32 = arith.constant 0 : i32
    %c0_i32_0 = arith.constant 0 : i32
    %c0_i32_1 = arith.constant 0 : i32
    return %c0_i32, %c0_i32_0 : i32, i32
  }
  func.func @transform_4(%arg0: i32) -> (i32, i32) {
    %c0_i32 = arith.constant 0 : i32
    %c0_i32_0 = arith.constant 0 : i32
    %c0_i32_1 = arith.constant 0 : i32
    return %c0_i32, %c0_i32_0 : i32, i32
  }
  func.func @transform_5(%arg0: i32) -> (i32, i32) {
    %c0_i32 = arith.constant 0 : i32
    %c0_i32_0 = arith.constant 0 : i32
    return %arg0, %c0_i32 : i32, i32
  }
}

module attributes {stable_mosaic.version = 11 : i64} {
  func.func @_fc1_kernel(%arg0: i32, %arg1: memref<64x32xbf16, #tpu.memory_space<vmem>>, %arg2: memref<32x128xbf16, #tpu.memory_space<vmem>>, %arg3: memref<1x128xf32, #tpu.memory_space<vmem>>, %arg4: memref<64x128xbf16, #tpu.memory_space<vmem>>) attributes {dimension_semantics = [#tpu.dimension_semantics<parallel>], iteration_bounds = array<i64: 2>, scalar_prefetch = 0 : i64, scratch_operands = 0 : i64, tpu.core_type = #tpu.core_type<tc>, window_params = [{transform_indices = @transform_0, window_bounds = array<i64: 64, 32>}, {pipeline_mode = #tpu.pipeline_mode<synchronous>, transform_indices = @transform_1, window_bounds = array<i64: 32, 128>}, {pipeline_mode = #tpu.pipeline_mode<synchronous>, transform_indices = @transform_2, window_bounds = array<i64: 1, 128>}, {transform_indices = @transform_3, window_bounds = array<i64: 64, 128>}]} {
    %c0 = arith.constant 0 : index
    %c0_0 = arith.constant 0 : index
    %0 = vector.load %arg1[%c0, %c0_0] : memref<64x32xbf16, #tpu.memory_space<vmem>>, vector<64x32xbf16>
    %c0_1 = arith.constant 0 : index
    %c0_2 = arith.constant 0 : index
    %1 = vector.load %arg2[%c0_1, %c0_2] : memref<32x128xbf16, #tpu.memory_space<vmem>>, vector<32x128xbf16>
    %cst = arith.constant dense<0.000000e+00> : vector<64x128xf32>
    %2 = tpu.matmul %0, %1, %cst {dimension_numbers = #tpu.dot_dimension_numbers<[1], [0], [0], [1], [0, 0, 1, 1], [], []>} : vector<64x32xbf16>, vector<32x128xbf16>, vector<64x128xf32> -> vector<64x128xf32>
    %c0_3 = arith.constant 0 : index
    %c0_4 = arith.constant 0 : index
    %3 = vector.load %arg3[%c0_3, %c0_4] : memref<1x128xf32, #tpu.memory_space<vmem>>, vector<1x128xf32>
    %4 = vector.broadcast %3 : vector<1x128xf32> to vector<64x128xf32>
    %5 = arith.addf %2, %4 : vector<64x128xf32>
    %cst_5 = arith.constant 0.000000e+00 : f32
    %6 = vector.broadcast %cst_5 : f32 to vector<64x128xf32>
    %7 = arith.maximumf %5, %6 : vector<64x128xf32>
    %8 = arith.truncf %7 : vector<64x128xf32> to vector<64x128xbf16>
    %c0_6 = arith.constant 0 : index
    %c0_7 = arith.constant 0 : index
    %9 = vector.load %arg4[%c0_6, %c0_7] : memref<64x128xbf16, #tpu.memory_space<vmem>>, vector<64x128xbf16>
    tpu.vector_store %arg4[%c0_6, %c0_7], %8 {strides = array<i32>} : memref<64x128xbf16, #tpu.memory_space<vmem>>, vector<64x128xbf16>,
    return
  }
  func.func @transform_0(%arg0: i32) -> (i32, i32) {
    %c0_i32 = arith.constant 0 : i32
    %c0_i32_0 = arith.constant 0 : i32
    return %arg0, %c0_i32 : i32, i32
  }
  func.func @transform_1(%arg0: i32) -> (i32, i32) {
    %c0_i32 = arith.constant 0 : i32
    %c0_i32_0 = arith.constant 0 : i32
    %c0_i32_1 = arith.constant 0 : i32
    return %c0_i32, %c0_i32_0 : i32, i32
  }
  func.func @transform_2(%arg0: i32) -> (i32, i32) {
    %c0_i32 = arith.constant 0 : i32
    %c0_i32_0 = arith.constant 0 : i32
    %c0_i32_1 = arith.constant 0 : i32
    return %c0_i32, %c0_i32_0 : i32, i32
  }
  func.func @transform_3(%arg0: i32) -> (i32, i32) {
    %c0_i32 = arith.constant 0 : i32
    %c0_i32_0 = arith.constant 0 : i32
    return %arg0, %c0_i32 : i32, i32
  }
}

module attributes {stable_mosaic.version = 11 : i64} {
  func.func @_attn_kernel(%arg0: i32, %arg1: memref<64x4x4xbf16, #tpu.memory_space<vmem>>, %arg2: memref<64x4x4xbf16, #tpu.memory_space<vmem>>, %arg3: memref<64x4x4xbf16, #tpu.memory_space<vmem>>, %arg4: memref<64x4x4xbf16, #tpu.memory_space<vmem>>) attributes {dimension_semantics = [#tpu.dimension_semantics<parallel>], iteration_bounds = array<i64: 2>, scalar_prefetch = 0 : i64, scratch_operands = 0 : i64, tpu.core_type = #tpu.core_type<tc>, window_params = [{transform_indices = @transform_0, window_bounds = array<i64: 64, 4, 4>}, {transform_indices = @transform_1, window_bounds = array<i64: 64, 4, 4>}, {transform_indices = @transform_2, window_bounds = array<i64: 64, 4, 4>}, {transform_indices = @transform_3, window_bounds = array<i64: 64, 4, 4>}]} {
    %c0 = arith.constant 0 : index
    %c0_0 = arith.constant 0 : index
    %c0_1 = arith.constant 0 : index
    %0 = vector.load %arg1[%c0, %c0_0, %c0_1] : memref<64x4x4xbf16, #tpu.memory_space<vmem>>, vector<64x4x4xbf16>
    %c0_2 = arith.constant 0 : index
    %c0_3 = arith.constant 0 : index
    %c0_4 = arith.constant 0 : index
    %1 = vector.load %arg2[%c0_2, %c0_3, %c0_4] : memref<64x4x4xbf16, #tpu.memory_space<vmem>>, vector<64x4x4xbf16>
    %c0_5 = arith.constant 0 : index
    %c0_6 = arith.constant 0 : index
    %c0_7 = arith.constant 0 : index
    %2 = vector.load %arg3[%c0_5, %c0_6, %c0_7] : memref<64x4x4xbf16, #tpu.memory_space<vmem>>, vector<64x4x4xbf16>
    "tpu.trace_start"() <{level = 10 : i32, message = "gqd,gkd->gqk"}> : () -> ()
    %cst = arith.constant dense<0.000000e+00> : vector<64x4x4xf32>
    %3 = tpu.matmul %0, %1, %cst {dimension_numbers = #tpu.dot_dimension_numbers<[2], [2], [1], [1], [0, 0, 0, 1, 1, 1], [0], [0]>} : vector<64x4x4xbf16>, vector<64x4x4xbf16>, vector<64x4x4xf32> -> vector<64x4x4xf32>
    "tpu.trace_stop"() : () -> ()
    %cst_8 = arith.constant 5.000000e-01 : f32
    %4 = vector.broadcast %cst_8 : f32 to vector<64x4x4xf32>
    %5 = arith.mulf %3, %4 : vector<64x4x4xf32>
    %6 = tpu.iota {dimensions = array<i32: 0>} : vector<4x4xi32>
    %7 = tpu.iota {dimensions = array<i32: 1>} : vector<4x4xi32>
    %8 = arith.cmpi sle, %7, %6 : vector<4x4xi32>
    %9 = vector.shape_cast %8 : vector<4x4xi1> to vector<1x4x4xi1>
    %cst_9 = arith.constant -3.276700e+04 : f32
    %10 = vector.shape_cast %9 : vector<1x4x4xi1> to vector<1x4x4xi1>
    %11 = vector.broadcast %10 : vector<1x4x4xi1> to vector<64x4x4xi1>
    %12 = vector.broadcast %cst_9 : f32 to vector<64x4x4xf32>
    %13 = arith.select %11, %5, %12 : vector<64x4x4xi1>, vector<64x4x4xf32>
    %cst_10 = arith.constant dense<0xFF800000> : vector<64x4xf32>
    %14 = vector.multi_reduction <maximumf>, %13, %cst_10 [2] : vector<64x4x4xf32> to vector<64x4xf32>
    %15 = vector.shape_cast %14 : vector<64x4xf32> to vector<64x4x1xf32>
    %16 = vector.broadcast %15 : vector<64x4x1xf32> to vector<64x4x4xf32>
    %17 = arith.subf %13, %16 : vector<64x4x4xf32>
    %18 = math.exp %17 : vector<64x4x4xf32>
    %cst_11 = arith.constant dense<0.000000e+00> : vector<64x4xf32>
    %19 = vector.multi_reduction <add>, %18, %cst_11 [2] : vector<64x4x4xf32> to vector<64x4xf32>
    %20 = vector.shape_cast %19 : vector<64x4xf32> to vector<64x4x1xf32>
    %21 = tpu.reciprocal %20 {approx = true} : vector<64x4x1xf32> -> vector<64x4x1xf32>
    %22 = vector.broadcast %21 : vector<64x4x1xf32> to vector<64x4x4xf32>
    %23 = arith.mulf %18, %22 : vector<64x4x4xf32>
    %24 = arith.truncf %23 : vector<64x4x4xf32> to vector<64x4x4xbf16>
    "tpu.trace_start"() <{level = 10 : i32, message = "gqk,gkd->gqd"}> : () -> ()
    %cst_12 = arith.constant dense<0.000000e+00> : vector<64x4x4xf32>
    %25 = tpu.matmul %24, %2, %cst_12 {dimension_numbers = #tpu.dot_dimension_numbers<[2], [1], [1], [2], [0, 0, 0, 1, 1, 2], [0], [0]>} : vector<64x4x4xbf16>, vector<64x4x4xbf16>, vector<64x4x4xf32> -> vector<64x4x4xf32>
    "tpu.trace_stop"() : () -> ()
    %26 = arith.truncf %25 : vector<64x4x4xf32> to vector<64x4x4xbf16>
    %c0_13 = arith.constant 0 : index
    %c0_14 = arith.constant 0 : index
    %c0_15 = arith.constant 0 : index
    %27 = vector.load %arg4[%c0_13, %c0_14, %c0_15] : memref<64x4x4xbf16, #tpu.memory_space<vmem>>, vector<64x4x4xbf16>
    tpu.vector_store %arg4[%c0_13, %c0_14, %c0_15], %26 {strides = array<i32>} : memref<64x4x4xbf16, #tpu.memory_space<vmem>>, vector<64x4x4xbf16>,
    return
  }
  func.func @transform_0(%arg0: i32) -> (i32, i32, i32) {
    %c0_i32 = arith.constant 0 : i32
    %c0_i32_0 = arith.constant 0 : i32
    %c0_i32_1 = arith.constant 0 : i32
    return %arg0, %c0_i32, %c0_i32_0 : i32, i32, i32
  }
  func.func @transform_1(%arg0: i32) -> (i32, i32, i32) {
    %c0_i32 = arith.constant 0 : i32
    %c0_i32_0 = arith.constant 0 : i32
    %c0_i32_1 = arith.constant 0 : i32
    return %arg0, %c0_i32, %c0_i32_0 : i32, i32, i32
  }
  func.func @transform_2(%arg0: i32) -> (i32, i32, i32) {
    %c0_i32 = arith.constant 0 : i32
    %c0_i32_0 = arith.constant 0 : i32
    %c0_i32_1 = arith.constant 0 : i32
    return %arg0, %c0_i32, %c0_i32_0 : i32, i32, i32
  }
  func.func @transform_3(%arg0: i32) -> (i32, i32, i32) {
    %c0_i32 = arith.constant 0 : i32
    %c0_i32_0 = arith.constant 0 : i32
    %c0_i32_1 = arith.constant 0 : i32
    return %arg0, %c0_i32, %c0_i32_0 : i32, i32, i32
  }
}

module attributes {stable_mosaic.version = 11 : i64} {
  func.func @_attn_kernel(%arg0: i32, %arg1: memref<16x16x4xbf16, #tpu.memory_space<vmem>>, %arg2: memref<16x16x4xbf16, #tpu.memory_space<vmem>>, %arg3: memref<16x16x4xbf16, #tpu.memory_space<vmem>>, %arg4: memref<16x16x4xbf16, #tpu.memory_space<vmem>>) attributes {dimension_semantics = [#tpu.dimension_semantics<parallel>], iteration_bounds = array<i64: 2>, scalar_prefetch = 0 : i64, scratch_operands = 0 : i64, tpu.core_type = #tpu.core_type<tc>, window_params = [{transform_indices = @transform_0, window_bounds = array<i64: 16, 16, 4>}, {transform_indices = @transform_1, window_bounds = array<i64: 16, 16, 4>}, {transform_indices = @transform_2, window_bounds = array<i64: 16, 16, 4>}, {transform_indices = @transform_3, window_bounds = array<i64: 16, 16, 4>}]} {
    %c0 = arith.constant 0 : index
    %c0_0 = arith.constant 0 : index
    %c0_1 = arith.constant 0 : index
    %0 = vector.load %arg1[%c0, %c0_0, %c0_1] : memref<16x16x4xbf16, #tpu.memory_space<vmem>>, vector<16x16x4xbf16>
    %c0_2 = arith.constant 0 : index
    %c0_3 = arith.constant 0 : index
    %c0_4 = arith.constant 0 : index
    %1 = vector.load %arg2[%c0_2, %c0_3, %c0_4] : memref<16x16x4xbf16, #tpu.memory_space<vmem>>, vector<16x16x4xbf16>
    %c0_5 = arith.constant 0 : index
    %c0_6 = arith.constant 0 : index
    %c0_7 = arith.constant 0 : index
    %2 = vector.load %arg3[%c0_5, %c0_6, %c0_7] : memref<16x16x4xbf16, #tpu.memory_space<vmem>>, vector<16x16x4xbf16>
    "tpu.trace_start"() <{level = 10 : i32, message = "gqd,gkd->gqk"}> : () -> ()
    %cst = arith.constant dense<0.000000e+00> : vector<16x16x16xf32>
    %3 = tpu.matmul %0, %1, %cst {dimension_numbers = #tpu.dot_dimension_numbers<[2], [2], [1], [1], [0, 0, 0, 1, 1, 1], [0], [0]>} : vector<16x16x4xbf16>, vector<16x16x4xbf16>, vector<16x16x16xf32> -> vector<16x16x16xf32>
    "tpu.trace_stop"() : () -> ()
    %cst_8 = arith.constant 5.000000e-01 : f32
    %4 = vector.broadcast %cst_8 : f32 to vector<16x16x16xf32>
    %5 = arith.mulf %3, %4 : vector<16x16x16xf32>
    %cst_9 = arith.constant dense<0xFF800000> : vector<16x16xf32>
    %6 = vector.multi_reduction <maximumf>, %5, %cst_9 [2] : vector<16x16x16xf32> to vector<16x16xf32>
    %7 = vector.shape_cast %6 : vector<16x16xf32> to vector<16x16x1xf32>
    %8 = vector.broadcast %7 : vector<16x16x1xf32> to vector<16x16x16xf32>
    %9 = arith.subf %5, %8 : vector<16x16x16xf32>
    %10 = math.exp %9 : vector<16x16x16xf32>
    %cst_10 = arith.constant dense<0.000000e+00> : vector<16x16xf32>
    %11 = vector.multi_reduction <add>, %10, %cst_10 [2] : vector<16x16x16xf32> to vector<16x16xf32>
    %12 = vector.shape_cast %11 : vector<16x16xf32> to vector<16x16x1xf32>
    %13 = tpu.reciprocal %12 {approx = true} : vector<16x16x1xf32> -> vector<16x16x1xf32>
    %14 = vector.broadcast %13 : vector<16x16x1xf32> to vector<16x16x16xf32>
    %15 = arith.mulf %10, %14 : vector<16x16x16xf32>
    %16 = arith.truncf %15 : vector<16x16x16xf32> to vector<16x16x16xbf16>
    "tpu.trace_start"() <{level = 10 : i32, message = "gqk,gkd->gqd"}> : () -> ()
    %cst_11 = arith.constant dense<0.000000e+00> : vector<16x16x4xf32>
    %17 = tpu.matmul %16, %2, %cst_11 {dimension_numbers = #tpu.dot_dimension_numbers<[2], [1], [1], [2], [0, 0, 0, 1, 1, 2], [0], [0]>} : vector<16x16x16xbf16>, vector<16x16x4xbf16>, vector<16x16x4xf32> -> vector<16x16x4xf32>
    "tpu.trace_stop"() : () -> ()
    %18 = arith.truncf %17 : vector<16x16x4xf32> to vector<16x16x4xbf16>
    %c0_12 = arith.constant 0 : index
    %c0_13 = arith.constant 0 : index
    %c0_14 = arith.constant 0 : index
    %19 = vector.load %arg4[%c0_12, %c0_13, %c0_14] : memref<16x16x4xbf16, #tpu.memory_space<vmem>>, vector<16x16x4xbf16>
    tpu.vector_store %arg4[%c0_12, %c0_13, %c0_14], %18 {strides = array<i32>} : memref<16x16x4xbf16, #tpu.memory_space<vmem>>, vector<16x16x4xbf16>,
    return
  }
  func.func @transform_0(%arg0: i32) -> (i32, i32, i32) {
    %c0_i32 = arith.constant 0 : i32
    %c0_i32_0 = arith.constant 0 : i32
    %c0_i32_1 = arith.constant 0 : i32
    return %arg0, %c0_i32, %c0_i32_0 : i32, i32, i32
  }
  func.func @transform_1(%arg0: i32) -> (i32, i32, i32) {
    %c0_i32 = arith.constant 0 : i32
    %c0_i32_0 = arith.constant 0 : i32
    %c0_i32_1 = arith.constant 0 : i32
    return %arg0, %c0_i32, %c0_i32_0 : i32, i32, i32
  }
  func.func @transform_2(%arg0: i32) -> (i32, i32, i32) {
    %c0_i32 = arith.constant 0 : i32
    %c0_i32_0 = arith.constant 0 : i32
    %c0_i32_1 = arith.constant 0 : i32
    return %arg0, %c0_i32, %c0_i32_0 : i32, i32, i32
  }
  func.func @transform_3(%arg0: i32) -> (i32, i32, i32) {
    %c0_i32 = arith.constant 0 : i32
    %c0_i32_0 = arith.constant 0 : i32
    %c0_i32_1 = arith.constant 0 : i32
    return %arg0, %c0_i32, %c0_i32_0 : i32, i32, i32
  }
}

module attributes {stable_mosaic.version = 11 : i64} {
  func.func @_gated_block_kernel(%arg0: i32, %arg1: memref<64x16xbf16, #tpu.memory_space<vmem>>, %arg2: memref<64x16xbf16, #tpu.memory_space<vmem>>, %arg3: memref<64x16xf32, #tpu.memory_space<vmem>>, %arg4: memref<16x16xbf16, #tpu.memory_space<vmem>>, %arg5: memref<1x16xf32, #tpu.memory_space<vmem>>, %arg6: memref<16x16xbf16, #tpu.memory_space<vmem>>, %arg7: memref<1x16xf32, #tpu.memory_space<vmem>>, %arg8: memref<16x16xbf16, #tpu.memory_space<vmem>>, %arg9: memref<16x16xbf16, #tpu.memory_space<vmem>>, %arg10: memref<1x16xf32, #tpu.memory_space<vmem>>, %arg11: memref<16x16xbf16, #tpu.memory_space<vmem>>, %arg12: memref<1x16xf32, #tpu.memory_space<vmem>>, %arg13: memref<16x16xbf16, #tpu.memory_space<vmem>>, %arg14: memref<1x16xf32, #tpu.memory_space<vmem>>, %arg15: memref<64x16xf32, #tpu.memory_space<vmem>>) attributes {dimension_semantics = [#tpu.dimension_semantics<parallel>], iteration_bounds = array<i64: 2>, scalar_prefetch = 0 : i64, scratch_operands = 0 : i64, tpu.core_type = #tpu.core_type<tc>, window_params = [{transform_indices = @transform_0, window_bounds = array<i64: 64, 16>}, {transform_indices = @transform_1, window_bounds = array<i64: 64, 16>}, {transform_indices = @transform_2, window_bounds = array<i64: 64, 16>}, {pipeline_mode = #tpu.pipeline_mode<synchronous>, transform_indices = @transform_3, window_bounds = array<i64: 16, 16>}, {pipeline_mode = #tpu.pipeline_mode<synchronous>, transform_indices = @transform_4, window_bounds = array<i64: 1, 16>}, {pipeline_mode = #tpu.pipeline_mode<synchronous>, transform_indices = @transform_5, window_bounds = array<i64: 16, 16>}, {pipeline_mode = #tpu.pipeline_mode<synchronous>, transform_indices = @transform_6, window_bounds = array<i64: 1, 16>}, {pipeline_mode = #tpu.pipeline_mode<synchronous>, transform_indices = @transform_7, window_bounds = array<i64: 16, 16>}, {pipeline_mode = #tpu.pipeline_mode<synchronous>, transform_indices = @transform_8, window_bounds = array<i64: 16, 16>}, {pipeline_mode = #tpu.pipeline_mode<synchronous>, transform_indices = @transform_9, window_bounds = array<i64: 1, 16>}, {pipeline_mode = #tpu.pipeline_mode<synchronous>, transform_indices = @transform_10, window_bounds = array<i64: 16, 16>}, {pipeline_mode = #tpu.pipeline_mode<synchronous>, transform_indices = @transform_11, window_bounds = array<i64: 1, 16>}, {pipeline_mode = #tpu.pipeline_mode<synchronous>, transform_indices = @transform_12, window_bounds = array<i64: 16, 16>}, {pipeline_mode = #tpu.pipeline_mode<synchronous>, transform_indices = @transform_13, window_bounds = array<i64: 1, 16>}, {transform_indices = @transform_14, window_bounds = array<i64: 64, 16>}]} {
    %c0 = arith.constant 0 : index
    %c0_0 = arith.constant 0 : index
    %0 = vector.load %arg1[%c0, %c0_0] : memref<64x16xbf16, #tpu.memory_space<vmem>>, vector<64x16xbf16>
    %c0_1 = arith.constant 0 : index
    %c0_2 = arith.constant 0 : index
    %1 = vector.load %arg4[%c0_1, %c0_2] : memref<16x16xbf16, #tpu.memory_space<vmem>>, vector<16x16xbf16>
    %cst = arith.constant dense<0.000000e+00> : vector<64x16xf32>
    %2 = tpu.matmul %0, %1, %cst {dimension_numbers = #tpu.dot_dimension_numbers<[1], [0], [0], [1], [0, 0, 1, 1], [], []>} : vector<64x16xbf16>, vector<16x16xbf16>, vector<64x16xf32> -> vector<64x16xf32>
    %c0_3 = arith.constant 0 : index
    %c0_4 = arith.constant 0 : index
    %3 = vector.load %arg5[%c0_3, %c0_4] : memref<1x16xf32, #tpu.memory_space<vmem>>, vector<1x16xf32>
    %4 = vector.broadcast %3 : vector<1x16xf32> to vector<64x16xf32>
    %5 = arith.addf %2, %4 : vector<64x16xf32>
    %cst_5 = arith.constant 0.000000e+00 : f32
    %6 = vector.broadcast %cst_5 : f32 to vector<64x16xf32>
    %7 = arith.maximumf %5, %6 : vector<64x16xf32>
    %c0_6 = arith.constant 0 : index
    %c0_7 = arith.constant 0 : index
    %8 = vector.load %arg2[%c0_6, %c0_7] : memref<64x16xbf16, #tpu.memory_space<vmem>>, vector<64x16xbf16>
    %c0_8 = arith.constant 0 : index
    %c0_9 = arith.constant 0 : index
    %9 = vector.load %arg6[%c0_8, %c0_9] : memref<16x16xbf16, #tpu.memory_space<vmem>>, vector<16x16xbf16>
    %cst_10 = arith.constant dense<0.000000e+00> : vector<64x16xf32>
    %10 = tpu.matmul %8, %9, %cst_10 {dimension_numbers = #tpu.dot_dimension_numbers<[1], [0], [0], [1], [0, 0, 1, 1], [], []>} : vector<64x16xbf16>, vector<16x16xbf16>, vector<64x16xf32> -> vector<64x16xf32>
    %c0_11 = arith.constant 0 : index
    %c0_12 = arith.constant 0 : index
    %11 = vector.load %arg7[%c0_11, %c0_12] : memref<1x16xf32, #tpu.memory_space<vmem>>, vector<1x16xf32>
    %12 = vector.broadcast %11 : vector<1x16xf32> to vector<64x16xf32>
    %13 = arith.addf %10, %12 : vector<64x16xf32>
    %cst_13 = arith.constant 0.000000e+00 : f32
    %14 = vector.broadcast %cst_13 : f32 to vector<64x16xf32>
    %15 = arith.maximumf %13, %14 : vector<64x16xf32>
    %16 = arith.truncf %7 : vector<64x16xf32> to vector<64x16xbf16>
    %c0_14 = arith.constant 0 : index
    %c0_15 = arith.constant 0 : index
    %17 = vector.load %arg8[%c0_14, %c0_15] : memref<16x16xbf16, #tpu.memory_space<vmem>>, vector<16x16xbf16>
    %cst_16 = arith.constant dense<0.000000e+00> : vector<64x16xf32>
    %18 = tpu.matmul %16, %17, %cst_16 {dimension_numbers = #tpu.dot_dimension_numbers<[1], [0], [0], [1], [0, 0, 1, 1], [], []>} : vector<64x16xbf16>, vector<16x16xbf16>, vector<64x16xf32> -> vector<64x16xf32>
    %19 = arith.truncf %15 : vector<64x16xf32> to vector<64x16xbf16>
    %c0_17 = arith.constant 0 : index
    %c0_18 = arith.constant 0 : index
    %20 = vector.load %arg9[%c0_17, %c0_18] : memref<16x16xbf16, #tpu.memory_space<vmem>>, vector<16x16xbf16>
    %cst_19 = arith.constant dense<0.000000e+00> : vector<64x16xf32>
    %21 = tpu.matmul %19, %20, %cst_19 {dimension_numbers = #tpu.dot_dimension_numbers<[1], [0], [0], [1], [0, 0, 1, 1], [], []>} : vector<64x16xbf16>, vector<16x16xbf16>, vector<64x16xf32> -> vector<64x16xf32>
    %c0_20 = arith.constant 0 : index
    %c0_21 = arith.constant 0 : index
    %22 = vector.load %arg10[%c0_20, %c0_21] : memref<1x16xf32, #tpu.memory_space<vmem>>, vector<1x16xf32>
    %23 = vector.broadcast %22 : vector<1x16xf32> to vector<64x16xf32>
    %24 = arith.addf %21, %23 : vector<64x16xf32>
    %25 = arith.addf %18, %24 : vector<64x16xf32>
    %26 = arith.negf %25 : vector<64x16xf32>
    %27 = math.exp %26 : vector<64x16xf32>
    %cst_22 = arith.constant 1.000000e+00 : f32
    %28 = vector.broadcast %cst_22 : f32 to vector<64x16xf32>
    %29 = arith.addf %28, %27 : vector<64x16xf32>
    %30 = arith.divf %28, %29 : vector<64x16xf32>
    %31 = arith.mulf %30, %7 : vector<64x16xf32>
    %cst_23 = arith.constant 1.000000e+00 : f32
    %32 = vector.broadcast %cst_23 : f32 to vector<64x16xf32>
    %33 = arith.subf %32, %30 : vector<64x16xf32>
    %34 = arith.mulf %33, %15 : vector<64x16xf32>
    %35 = arith.addf %31, %34 : vector<64x16xf32>
    %36 = arith.truncf %35 : vector<64x16xf32> to vector<64x16xbf16>
    %c0_24 = arith.constant 0 : index
    %c0_25 = arith.constant 0 : index
    %37 = vector.load %arg11[%c0_24, %c0_25] : memref<16x16xbf16, #tpu.memory_space<vmem>>, vector<16x16xbf16>
    %cst_26 = arith.constant dense<0.000000e+00> : vector<64x16xf32>
    %38 = tpu.matmul %36, %37, %cst_26 {dimension_numbers = #tpu.dot_dimension_numbers<[1], [0], [0], [1], [0, 0, 1, 1], [], []>} : vector<64x16xbf16>, vector<16x16xbf16>, vector<64x16xf32> -> vector<64x16xf32>
    %c0_27 = arith.constant 0 : index
    %c0_28 = arith.constant 0 : index
    %39 = vector.load %arg12[%c0_27, %c0_28] : memref<1x16xf32, #tpu.memory_space<vmem>>, vector<1x16xf32>
    %40 = vector.broadcast %39 : vector<1x16xf32> to vector<64x16xf32>
    %41 = arith.addf %38, %40 : vector<64x16xf32>
    %cst_29 = arith.constant 0.000000e+00 : f32
    %42 = vector.broadcast %cst_29 : f32 to vector<64x16xf32>
    %43 = arith.maximumf %41, %42 : vector<64x16xf32>
    %44 = arith.truncf %43 : vector<64x16xf32> to vector<64x16xbf16>
    %c0_30 = arith.constant 0 : index
    %c0_31 = arith.constant 0 : index
    %45 = vector.load %arg13[%c0_30, %c0_31] : memref<16x16xbf16, #tpu.memory_space<vmem>>, vector<16x16xbf16>
    %cst_32 = arith.constant dense<0.000000e+00> : vector<64x16xf32>
    %46 = tpu.matmul %44, %45, %cst_32 {dimension_numbers = #tpu.dot_dimension_numbers<[1], [0], [0], [1], [0, 0, 1, 1], [], []>} : vector<64x16xbf16>, vector<16x16xbf16>, vector<64x16xf32> -> vector<64x16xf32>
    %c0_33 = arith.constant 0 : index
    %c0_34 = arith.constant 0 : index
    %47 = vector.load %arg14[%c0_33, %c0_34] : memref<1x16xf32, #tpu.memory_space<vmem>>, vector<1x16xf32>
    %48 = vector.broadcast %47 : vector<1x16xf32> to vector<64x16xf32>
    %49 = arith.addf %46, %48 : vector<64x16xf32>
    %c0_35 = arith.constant 0 : index
    %c0_36 = arith.constant 0 : index
    %50 = vector.load %arg3[%c0_35, %c0_36] : memref<64x16xf32, #tpu.memory_space<vmem>>, vector<64x16xf32>
    %51 = arith.addf %50, %49 : vector<64x16xf32>
    %c0_37 = arith.constant 0 : index
    %c0_38 = arith.constant 0 : index
    %52 = vector.load %arg15[%c0_37, %c0_38] : memref<64x16xf32, #tpu.memory_space<vmem>>, vector<64x16xf32>
    tpu.vector_store %arg15[%c0_37, %c0_38], %51 {strides = array<i32>} : memref<64x16xf32, #tpu.memory_space<vmem>>, vector<64x16xf32>,
    return
  }
  func.func @transform_0(%arg0: i32) -> (i32, i32) {
    %c0_i32 = arith.constant 0 : i32
    %c0_i32_0 = arith.constant 0 : i32
    return %arg0, %c0_i32 : i32, i32
  }
  func.func @transform_1(%arg0: i32) -> (i32, i32) {
    %c0_i32 = arith.constant 0 : i32
    %c0_i32_0 = arith.constant 0 : i32
    return %arg0, %c0_i32 : i32, i32
  }
  func.func @transform_2(%arg0: i32) -> (i32, i32) {
    %c0_i32 = arith.constant 0 : i32
    %c0_i32_0 = arith.constant 0 : i32
    return %arg0, %c0_i32 : i32, i32
  }
  func.func @transform_3(%arg0: i32) -> (i32, i32) {
    %c0_i32 = arith.constant 0 : i32
    %c0_i32_0 = arith.constant 0 : i32
    %c0_i32_1 = arith.constant 0 : i32
    return %c0_i32, %c0_i32_0 : i32, i32
  }
  func.func @transform_4(%arg0: i32) -> (i32, i32) {
    %c0_i32 = arith.constant 0 : i32
    %c0_i32_0 = arith.constant 0 : i32
    %c0_i32_1 = arith.constant 0 : i32
    return %c0_i32, %c0_i32_0 : i32, i32
  }
  func.func @transform_5(%arg0: i32) -> (i32, i32) {
    %c0_i32 = arith.constant 0 : i32
    %c0_i32_0 = arith.constant 0 : i32
    %c0_i32_1 = arith.constant 0 : i32
    return %c0_i32, %c0_i32_0 : i32, i32
  }
  func.func @transform_6(%arg0: i32) -> (i32, i32) {
    %c0_i32 = arith.constant 0 : i32
    %c0_i32_0 = arith.constant 0 : i32
    %c0_i32_1 = arith.constant 0 : i32
    return %c0_i32, %c0_i32_0 : i32, i32
  }
  func.func @transform_7(%arg0: i32) -> (i32, i32) {
    %c0_i32 = arith.constant 0 : i32
    %c0_i32_0 = arith.constant 0 : i32
    %c0_i32_1 = arith.constant 0 : i32
    return %c0_i32, %c0_i32_0 : i32, i32
  }
  func.func @transform_8(%arg0: i32) -> (i32, i32) {
    %c0_i32 = arith.constant 0 : i32
    %c0_i32_0 = arith.constant 0 : i32
    %c0_i32_1 = arith.constant 0 : i32
    return %c0_i32, %c0_i32_0 : i32, i32
  }
  func.func @transform_9(%arg0: i32) -> (i32, i32) {
    %c0_i32 = arith.constant 0 : i32
    %c0_i32_0 = arith.constant 0 : i32
    %c0_i32_1 = arith.constant 0 : i32
    return %c0_i32, %c0_i32_0 : i32, i32
  }
  func.func @transform_10(%arg0: i32) -> (i32, i32) {
    %c0_i32 = arith.constant 0 : i32
    %c0_i32_0 = arith.constant 0 : i32
    %c0_i32_1 = arith.constant 0 : i32
    return %c0_i32, %c0_i32_0 : i32, i32
  }
  func.func @transform_11(%arg0: i32) -> (i32, i32) {
    %c0_i32 = arith.constant 0 : i32
    %c0_i32_0 = arith.constant 0 : i32
    %c0_i32_1 = arith.constant 0 : i32
    return %c0_i32, %c0_i32_0 : i32, i32
  }
  func.func @transform_12(%arg0: i32) -> (i32, i32) {
    %c0_i32 = arith.constant 0 : i32
    %c0_i32_0 = arith.constant 0 : i32
    %c0_i32_1 = arith.constant 0 : i32
    return %c0_i32, %c0_i32_0 : i32, i32
  }
  func.func @transform_13(%arg0: i32) -> (i32, i32) {
    %c0_i32 = arith.constant 0 : i32
    %c0_i32_0 = arith.constant 0 : i32
    %c0_i32_1 = arith.constant 0 : i32
    return %c0_i32, %c0_i32_0 : i32, i32
  }
  func.func @transform_14(%arg0: i32) -> (i32, i32) {
    %c0_i32 = arith.constant 0 : i32
    %c0_i32_0 = arith.constant 0 : i32
    return %arg0, %c0_i32 : i32, i32
  }
}

module attributes {stable_mosaic.version = 11 : i64} {
  func.func @_fc1_kernel(%arg0: i32, %arg1: memref<64x16xbf16, #tpu.memory_space<vmem>>, %arg2: memref<16x16xbf16, #tpu.memory_space<vmem>>, %arg3: memref<1x16xf32, #tpu.memory_space<vmem>>, %arg4: memref<64x16xbf16, #tpu.memory_space<vmem>>) attributes {dimension_semantics = [#tpu.dimension_semantics<parallel>], iteration_bounds = array<i64: 2>, scalar_prefetch = 0 : i64, scratch_operands = 0 : i64, tpu.core_type = #tpu.core_type<tc>, window_params = [{transform_indices = @transform_0, window_bounds = array<i64: 64, 16>}, {pipeline_mode = #tpu.pipeline_mode<synchronous>, transform_indices = @transform_1, window_bounds = array<i64: 16, 16>}, {pipeline_mode = #tpu.pipeline_mode<synchronous>, transform_indices = @transform_2, window_bounds = array<i64: 1, 16>}, {transform_indices = @transform_3, window_bounds = array<i64: 64, 16>}]} {
    %c0 = arith.constant 0 : index
    %c0_0 = arith.constant 0 : index
    %0 = vector.load %arg1[%c0, %c0_0] : memref<64x16xbf16, #tpu.memory_space<vmem>>, vector<64x16xbf16>
    %c0_1 = arith.constant 0 : index
    %c0_2 = arith.constant 0 : index
    %1 = vector.load %arg2[%c0_1, %c0_2] : memref<16x16xbf16, #tpu.memory_space<vmem>>, vector<16x16xbf16>
    %cst = arith.constant dense<0.000000e+00> : vector<64x16xf32>
    %2 = tpu.matmul %0, %1, %cst {dimension_numbers = #tpu.dot_dimension_numbers<[1], [0], [0], [1], [0, 0, 1, 1], [], []>} : vector<64x16xbf16>, vector<16x16xbf16>, vector<64x16xf32> -> vector<64x16xf32>
    %c0_3 = arith.constant 0 : index
    %c0_4 = arith.constant 0 : index
    %3 = vector.load %arg3[%c0_3, %c0_4] : memref<1x16xf32, #tpu.memory_space<vmem>>, vector<1x16xf32>
    %4 = vector.broadcast %3 : vector<1x16xf32> to vector<64x16xf32>
    %5 = arith.addf %2, %4 : vector<64x16xf32>
    %cst_5 = arith.constant 0.000000e+00 : f32
    %6 = vector.broadcast %cst_5 : f32 to vector<64x16xf32>
    %7 = arith.maximumf %5, %6 : vector<64x16xf32>
    %8 = arith.truncf %7 : vector<64x16xf32> to vector<64x16xbf16>
    %c0_6 = arith.constant 0 : index
    %c0_7 = arith.constant 0 : index
    %9 = vector.load %arg4[%c0_6, %c0_7] : memref<64x16xbf16, #tpu.memory_space<vmem>>, vector<64x16xbf16>
    tpu.vector_store %arg4[%c0_6, %c0_7], %8 {strides = array<i32>} : memref<64x16xbf16, #tpu.memory_space<vmem>>, vector<64x16xbf16>,
    return
  }
  func.func @transform_0(%arg0: i32) -> (i32, i32) {
    %c0_i32 = arith.constant 0 : i32
    %c0_i32_0 = arith.constant 0 : i32
    return %arg0, %c0_i32 : i32, i32
  }
  func.func @transform_1(%arg0: i32) -> (i32, i32) {
    %c0_i32 = arith.constant 0 : i32
    %c0_i32_0 = arith.constant 0 : i32
    %c0_i32_1 = arith.constant 0 : i32
    return %c0_i32, %c0_i32_0 : i32, i32
  }
  func.func @transform_2(%arg0: i32) -> (i32, i32) {
    %c0_i32 = arith.constant 0 : i32
    %c0_i32_0 = arith.constant 0 : i32
    %c0_i32_1 = arith.constant 0 : i32
    return %c0_i32, %c0_i32_0 : i32, i32
  }
  func.func @transform_3(%arg0: i32) -> (i32, i32) {
    %c0_i32 = arith.constant 0 : i32
    %c0_i32_0 = arith.constant 0 : i32
    return %arg0, %c0_i32 : i32, i32
  }
}

module attributes {stable_mosaic.version = 11 : i64} {
  func.func @_fc1_kernel(%arg0: i32, %arg1: memref<64x16xbf16, #tpu.memory_space<vmem>>, %arg2: memref<16x16xbf16, #tpu.memory_space<vmem>>, %arg3: memref<1x16xf32, #tpu.memory_space<vmem>>, %arg4: memref<64x16xf32, #tpu.memory_space<vmem>>) attributes {dimension_semantics = [#tpu.dimension_semantics<parallel>], iteration_bounds = array<i64: 2>, scalar_prefetch = 0 : i64, scratch_operands = 0 : i64, tpu.core_type = #tpu.core_type<tc>, window_params = [{transform_indices = @transform_0, window_bounds = array<i64: 64, 16>}, {pipeline_mode = #tpu.pipeline_mode<synchronous>, transform_indices = @transform_1, window_bounds = array<i64: 16, 16>}, {pipeline_mode = #tpu.pipeline_mode<synchronous>, transform_indices = @transform_2, window_bounds = array<i64: 1, 16>}, {transform_indices = @transform_3, window_bounds = array<i64: 64, 16>}]} {
    %c0 = arith.constant 0 : index
    %c0_0 = arith.constant 0 : index
    %0 = vector.load %arg1[%c0, %c0_0] : memref<64x16xbf16, #tpu.memory_space<vmem>>, vector<64x16xbf16>
    %c0_1 = arith.constant 0 : index
    %c0_2 = arith.constant 0 : index
    %1 = vector.load %arg2[%c0_1, %c0_2] : memref<16x16xbf16, #tpu.memory_space<vmem>>, vector<16x16xbf16>
    %cst = arith.constant dense<0.000000e+00> : vector<64x16xf32>
    %2 = tpu.matmul %0, %1, %cst {dimension_numbers = #tpu.dot_dimension_numbers<[1], [0], [0], [1], [0, 0, 1, 1], [], []>} : vector<64x16xbf16>, vector<16x16xbf16>, vector<64x16xf32> -> vector<64x16xf32>
    %c0_3 = arith.constant 0 : index
    %c0_4 = arith.constant 0 : index
    %3 = vector.load %arg3[%c0_3, %c0_4] : memref<1x16xf32, #tpu.memory_space<vmem>>, vector<1x16xf32>
    %4 = vector.broadcast %3 : vector<1x16xf32> to vector<64x16xf32>
    %5 = arith.addf %2, %4 : vector<64x16xf32>
    %cst_5 = arith.constant 0.000000e+00 : f32
    %6 = vector.broadcast %cst_5 : f32 to vector<64x16xf32>
    %7 = arith.maximumf %5, %6 : vector<64x16xf32>
    %c0_6 = arith.constant 0 : index
    %c0_7 = arith.constant 0 : index
    %8 = vector.load %arg4[%c0_6, %c0_7] : memref<64x16xf32, #tpu.memory_space<vmem>>, vector<64x16xf32>
    tpu.vector_store %arg4[%c0_6, %c0_7], %7 {strides = array<i32>} : memref<64x16xf32, #tpu.memory_space<vmem>>, vector<64x16xf32>,
    return
  }
  func.func @transform_0(%arg0: i32) -> (i32, i32) {
    %c0_i32 = arith.constant 0 : i32
    %c0_i32_0 = arith.constant 0 : i32
    return %arg0, %c0_i32 : i32, i32
  }
  func.func @transform_1(%arg0: i32) -> (i32, i32) {
    %c0_i32 = arith.constant 0 : i32
    %c0_i32_0 = arith.constant 0 : i32
    %c0_i32_1 = arith.constant 0 : i32
    return %c0_i32, %c0_i32_0 : i32, i32
  }
  func.func @transform_2(%arg0: i32) -> (i32, i32) {
    %c0_i32 = arith.constant 0 : i32
    %c0_i32_0 = arith.constant 0 : i32
    %c0_i32_1 = arith.constant 0 : i32
    return %c0_i32, %c0_i32_0 : i32, i32
  }
  func.func @transform_3(%arg0: i32) -> (i32, i32) {
    %c0_i32 = arith.constant 0 : i32
    %c0_i32_0 = arith.constant 0 : i32
    return %arg0, %c0_i32 : i32, i32
  }
}

module attributes {stable_mosaic.version = 11 : i64} {
  func.func @_attn_kernel(%arg0: i32, %arg1: memref<64x4x4xbf16, #tpu.memory_space<vmem>>, %arg2: memref<64x4x4xbf16, #tpu.memory_space<vmem>>, %arg3: memref<64x4x4xbf16, #tpu.memory_space<vmem>>, %arg4: memref<64x4x4xbf16, #tpu.memory_space<vmem>>) attributes {dimension_semantics = [#tpu.dimension_semantics<parallel>], iteration_bounds = array<i64: 2>, scalar_prefetch = 0 : i64, scratch_operands = 0 : i64, tpu.core_type = #tpu.core_type<tc>, window_params = [{transform_indices = @transform_0, window_bounds = array<i64: 64, 4, 4>}, {transform_indices = @transform_1, window_bounds = array<i64: 64, 4, 4>}, {transform_indices = @transform_2, window_bounds = array<i64: 64, 4, 4>}, {transform_indices = @transform_3, window_bounds = array<i64: 64, 4, 4>}]} {
    %c0 = arith.constant 0 : index
    %c0_0 = arith.constant 0 : index
    %c0_1 = arith.constant 0 : index
    %0 = vector.load %arg1[%c0, %c0_0, %c0_1] : memref<64x4x4xbf16, #tpu.memory_space<vmem>>, vector<64x4x4xbf16>
    %c0_2 = arith.constant 0 : index
    %c0_3 = arith.constant 0 : index
    %c0_4 = arith.constant 0 : index
    %1 = vector.load %arg2[%c0_2, %c0_3, %c0_4] : memref<64x4x4xbf16, #tpu.memory_space<vmem>>, vector<64x4x4xbf16>
    %c0_5 = arith.constant 0 : index
    %c0_6 = arith.constant 0 : index
    %c0_7 = arith.constant 0 : index
    %2 = vector.load %arg3[%c0_5, %c0_6, %c0_7] : memref<64x4x4xbf16, #tpu.memory_space<vmem>>, vector<64x4x4xbf16>
    "tpu.trace_start"() <{level = 10 : i32, message = "gqd,gkd->gqk"}> : () -> ()
    %cst = arith.constant dense<0.000000e+00> : vector<64x4x4xf32>
    %3 = tpu.matmul %0, %1, %cst {dimension_numbers = #tpu.dot_dimension_numbers<[2], [2], [1], [1], [0, 0, 0, 1, 1, 1], [0], [0]>} : vector<64x4x4xbf16>, vector<64x4x4xbf16>, vector<64x4x4xf32> -> vector<64x4x4xf32>
    "tpu.trace_stop"() : () -> ()
    %cst_8 = arith.constant 5.000000e-01 : f32
    %4 = vector.broadcast %cst_8 : f32 to vector<64x4x4xf32>
    %5 = arith.mulf %3, %4 : vector<64x4x4xf32>
    %cst_9 = arith.constant dense<0xFF800000> : vector<64x4xf32>
    %6 = vector.multi_reduction <maximumf>, %5, %cst_9 [2] : vector<64x4x4xf32> to vector<64x4xf32>
    %7 = vector.shape_cast %6 : vector<64x4xf32> to vector<64x4x1xf32>
    %8 = vector.broadcast %7 : vector<64x4x1xf32> to vector<64x4x4xf32>
    %9 = arith.subf %5, %8 : vector<64x4x4xf32>
    %10 = math.exp %9 : vector<64x4x4xf32>
    %cst_10 = arith.constant dense<0.000000e+00> : vector<64x4xf32>
    %11 = vector.multi_reduction <add>, %10, %cst_10 [2] : vector<64x4x4xf32> to vector<64x4xf32>
    %12 = vector.shape_cast %11 : vector<64x4xf32> to vector<64x4x1xf32>
    %13 = tpu.reciprocal %12 {approx = true} : vector<64x4x1xf32> -> vector<64x4x1xf32>
    %14 = vector.broadcast %13 : vector<64x4x1xf32> to vector<64x4x4xf32>
    %15 = arith.mulf %10, %14 : vector<64x4x4xf32>
    %16 = arith.truncf %15 : vector<64x4x4xf32> to vector<64x4x4xbf16>
    "tpu.trace_start"() <{level = 10 : i32, message = "gqk,gkd->gqd"}> : () -> ()
    %cst_11 = arith.constant dense<0.000000e+00> : vector<64x4x4xf32>
    %17 = tpu.matmul %16, %2, %cst_11 {dimension_numbers = #tpu.dot_dimension_numbers<[2], [1], [1], [2], [0, 0, 0, 1, 1, 2], [0], [0]>} : vector<64x4x4xbf16>, vector<64x4x4xbf16>, vector<64x4x4xf32> -> vector<64x4x4xf32>
    "tpu.trace_stop"() : () -> ()
    %18 = arith.truncf %17 : vector<64x4x4xf32> to vector<64x4x4xbf16>
    %c0_12 = arith.constant 0 : index
    %c0_13 = arith.constant 0 : index
    %c0_14 = arith.constant 0 : index
    %19 = vector.load %arg4[%c0_12, %c0_13, %c0_14] : memref<64x4x4xbf16, #tpu.memory_space<vmem>>, vector<64x4x4xbf16>
    tpu.vector_store %arg4[%c0_12, %c0_13, %c0_14], %18 {strides = array<i32>} : memref<64x4x4xbf16, #tpu.memory_space<vmem>>, vector<64x4x4xbf16>,
    return
  }
  func.func @transform_0(%arg0: i32) -> (i32, i32, i32) {
    %c0_i32 = arith.constant 0 : i32
    %c0_i32_0 = arith.constant 0 : i32
    %c0_i32_1 = arith.constant 0 : i32
    return %arg0, %c0_i32, %c0_i32_0 : i32, i32, i32
  }
  func.func @transform_1(%arg0: i32) -> (i32, i32, i32) {
    %c0_i32 = arith.constant 0 : i32
    %c0_i32_0 = arith.constant 0 : i32
    %c0_i32_1 = arith.constant 0 : i32
    return %arg0, %c0_i32, %c0_i32_0 : i32, i32, i32
  }
  func.func @transform_2(%arg0: i32) -> (i32, i32, i32) {
    %c0_i32 = arith.constant 0 : i32
    %c0_i32_0 = arith.constant 0 : i32
    %c0_i32_1 = arith.constant 0 : i32
    return %arg0, %c0_i32, %c0_i32_0 : i32, i32, i32
  }
  func.func @transform_3(%arg0: i32) -> (i32, i32, i32) {
    %c0_i32 = arith.constant 0 : i32
    %c0_i32_0 = arith.constant 0 : i32
    %c0_i32_1 = arith.constant 0 : i32
    return %arg0, %c0_i32, %c0_i32_0 : i32, i32, i32
  }
}

module attributes {stable_mosaic.version = 11 : i64} {
  func.func @_fc2_kernel(%arg0: i32, %arg1: memref<64x16xbf16, #tpu.memory_space<vmem>>, %arg2: memref<16x16xbf16, #tpu.memory_space<vmem>>, %arg3: memref<1x16xf32, #tpu.memory_space<vmem>>, %arg4: memref<16x1xbf16, #tpu.memory_space<vmem>>, %arg5: memref<1x1xf32, #tpu.memory_space<vmem>>, %arg6: memref<64x1xf32, #tpu.memory_space<vmem>>) attributes {dimension_semantics = [#tpu.dimension_semantics<parallel>], iteration_bounds = array<i64: 2>, scalar_prefetch = 0 : i64, scratch_operands = 0 : i64, tpu.core_type = #tpu.core_type<tc>, window_params = [{transform_indices = @transform_0, window_bounds = array<i64: 64, 16>}, {pipeline_mode = #tpu.pipeline_mode<synchronous>, transform_indices = @transform_1, window_bounds = array<i64: 16, 16>}, {pipeline_mode = #tpu.pipeline_mode<synchronous>, transform_indices = @transform_2, window_bounds = array<i64: 1, 16>}, {pipeline_mode = #tpu.pipeline_mode<synchronous>, transform_indices = @transform_3, window_bounds = array<i64: 16, 1>}, {pipeline_mode = #tpu.pipeline_mode<synchronous>, transform_indices = @transform_4, window_bounds = array<i64: 1, 1>}, {transform_indices = @transform_5, window_bounds = array<i64: 64, 1>}]} {
    %c0 = arith.constant 0 : index
    %c0_0 = arith.constant 0 : index
    %0 = vector.load %arg1[%c0, %c0_0] : memref<64x16xbf16, #tpu.memory_space<vmem>>, vector<64x16xbf16>
    %c0_1 = arith.constant 0 : index
    %c0_2 = arith.constant 0 : index
    %1 = vector.load %arg2[%c0_1, %c0_2] : memref<16x16xbf16, #tpu.memory_space<vmem>>, vector<16x16xbf16>
    %cst = arith.constant dense<0.000000e+00> : vector<64x16xf32>
    %2 = tpu.matmul %0, %1, %cst {dimension_numbers = #tpu.dot_dimension_numbers<[1], [0], [0], [1], [0, 0, 1, 1], [], []>} : vector<64x16xbf16>, vector<16x16xbf16>, vector<64x16xf32> -> vector<64x16xf32>
    %c0_3 = arith.constant 0 : index
    %c0_4 = arith.constant 0 : index
    %3 = vector.load %arg3[%c0_3, %c0_4] : memref<1x16xf32, #tpu.memory_space<vmem>>, vector<1x16xf32>
    %4 = vector.broadcast %3 : vector<1x16xf32> to vector<64x16xf32>
    %5 = arith.addf %2, %4 : vector<64x16xf32>
    %cst_5 = arith.constant 0.000000e+00 : f32
    %6 = vector.broadcast %cst_5 : f32 to vector<64x16xf32>
    %7 = arith.maximumf %5, %6 : vector<64x16xf32>
    %8 = arith.truncf %7 : vector<64x16xf32> to vector<64x16xbf16>
    %c0_6 = arith.constant 0 : index
    %c0_7 = arith.constant 0 : index
    %9 = vector.load %arg4[%c0_6, %c0_7] : memref<16x1xbf16, #tpu.memory_space<vmem>>, vector<16x1xbf16>
    %cst_8 = arith.constant dense<0.000000e+00> : vector<64x1xf32>
    %10 = tpu.matmul %8, %9, %cst_8 {dimension_numbers = #tpu.dot_dimension_numbers<[1], [0], [0], [1], [0, 0, 1, 1], [], []>} : vector<64x16xbf16>, vector<16x1xbf16>, vector<64x1xf32> -> vector<64x1xf32>
    %c0_9 = arith.constant 0 : index
    %c0_10 = arith.constant 0 : index
    %11 = vector.load %arg5[%c0_9, %c0_10] : memref<1x1xf32, #tpu.memory_space<vmem>>, vector<1x1xf32>
    %12 = vector.broadcast %11 : vector<1x1xf32> to vector<64x1xf32>
    %13 = arith.addf %10, %12 : vector<64x1xf32>
    %c0_11 = arith.constant 0 : index
    %c0_12 = arith.constant 0 : index
    %14 = vector.load %arg6[%c0_11, %c0_12] : memref<64x1xf32, #tpu.memory_space<vmem>>, vector<64x1xf32>
    tpu.vector_store %arg6[%c0_11, %c0_12], %13 {strides = array<i32>} : memref<64x1xf32, #tpu.memory_space<vmem>>, vector<64x1xf32>,
    return
  }
  func.func @transform_0(%arg0: i32) -> (i32, i32) {
    %c0_i32 = arith.constant 0 : i32
    %c0_i32_0 = arith.constant 0 : i32
    return %arg0, %c0_i32 : i32, i32
  }
  func.func @transform_1(%arg0: i32) -> (i32, i32) {
    %c0_i32 = arith.constant 0 : i32
    %c0_i32_0 = arith.constant 0 : i32
    %c0_i32_1 = arith.constant 0 : i32
    return %c0_i32, %c0_i32_0 : i32, i32
  }
  func.func @transform_2(%arg0: i32) -> (i32, i32) {
    %c0_i32 = arith.constant 0 : i32
    %c0_i32_0 = arith.constant 0 : i32
    %c0_i32_1 = arith.constant 0 : i32
    return %c0_i32, %c0_i32_0 : i32, i32
  }
  func.func @transform_3(%arg0: i32) -> (i32, i32) {
    %c0_i32 = arith.constant 0 : i32
    %c0_i32_0 = arith.constant 0 : i32
    %c0_i32_1 = arith.constant 0 : i32
    return %c0_i32, %c0_i32_0 : i32, i32
  }
  func.func @transform_4(%arg0: i32) -> (i32, i32) {
    %c0_i32 = arith.constant 0 : i32
    %c0_i32_0 = arith.constant 0 : i32
    %c0_i32_1 = arith.constant 0 : i32
    return %c0_i32, %c0_i32_0 : i32, i32
  }
  func.func @transform_5(%arg0: i32) -> (i32, i32) {
    %c0_i32 = arith.constant 0 : i32
    %c0_i32_0 = arith.constant 0 : i32
    return %arg0, %c0_i32 : i32, i32
  }
}

</mosaic_0001>

<bundles_post_ra>
// kernel: _lambda_.19
= control target key start
LH: loop header
LB: loop body
LE: loop exit
PB: predicated region body
PF: predicated region fallthrough
CT: control target
= control target key end

     0   :  { %s426_s18 = smov 0   ;;  %s458_s0 = inlined_call_operand.vmem [shape: bf16[16,31], index: 0, kind: input, shape index: {}]   ;;  %s459_s1 = inlined_call_operand.vmem [shape: bf16[31,16], index: 1, kind: input, shape index: {}]   ;;  %s460_s2 = inlined_call_operand.vmem [shape: f32[1,16], index: 2, kind: input, shape index: {}]   ;;  %s461_s3 = inlined_call_operand.vmem [shape: bf16[16,16], index: 3, kind: input, shape index: {}]   ;;  %s462_s4 = inlined_call_operand.vmem [shape: f32[1,16], index: 4, kind: input, shape index: {}]   ;;  %s463_s5 = inlined_call_operand.vmem [shape: f32[16,16], index: 5, kind: output, shape index: {}]  }
   0x1 LB: > { %s350_s19 = sadd.s32 4294967295, %s393_s18   ;;  %p354_p0 = scmp.ge.s32.totalorder %s393_s18, 1  ;;  %s393_s18 = sphi %s426_s18, %s15_s18  }
   0x2   : > { %p186_p1 = scmp.lt.s32.totalorder %s393_s18, 3 }
   0x4   : > { %p187_p2 = pnand %p354_p0, %p186_p1 }
   0x5   : > { %p212_p3 = scmp.lt.s32.totalorder (!%p187_p2), %s350_s19, 1 }
   0x6   : > { %190 = sbr.rel (%p187_p2) target bundleno = 289 (0x121), region = 40 }
   0xb   : > { %v374_v0 = vld [vmem:[%s459_s1 + $0x8] sm:$0xff]  ;;  %vm245_vm0 = vcmask 1046528   ;;  %vm246_vm1 = vcmask 1047552   ;;  %v395_v1 = vmov 65535   ;;  %s465_s19 = smov (!%p212_p3, %s350_s19), 1  ;;  %v373_v5 = vld [vmem:[%s459_s1] sm:$0xff] }
   0xc   : > { %v247_v2 = vsel %vm245_vm0, 4294967295, %v395_v1  ;;  %s355_s22 = sshll.u32 %s465_s19, 2  ;;  %vm241_vm2 = vcmask 252928   ;;  %v375_v7 = vld [vmem:[%s461_s3] sm:$0xff]  ;;  %vm279_vm3 = vcmask 130048   ;;  %s356_s7 = sshll.u32 %s465_s19, 3 }
   0xd   : > { %v248_v3 = vsel %vm246_vm1, %v247_v2, 0  ;;  %s215_s27 = scalar_lea.vmem %s458_s0, %s355_s22  ;;  %290 = vmatpush.bf16.msra.mxu1 %v375_v7  ;;  %v385_v8 = vld [vmem:[%s460_s2] ss:$0 sm:$0xff]  ;;  %s219_s12 = scalar_lea.vmem %s463_s5, %s356_s7 }
   0xe   : > { %v250_v4 = vand.u32 %v374_v0, %v248_v3  ;;  %v221_v6 = vld [vmem:[%s215_s27] sm:$0xf] }
   0xf   : > { %v386_v14 = vld [vmem:[%s462_s4] ss:$0 sm:$0xff] }
  0x10   : > { %258 = vmatpush.bf16.msra.mxu0 %v250_v4 }
  0x14   : > { %259 = vmatpush.bf16.msra.mxu0 %v373_v5 }
  0x17   : > { %365 = vmatmul.msk.bf16.vlgmr.msra.gmra.mxu0 %vm241_vm2, %v221_v6 }
  0x94   : > { %v261_v9 = vpop.f32.mrf.mxu0 }
  0x95   : > { %v262_v10 = vadd.f32 %v385_v8, %v261_v9 }
  0x97   : > { %v265_v11 = vmax.f32 %v262_v10, 0.0 }
  0x99   : > { %v266_v12 = vpack.c.bf16 %v265_v11, %v265_v11 }
  0x9b   : > { %370 = vmatmul.msk.bf16.vlgmr.msra.gmra.mxu1 %vm279_vm3, %v266_v12 }
  0x9c   : > { %v263_v13 = vpop.f32.mrf.mxu0 }
 0x118   : > { %v292_v15 = vpop.f32.mrf.mxu1 }
 0x119   : > { %v293_v16 = vadd.f32 %v386_v14, %v292_v15 }
 0x11b   : > { %296 = vst.msk [vmem:[%s219_s12] sm:$0xff] %vm279_vm3, %v293_v16 }
 0x120   : > { %v294_v17 = vpop.f32.mrf.mxu1 }
 0x121 PF: > { %s15_s18 = sadd.s32 1, %s393_s18  }
 0x122   : > { %p12_p4 = scmp.ge.s32.totalorder %s15_s18, 4  }
 0x124   :  { %14 = sbr.rel (!%p12_p4) target bundleno = 1 (0x1), region = 70 }

// kernel: _lambda_.18
= control target key start
LH: loop header
LB: loop body
LE: loop exit
PB: predicated region body
PF: predicated region fallthrough
CT: control target
= control target key end

     0   :  { %s404_s18 = smov 0   ;;  %s436_s0 = inlined_call_operand.vmem [shape: bf16[16,16], index: 0, kind: input, shape index: {}]   ;;  %s437_s1 = inlined_call_operand.vmem [shape: bf16[16,16], index: 1, kind: input, shape index: {}]   ;;  %s438_s2 = inlined_call_operand.vmem [shape: f32[1,16], index: 2, kind: input, shape index: {}]   ;;  %s439_s3 = inlined_call_operand.vmem [shape: bf16[16,16], index: 3, kind: input, shape index: {}]   ;;  %s440_s4 = inlined_call_operand.vmem [shape: f32[1,16], index: 4, kind: input, shape index: {}]   ;;  %s441_s5 = inlined_call_operand.vmem [shape: f32[16,16], index: 5, kind: output, shape index: {}]  }
   0x1 LB: > { %s335_s19 = sadd.s32 4294967295, %s372_s18   ;;  %p339_p0 = scmp.ge.s32.totalorder %s372_s18, 1  ;;  %s372_s18 = sphi %s404_s18, %s15_s18  }
   0x2   : > { %p186_p1 = scmp.lt.s32.totalorder %s372_s18, 3 }
   0x4   : > { %p187_p2 = pnand %p339_p0, %p186_p1 }
   0x5   : > { %p212_p3 = scmp.lt.s32.totalorder (!%p187_p2), %s335_s19, 1 }
   0x6   : > { %190 = sbr.rel (%p187_p2) target bundleno = 281 (0x119), region = 40 }
   0xb   : > { %v354_v0 = vld [vmem:[%s437_s1] sm:$0xff]  ;;  %s443_s19 = smov (!%p212_p3, %s335_s19), 1  ;;  %vm234_vm0 = vcmask 130048  }
   0xc   : > { %245 = vmatpush.bf16.msra.mxu0 %v354_v0  ;;  %s340_s22 = sshll.u32 %s443_s19, 2  ;;  %v355_v2 = vld [vmem:[%s439_s3] sm:$0xff]  ;;  %s341_s30 = sshll.u32 %s443_s19, 3 }
   0xd   : > { %s215_s25 = scalar_lea.vmem %s436_s0, %s340_s22  ;;  %275 = vmatpush.bf16.msra.mxu1 %v355_v2  ;;  %v364_v3 = vld [vmem:[%s438_s2] ss:$0 sm:$0xff]  ;;  %s219_s10 = scalar_lea.vmem %s441_s5, %s341_s30 }
   0xe   : > { %v221_v1 = vld [vmem:[%s215_s25] sm:$0xf] }
   0xf   : > { %346 = vmatmul.msk.bf16.vlgmr.msra.gmra.mxu0 %vm234_vm0, %v221_v1  ;;  %v365_v9 = vld [vmem:[%s440_s4] ss:$0 sm:$0xff] }
  0x8c   : > { %v247_v4 = vpop.f32.mrf.mxu0 }
  0x8d   : > { %v248_v5 = vadd.f32 %v364_v3, %v247_v4 }
  0x8f   : > { %v251_v6 = vmax.f32 %v248_v5, 0.0 }
  0x91   : > { %v252_v7 = vpack.c.bf16 %v251_v6, %v251_v6 }
  0x93   : > { %351 = vmatmul.msk.bf16.vlgmr.msra.gmra.mxu1 %vm234_vm0, %v252_v7 }
  0x94   : > { %v249_v8 = vpop.f32.mrf.mxu0 }
 0x110   : > { %v277_v10 = vpop.f32.mrf.mxu1 }
 0x111   : > { %v278_v11 = vadd.f32 %v365_v9, %v277_v10 }
 0x113   : > { %281 = vst.msk [vmem:[%s219_s10] sm:$0xff] %vm234_vm0, %v278_v11 }
 0x118   : > { %v279_v12 = vpop.f32.mrf.mxu1 }
 0x119 PF: > { %s15_s18 = sadd.s32 1, %s372_s18  }
 0x11a   : > { %p12_p4 = scmp.ge.s32.totalorder %s15_s18, 4  }
 0x11c   :  { %14 = sbr.rel (!%p12_p4) target bundleno = 1 (0x1), region = 70 }

// kernel: _lambda_.17
= control target key start
LH: loop header
LB: loop body
LE: loop exit
PB: predicated region body
PF: predicated region fallthrough
CT: control target
= control target key end

     0   :  { %s536_s18 = smov 0   ;;  %s581_s0 = inlined_call_operand.vmem [shape: bf16[128,1], index: 0, kind: input, shape index: {}]   ;;  %s582_s1 = inlined_call_operand.vmem [shape: bf16[1,16], index: 1, kind: input, shape index: {}]   ;;  %s583_s2 = inlined_call_operand.vmem [shape: f32[1,16], index: 2, kind: input, shape index: {}]   ;;  %s584_s3 = inlined_call_operand.vmem [shape: bf16[16,16], index: 3, kind: input, shape index: {}]   ;;  %s585_s4 = inlined_call_operand.vmem [shape: f32[1,16], index: 4, kind: input, shape index: {}]   ;;  %s586_s5 = inlined_call_operand.vmem [shape: f32[128,16], index: 5, kind: output, shape index: {}]  }
   0x1 LB: > { %s440_s19 = sadd.s32 4294967295, %s503_s18   ;;  %p444_p0 = scmp.ge.s32.totalorder %s503_s18, 1  ;;  %s503_s18 = sphi %s536_s18, %s15_s18  }
   0x2   : > { %p188_p1 = scmp.lt.s32.totalorder %s503_s18, 3 }
   0x4   : > { %p189_p2 = pnand %p444_p0, %p188_p1 }
   0x5   : > { %s445_s22 = sshll.u32 (!%p189_p2), %s440_s19, 3 }
   0x6   : > { %192 = sbr.rel (%p189_p2) target bundleno = 323 (0x143), region = 40  ;;  %p217_p3 = scmp.lt.s32.totalorder (!%p189_p2), %s445_s22, 15 }
   0xb   : > { %v237_v0 = vld [vmem:[%s582_s1] sm:$0x1]  ;;  %vm275_vm0 = vcmask 1040384   ;;  %v505_v1 = vmov 0   ;;  %s588_s22 = smov (!%p217_p3, %s445_s22), 15  ;;  %vm262_vm1 = vcmask 7168  }
   0xc   : > { %v277_v2 = vsel %vm275_vm0, 65535, %v505_v1  ;;  %s446_s23 = sshll.u32 %s588_s22, 2  ;;  %v483_v8 = vld [vmem:[%s584_s3] sm:$0xff]  ;;  %vm334_vm2 = vcmask 130048   ;;  %s448_s6 = sshll.u32 %s588_s22, 3 }
   0xd   : > { %v279_v3 = vand.u32 %v277_v2, %v237_v0  ;;  %s220_s26 = scalar_lea.vmem %s581_s0, %s446_s23  ;;  %354 = vmatpush.bf16.msra.mxu1 %v483_v8  ;;  %485 = vmatpush.bf16.msra.mxu3 %v483_v8  ;;  %v495_v10 = vld [vmem:[%s583_s2] ss:$0 sm:$0xff]  ;;  %s226_s11 = scalar_lea.vmem %s586_s5, %s448_s6 }
   0xe   : > { %v479_v4 = vld [vmem:[%s220_s26] sm:$0xff]  ;;  %v481_v5 = vld [vmem:[%s220_s26 + $0x10] sm:$0xff]  ;;  %v480_v6 = vld [vmem:[%s220_s26 + $0x8] sm:$0xff] }
   0xf   : > { %288 = vmatpush.bf16.msra.mxu0 %v279_v3  ;;  %484 = vmatpush.bf16.msra.mxu2 %v279_v3  ;;  %v482_v7 = vld [vmem:[%s220_s26 + $0x18] sm:$0xff]  ;;  %v496_v38 = vld [vmem:[%s585_s4] ss:$0 sm:$0xff] }
  0x12   : > { %465 = vmatmul.msk.bf16.vlgmr.msra.gmra.mxu0 %vm262_vm1, %v479_v4  ;;  %467 = vmatmul.msk.bf16.vlgmr.msra.gmra.mxu2 %vm262_vm1, %v481_v5 }
  0x22   : > { %466 = vmatmul.msk.bf16.gmra.mxu0 %vm262_vm1, %v480_v6  ;;  %468 = vmatmul.msk.bf16.gmra.mxu2 %vm262_vm1, %v482_v7 }
  0x8f   : > { %v290_v9 = vpop.f32.mrf.mxu0 }
  0x90   : > { %v291_v11 = vadd.f32 %v495_v10, %v290_v9 }
  0x92   : > { %v310_v14 = vmax.f32 %v291_v11, 0.0 }
  0x95   : > { %v300_v12 = vpop.f32.mrf.mxu2 }
  0x96   : > { %v301_v17 = vadd.f32 %v495_v10, %v300_v12 }
  0x97   : > { %v292_v13 = vpop.f32.mrf.mxu0 }
  0x98   : > { %v293_v15 = vadd.f32 %v495_v10, %v292_v13  ;;  %v314_v22 = vmax.f32 %v301_v17, 0.0 }
  0x9a   : > { %v311_v16 = vmax.f32 %v293_v15, 0.0 }
  0x9c   : > { %v318_v18 = vpack.c.bf16 %v311_v16, %v310_v14 }
  0x9d   : > { %v302_v19 = vpop.f32.mrf.mxu2 }
  0x9e   : > { %v303_v20 = vadd.f32 %v495_v10, %v302_v19  ;;  %473 = vmatmul.msk.bf16.vlgmr.msra.gmra.mxu1 %vm334_vm2, %v318_v18 }
  0x9f   : > { %v295_v21 = vpop.f32.mrf.mxu0 }
  0xa0   : > { %v315_v23 = vmax.f32 %v303_v20, 0.0  ;;  %v296_v25 = vadd.f32 %v495_v10, %v295_v21 }
  0xa2   : > { %v320_v24 = vpack.c.bf16 %v315_v23, %v314_v22  ;;  %v312_v28 = vmax.f32 %v296_v25, 0.0 }
  0xa4   : > { %475 = vmatmul.msk.bf16.vlgmr.msra.gmra.mxu3 %vm334_vm2, %v320_v24 }
  0xa5   : > { %v305_v26 = vpop.f32.mrf.mxu2 }
  0xa6   : > { %v306_v31 = vadd.f32 %v495_v10, %v305_v26 }
  0xa7   : > { %v297_v27 = vpop.f32.mrf.mxu0 }
  0xa8   : > { %v298_v29 = vadd.f32 %v495_v10, %v297_v27  ;;  %v316_v35 = vmax.f32 %v306_v31, 0.0 }
  0xaa   : > { %v313_v30 = vmax.f32 %v298_v29, 0.0 }
  0xac   : > { %v319_v32 = vpack.c.bf16 %v313_v30, %v312_v28 }
  0xad   : > { %v307_v33 = vpop.f32.mrf.mxu2 }
  0xae   : > { %v308_v34 = vadd.f32 %v495_v10, %v307_v33  ;;  %474 = vmatmul.msk.bf16.gmra.mxu1 %vm334_vm2, %v319_v32 }
  0xb0   : > { %v317_v36 = vmax.f32 %v308_v34, 0.0 }
  0xb2   : > { %v321_v37 = vpack.c.bf16 %v317_v36, %v316_v35 }
  0xb4   : > { %476 = vmatmul.msk.bf16.gmra.mxu3 %vm334_vm2, %v321_v37 }
 0x11b   : > { %v356_v39 = vpop.f32.mrf.mxu1 }
 0x11c   : > { %v357_v40 = vadd.f32 %v496_v38, %v356_v39 }
 0x11e   : > { %376 = vst.msk [vmem:[%s226_s11] sm:$0xff] %vm334_vm2, %v357_v40 }
 0x123   : > { %v358_v41 = vpop.f32.mrf.mxu1 }
 0x124   : > { %v359_v42 = vadd.f32 %v496_v38, %v358_v41 }
 0x126   : > { %377 = vst.msk [vmem:[%s226_s11 + $0x8] sm:$0xff] %vm334_vm2, %v359_v42 }
 0x127   : > { %v366_v43 = vpop.f32.mrf.mxu3 }
 0x128   : > { %v367_v44 = vadd.f32 %v496_v38, %v366_v43 }
 0x12a   : > { %380 = vst.msk [vmem:[%s226_s11 + $0x20] sm:$0xff] %vm334_vm2, %v367_v44 }
 0x12b   : > { %v361_v45 = vpop.f32.mrf.mxu1 }
 0x12c   : > { %v362_v46 = vadd.f32 %v496_v38, %v361_v45 }
 0x12e   : > { %378 = vst.msk [vmem:[%s226_s11 + $0x10] sm:$0xff] %vm334_vm2, %v362_v46 }
 0x12f   : > { %v368_v47 = vpop.f32.mrf.mxu3 }
 0x130   : > { %v369_v48 = vadd.f32 %v496_v38, %v368_v47 }
 0x132   : > { %381 = vst.msk [vmem:[%s226_s11 + $0x28] sm:$0xff] %vm334_vm2, %v369_v48 }
 0x133   : > { %v363_v49 = vpop.f32.mrf.mxu1 }
 0x134   : > { %v364_v50 = vadd.f32 %v496_v38, %v363_v49 }
 0x136   : > { %379 = vst.msk [vmem:[%s226_s11 + $0x18] sm:$0xff] %vm334_vm2, %v364_v50 }
 0x137   : > { %v371_v51 = vpop.f32.mrf.mxu3 }
 0x138   : > { %v372_v52 = vadd.f32 %v496_v38, %v371_v51 }
 0x13a   : > { %382 = vst.msk [vmem:[%s226_s11 + $0x30] sm:$0xff] %vm334_vm2, %v372_v52 }
 0x13f   : > { %v373_v53 = vpop.f32.mrf.mxu3 }
 0x140   : > { %v374_v54 = vadd.f32 %v496_v38, %v373_v53 }
 0x142   : > { %383 = vst.msk [vmem:[%s226_s11 + $0x38] sm:$0xff] %vm334_vm2, %v374_v54 }
 0x143 PF: > { %s15_s18 = sadd.s32 1, %s503_s18  }
 0x144   : > { %p12_p4 = scmp.ge.s32.totalorder %s15_s18, 4  }
 0x146   :  { %14 = sbr.rel (!%p12_p4) target bundleno = 1 (0x1), region = 70 }

// kernel: _lambda_.20
= control target key start
LH: loop header
LB: loop body
LE: loop exit
PB: predicated region body
PF: predicated region fallthrough
CT: control target
= control target key end

     0   :  { %s456_s12 = smov 0   ;;  %s489_s0 = inlined_call_operand.vmem [shape: bf16[128,32], index: 0, kind: input, shape index: {}]   ;;  %s490_s1 = inlined_call_operand.vmem [shape: bf16[32,128], index: 1, kind: input, shape index: {}]   ;;  %s491_s2 = inlined_call_operand.vmem [shape: f32[1,128], index: 2, kind: input, shape index: {}]   ;;  %s492_s3 = inlined_call_operand.vmem [shape: bf16[128,128], index: 3, kind: output, shape index: {}]  }
   0x1 LB: > { %s345_s13 = sadd.s32 4294967295, %s434_s12   ;;  %p349_p0 = scmp.ge.s32.totalorder %s434_s12, 1  ;;  %s434_s12 = sphi %s456_s12, %s13_s12  }
   0x2   : > { %p138_p1 = scmp.lt.s32.totalorder %s434_s12, 3 }
   0x4   : > { %p139_p2 = pnand %p349_p0, %p138_p1 }
   0x5   : > { %s350_s16 = sshll.u32 (!%p139_p2), %s345_s13, 3 }
   0x6   : > { %142 = sbr.rel (%p139_p2) target bundleno = 168 (0xa8), region = 32  ;;  %p163_p3 = scmp.lt.s32.totalorder (!%p139_p2), %s350_s16, 15 }
   0xb   : > { %v389_v0 = vld [vmem:[%s490_s1 + $0x8] sm:$0xff]  ;;  %v388_v1 = vld [vmem:[%s490_s1] sm:$0xff]  ;;  %s494_s16 = smov (!%p163_p3, %s350_s16), 15  ;;  %vm223_vm0 = vcmask 261120  }
   0xc   : > { %242 = vmatpush.bf16.msra.mxu0 %v389_v0  ;;  %413 = vmatpush.bf16.msra.mxu1 %v389_v0  ;;  %s351_s19 = sshll.u32 %s494_s16, 2  ;;  %v427_v8 = vld [vmem:[%s491_s2] ss:$0 sm:$0xff] }
   0xd   : > { %414 = vmatpush.bf16.msra.mxu2 %v389_v0  ;;  %415 = vmatpush.bf16.msra.mxu3 %v389_v0  ;;  %s166_s22 = scalar_lea.vmem %s489_s0, %s351_s19  ;;  %s172_s27 = scalar_lea.vmem %s492_s3, %s351_s19 }
   0xe   : > { %v384_v2 = vld [vmem:[%s166_s22] sm:$0xff]  ;;  %v385_v3 = vld [vmem:[%s166_s22 + $0x8] sm:$0xff]  ;;  %v386_v4 = vld [vmem:[%s166_s22 + $0x10] sm:$0xff] }
   0xf   : > { %v387_v5 = vld [vmem:[%s166_s22 + $0x18] sm:$0xff] }
  0x10   : > { %243 = vmatpush.bf16.msra.mxu0 %v388_v1  ;;  %416 = vmatpush.bf16.msra.mxu1 %v388_v1 }
  0x11   : > { %417 = vmatpush.bf16.msra.mxu2 %v388_v1  ;;  %418 = vmatpush.bf16.msra.mxu3 %v388_v1 }
  0x13   : > { %378 = vmatmul.msk.bf16.vlgmr.msra.gmra.mxu0 %vm223_vm0, %v384_v2  ;;  %379 = vmatmul.msk.bf16.vlgmr.msra.gmra.mxu1 %vm223_vm0, %v385_v3 }
  0x14   : > { %380 = vmatmul.msk.bf16.vlgmr.msra.gmra.mxu2 %vm223_vm0, %v386_v4  ;;  %381 = vmatmul.msk.bf16.vlgmr.msra.gmra.mxu3 %vm223_vm0, %v387_v5 }
  0x90   : > { %v245_v6 = vpop.f32.mrf.mxu0  ;;  %v250_v7 = vpop.f32.mrf.mxu1 }
  0x91   : > { %v246_v9 = vadd.f32 %v427_v8, %v245_v6  ;;  %v251_v10 = vadd.f32 %v427_v8, %v250_v7 }
  0x93   : > { %v265_v17 = vmax.f32 %v246_v9, 0.0  ;;  %v267_v18 = vmax.f32 %v251_v10, 0.0 }
  0x97   : > { %v255_v11 = vpop.f32.mrf.mxu2  ;;  %v260_v12 = vpop.f32.mrf.mxu3 }
  0x98   : > { %v247_v13 = vpop.f32.mrf.mxu0  ;;  %v252_v14 = vpop.f32.mrf.mxu1  ;;  %v256_v23 = vadd.f32 %v427_v8, %v255_v11  ;;  %v261_v24 = vadd.f32 %v427_v8, %v260_v12 }
  0x99   : > { %v248_v15 = vadd.f32 %v427_v8, %v247_v13  ;;  %v253_v16 = vadd.f32 %v427_v8, %v252_v14 }
  0x9a   : > { %v269_v29 = vmax.f32 %v256_v23, 0.0  ;;  %v271_v30 = vmax.f32 %v261_v24, 0.0 }
  0x9b   : > { %v266_v19 = vmax.f32 %v248_v15, 0.0  ;;  %v268_v20 = vmax.f32 %v253_v16, 0.0 }
  0x9d   : > { %v393_v21 = vpack.c.bf16 %v266_v19, %v265_v17  ;;  %v398_v22 = vpack.c.bf16 %v268_v20, %v267_v18 }
  0x9f   : > { %394 = vst [vmem:[%s172_s27] sm:$0xff] %v393_v21   ;;  %v257_v25 = vpop.f32.mrf.mxu2  ;;  %v262_v26 = vpop.f32.mrf.mxu3 }
  0xa0   : > { %410 = vst [vmem:[%s172_s27 + $0x8] sm:$0xff] %v398_v22   ;;  %v258_v27 = vadd.f32 %v427_v8, %v257_v25  ;;  %v263_v28 = vadd.f32 %v427_v8, %v262_v26 }
  0xa2   : > { %v270_v31 = vmax.f32 %v258_v27, 0.0  ;;  %v272_v32 = vmax.f32 %v263_v28, 0.0 }
  0xa4   : > { %v403_v33 = vpack.c.bf16 %v270_v31, %v269_v29  ;;  %v408_v34 = vpack.c.bf16 %v272_v32, %v271_v30 }
  0xa6   : > { %411 = vst [vmem:[%s172_s27 + $0x10] sm:$0xff] %v403_v33  }
  0xa7   : > { %412 = vst [vmem:[%s172_s27 + $0x18] sm:$0xff] %v408_v34  }
  0xa8 PF: > { %s13_s12 = sadd.s32 1, %s434_s12  }
  0xa9   : > { %p10_p4 = scmp.ge.s32.totalorder %s13_s12, 4  }
  0xab   :  { %12 = sbr.rel (!%p10_p4) target bundleno = 1 (0x1), region = 62 }

// kernel: _lambda_.26
= control target key start
LH: loop header
LB: loop body
LE: loop exit
PB: predicated region body
PF: predicated region fallthrough
CT: control target
= control target key end

     0   :  { %s418_s12 = smov 0   ;;  %s459_s0 = inlined_call_operand.vmem [shape: bf16[128,16], index: 0, kind: input, shape index: {}]   ;;  %s460_s1 = inlined_call_operand.vmem [shape: bf16[16,16], index: 1, kind: input, shape index: {}]   ;;  %s461_s2 = inlined_call_operand.vmem [shape: f32[1,16], index: 2, kind: input, shape index: {}]   ;;  %s462_s3 = inlined_call_operand.vmem [shape: bf16[128,16], index: 3, kind: output, shape index: {}]  }
   0x1 LB: > { %s338_s13 = sadd.s32 4294967295, %s396_s12   ;;  %p342_p0 = scmp.ge.s32.totalorder %s396_s12, 1  ;;  %s396_s12 = sphi %s418_s12, %s13_s12  }
   0x2   : > { %p138_p1 = scmp.lt.s32.totalorder %s396_s12, 3 }
   0x4   : > { %p139_p2 = pnand %p342_p0, %p138_p1 }
   0x5   : > { %s343_s16 = sshll.u32 (!%p139_p2), %s338_s13, 3 }
   0x6   : > { %142 = sbr.rel (%p139_p2) target bundleno = 164 (0xa4), region = 32  ;;  %p163_p3 = scmp.lt.s32.totalorder (!%p139_p2), %s343_s16, 15 }
   0xb   : > { %v377_v0 = vld [vmem:[%s460_s1] sm:$0xff]  ;;  %s464_s16 = smov (!%p163_p3, %s343_s16), 15  ;;  %vm215_vm0 = vcmask 130048   ;;  %vm273_vm1 = vcmask 125952  }
   0xc   : > { %235 = vmatpush.bf16.msra.mxu0 %v377_v0  ;;  %378 = vmatpush.bf16.msra.mxu1 %v377_v0  ;;  %s344_s17 = sshll.u32 %s464_s16, 2  ;;  %v389_v5 = vld [vmem:[%s461_s2] ss:$0 sm:$0xff] }
   0xd   : > { %379 = vmatpush.bf16.msra.mxu2 %v377_v0  ;;  %380 = vmatpush.bf16.msra.mxu3 %v377_v0  ;;  %s166_s20 = scalar_lea.vmem %s459_s0, %s344_s17  ;;  %s438_s25 = scalar_lea.vmem %s462_s3, %s344_s17 }
   0xe   : > { %v373_v1 = vld [vmem:[%s166_s20] sm:$0xff]  ;;  %v374_v2 = vld [vmem:[%s166_s20 + $0x8] sm:$0xff]  ;;  %v375_v3 = vld [vmem:[%s166_s20 + $0x10] sm:$0xff] }
   0xf   : > { %v376_v4 = vld [vmem:[%s166_s20 + $0x18] sm:$0xff]  ;;  %367 = vmatmul.msk.bf16.vlgmr.msra.gmra.mxu0 %vm215_vm0, %v373_v1  ;;  %368 = vmatmul.msk.bf16.vlgmr.msra.gmra.mxu1 %vm215_vm0, %v374_v2 }
  0x10   : > { %369 = vmatmul.msk.bf16.vlgmr.msra.gmra.mxu2 %vm215_vm0, %v375_v3  ;;  %370 = vmatmul.msk.bf16.vlgmr.msra.gmra.mxu3 %vm215_vm0, %v376_v4 }
  0x8c   : > { %v237_v6 = vpop.f32.mrf.mxu0  ;;  %v242_v7 = vpop.f32.mrf.mxu1 }
  0x8d   : > { %v238_v8 = vadd.f32 %v389_v5, %v237_v6  ;;  %v243_v9 = vadd.f32 %v389_v5, %v242_v7 }
  0x8f   : > { %v257_v10 = vmax.f32 %v238_v8, 0.0  ;;  %v259_v11 = vmax.f32 %v243_v9, 0.0 }
  0x91   : > { %v265_v12 = vpack.c.bf16 %v257_v10, %v257_v10  ;;  %v267_v13 = vpack.c.bf16 %v259_v11, %v259_v11 }
  0x93   : > { %274 = vst.msk [vmem:[%s438_s25] sm:$0xf] %vm273_vm1, %v265_v12  ;;  %v247_v14 = vpop.f32.mrf.mxu2  ;;  %v252_v15 = vpop.f32.mrf.mxu3 }
  0x94   : > { %276 = vst.msk [vmem:[%s438_s25 + $0x8] sm:$0xf] %vm273_vm1, %v267_v13  ;;  %v248_v16 = vadd.f32 %v389_v5, %v247_v14  ;;  %v253_v17 = vadd.f32 %v389_v5, %v252_v15  ;;  %v239_v18 = vpop.f32.mrf.mxu0  ;;  %v244_v19 = vpop.f32.mrf.mxu1 }
  0x95   : > { %v240_v20 = vadd.f32 %v389_v5, %v239_v18  ;;  %v245_v21 = vadd.f32 %v389_v5, %v244_v19 }
  0x96   : > { %v261_v22 = vmax.f32 %v248_v16, 0.0  ;;  %v263_v23 = vmax.f32 %v253_v17, 0.0 }
  0x97   : > { %v258_v24 = vmax.f32 %v240_v20, 0.0  ;;  %v260_v25 = vmax.f32 %v245_v21, 0.0 }
  0x98   : > { %v269_v26 = vpack.c.bf16 %v261_v22, %v261_v22  ;;  %v271_v27 = vpack.c.bf16 %v263_v23, %v263_v23 }
  0x99   : > { %v266_v28 = vpack.c.bf16 %v258_v24, %v258_v24  ;;  %v268_v29 = vpack.c.bf16 %v260_v25, %v260_v25 }
  0x9a   : > { %278 = vst.msk [vmem:[%s438_s25 + $0x10] sm:$0xf] %vm273_vm1, %v269_v26 }
  0x9b   : > { %280 = vst.msk [vmem:[%s438_s25 + $0x18] sm:$0xf] %vm273_vm1, %v271_v27  ;;  %v249_v30 = vpop.f32.mrf.mxu2  ;;  %v254_v31 = vpop.f32.mrf.mxu3 }
  0x9c   : > { %275 = vst.msk [vmem:[%s438_s25 + $0x4] sm:$0xf] %vm273_vm1, %v266_v28  ;;  %v250_v32 = vadd.f32 %v389_v5, %v249_v30  ;;  %v255_v33 = vadd.f32 %v389_v5, %v254_v31 }
  0x9d   : > { %277 = vst.msk [vmem:[%s438_s25 + $0xc] sm:$0xf] %vm273_vm1, %v268_v29 }
  0x9e   : > { %v262_v34 = vmax.f32 %v250_v32, 0.0  ;;  %v264_v35 = vmax.f32 %v255_v33, 0.0 }
  0xa0   : > { %v270_v36 = vpack.c.bf16 %v262_v34, %v262_v34  ;;  %v272_v37 = vpack.c.bf16 %v264_v35, %v264_v35 }
  0xa2   : > { %279 = vst.msk [vmem:[%s438_s25 + $0x14] sm:$0xf] %vm273_vm1, %v270_v36 }
  0xa3   : > { %281 = vst.msk [vmem:[%s438_s25 + $0x1c] sm:$0xf] %vm273_vm1, %v272_v37 }
  0xa4 PF: > { %s13_s12 = sadd.s32 1, %s396_s12  }
  0xa5   : > { %p10_p4 = scmp.ge.s32.totalorder %s13_s12, 4  }
  0xa7   :  { %12 = sbr.rel (!%p10_p4) target bundleno = 1 (0x1), region = 62 }

// kernel: _lambda_.23
= control target key start
LH: loop header
LB: loop body
LE: loop exit
PB: predicated region body
PF: predicated region fallthrough
CT: control target
= control target key end

     0   :  { %s1462_s29 = smov 0   ;;  %s1712_s0 = inlined_call_operand.vmem [shape: bf16[128,16], index: 0, kind: input, shape index: {}]   ;;  %s1713_s1 = inlined_call_operand.vmem [shape: bf16[128,16], index: 1, kind: input, shape index: {}]   ;;  %s1714_s2 = inlined_call_operand.vmem [shape: f32[128,16], index: 2, kind: input, shape index: {}]   ;;  %s1715_s3 = inlined_call_operand.vmem [shape: bf16[16,16], index: 3, kind: input, shape index: {}]   ;;  %s1716_s4 = inlined_call_operand.vmem [shape: f32[1,16], index: 4, kind: input, shape index: {}]   ;;  %s1717_s5 = inlined_call_operand.vmem [shape: bf16[16,16], index: 5, kind: input, shape index: {}]   ;;  %s1718_s6 = inlined_call_operand.vmem [shape: f32[1,16], index: 6, kind: input, shape index: {}]   ;;  %s1719_s7 = inlined_call_operand.vmem [shape: bf16[16,16], index: 7, kind: input, shape index: {}]   ;;  %s1720_s8 = inlined_call_operand.vmem [shape: bf16[16,16], index: 8, kind: input, shape index: {}]   ;;  %s1721_s9 = inlined_call_operand.vmem [shape: f32[1,16], index: 9, kind: input, shape index: {}]   ;;  %s1722_s10 = inlined_call_operand.vmem [shape: bf16[16,16], index: 10, kind: input, shape index: {}]   ;;  %s1723_s11 = inlined_call_operand.vmem [shape: f32[1,16], index: 11, kind: input, shape index: {}]   ;;  %s1724_s12 = inlined_call_operand.vmem [shape: bf16[16,16], index: 12, kind: input, shape index: {}]   ;;  %s1725_s13 = inlined_call_operand.vmem [shape: f32[1,16], index: 13, kind: input, shape index: {}]   ;;  %s1726_s14 = inlined_call_operand.vmem [shape: f32[128,16], index: 14, kind: output, shape index: {}]  }
   0x1 LB: > { %s1215_s30 = sadd.s32 4294967295, %s1385_s29   ;;  %p1219_p0 = scmp.ge.s32.totalorder %s1385_s29, 1  ;;  %s1385_s29 = sphi %s1462_s29, %s24_s29  }
   0x2   : > { %p435_p1 = scmp.lt.s32.totalorder %s1385_s29, 3 }
   0x4   : > { %p436_p2 = pnand %p1219_p0, %p435_p1 }
   0x5   : > { %s1220_s19 = sshll.u32 (!%p436_p2), %s1215_s30, 3 }
   0x6   : > { %439 = sbr.rel (%p436_p2) target bundleno = 664 (0x298), region = 76  ;;  %p492_p3 = scmp.lt.s32.totalorder (!%p436_p2), %s1220_s19, 15 }
   0xb   : > { %v1322_v0 = vld [vmem:[%s1715_s3] sm:$0xff]  ;;  %s1728_s19 = smov (!%p492_p3, %s1220_s19), 15  ;;  %vm556_vm0 = vcmask 130048  }
   0xc   : > { %v1327_v1 = vld [vmem:[%s1717_s5] sm:$0xff]  ;;  %576 = vmatpush.bf16.msra.mxu0 %v1322_v0  ;;  %1332 = vmatpush.bf16.msra.mxu2 %v1322_v0  ;;  %s1221_s24 = sshll.u32 %s1728_s19, 2  ;;  %s1225_s30 = sshll.u32 %s1728_s19, 3 }
   0xd   : > { %v1329_v2 = vld [vmem:[%s1720_s8] sm:$0xff]  ;;  %665 = vmatpush.bf16.msra.mxu1 %v1327_v1  ;;  %1333 = vmatpush.bf16.msra.mxu3 %v1327_v1  ;;  %s495_s27 = scalar_lea.vmem %s1712_s0, %s1221_s24  ;;  %s501_s15 = scalar_lea.vmem %s1713_s1, %s1221_s24 }
   0xe   : > { %v1328_v3 = vld [vmem:[%s1719_s7] sm:$0xff]  ;;  %v1325_v6 = vld [vmem:[%s501_s15 + $0x10] sm:$0xff]  ;;  %v1319_v8 = vld [vmem:[%s495_s27 + $0x8] sm:$0xff]  ;;  %s1675_s17 = scalar_lea.vmem %s1714_s2, %s1225_s30  ;;  %s1684_s19 = scalar_lea.vmem %s1726_s14, %s1225_s30 }
   0xf   : > { %v1318_v4 = vld [vmem:[%s495_s27] sm:$0xff]  ;;  %v1320_v7 = vld [vmem:[%s495_s27 + $0x10] sm:$0xff]  ;;  %v1324_v9 = vld [vmem:[%s501_s15 + $0x8] sm:$0xff] }
  0x10   : > { %736 = vmatpush.bf16.msrb.mxu2 %v1329_v2  ;;  %v1323_v5 = vld [vmem:[%s501_s15] sm:$0xff]  ;;  %1248 = vmatmul.msk.bf16.vlgmr.msra.gmra.mxu0 %vm556_vm0, %v1318_v4  ;;  %v1326_v10 = vld [vmem:[%s501_s15 + $0x18] sm:$0xff] }
  0x11   : > { %783 = vmatpush.bf16.msrb.mxu3 %v1328_v3  ;;  %1272 = vmatmul.msk.bf16.vlgmr.msra.gmra.mxu1 %vm556_vm0, %v1323_v5  ;;  %v1321_v11 = vld [vmem:[%s495_s27 + $0x18] sm:$0xff]  ;;  %v1342_v14 = vld [vmem:[%s1716_s4] ss:$0 sm:$0xff] }
  0x12   : > { %1274 = vmatmul.msk.bf16.vlgmr.msra.gmra.mxu3 %vm556_vm0, %v1325_v6  ;;  %1250 = vmatmul.msk.bf16.vlgmr.msra.gmra.mxu2 %vm556_vm0, %v1320_v7  ;;  %v1343_v15 = vld [vmem:[%s1718_s6] ss:$0 sm:$0xff] }
  0x13   : > { %v1596_v6 = vld [vmem:[%s1721_s9] ss:$0 sm:$0xff] }
  0x20   : > { %1249 = vmatmul.msk.bf16.gmra.mxu0 %vm556_vm0, %v1319_v8 }
  0x21   : > { %1273 = vmatmul.msk.bf16.gmra.mxu1 %vm556_vm0, %v1324_v9 }
  0x22   : > { %1275 = vmatmul.msk.bf16.gmra.mxu3 %vm556_vm0, %v1326_v10  ;;  %1251 = vmatmul.msk.bf16.gmra.mxu2 %vm556_vm0, %v1321_v11 }
  0x8d   : > { %v578_v12 = vpop.f32.mrf.mxu0 }
  0x8e   : > { %v667_v13 = vpop.f32.mrf.mxu1  ;;  %v1505_v16 = vadd.f32 %v1342_v14, %v578_v12 }
  0x8f   : > { %v1507_v17 = vadd.f32 %v1343_v15, %v667_v13 }
  0x90   : > { %v598_v22 = vmax.f32 %v1505_v16, 0.0 }
  0x91   : > { %v687_v23 = vmax.f32 %v1507_v17, 0.0 }
  0x95   : > { %v580_v18 = vpop.f32.mrf.mxu0  ;;  %v677_v30 = vpop.f32.mrf.mxu3 }
  0x96   : > { %v669_v19 = vpop.f32.mrf.mxu1  ;;  %v1509_v20 = vadd.f32 %v1342_v14, %v580_v18  ;;  %v588_v31 = vpop.f32.mrf.mxu2  ;;  %v1549_v46 = vadd.f32 %v1343_v15, %v677_v30 }
  0x97   : > { %v1511_v21 = vadd.f32 %v1343_v15, %v669_v19  ;;  %v1551_v47 = vadd.f32 %v1342_v14, %v588_v31 }
  0x98   : > { %v599_v24 = vmax.f32 %v1509_v20, 0.0  ;;  %v691_v52 = vmax.f32 %v1549_v46, 0.0 }
  0x99   : > { %v688_v25 = vmax.f32 %v1511_v21, 0.0  ;;  %v602_v53 = vmax.f32 %v1551_v47, 0.0 }
  0x9a   : > { %v695_v26 = vpack.c.bf16 %v599_v24, %v598_v22 }
  0x9b   : > { %v701_v27 = vpack.c.bf16 %v688_v25, %v687_v23 }
  0x9c   : > { %1288 = vmatmul.msk.bf16.vlgmr.msrb.gmra.mxu3 %vm556_vm0, %v695_v26 }
  0x9d   : > { %1280 = vmatmul.msk.bf16.vlgmr.msrb.gmra.mxu2 %vm556_vm0, %v701_v27  ;;  %v583_v28 = vpop.f32.mrf.mxu0  ;;  %v679_v44 = vpop.f32.mrf.mxu3 }
  0x9e   : > { %v672_v29 = vpop.f32.mrf.mxu1  ;;  %v1527_v32 = vadd.f32 %v1342_v14, %v583_v28  ;;  %v590_v45 = vpop.f32.mrf.mxu2  ;;  %v1553_v48 = vadd.f32 %v1343_v15, %v679_v44 }
  0x9f   : > { %v1529_v33 = vadd.f32 %v1343_v15, %v672_v29  ;;  %v1555_v49 = vadd.f32 %v1342_v14, %v590_v45 }
  0xa0   : > { %v600_v38 = vmax.f32 %v1527_v32, 0.0  ;;  %v692_v54 = vmax.f32 %v1553_v48, 0.0 }
  0xa1   : > { %v689_v39 = vmax.f32 %v1529_v33, 0.0  ;;  %v603_v55 = vmax.f32 %v1555_v49, 0.0 }
  0xa2   : > { %v703_v56 = vpack.c.bf16 %v692_v54, %v691_v52 }
  0xa3   : > { %v697_v57 = vpack.c.bf16 %v603_v55, %v602_v53 }
  0xa5   : > { %v585_v34 = vpop.f32.mrf.mxu0  ;;  %v682_v50 = vpop.f32.mrf.mxu3 }
  0xa6   : > { %v674_v35 = vpop.f32.mrf.mxu1  ;;  %v1531_v36 = vadd.f32 %v1342_v14, %v585_v34  ;;  %v593_v51 = vpop.f32.mrf.mxu2  ;;  %v1571_v60 = vadd.f32 %v1343_v15, %v682_v50 }
  0xa7   : > { %v1533_v37 = vadd.f32 %v1343_v15, %v674_v35  ;;  %v1573_v61 = vadd.f32 %v1342_v14, %v593_v51 }
  0xa8   : > { %v601_v40 = vmax.f32 %v1531_v36, 0.0  ;;  %v693_v0 = vmax.f32 %v1571_v60, 0.0  ;;  %v1345_v60 = vld [vmem:[%s1723_s11] ss:$0 sm:$0xff] }
  0xa9   : > { %v690_v41 = vmax.f32 %v1533_v37, 0.0  ;;  %v604_v1 = vmax.f32 %v1573_v61, 0.0 }
  0xaa   : > { %v696_v42 = vpack.c.bf16 %v601_v40, %v600_v38 }
  0xab   : > { %v702_v43 = vpack.c.bf16 %v690_v41, %v689_v39 }
  0xac   : > { %1289 = vmatmul.msk.bf16.gmra.mxu3 %vm556_vm0, %v696_v42 }
  0xad   : > { %1281 = vmatmul.msk.bf16.gmra.mxu2 %vm556_vm0, %v702_v43  ;;  %v684_v58 = vpop.f32.mrf.mxu3 }
  0xae   : > { %v595_v59 = vpop.f32.mrf.mxu2  ;;  %v1575_v62 = vadd.f32 %v1343_v15, %v684_v58  ;;  %v1330_v15 = vld [vmem:[%s1722_s10] sm:$0xff] }
  0xaf   : > { %v1577_v63 = vadd.f32 %v1342_v14, %v595_v59  ;;  %1024 = vmatpush.bf16.msrb.mxu0 %v1330_v15 }
  0xb0   : > { %v694_v2 = vmax.f32 %v1575_v62, 0.0 }
  0xb1   : > { %v605_v3 = vmax.f32 %v1577_v63, 0.0 }
  0xb2   : > { %v704_v4 = vpack.c.bf16 %v694_v2, %v693_v0 }
  0xb3   : > { %v698_v5 = vpack.c.bf16 %v605_v3, %v604_v1 }
  0xbc   : > { %1290 = vmatmul.msk.bf16.gmra.mxu3 %vm556_vm0, %v697_v57 }
  0xbd   : > { %1282 = vmatmul.msk.bf16.gmra.mxu2 %vm556_vm0, %v703_v56 }
  0xcc   : > { %1291 = vmatmul.msk.bf16.gmra.mxu3 %vm556_vm0, %v698_v5 }
  0xcd   : > { %1283 = vmatmul.msk.bf16.gmra.mxu2 %vm556_vm0, %v704_v4 }
 0x11f   : > { %v785_v8 = vpop.f32.mrf.mxu3 }
 0x120   : > { %v738_v7 = vpop.f32.mrf.mxu2 }
 0x121   : > { %v739_v9 = vadd.f32 %v1596_v6, %v738_v7 }
 0x123   : > { %v786_v10 = vadd.f32 %v785_v8, %v739_v9 }
 0x125   : > { %v1292_v11 = vmul.f32 -1.442695, %v786_v10 }
 0x127   : > { %1347 = vpow2.f32 %v1292_v11  ;;  %v787_v13 = vpop.f32.mrf.mxu3 }
 0x128   : > { %v740_v12 = vpop.f32.mrf.mxu2 }
 0x129   : > { %v741_v14 = vadd.f32 %v1596_v6, %v740_v12 }
 0x12b   : > { %v788_v18 = vadd.f32 %v787_v13, %v741_v14 }
 0x12d   : > { %v1348_v19 = vpop.eup %1347  ;;  %v1293_v26 = vmul.f32 -1.442695, %v788_v18 }
 0x12e   : > { %v829_v27 = vadd.f32 1.0, %v1348_v19 }
 0x12f   : > { %1349 = vpow2.f32 %v1293_v26  ;;  %v790_v29 = vpop.f32.mrf.mxu3 }
 0x130   : > { %1351 = vrcp.f32 %v829_v27  ;;  %v743_v28 = vpop.f32.mrf.mxu2  ;;  %v848_v59 = vand.u32 2147483648, %v829_v27  ;;  %vm842_vm2 = vweird.f32 %v829_v27  ;;  %v846_v8 = vand.u32 2147483647, %v829_v27 }
 0x131   : > { %v744_v30 = vadd.f32 %v1596_v6, %v743_v28 }
 0x132   : > { %v849_v13 = vor.u32 1.1754944e-38, %v848_v59  ;;  %vm847_vm4 = vcmp.eq.f32.partialorder %v846_v8, 8.507059e+37 }
 0x133   : > { %v791_v31 = vadd.f32 %v790_v29, %v744_v30 }
 0x135   : > { %v1350_v34 = vpop.eup %1349  ;;  %v1294_v35 = vmul.f32 -1.442695, %v791_v31 }
 0x136   : > { %v1352_v42 = vpop.eup %1351  ;;  %v830_v43 = vadd.f32 1.0, %v1350_v34 }
 0x137   : > { %v838_v44 = vmul.f32 %v1352_v42, %v829_v27  ;;  %1353 = vpow2.f32 %v1294_v35  ;;  %v792_v50 = vpop.f32.mrf.mxu3  ;;  %vm843_vm1 = vweird.f32 %v1352_v42 }
 0x138   : > { %1355 = vrcp.f32 %v830_v43  ;;  %v745_v45 = vpop.f32.mrf.mxu2  ;;  %vm844_vm3 = vmor %vm842_vm2, %vm843_vm1  ;;  %v863_v26 = vand.u32 2147483648, %v830_v43  ;;  %v861_v30 = vand.u32 2147483647, %v830_v43  ;;  %vm857_vm6 = vweird.f32 %v830_v43 }
 0x139   : > { %v839_v51 = vsub.f32 1.0, %v838_v44  ;;  %v746_v56 = vadd.f32 %v1596_v6, %v745_v45 }
 0x13a   : > { %v864_v45 = vor.u32 1.1754944e-38, %v863_v26  ;;  %vm862_vm8 = vcmp.eq.f32.partialorder %v861_v30, 8.507059e+37 }
 0x13b   : > { %v840_v57 = vmul.f32 %v1352_v42, %v839_v51  ;;  %v793_v58 = vadd.f32 %v792_v50, %v746_v56 }
 0x13d   : > { %v1354_v4 = vpop.eup %1353  ;;  %v1295_v5 = vmul.f32 -1.442695, %v793_v58  ;;  %v841_v7 = vadd.f32 %v1352_v42, %v840_v57 }
 0x13e   : > { %v1356_v9 = vpop.eup %1355  ;;  %v1605_v10 = vadd.f32 1.0, %v1354_v4 }
 0x13f   : > { %v853_v11 = vmul.f32 %v1356_v9, %v830_v43  ;;  %1357 = vpow2.f32 %v1295_v5  ;;  %v845_v12 = vsel %vm844_vm3, %v1352_v42, %v841_v7  ;;  %v795_v15 = vpop.f32.mrf.mxu3  ;;  %vm858_vm5 = vweird.f32 %v1356_v9 }
 0x140   : > { %1359 = vrcp.f32 %v1605_v10  ;;  %v748_v14 = vpop.f32.mrf.mxu2  ;;  %v850_v28 = vsel %vm847_vm4, %v849_v13, %v845_v12  ;;  %vm859_vm7 = vmor %vm857_vm6, %vm858_vm5  ;;  %vm872_vm10 = vweird.f32 %v1605_v10 }
 0x141   : > { %v854_v18 = vsub.f32 1.0, %v853_v11  ;;  %v749_v19 = vadd.f32 %v1596_v6, %v748_v14  ;;  %v965_v42 = vsub.f32 1.0, %v850_v28  ;;  %v957_v8 = vmul.f32 %v850_v28, %v598_v22 }
 0x142   : > { %v876_v14 = vand.u32 2147483647, %v1605_v10 }
 0x143   : > { %v855_v29 = vmul.f32 %v1356_v9, %v854_v18  ;;  %v796_v27 = vadd.f32 %v795_v15, %v749_v19  ;;  %v973_v7 = vmul.f32 %v965_v42, %v687_v23  ;;  %v878_v15 = vand.u32 2147483648, %v1605_v10 }
 0x144   : > { %vm877_vm12 = vcmp.eq.f32.partialorder %v876_v14, 8.507059e+37 }
 0x145   : > { %v1358_v31 = vpop.eup %1357  ;;  %v1296_v34 = vmul.f32 -1.442695, %v796_v27  ;;  %v856_v35 = vadd.f32 %v1356_v9, %v855_v29  ;;  %v981_v18 = vadd.f32 %v973_v7, %v957_v8  ;;  %v879_v29 = vor.u32 1.1754944e-38, %v878_v15 }
 0x146   : > { %v1360_v44 = vpop.eup %1359  ;;  %v832_v50 = vadd.f32 1.0, %v1358_v31 }
 0x147   : > { %v868_v51 = vmul.f32 %v1360_v44, %v1605_v10  ;;  %1361 = vpow2.f32 %v1296_v34  ;;  %v860_v56 = vsel %vm859_vm7, %v1356_v9, %v856_v35  ;;  %v797_v58 = vpop.f32.mrf.mxu3  ;;  %vm873_vm9 = vweird.f32 %v1360_v44 }
 0x148   : > { %1363 = vrcp.f32 %v832_v50  ;;  %v750_v57 = vpop.f32.mrf.mxu2  ;;  %v865_v59 = vsel %vm862_vm8, %v864_v45, %v860_v56  ;;  %vm874_vm11 = vmor %vm872_vm10, %vm873_vm9  ;;  %v893_v31 = vand.u32 2147483648, %v832_v50  ;;  %v891_v42 = vand.u32 2147483647, %v832_v50 }
 0x149   : > { %v869_v4 = vsub.f32 1.0, %v868_v51  ;;  %v751_v5 = vadd.f32 %v1596_v6, %v750_v57  ;;  %v966_v43 = vsub.f32 1.0, %v865_v59  ;;  %v958_v9 = vmul.f32 %v865_v59, %v599_v24 }
 0x14a   : > { %vm887_vm14 = vweird.f32 %v832_v50  ;;  %v894_v59 = vor.u32 1.1754944e-38, %v893_v31  ;;  %vm892_vm1 = vcmp.eq.f32.partialorder %v891_v42, 8.507059e+37 }
 0x14b   : > { %v798_v11 = vadd.f32 %v797_v58, %v751_v5  ;;  %v974_v12 = vmul.f32 %v966_v43, %v688_v25  ;;  %v870_v13 = vmul.f32 %v1360_v44, %v869_v4 }
 0x14d   : > { %v1362_v17 = vpop.eup %1361  ;;  %v1297_v23 = vmul.f32 -1.442695, %v798_v11  ;;  %v982_v16 = vadd.f32 %v974_v12, %v958_v9  ;;  %v871_v22 = vadd.f32 %v1360_v44, %v870_v13 }
 0x14e   : > { %v1364_v19 = vpop.eup %1363  ;;  %v1622_v26 = vadd.f32 1.0, %v1362_v17 }
 0x14f   : > { %v883_v20 = vmul.f32 %v1364_v19, %v832_v50  ;;  %1365 = vpow2.f32 %v1297_v23  ;;  %v989_v21 = vpack.c.bf16 %v982_v16, %v981_v18  ;;  %v875_v24 = vsel %vm874_vm11, %v1360_v44, %v871_v22  ;;  %v800_v28 = vpop.f32.mrf.mxu3 }
 0x150   : > { %1367 = vrcp.f32 %v1622_v26  ;;  %v753_v25 = vpop.f32.mrf.mxu2  ;;  %v880_v30 = vsel %vm877_vm12, %v879_v29, %v875_v24  ;;  %vm888_vm13 = vweird.f32 %v1364_v19  ;;  %vm902_vm3 = vweird.f32 %v1622_v26 }
 0x151   : > { %v884_v10 = vsub.f32 1.0, %v883_v20  ;;  %v754_v27 = vadd.f32 %v1596_v6, %v753_v25  ;;  %1304 = vmatmul.msk.bf16.vlgmr.msrb.gmra.mxu0 %vm556_vm0, %v989_v21  ;;  %v967_v56 = vsub.f32 1.0, %v880_v30  ;;  %vm889_vm15 = vmor %vm887_vm14, %vm888_vm13  ;;  %v959_v13 = vmul.f32 %v880_v30, %v600_v38 }
 0x152   : > { %v908_v33 = vand.u32 2147483648, %v1622_v26 }
 0x153   : > { %v801_v34 = vadd.f32 %v800_v28, %v754_v27  ;;  %v885_v35 = vmul.f32 %v1364_v19, %v884_v10  ;;  %v975_v50 = vmul.f32 %v967_v56, %v689_v39 }
 0x155   : > { %v1366_v45 = vpop.eup %1365  ;;  %v1298_v51 = vmul.f32 -1.442695, %v801_v34  ;;  %v886_v44 = vadd.f32 %v1364_v19, %v885_v35  ;;  %v983_v16 = vadd.f32 %v975_v50, %v959_v13 }
 0x156   : > { %v1368_v57 = vpop.eup %1367  ;;  %v834_v58 = vadd.f32 1.0, %v1366_v45 }
 0x157   : > { %v898_v4 = vmul.f32 %v1368_v57, %v1622_v26  ;;  %1369 = vpow2.f32 %v1298_v51  ;;  %v890_v5 = vsel %vm889_vm15, %v1364_v19, %v886_v44  ;;  %v802_v12 = vpop.f32.mrf.mxu3  ;;  %vm903_vm2 = vweird.f32 %v1368_v57 }
 0x158   : > { %1371 = vrcp.f32 %v834_v58  ;;  %v755_v43 = vpop.f32.mrf.mxu2  ;;  %v895_v7 = vsel %vm892_vm1, %v894_v59, %v890_v5  ;;  %vm904_vm4 = vmor %vm902_vm3, %vm903_vm2  ;;  %v923_v24 = vand.u32 2147483648, %v834_v58  ;;  %v921_v28 = vand.u32 2147483647, %v834_v58 }
 0x159   : > { %v899_v8 = vsub.f32 1.0, %v898_v4  ;;  %v756_v11 = vadd.f32 %v1596_v6, %v755_v43  ;;  %v968_v9 = vsub.f32 1.0, %v895_v7  ;;  %v960_v15 = vmul.f32 %v895_v7, %v601_v40 }
 0x15a   : > { %v906_v6 = vand.u32 2147483647, %v1622_v26  ;;  %v1331_v26 = vld [vmem:[%s1724_s12] sm:$0xff]  ;;  %vm917_vm7 = vweird.f32 %v834_v58  ;;  %v924_v34 = vor.u32 1.1754944e-38, %v923_v24  ;;  %vm922_vm9 = vcmp.eq.f32.partialorder %v921_v28, 8.507059e+37 }
 0x15b   : > { %v803_v14 = vadd.f32 %v802_v12, %v756_v11  ;;  %v976_v17 = vmul.f32 %v968_v9, %v690_v41  ;;  %v900_v23 = vmul.f32 %v1368_v57, %v899_v8  ;;  %v909_v41 = vor.u32 1.1754944e-38, %v908_v33  ;;  %1089 = vmatpush.bf16.msrb.mxu1 %v1331_v26 }
 0x15c   : > { %vm907_vm5 = vcmp.eq.f32.partialorder %v906_v6, 8.507059e+37 }
 0x15d   : > { %v1370_v39 = vpop.eup %1369  ;;  %v1299_v18 = vmul.f32 -1.442695, %v803_v14  ;;  %v984_v32 = vadd.f32 %v976_v17, %v960_v15  ;;  %v901_v38 = vadd.f32 %v1368_v57, %v900_v23 }
 0x15e   : > { %v1372_v22 = vpop.eup %1371  ;;  %v835_v19 = vadd.f32 1.0, %v1370_v39 }
 0x15f   : > { %v913_v36 = vmul.f32 %v1372_v22, %v834_v58  ;;  %1373 = vpow2.f32 %v1299_v18  ;;  %v990_v37 = vpack.c.bf16 %v984_v32, %v983_v16  ;;  %v905_v40 = vsel %vm904_vm4, %v1368_v57, %v901_v38 }
 0x160   : > { %1375 = vrcp.f32 %v835_v19  ;;  %v910_v21 = vsel %vm907_vm5, %v909_v41, %v905_v40  ;;  %vm918_vm6 = vweird.f32 %v1372_v22  ;;  %vm932_vm11 = vweird.f32 %v835_v19 }
 0x161   : > { %v914_v20 = vsub.f32 1.0, %v913_v36  ;;  %1305 = vmatmul.msk.bf16.gmra.mxu0 %vm556_vm0, %v990_v37  ;;  %v969_v27 = vsub.f32 1.0, %v910_v21  ;;  %vm919_vm8 = vmor %vm917_vm7, %vm918_vm6  ;;  %v961_v57 = vmul.f32 %v910_v21, %v602_v53  ;;  %v938_v5 = vand.u32 2147483648, %v835_v19 }
 0x162   : > { %v936_v11 = vand.u32 2147483647, %v835_v19 }
 0x163   : > { %v915_v25 = vmul.f32 %v1372_v22, %v914_v20  ;;  %v977_v56 = vmul.f32 %v969_v27, %v691_v52  ;;  %v939_v53 = vor.u32 1.1754944e-38, %v938_v5 }
 0x164   : > { %vm937_vm13 = vcmp.eq.f32.partialorder %v936_v11, 8.507059e+37 }
 0x165   : > { %v1374_v29 = vpop.eup %1373  ;;  %v916_v10 = vadd.f32 %v1372_v22, %v915_v25  ;;  %v985_v43 = vadd.f32 %v977_v56, %v961_v57  ;;  %v1111_v56 = vld [vmem:[%s1675_s17] sm:$0xff] }
 0x166   : > { %v1376_v30 = vpop.eup %1375  ;;  %v836_v31 = vadd.f32 1.0, %v1374_v29 }
 0x167   : > { %v928_v35 = vmul.f32 %v1376_v30, %v835_v19  ;;  %v920_v42 = vsel %vm919_vm8, %v1372_v22, %v916_v10  ;;  %vm933_vm10 = vweird.f32 %v1376_v30 }
 0x168   : > { %1377 = vrcp.f32 %v836_v31  ;;  %v925_v45 = vsel %vm922_vm9, %v924_v34, %v920_v42  ;;  %vm934_vm12 = vmor %vm932_vm11, %vm933_vm10  ;;  %v953_v49 = vand.u32 2147483648, %v836_v31  ;;  %vm947_vm15 = vweird.f32 %v836_v31 }
 0x169   : > { %v929_v51 = vsub.f32 1.0, %v928_v35  ;;  %v970_v44 = vsub.f32 1.0, %v925_v45  ;;  %v962_v58 = vmul.f32 %v925_v45, %v603_v55  ;;  %v951_v55 = vand.u32 2147483647, %v836_v31 }
 0x16a   : > { %v954_v14 = vor.u32 1.1754944e-38, %v953_v49 }
 0x16b   : > { %v978_v59 = vmul.f32 %v970_v44, %v692_v54  ;;  %v930_v4 = vmul.f32 %v1376_v30, %v929_v51  ;;  %vm952_vm2 = vcmp.eq.f32.partialorder %v951_v55, 8.507059e+37  ;;  %v1346_v51 = vld [vmem:[%s1725_s13] ss:$0 sm:$0xff] }
 0x16d   : > { %v986_v7 = vadd.f32 %v978_v59, %v962_v58  ;;  %v931_v8 = vadd.f32 %v1376_v30, %v930_v4  ;;  %v1112_v4 = vld [vmem:[%s1675_s17 + $0x8] sm:$0xff] }
 0x16e   : > { %v1378_v9 = vpop.eup %1377 }
 0x16f   : > { %v943_v46 = vmul.f32 %v1378_v9, %v836_v31  ;;  %v991_v52 = vpack.c.bf16 %v986_v7, %v985_v43  ;;  %v935_v47 = vsel %vm934_vm12, %v1376_v30, %v931_v8  ;;  %vm948_vm14 = vweird.f32 %v1378_v9  ;;  %v1113_v8 = vld [vmem:[%s1675_s17 + $0x10] sm:$0xff] }
 0x170   : > { %v940_v48 = vsel %vm937_vm13, %v939_v53, %v935_v47  ;;  %vm949_vm1 = vmor %vm947_vm15, %vm948_vm14 }
 0x171   : > { %v944_v50 = vsub.f32 1.0, %v943_v46  ;;  %1306 = vmatmul.msk.bf16.gmra.mxu0 %vm556_vm0, %v991_v52  ;;  %v971_v13 = vsub.f32 1.0, %v940_v48  ;;  %v963_v33 = vmul.f32 %v940_v48, %v604_v1  ;;  %v1114_v52 = vld [vmem:[%s1675_s17 + $0x18] sm:$0xff]  ;;  %v1115_v48 = vld [vmem:[%s1675_s17 + $0x20] sm:$0xff] }
 0x173   : > { %v945_v54 = vmul.f32 %v1378_v9, %v944_v50  ;;  %v979_v6 = vmul.f32 %v971_v13, %v693_v0 }
 0x175   : > { %v946_v12 = vadd.f32 %v1378_v9, %v945_v54  ;;  %v987_v16 = vadd.f32 %v979_v6, %v963_v33 }
 0x177   : > { %v950_v15 = vsel %vm949_vm1, %v1378_v9, %v946_v12  ;;  %v1116_v12 = vld [vmem:[%s1675_s17 + $0x28] sm:$0xff] }
 0x178   : > { %v955_v17 = vsel %vm952_vm2, %v954_v14, %v950_v15 }
 0x179   : > { %v972_v23 = vsub.f32 1.0, %v955_v17  ;;  %v964_v39 = vmul.f32 %v955_v17, %v605_v3  ;;  %v1117_v17 = vld [vmem:[%s1675_s17 + $0x30] sm:$0xff] }
 0x17b   : > { %v980_v18 = vmul.f32 %v972_v23, %v694_v2 }
 0x17d   : > { %v988_v32 = vadd.f32 %v980_v18, %v964_v39  ;;  %v1118_v39 = vld [vmem:[%s1675_s17 + $0x38] sm:$0xff] }
 0x17f   : > { %v992_v38 = vpack.c.bf16 %v988_v32, %v987_v16 }
 0x181   : > { %1307 = vmatmul.msk.bf16.gmra.mxu0 %vm556_vm0, %v992_v38 }
 0x1ce   : > { %v1026_v22 = vpop.f32.mrf.mxu0 }
 0x1cf   : > { %v1027_v0 = vadd.f32 %v1345_v60, %v1026_v22 }
 0x1d1   : > { %v1046_v1 = vmax.f32 %v1027_v0, 0.0 }
 0x1d6   : > { %v1028_v19 = vpop.f32.mrf.mxu0 }
 0x1d7   : > { %v1029_v61 = vadd.f32 %v1345_v60, %v1028_v19 }
 0x1d9   : > { %v1047_v36 = vmax.f32 %v1029_v61, 0.0 }
 0x1db   : > { %v1054_v63 = vpack.c.bf16 %v1047_v36, %v1046_v1 }
 0x1dd   : > { %1312 = vmatmul.msk.bf16.vlgmr.msrb.gmra.mxu1 %vm556_vm0, %v1054_v63 }
 0x1de   : > { %v1031_v62 = vpop.f32.mrf.mxu0 }
 0x1df   : > { %v1032_v2 = vadd.f32 %v1345_v60, %v1031_v62 }
 0x1e1   : > { %v1048_v40 = vmax.f32 %v1032_v2, 0.0 }
 0x1e6   : > { %v1033_v3 = vpop.f32.mrf.mxu0 }
 0x1e7   : > { %v1034_v37 = vadd.f32 %v1345_v60, %v1033_v3 }
 0x1e9   : > { %v1049_v41 = vmax.f32 %v1034_v37, 0.0 }
 0x1eb   : > { %v1055_v20 = vpack.c.bf16 %v1049_v41, %v1048_v40 }
 0x1ed   : > { %1313 = vmatmul.msk.bf16.gmra.mxu1 %vm556_vm0, %v1055_v20 }
 0x1ee   : > { %v1036_v26 = vpop.f32.mrf.mxu0 }
 0x1ef   : > { %v1037_v21 = vadd.f32 %v1345_v60, %v1036_v26 }
 0x1f1   : > { %v1050_v28 = vmax.f32 %v1037_v21, 0.0 }
 0x1f6   : > { %v1038_v24 = vpop.f32.mrf.mxu0 }
 0x1f7   : > { %v1039_v25 = vadd.f32 %v1345_v60, %v1038_v24 }
 0x1f9   : > { %v1051_v29 = vmax.f32 %v1039_v25, 0.0 }
 0x1fb   : > { %v1056_v10 = vpack.c.bf16 %v1051_v29, %v1050_v28 }
 0x1fd   : > { %1314 = vmatmul.msk.bf16.gmra.mxu1 %vm556_vm0, %v1056_v10 }
 0x1fe   : > { %v1041_v27 = vpop.f32.mrf.mxu0 }
 0x1ff   : > { %v1042_v30 = vadd.f32 %v1345_v60, %v1041_v27 }
 0x201   : > { %v1052_v35 = vmax.f32 %v1042_v30, 0.0 }
 0x206   : > { %v1043_v31 = vpop.f32.mrf.mxu0 }
 0x207   : > { %v1044_v34 = vadd.f32 %v1345_v60, %v1043_v31 }
 0x209   : > { %v1053_v42 = vmax.f32 %v1044_v34, 0.0 }
 0x20b   : > { %v1057_v45 = vpack.c.bf16 %v1053_v42, %v1052_v35 }
 0x20d   : > { %1315 = vmatmul.msk.bf16.gmra.mxu1 %vm556_vm0, %v1057_v45 }
 0x25a   : > { %v1091_v44 = vpop.f32.mrf.mxu1 }
 0x25b   : > { %v1092_v57 = vadd.f32 %v1346_v51, %v1091_v44 }
 0x25d   : > { %v1119_v58 = vadd.f32 %v1111_v56, %v1092_v57 }
 0x25f   : > { %1127 = vst.msk [vmem:[%s1684_s19] sm:$0xff] %vm556_vm0, %v1119_v58 }
 0x262   : > { %v1093_v59 = vpop.f32.mrf.mxu1 }
 0x263   : > { %v1094_v5 = vadd.f32 %v1346_v51, %v1093_v59 }
 0x265   : > { %v1120_v43 = vadd.f32 %v1112_v4, %v1094_v5 }
 0x267   : > { %1128 = vst.msk [vmem:[%s1684_s19 + $0x8] sm:$0xff] %vm556_vm0, %v1120_v43 }
 0x26a   : > { %v1096_v7 = vpop.f32.mrf.mxu1 }
 0x26b   : > { %v1097_v11 = vadd.f32 %v1346_v51, %v1096_v7 }
 0x26d   : > { %v1121_v9 = vadd.f32 %v1113_v8, %v1097_v11 }
 0x26f   : > { %1129 = vst.msk [vmem:[%s1684_s19 + $0x10] sm:$0xff] %vm556_vm0, %v1121_v9 }
 0x272   : > { %v1098_v46 = vpop.f32.mrf.mxu1 }
 0x273   : > { %v1099_v47 = vadd.f32 %v1346_v51, %v1098_v46 }
 0x275   : > { %v1122_v53 = vadd.f32 %v1114_v52, %v1099_v47 }
 0x277   : > { %1130 = vst.msk [vmem:[%s1684_s19 + $0x18] sm:$0xff] %vm556_vm0, %v1122_v53 }
 0x27a   : > { %v1101_v50 = vpop.f32.mrf.mxu1 }
 0x27b   : > { %v1102_v49 = vadd.f32 %v1346_v51, %v1101_v50 }
 0x27d   : > { %v1123_v54 = vadd.f32 %v1115_v48, %v1102_v49 }
 0x27f   : > { %1131 = vst.msk [vmem:[%s1684_s19 + $0x20] sm:$0xff] %vm556_vm0, %v1123_v54 }
 0x282   : > { %v1103_v55 = vpop.f32.mrf.mxu1 }
 0x283   : > { %v1104_v13 = vadd.f32 %v1346_v51, %v1103_v55 }
 0x285   : > { %v1124_v14 = vadd.f32 %v1116_v12, %v1104_v13 }
 0x287   : > { %1132 = vst.msk [vmem:[%s1684_s19 + $0x28] sm:$0xff] %vm556_vm0, %v1124_v14 }
 0x28a   : > { %v1106_v15 = vpop.f32.mrf.mxu1 }
 0x28b   : > { %v1107_v23 = vadd.f32 %v1346_v51, %v1106_v15 }
 0x28d   : > { %v1125_v6 = vadd.f32 %v1117_v17, %v1107_v23 }
 0x28f   : > { %1133 = vst.msk [vmem:[%s1684_s19 + $0x30] sm:$0xff] %vm556_vm0, %v1125_v6 }
 0x292   : > { %v1108_v33 = vpop.f32.mrf.mxu1 }
 0x293   : > { %v1109_v18 = vadd.f32 %v1346_v51, %v1108_v33 }
 0x295   : > { %v1126_v16 = vadd.f32 %v1118_v39, %v1109_v18 }
 0x297   : > { %1134 = vst.msk [vmem:[%s1684_s19 + $0x38] sm:$0xff] %vm556_vm0, %v1126_v16 }
 0x298 PF: > { %s24_s29 = sadd.s32 1, %s1385_s29  }
 0x299   : > { %p21_p4 = scmp.ge.s32.totalorder %s24_s29, 4  }
 0x29b   :  { %23 = sbr.rel (!%p21_p4) target bundleno = 1 (0x1), region = 112 }

// kernel: _lambda_.21
= control target key start
LH: loop header
LB: loop body
LE: loop exit
PB: predicated region body
PF: predicated region fallthrough
CT: control target
= control target key end

     0   :  { %s2278_s12 = smov 0   ;;  %s2795_s0 = inlined_call_operand.vmem [shape: bf16[32,16,4], index: 0, kind: input, shape index: {}]   ;;  %s2796_s1 = inlined_call_operand.vmem [shape: bf16[32,16,4], index: 1, kind: input, shape index: {}]   ;;  %s2797_s2 = inlined_call_operand.vmem [shape: bf16[32,16,4], index: 2, kind: input, shape index: {}]   ;;  %s2798_s3 = inlined_call_operand.vmem [shape: bf16[32,16,4], index: 3, kind: output, shape index: {}]  }
   0x1 LB: > { %s1819_s13 = sadd.s32 4294967295, %s2256_s12   ;;  %p1823_p0 = scmp.ge.s32.totalorder %s2256_s12, 1  ;;  %s2256_s12 = sphi %s2278_s12, %s13_s12  }
   0x2   : > { %p163_p1 = scmp.lt.s32.totalorder %s2256_s12, 3 }
   0x4   : > { %p164_p2 = pnand %p1823_p0, %p163_p1 }
   0x5   : > { %s1824_s14 = sshll.u32 (!%p164_p2), %s1819_s13, 4 }
   0x6   : > { %167 = sbr.rel (%p164_p2) target bundleno = 639 (0x27f), region = 32  ;;  %p202_p3 = scmp.lt.s32.totalorder (!%p164_p2), %s1824_s14, 31 }
   0xb   : > { %s2800_s14 = smov (!%p202_p3, %s1824_s14), 31  ;;  %vm336_vm0 = vcmask 31744   ;;  %vm839_vm1 = vcmask 130048   ;;  %vm1704_vm2 = vcmask 27648  }
   0xc   : > { %s2286_s15 = sshll.u32 %s2800_s14, 3 }
   0xd   : > { %s2292_s18 = scalar_lea.vmem %s2796_s1, %s2286_s15  ;;  %s2305_s21 = scalar_lea.vmem %s2795_s0, %s2286_s15 }
   0xe   : > { %v2082_v0 = vld [vmem:[%s2292_s18] sm:$0xff]  ;;  %v2083_v1 = vld [vmem:[%s2292_s18 + $0x8] sm:$0xff]  ;;  %v2084_v2 = vld [vmem:[%s2292_s18 + $0x10] sm:$0xff]  ;;  %s2656_s24 = scalar_lea.vmem %s2797_s2, %s2286_s15  ;;  %s2726_s27 = scalar_lea.vmem %s2798_s3, %s2286_s15 }
   0xf   : > { %v2085_v3 = vld [vmem:[%s2292_s18 + $0x18] sm:$0xff]  ;;  %v341_v4 = vsel %vm336_vm0, %v2082_v0, 0  ;;  %v371_v5 = vsel %vm336_vm0, %v2083_v1, 0  ;;  %v401_v6 = vsel %vm336_vm0, %v2084_v2, 0  ;;  %v2086_v7 = vld [vmem:[%s2292_s18 + $0x20] sm:$0xff]  ;;  %v2087_v9 = vld [vmem:[%s2292_s18 + $0x28] sm:$0xff] }
  0x10   : > { %350 = vmatpush.bf16.xpose.msra.mxu0 %v341_v4  ;;  %380 = vmatpush.bf16.xpose.msra.mxu1 %v371_v5  ;;  %v431_v8 = vsel %vm336_vm0, %v2085_v3, 0  ;;  %v2088_v10 = vld [vmem:[%s2292_s18 + $0x30] sm:$0xff]  ;;  %v2089_v11 = vld [vmem:[%s2292_s18 + $0x38] sm:$0xff]  ;;  %v461_v12 = vsel %vm336_vm0, %v2086_v7, 0  ;;  %v2066_v13 = vld [vmem:[%s2305_s21] sm:$0xff]  ;;  %v491_v14 = vsel %vm336_vm0, %v2087_v9, 0 }
  0x11   : > { %410 = vmatpush.bf16.xpose.msra.mxu2 %v401_v6  ;;  %440 = vmatpush.bf16.xpose.msra.mxu3 %v431_v8  ;;  %v521_v15 = vsel %vm336_vm0, %v2088_v10, 0  ;;  %v551_v16 = vsel %vm336_vm0, %v2089_v11, 0  ;;  %v2092_v17 = vld [vmem:[%s2292_s18 + $0x50] sm:$0xff]  ;;  %v2093_v18 = vld [vmem:[%s2292_s18 + $0x58] sm:$0xff]  ;;  %v2067_v19 = vld [vmem:[%s2305_s21 + $0x8] sm:$0xff] }
  0x12   : > { %v2090_v20 = vld [vmem:[%s2292_s18 + $0x40] sm:$0xff]  ;;  %v2091_v21 = vld [vmem:[%s2292_s18 + $0x48] sm:$0xff]  ;;  %v2068_v22 = vld [vmem:[%s2305_s21 + $0x10] sm:$0xff]  ;;  %v641_v24 = vsel %vm336_vm0, %v2092_v17, 0  ;;  %v671_v25 = vsel %vm336_vm0, %v2093_v18, 0 }
  0x13   : > { %v2069_v23 = vld [vmem:[%s2305_s21 + $0x18] sm:$0xff]  ;;  %v581_v26 = vsel %vm336_vm0, %v2090_v20, 0  ;;  %v611_v27 = vsel %vm336_vm0, %v2091_v21, 0  ;;  %v2096_v28 = vld [vmem:[%s2292_s18 + $0x70] sm:$0xff]  ;;  %v2094_v29 = vld [vmem:[%s2292_s18 + $0x60] sm:$0xff] }
  0x14   : > { %v2070_v30 = vld [vmem:[%s2305_s21 + $0x20] sm:$0xff]  ;;  %v2071_v31 = vld [vmem:[%s2305_s21 + $0x28] sm:$0xff]  ;;  %v2072_v32 = vld [vmem:[%s2305_s21 + $0x30] sm:$0xff]  ;;  %v761_v34 = vsel %vm336_vm0, %v2096_v28, 0  ;;  %v701_v35 = vsel %vm336_vm0, %v2094_v29, 0 }
  0x15   : > { %v2073_v33 = vld [vmem:[%s2305_s21 + $0x38] sm:$0xff]  ;;  %v2095_v37 = vld [vmem:[%s2292_s18 + $0x68] sm:$0xff]  ;;  %v2074_v40 = vld [vmem:[%s2305_s21 + $0x40] sm:$0xff] }
  0x16   : > { %v2097_v36 = vld [vmem:[%s2292_s18 + $0x78] sm:$0xff]  ;;  %v731_v39 = vsel %vm336_vm0, %v2095_v37, 0  ;;  %v2075_v41 = vld [vmem:[%s2305_s21 + $0x48] sm:$0xff]  ;;  %v2076_v42 = vld [vmem:[%s2305_s21 + $0x50] sm:$0xff] }
  0x17   : > { %1844 = vmatmul.msk.bf16.vlgmr.msra.gmra.mxu0 %vm336_vm0, %v2066_v13  ;;  %1853 = vmatmul.msk.bf16.vlgmr.msra.gmra.mxu1 %vm336_vm0, %v2067_v19  ;;  %v791_v38 = vsel %vm336_vm0, %v2097_v36, 0  ;;  %v2077_v43 = vld [vmem:[%s2305_s21 + $0x58] sm:$0xff]  ;;  %v2078_v44 = vld [vmem:[%s2305_s21 + $0x60] sm:$0xff]  ;;  %v2079_v45 = vld [vmem:[%s2305_s21 + $0x68] sm:$0xff] }
  0x18   : > { %470 = vmatpush.bf16.xpose.msrb.mxu0 %v461_v12  ;;  %500 = vmatpush.bf16.xpose.msrb.mxu1 %v491_v14  ;;  %v2080_v46 = vld [vmem:[%s2305_s21 + $0x70] sm:$0xff]  ;;  %v2081_v47 = vld [vmem:[%s2305_s21 + $0x78] sm:$0xff] }
  0x19   : > { %530 = vmatpush.bf16.xpose.msrb.mxu2 %v521_v15  ;;  %560 = vmatpush.bf16.xpose.msrb.mxu3 %v551_v16 }
  0x1a   : > { %1862 = vmatmul.msk.bf16.vlgmr.msra.gmra.mxu2 %vm336_vm0, %v2068_v22  ;;  %1871 = vmatmul.msk.bf16.vlgmr.msra.gmra.mxu3 %vm336_vm0, %v2069_v23 }
  0x20   : > { %590 = vmatpush.bf16.xpose.msra.mxu0 %v581_v26  ;;  %620 = vmatpush.bf16.xpose.msra.mxu1 %v611_v27 }
  0x21   : > { %650 = vmatpush.bf16.xpose.msra.mxu2 %v641_v24  ;;  %680 = vmatpush.bf16.xpose.msra.mxu3 %v671_v25 }
  0x27   : > { %1880 = vmatmul.msk.bf16.vlgmr.msrb.gmra.mxu0 %vm336_vm0, %v2070_v30  ;;  %1889 = vmatmul.msk.bf16.vlgmr.msrb.gmra.mxu1 %vm336_vm0, %v2071_v31 }
  0x28   : > { %710 = vmatpush.bf16.xpose.msrb.mxu0 %v701_v35  ;;  %740 = vmatpush.bf16.xpose.msrb.mxu1 %v731_v39 }
  0x2a   : > { %1898 = vmatmul.msk.bf16.vlgmr.msrb.gmra.mxu2 %vm336_vm0, %v2072_v32  ;;  %1907 = vmatmul.msk.bf16.vlgmr.msrb.gmra.mxu3 %vm336_vm0, %v2073_v33 }
  0x2b   : > { %770 = vmatpush.bf16.xpose.msrb.mxu2 %v761_v34  ;;  %800 = vmatpush.bf16.xpose.msrb.mxu3 %v791_v38 }
  0x37   : > { %1916 = vmatmul.msk.bf16.vlgmr.msra.gmra.mxu0 %vm336_vm0, %v2074_v40  ;;  %1925 = vmatmul.msk.bf16.vlgmr.msra.gmra.mxu1 %vm336_vm0, %v2075_v41 }
  0x3a   : > { %1934 = vmatmul.msk.bf16.vlgmr.msra.gmra.mxu2 %vm336_vm0, %v2076_v42  ;;  %1943 = vmatmul.msk.bf16.vlgmr.msra.gmra.mxu3 %vm336_vm0, %v2077_v43 }
  0x47   : > { %1952 = vmatmul.msk.bf16.vlgmr.msrb.gmra.mxu0 %vm336_vm0, %v2078_v44  ;;  %1961 = vmatmul.msk.bf16.vlgmr.msrb.gmra.mxu1 %vm336_vm0, %v2079_v45 }
  0x4a   : > { %1970 = vmatmul.msk.bf16.vlgmr.msrb.gmra.mxu2 %vm336_vm0, %v2080_v46  ;;  %1979 = vmatmul.msk.bf16.vlgmr.msrb.gmra.mxu3 %vm336_vm0, %v2081_v47 }
  0x94   : > { %v352_v48 = vpop.f32.mrf.mxu0  ;;  %v382_v49 = vpop.f32.mrf.mxu1 }
  0x95   : > { %v2364_v50 = vmul.f32 0.5, %v352_v48  ;;  %v2366_v51 = vmul.f32 0.5, %v382_v49 }
  0x97   : > { %v846_v52 = vsel %vm839_vm1, %v2366_v51, -inf  ;;  %v840_v53 = vsel %vm839_vm1, %v2364_v50, -inf }
  0x98   : > { %847 = vmax.xlane.f32.xlu0 %v846_v52  ;;  %841 = vmax.xlane.f32.xlu2 %v840_v53 }
  0x9c   : > { %v354_v58 = vpop.f32.mrf.mxu0  ;;  %v384_v59 = vpop.f32.mrf.mxu1 }
  0x9d   : > { %v412_v54 = vpop.f32.mrf.mxu2  ;;  %v442_v55 = vpop.f32.mrf.mxu3  ;;  %v2376_v60 = vmul.f32 0.5, %v354_v58  ;;  %v2384_v0 = vmul.f32 0.5, %v384_v59 }
  0x9e   : > { %v2372_v56 = vmul.f32 0.5, %v412_v54  ;;  %v2374_v57 = vmul.f32 0.5, %v442_v55 }
  0x9f   : > { %v843_v63 = vsel %vm839_vm1, %v2376_v60, -inf  ;;  %v849_v7 = vsel %vm839_vm1, %v2384_v0, -inf }
  0xa0   : > { %v858_v61 = vsel %vm839_vm1, %v2374_v57, -inf  ;;  %v852_v62 = vsel %vm839_vm1, %v2372_v56, -inf  ;;  %844 = vmax.xlane.f32.xlu2 %v843_v63 }
  0xa1   : > { %859 = vmax.xlane.f32.xlu1 %v858_v61  ;;  %853 = vmax.xlane.f32.xlu0 %v852_v62 }
  0xa4   : > { %v472_v4 = vpop.f32.mrf.mxu0  ;;  %v502_v5 = vpop.f32.mrf.mxu1 }
  0xa5   : > { %v414_v1 = vpop.f32.mrf.mxu2  ;;  %v444_v2 = vpop.f32.mrf.mxu3  ;;  %v2388_v6 = vmul.f32 0.5, %v502_v5  ;;  %v2396_v10 = vmul.f32 0.5, %v472_v4 }
  0xa6   : > { %v2386_v3 = vmul.f32 0.5, %v414_v1  ;;  %v2398_v11 = vmul.f32 0.5, %v444_v2 }
  0xa7   : > { %v870_v9 = vsel %vm839_vm1, %v2388_v6, -inf  ;;  %v864_v16 = vsel %vm839_vm1, %v2396_v10, -inf }
  0xa8   : > { %v855_v8 = vsel %vm839_vm1, %v2386_v3, -inf  ;;  %871 = vmax.xlane.f32.xlu2 %v870_v9  ;;  %v861_v18 = vsel %vm839_vm1, %v2398_v11, -inf }
  0xa9   : > { %850 = vmax.xlane.f32.xlu1 %v849_v7  ;;  %856 = vmax.xlane.f32.xlu0 %v855_v8 }
  0xac   : > { %v504_v14 = vpop.f32.mrf.mxu1  ;;  %v474_v17 = vpop.f32.mrf.mxu0 }
  0xad   : > { %v532_v12 = vpop.f32.mrf.mxu2  ;;  %v562_v13 = vpop.f32.mrf.mxu3  ;;  %v2410_v21 = vmul.f32 0.5, %v504_v14  ;;  %v2422_v31 = vmul.f32 0.5, %v474_v17 }
  0xae   : > { %v2400_v15 = vmul.f32 0.5, %v532_v12  ;;  %v2408_v20 = vmul.f32 0.5, %v562_v13 }
  0xaf   : > { %v873_v29 = vsel %vm839_vm1, %v2410_v21, -inf  ;;  %v867_v35 = vsel %vm839_vm1, %v2422_v31, -inf }
  0xb0   : > { %v876_v19 = vsel %vm839_vm1, %v2400_v15, -inf  ;;  %v882_v25 = vsel %vm839_vm1, %v2408_v20, -inf }
  0xb1   : > { %862 = vmax.xlane.f32.xlu1 %v861_v18  ;;  %877 = vmax.xlane.f32.xlu2 %v876_v19 }
  0xb2   : > { %865 = vmax.xlane.f32.xlu0 %v864_v16 }
  0xb4   : > { %v622_v26 = vpop.f32.mrf.mxu1  ;;  %v592_v28 = vpop.f32.mrf.mxu0 }
  0xb5   : > { %v534_v22 = vpop.f32.mrf.mxu2  ;;  %v564_v23 = vpop.f32.mrf.mxu3  ;;  %v2420_v30 = vmul.f32 0.5, %v592_v28  ;;  %v2432_v38 = vmul.f32 0.5, %v622_v26 }
  0xb6   : > { %v2412_v24 = vmul.f32 0.5, %v564_v23  ;;  %v2424_v32 = vmul.f32 0.5, %v534_v22 }
  0xb7   : > { %v888_v34 = vsel %vm839_vm1, %v2420_v30, -inf  ;;  %v894_v43 = vsel %vm839_vm1, %v2432_v38, -inf }
  0xb8   : > { %v885_v27 = vsel %vm839_vm1, %v2412_v24, -inf  ;;  %v879_v37 = vsel %vm839_vm1, %v2424_v32, -inf }
  0xb9   : > { %883 = vmax.xlane.f32.xlu1 %v882_v25  ;;  %886 = vmax.xlane.f32.xlu2 %v885_v27 }
  0xba   : > { %874 = vmax.xlane.f32.xlu0 %v873_v29 }
  0xbc   : > { %v624_v36 = vpop.f32.mrf.mxu1  ;;  %v594_v42 = vpop.f32.mrf.mxu0 }
  0xbd   : > { %v652_v33 = vpop.f32.mrf.mxu2  ;;  %v682_v39 = vpop.f32.mrf.mxu3  ;;  %v2436_v41 = vmul.f32 0.5, %v624_v36  ;;  %v2446_v48 = vmul.f32 0.5, %v594_v42 }
  0xbe   : > { %v2434_v40 = vmul.f32 0.5, %v682_v39  ;;  %v2444_v47 = vmul.f32 0.5, %v652_v33 }
  0xbf   : > { %v897_v45 = vsel %vm839_vm1, %v2436_v41, -inf  ;;  %v891_v58 = vsel %vm839_vm1, %v2446_v48, -inf }
  0xc0   : > { %v906_v44 = vsel %vm839_vm1, %v2434_v40, -inf  ;;  %v900_v54 = vsel %vm839_vm1, %v2444_v47, -inf }
  0xc1   : > { %868 = vmax.xlane.f32.xlu1 %v867_v35  ;;  %889 = vmax.xlane.f32.xlu2 %v888_v34 }
  0xc2   : > { %880 = vmax.xlane.f32.xlu0 %v879_v37 }
  0xc4   : > { %v712_v53 = vpop.f32.mrf.mxu0  ;;  %v742_v4 = vpop.f32.mrf.mxu1 }
  0xc5   : > { %v654_v46 = vpop.f32.mrf.mxu2  ;;  %v684_v52 = vpop.f32.mrf.mxu3  ;;  %v2456_v61 = vmul.f32 0.5, %v712_v53  ;;  %v2468_v9 = vmul.f32 0.5, %v742_v4 }
  0xc6   : > { %v2448_v49 = vmul.f32 0.5, %v654_v46  ;;  %v2460_v63 = vmul.f32 0.5, %v684_v52 }
  0xc7   : > { %v912_v2 = vsel %vm839_vm1, %v2456_v61, -inf  ;;  %v918_v14 = vsel %vm839_vm1, %v2468_v9, -inf }
  0xc8   : > { %v903_v55 = vsel %vm839_vm1, %v2448_v49, -inf  ;;  %v909_v7 = vsel %vm839_vm1, %v2460_v63, -inf }
  0xc9   : > { %895 = vmax.xlane.f32.xlu1 %v894_v43  ;;  %898 = vmax.xlane.f32.xlu2 %v897_v45 }
  0xca   : > { %907 = vmax.xlane.f32.xlu0 %v906_v44 }
  0xcc   : > { %v714_v8 = vpop.f32.mrf.mxu0  ;;  %v744_v19 = vpop.f32.mrf.mxu1 }
  0xcd   : > { %v772_v59 = vpop.f32.mrf.mxu2  ;;  %v802_v5 = vpop.f32.mrf.mxu3  ;;  %v2472_v13 = vmul.f32 0.5, %v714_v8  ;;  %v2482_v25 = vmul.f32 0.5, %v744_v19 }
  0xce   : > { %v2458_v62 = vmul.f32 0.5, %v772_v59  ;;  %v2470_v12 = vmul.f32 0.5, %v802_v5 }
  0xcf   : > { %v915_v18 = vsel %vm839_vm1, %v2472_v13, -inf  ;;  %v921_v28 = vsel %vm839_vm1, %v2482_v25, -inf }
  0xd0   : > { %v924_v1 = vsel %vm839_vm1, %v2458_v62, -inf  ;;  %v930_v16 = vsel %vm839_vm1, %v2470_v12, -inf }
  0xd1   : > { %901 = vmax.xlane.f32.xlu1 %v900_v54  ;;  %904 = vmax.xlane.f32.xlu2 %v903_v55 }
  0xd2   : > { %892 = vmax.xlane.f32.xlu0 %v891_v58 }
  0xd5   : > { %v774_v17 = vpop.f32.mrf.mxu2  ;;  %v804_v22 = vpop.f32.mrf.mxu3 }
  0xd6   : > { %v2480_v23 = vmul.f32 0.5, %v774_v17  ;;  %v2484_v26 = vmul.f32 0.5, %v804_v22 }
  0xd8   : > { %v927_v27 = vsel %vm839_vm1, %v2480_v23, -inf  ;;  %v933_v29 = vsel %vm839_vm1, %v2484_v26, -inf }
  0xd9   : > { %910 = vmax.xlane.f32.xlu1 %v909_v7  ;;  %913 = vmax.xlane.f32.xlu2 %v912_v2 }
  0xda   : > { %925 = vmax.xlane.f32.xlu0 %v924_v1 }
  0xe1   : > { %919 = vmax.xlane.f32.xlu1 %v918_v14  ;;  %931 = vmax.xlane.f32.xlu2 %v930_v16 }
  0xe2   : > { %916 = vmax.xlane.f32.xlu0 %v915_v18 }
  0xe9   : > { %928 = vmax.xlane.f32.xlu1 %v927_v27  ;;  %922 = vmax.xlane.f32.xlu2 %v921_v28 }
  0xea   : > { %934 = vmax.xlane.f32.xlu0 %v933_v29 }
 0x10b   : > { %v848_v33 = vpop.xlane.xlu0 %847  ;;  %v842_v34 = vpop.xlane.xlu2 %841 }
 0x10c   : > { %v938_v35 = vsub.f32 %v2366_v51, %v848_v33  ;;  %v936_v36 = vsub.f32 %v2364_v50, %v842_v34 }
 0x10e   : > { %v972_v37 = vmul.f32 1.442695, %v938_v35  ;;  %v968_v39 = vmul.f32 1.442695, %v936_v36 }
 0x110   : > { %2122 = vpow2.f32 %v972_v37 }
 0x111   : > { %2124 = vpow2.f32 %v968_v39 }
 0x113   : > { %v845_v45 = vpop.xlane.xlu2 %844 }
 0x114   : > { %v860_v42 = vpop.xlane.xlu1 %859  ;;  %v854_v44 = vpop.xlane.xlu0 %853  ;;  %v937_v55 = vsub.f32 %v2376_v60, %v845_v45 }
 0x115   : > { %v942_v43 = vsub.f32 %v2374_v57, %v860_v42  ;;  %v940_v46 = vsub.f32 %v2372_v56, %v854_v44 }
 0x116   : > { %v2496_v53 = vpop.eup %2122  ;;  %v970_v58 = vmul.f32 1.442695, %v937_v55 }
 0x117   : > { %v980_v52 = vmul.f32 1.442695, %v942_v43  ;;  %v976_v54 = vmul.f32 1.442695, %v940_v46  ;;  %v2499_v51 = vpop.eup %2124  ;;  %v1038_v50 = vsel %vm839_vm1, %v2496_v53, 0.0 }
 0x118   : > { %1039 = vadd.xlane.f32.xlu2 %v1038_v50  ;;  %v1032_v57 = vsel %vm839_vm1, %v2499_v51, 0.0 }
 0x119   : > { %2126 = vpow2.f32 %v980_v52  ;;  %1033 = vadd.xlane.f32.xlu0 %v1032_v57 }
 0x11a   : > { %2128 = vpow2.f32 %v976_v54 }
 0x11b   : > { %v872_v2 = vpop.xlane.xlu2 %871  ;;  %2130 = vpow2.f32 %v970_v58 }
 0x11c   : > { %v851_v56 = vpop.xlane.xlu1 %850  ;;  %v857_v1 = vpop.xlane.xlu0 %856  ;;  %v946_v33 = vsub.f32 %v2388_v6, %v872_v2 }
 0x11d   : > { %v939_v59 = vsub.f32 %v2384_v0, %v851_v56  ;;  %v941_v60 = vsub.f32 %v2386_v3, %v857_v1 }
 0x11e   : > { %v988_v36 = vmul.f32 1.442695, %v946_v33 }
 0x11f   : > { %v2507_v4 = vpop.eup %2126  ;;  %v974_v5 = vmul.f32 1.442695, %v939_v59  ;;  %v978_v8 = vmul.f32 1.442695, %v941_v60 }
 0x120   : > { %v2509_v7 = vpop.eup %2128  ;;  %v1050_v0 = vsel %vm839_vm1, %v2507_v4, 0.0 }
 0x121   : > { %2132 = vpow2.f32 %v974_v5  ;;  %v1044_v14 = vsel %vm839_vm1, %v2509_v7, 0.0  ;;  %1051 = vadd.xlane.f32.xlu0 %v1050_v0  ;;  %v2516_v19 = vpop.eup %2130 }
 0x122   : > { %2134 = vpow2.f32 %v978_v8  ;;  %1045 = vadd.xlane.f32.xlu1 %v1044_v14  ;;  %v1035_v35 = vsel %vm839_vm1, %v2516_v19, 0.0 }
 0x124   : > { %v863_v16 = vpop.xlane.xlu1 %862  ;;  %v878_v17 = vpop.xlane.xlu2 %877 }
 0x125   : > { %v943_v3 = vsub.f32 %v2398_v11, %v863_v16  ;;  %v866_v18 = vpop.xlane.xlu0 %865  ;;  %v948_v46 = vsub.f32 %v2400_v15, %v878_v17 }
 0x126   : > { %v944_v22 = vsub.f32 %v2396_v10, %v866_v18 }
 0x127   : > { %v2519_v27 = vpop.eup %2132  ;;  %v982_v28 = vmul.f32 1.442695, %v943_v3 }
 0x128   : > { %v2521_v29 = vpop.eup %2134  ;;  %v984_v34 = vmul.f32 1.442695, %v944_v22  ;;  %v1041_v10 = vsel %vm839_vm1, %v2519_v27, 0.0 }
 0x129   : > { %2136 = vpow2.f32 %v982_v28  ;;  %v1047_v11 = vsel %vm839_vm1, %v2521_v29, 0.0  ;;  %1042 = vadd.xlane.f32.xlu0 %v1041_v10 }
 0x12a   : > { %1036 = vadd.xlane.f32.xlu1 %v1035_v35  ;;  %1048 = vadd.xlane.f32.xlu2 %v1047_v11  ;;  %2138 = vpow2.f32 %v984_v34 }
 0x12b   : > { %2140 = vpow2.f32 %v988_v36 }
 0x12c   : > { %v884_v37 = vpop.xlane.xlu1 %883  ;;  %v887_v6 = vpop.xlane.xlu2 %886 }
 0x12d   : > { %v950_v39 = vsub.f32 %v2408_v20, %v884_v37  ;;  %v875_v42 = vpop.xlane.xlu0 %874  ;;  %v951_v60 = vsub.f32 %v2412_v24, %v887_v6 }
 0x12e   : > { %v947_v43 = vsub.f32 %v2410_v21, %v875_v42  ;;  %v992_v21 = vmul.f32 1.442695, %v948_v46 }
 0x12f   : > { %v2532_v44 = vpop.eup %2136  ;;  %v996_v45 = vmul.f32 1.442695, %v950_v39  ;;  %v998_v0 = vmul.f32 1.442695, %v951_v60 }
 0x130   : > { %v990_v52 = vmul.f32 1.442695, %v947_v43  ;;  %v2535_v54 = vpop.eup %2138  ;;  %v1053_v55 = vsel %vm839_vm1, %v2532_v44, 0.0 }
 0x131   : > { %2142 = vpow2.f32 %v996_v45  ;;  %v1056_v20 = vsel %vm839_vm1, %v2535_v54, 0.0  ;;  %v2542_v15 = vpop.eup %2140 }
 0x132   : > { %1054 = vadd.xlane.f32.xlu1 %v1053_v55  ;;  %2144 = vpow2.f32 %v990_v52  ;;  %1057 = vadd.xlane.f32.xlu2 %v1056_v20 }
 0x133   : > { %2146 = vpow2.f32 %v992_v21 }
 0x134   : > { %v869_v50 = vpop.xlane.xlu1 %868  ;;  %v890_v56 = vpop.xlane.xlu2 %889 }
 0x135   : > { %v945_v57 = vsub.f32 %v2422_v31, %v869_v50  ;;  %v881_v58 = vpop.xlane.xlu0 %880  ;;  %v1062_v31 = vsel %vm839_vm1, %v2542_v15, 0.0  ;;  %v952_v35 = vsub.f32 %v2420_v30, %v890_v56 }
 0x136   : > { %v949_v59 = vsub.f32 %v2424_v32, %v881_v58 }
 0x137   : > { %v2545_v1 = vpop.eup %2142  ;;  %v986_v2 = vmul.f32 1.442695, %v945_v57  ;;  %v1000_v36 = vmul.f32 1.442695, %v952_v35 }
 0x138   : > { %v994_v5 = vmul.f32 1.442695, %v949_v59  ;;  %v1074_v8 = vsel %vm839_vm1, %v2545_v1, 0.0  ;;  %v2550_v14 = vpop.eup %2144 }
 0x139   : > { %2148 = vpow2.f32 %v986_v2  ;;  %1075 = vadd.xlane.f32.xlu0 %v1074_v8  ;;  %v1065_v32 = vsel %vm839_vm1, %v2550_v14, 0.0  ;;  %v2557_v18 = vpop.eup %2146 }
 0x13a   : > { %2150 = vpow2.f32 %v994_v5  ;;  %1063 = vadd.xlane.f32.xlu1 %v1062_v31  ;;  %1066 = vadd.xlane.f32.xlu2 %v1065_v32 }
 0x13b   : > { %2152 = vpow2.f32 %v998_v0 }
 0x13c   : > { %v896_v16 = vpop.xlane.xlu1 %895  ;;  %v899_v17 = vpop.xlane.xlu2 %898 }
 0x13d   : > { %v954_v24 = vsub.f32 %v2432_v38, %v896_v16  ;;  %v908_v3 = vpop.xlane.xlu0 %907  ;;  %v1068_v38 = vsel %vm839_vm1, %v2557_v18, 0.0  ;;  %v955_v31 = vsub.f32 %v2436_v41, %v899_v17 }
 0x13e   : > { %v958_v22 = vsub.f32 %v2434_v40, %v908_v3 }
 0x13f   : > { %v2560_v28 = vpop.eup %2148  ;;  %v1004_v33 = vmul.f32 1.442695, %v954_v24  ;;  %v1006_v41 = vmul.f32 1.442695, %v955_v31 }
 0x140   : > { %v2562_v34 = vpop.eup %2150  ;;  %v1012_v11 = vmul.f32 1.442695, %v958_v22  ;;  %v1059_v10 = vsel %vm839_vm1, %v2560_v28, 0.0 }
 0x141   : > { %2154 = vpow2.f32 %v1004_v33  ;;  %1060 = vadd.xlane.f32.xlu0 %v1059_v10  ;;  %v1071_v40 = vsel %vm839_vm1, %v2562_v34, 0.0  ;;  %v2572_v42 = vpop.eup %2152 }
 0x142   : > { %2156 = vpow2.f32 %v1012_v11  ;;  %1069 = vadd.xlane.f32.xlu1 %v1068_v38  ;;  %1072 = vadd.xlane.f32.xlu2 %v1071_v40 }
 0x143   : > { %2158 = vpow2.f32 %v1000_v36 }
 0x144   : > { %v902_v37 = vpop.xlane.xlu1 %901  ;;  %v905_v30 = vpop.xlane.xlu2 %904 }
 0x145   : > { %v956_v39 = vsub.f32 %v2444_v47, %v902_v37  ;;  %v893_v6 = vpop.xlane.xlu0 %892  ;;  %v957_v55 = vsub.f32 %v2448_v49, %v905_v30  ;;  %v1077_v47 = vsel %vm839_vm1, %v2572_v42, 0.0 }
 0x146   : > { %v953_v43 = vsub.f32 %v2446_v48, %v893_v6 }
 0x147   : > { %v2575_v45 = vpop.eup %2154  ;;  %v1008_v46 = vmul.f32 1.442695, %v956_v39  ;;  %v1010_v50 = vmul.f32 1.442695, %v957_v55 }
 0x148   : > { %v2577_v52 = vpop.eup %2156  ;;  %v1002_v20 = vmul.f32 1.442695, %v953_v43  ;;  %v1086_v21 = vsel %vm839_vm1, %v2575_v45, 0.0 }
 0x149   : > { %2160 = vpow2.f32 %v1008_v46  ;;  %1087 = vadd.xlane.f32.xlu0 %v1086_v21  ;;  %v1098_v48 = vsel %vm839_vm1, %v2577_v52, 0.0  ;;  %v2587_v59 = vpop.eup %2158 }
 0x14a   : > { %1078 = vadd.xlane.f32.xlu1 %v1077_v47  ;;  %2162 = vpow2.f32 %v1002_v20  ;;  %1099 = vadd.xlane.f32.xlu2 %v1098_v48 }
 0x14b   : > { %2164 = vpow2.f32 %v1010_v50 }
 0x14c   : > { %v911_v57 = vpop.xlane.xlu1 %910  ;;  %v914_v56 = vpop.xlane.xlu2 %913 }
 0x14d   : > { %v959_v58 = vsub.f32 %v2460_v63, %v911_v57  ;;  %v926_v49 = vpop.xlane.xlu0 %925  ;;  %v960_v8 = vsub.f32 %v2456_v61, %v914_v56  ;;  %v1080_v63 = vsel %vm839_vm1, %v2587_v59, 0.0 }
 0x14e   : > { %v964_v2 = vsub.f32 %v2458_v62, %v926_v49 }
 0x14f   : > { %v2590_v60 = vpop.eup %2160  ;;  %v1014_v5 = vmul.f32 1.442695, %v959_v58  ;;  %v1016_v61 = vmul.f32 1.442695, %v960_v8 }
 0x150   : > { %v1024_v32 = vmul.f32 1.442695, %v964_v2  ;;  %v1092_v0 = vsel %vm839_vm1, %v2590_v60, 0.0  ;;  %v2596_v16 = vpop.eup %2162 }
 0x151   : > { %2166 = vpow2.f32 %v1014_v5  ;;  %1093 = vadd.xlane.f32.xlu0 %v1092_v0  ;;  %v1083_v62 = vsel %vm839_vm1, %v2596_v16, 0.0  ;;  %v2602_v22 = vpop.eup %2164 }
 0x152   : > { %2168 = vpow2.f32 %v1024_v32  ;;  %1081 = vadd.xlane.f32.xlu1 %v1080_v63  ;;  %1084 = vadd.xlane.f32.xlu2 %v1083_v62  ;;  %v1095_v38 = vsel %vm839_vm1, %v2602_v22, 0.0  ;;  %v2098_v62 = vld [vmem:[%s2656_s24] sm:$0xff] }
 0x153   : > { %2170 = vpow2.f32 %v1016_v61  ;;  %v2099_v61 = vld [vmem:[%s2656_s24 + $0x8] sm:$0xff]  ;;  %1245 = vmatpush.bf16.msra.mxu0 %v2098_v62 }
 0x154   : > { %v920_v24 = vpop.xlane.xlu1 %919  ;;  %v932_v3 = vpop.xlane.xlu2 %931  ;;  %2172 = vpow2.f32 %v1006_v41  ;;  %v2100_v41 = vld [vmem:[%s2656_s24 + $0x10] sm:$0xff]  ;;  %1273 = vmatpush.bf16.msra.mxu1 %v2099_v61 }
 0x155   : > { %v917_v17 = vpop.xlane.xlu0 %916  ;;  %v966_v11 = vsub.f32 %v2470_v12, %v932_v3  ;;  %v962_v50 = vsub.f32 %v2468_v9, %v920_v24  ;;  %1301 = vmatpush.bf16.msra.mxu2 %v2100_v41  ;;  %v2101_v3 = vld [vmem:[%s2656_s24 + $0x18] sm:$0xff] }
 0x156   : > { %v961_v21 = vsub.f32 %v2472_v13, %v917_v17  ;;  %1329 = vmatpush.bf16.msra.mxu3 %v2101_v3  ;;  %v2105_v3 = vld [vmem:[%s2656_s24 + $0x38] sm:$0xff] }
 0x157   : > { %v2604_v33 = vpop.eup %2166  ;;  %v1028_v36 = vmul.f32 1.442695, %v966_v11  ;;  %v1020_v58 = vmul.f32 1.442695, %v962_v50 }
 0x158   : > { %v2606_v35 = vpop.eup %2168  ;;  %v1101_v10 = vsel %vm839_vm1, %v2604_v33, 0.0 }
 0x159   : > { %1102 = vadd.xlane.f32.xlu0 %v1101_v10  ;;  %v1116_v40 = vsel %vm839_vm1, %v2606_v35, 0.0  ;;  %v2615_v39 = vpop.eup %2170  ;;  %2174 = vpow2.f32 %v1028_v36 }
 0x15a   : > { %1096 = vadd.xlane.f32.xlu1 %v1095_v38  ;;  %1117 = vadd.xlane.f32.xlu2 %v1116_v40  ;;  %v2618_v43 = vpop.eup %2172  ;;  %v1104_v48 = vsel %vm839_vm1, %v2615_v39, 0.0  ;;  %v2103_v38 = vld [vmem:[%s2656_s24 + $0x28] sm:$0xff] }
 0x15b   : > { %1385 = vmatpush.bf16.msrb.mxu1 %v2103_v38  ;;  %1441 = vmatpush.bf16.msrb.mxu3 %v2105_v3 }
 0x15c   : > { %v929_v37 = vpop.xlane.xlu1 %928  ;;  %v923_v6 = vpop.xlane.xlu2 %922 }
 0x15d   : > { %v965_v30 = vsub.f32 %v2480_v23, %v929_v37  ;;  %v935_v12 = vpop.xlane.xlu0 %934  ;;  %v963_v20 = vsub.f32 %v2482_v25, %v923_v6  ;;  %v1089_v23 = vsel %vm839_vm1, %v2618_v43, 0.0 }
 0x15e   : > { %v967_v46 = vsub.f32 %v2484_v26, %v935_v12  ;;  %v1018_v26 = vmul.f32 1.442695, %v961_v21  ;;  %v2104_v21 = vld [vmem:[%s2656_s24 + $0x30] sm:$0xff] }
 0x15f   : > { %v1026_v55 = vmul.f32 1.442695, %v965_v30  ;;  %v1022_v57 = vmul.f32 1.442695, %v963_v20  ;;  %v2628_v25 = vpop.eup %2174  ;;  %1413 = vmatpush.bf16.msrb.mxu2 %v2104_v21 }
 0x160   : > { %v1030_v47 = vmul.f32 1.442695, %v967_v46  ;;  %v1122_v56 = vsel %vm839_vm1, %v2628_v25, 0.0  ;;  %v2102_v46 = vld [vmem:[%s2656_s24 + $0x20] sm:$0xff] }
 0x161   : > { %2176 = vpow2.f32 %v1026_v55  ;;  %1105 = vadd.xlane.f32.xlu0 %v1104_v48  ;;  %1357 = vmatpush.bf16.msrb.mxu0 %v2102_v46 }
 0x162   : > { %1090 = vadd.xlane.f32.xlu1 %v1089_v23  ;;  %2178 = vpow2.f32 %v1030_v47 }
 0x163   : > { %2180 = vpow2.f32 %v1022_v57 }
 0x164   : > { %2182 = vpow2.f32 %v1018_v26 }
 0x165   : > { %2184 = vpow2.f32 %v1020_v58 }
 0x167   : > { %v2630_v49 = vpop.eup %2176 }
 0x168   : > { %v1119_v13 = vsel %vm839_vm1, %v2630_v49, 0.0  ;;  %v2634_v9 = vpop.eup %2178 }
 0x169   : > { %1120 = vadd.xlane.f32.xlu0 %v1119_v13  ;;  %v1125_v2 = vsel %vm839_vm1, %v2634_v9, 0.0  ;;  %v2640_v5 = vpop.eup %2180 }
 0x16a   : > { %1123 = vadd.xlane.f32.xlu1 %v1122_v56  ;;  %1126 = vadd.xlane.f32.xlu2 %v1125_v2  ;;  %v2642_v8 = vpop.eup %2182  ;;  %v1113_v32 = vsel %vm839_vm1, %v2640_v5, 0.0 }
 0x16b   : > { %v2644_v31 = vpop.eup %2184  ;;  %v1107_v0 = vsel %vm839_vm1, %v2642_v8, 0.0 }
 0x16c   : > { %v1110_v63 = vsel %vm839_vm1, %v2644_v31, 0.0 }
 0x171   : > { %1114 = vadd.xlane.f32.xlu0 %v1113_v32 }
 0x172   : > { %1108 = vadd.xlane.f32.xlu1 %v1107_v0  ;;  %1111 = vadd.xlane.f32.xlu2 %v1110_v63 }
 0x18b   : > { %v1040_v17 = vpop.xlane.xlu2 %1039 }
 0x18c   : > { %v1034_v24 = vpop.xlane.xlu0 %1033 }
 0x18d   : > { %2186 = vrcp.f32 %v1034_v24 }
 0x193   : > { %v2187_v37 = vpop.eup %2186 }
 0x194   : > { %v1052_v10 = vpop.xlane.xlu0 %1051  ;;  %v1160_v55 = vmul.f32 %v2187_v37, %v2499_v51 }
 0x195   : > { %v1046_v11 = vpop.xlane.xlu1 %1045 }
 0x196   : > { %2188 = vrcp.f32 %v1046_v11  ;;  %v1192_v57 = vpack.c.bf16 %v1160_v55, %v1160_v55  ;;  %v2106_v55 = vld [vmem:[%s2656_s24 + $0x40] sm:$0xff] }
 0x197   : > { %2190 = vrcp.f32 %v1040_v17 }
 0x198   : > { %2192 = vrcp.f32 %v1052_v10 }
 0x19c   : > { %v1043_v30 = vpop.xlane.xlu0 %1042  ;;  %v2189_v6 = vpop.eup %2188 }
 0x19d   : > { %v1037_v40 = vpop.xlane.xlu1 %1036  ;;  %v1049_v36 = vpop.xlane.xlu2 %1048  ;;  %v1164_v20 = vmul.f32 %v2189_v6, %v2509_v7 }
 0x19e   : > { %2194 = vrcp.f32 %v1037_v40  ;;  %v2191_v12 = vpop.eup %2190 }
 0x19f   : > { %2196 = vrcp.f32 %v1049_v36  ;;  %v2193_v47 = vpop.eup %2192  ;;  %v1162_v48 = vmul.f32 %v2191_v12, %v2496_v53  ;;  %v1196_v56 = vpack.c.bf16 %v1164_v20, %v1164_v20  ;;  %v1226_v53 = vunpack.c.l.b16 %v1192_v57 }
 0x1a0   : > { %2198 = vrcp.f32 %v1043_v30  ;;  %v1166_v62 = vmul.f32 %v2193_v47, %v2507_v4 }
 0x1a1   : > { %v1194_v7 = vpack.c.bf16 %v1162_v48, %v1162_v48  ;;  %v1282_v24 = vunpack.c.l.b16 %v1196_v56 }
 0x1a2   : > { %v1198_v36 = vpack.c.bf16 %v1166_v62, %v1166_v62 }
 0x1a3   : > { %v1254_v17 = vunpack.c.l.b16 %v1194_v7  ;;  %v2108_v7 = vld [vmem:[%s2656_s24 + $0x50] sm:$0xff] }
 0x1a4   : > { %v2195_v50 = vpop.eup %2194  ;;  %v1310_v12 = vunpack.c.l.b16 %v1198_v36 }
 0x1a5   : > { %v2197_v23 = vpop.eup %2196  ;;  %v1161_v26 = vmul.f32 %v2195_v50, %v2516_v19  ;;  %v1055_v58 = vpop.xlane.xlu1 %1054 }
 0x1a6   : > { %v2199_v13 = vpop.eup %2198  ;;  %v1165_v2 = vmul.f32 %v2197_v23, %v2521_v29  ;;  %2200 = vrcp.f32 %v1055_v58  ;;  %v1058_v51 = vpop.xlane.xlu2 %1057 }
 0x1a7   : > { %v1193_v32 = vpack.c.bf16 %v1161_v26, %v1161_v26  ;;  %v1163_v0 = vmul.f32 %v2199_v13, %v2519_v27  ;;  %2202 = vrcp.f32 %v1058_v51 }
 0x1a8   : > { %v1197_v63 = vpack.c.bf16 %v1165_v2, %v1165_v2 }
 0x1a9   : > { %v1227_v61 = vunpack.c.l.b16 %v1193_v32  ;;  %v1195_v41 = vpack.c.bf16 %v1163_v0, %v1163_v0  ;;  %v2109_v32 = vld [vmem:[%s2656_s24 + $0x58] sm:$0xff] }
 0x1aa   : > { %v1283_v19 = vunpack.c.l.b16 %v1197_v63 }
 0x1ab   : > { %v1228_v11 = vpack.c.b16 %v1227_v61, %v1226_v53  ;;  %v1255_v10 = vunpack.c.l.b16 %v1195_v41 }
 0x1ac   : > { %v2201_v38 = vpop.eup %2200  ;;  %v1284_v29 = vpack.c.b16 %v1283_v19, %v1282_v24  ;;  %v1076_v40 = vpop.xlane.xlu0 %1075 }
 0x1ad   : > { %v1256_v37 = vpack.c.b16 %v1255_v10, %v1254_v17  ;;  %v1167_v27 = vmul.f32 %v2201_v38, %v2532_v44  ;;  %v1064_v30 = vpop.xlane.xlu1 %1063  ;;  %1984 = vmatmul.msk.bf16.vlgmr.msra.gmra.mxu0 %vm839_vm1, %v1228_v11  ;;  %v2203_v20 = vpop.eup %2202 }
 0x1ae   : > { %2204 = vrcp.f32 %v1064_v30  ;;  %1994 = vmatmul.msk.bf16.vlgmr.msra.gmra.mxu2 %vm839_vm1, %v1284_v29  ;;  %v1067_v4 = vpop.xlane.xlu2 %1066  ;;  %1469 = vmatpush.bf16.msra.mxu0 %v2106_v55  ;;  %v1168_v13 = vmul.f32 %v2203_v20, %v2535_v54 }
 0x1af   : > { %v1199_v6 = vpack.c.bf16 %v1167_v27, %v1167_v27  ;;  %2206 = vrcp.f32 %v1067_v4  ;;  %1989 = vmatmul.msk.bf16.vlgmr.msra.gmra.mxu1 %vm839_vm1, %v1256_v37  ;;  %1525 = vmatpush.bf16.msra.mxu2 %v2108_v7 }
 0x1b0   : > { %v1200_v63 = vpack.c.bf16 %v1168_v13, %v1168_v13 }
 0x1b1   : > { %v1311_v46 = vunpack.c.l.b16 %v1199_v6 }
 0x1b2   : > { %v1338_v10 = vunpack.c.l.b16 %v1200_v63 }
 0x1b3   : > { %v1312_v21 = vpack.c.b16 %v1311_v46, %v1310_v12 }
 0x1b4   : > { %v2205_v47 = vpop.eup %2204  ;;  %v1061_v48 = vpop.xlane.xlu0 %1060 }
 0x1b5   : > { %v2207_v44 = vpop.eup %2206  ;;  %v1170_v50 = vmul.f32 %v2205_v47, %v2542_v15  ;;  %2208 = vrcp.f32 %v1061_v48  ;;  %v1070_v23 = vpop.xlane.xlu1 %1069  ;;  %1999 = vmatmul.msk.bf16.vlgmr.msra.gmra.mxu3 %vm839_vm1, %v1312_v21  ;;  %v2112_v21 = vld [vmem:[%s2656_s24 + $0x70] sm:$0xff]  ;;  %v2113_v47 = vld [vmem:[%s2656_s24 + $0x78] sm:$0xff] }
 0x1b6   : > { %v1171_v57 = vmul.f32 %v2207_v44, %v2550_v14  ;;  %2210 = vrcp.f32 %v1070_v23  ;;  %v1073_v26 = vpop.xlane.xlu2 %1072  ;;  %1553 = vmatpush.bf16.msra.mxu3 %v2109_v32 }
 0x1b7   : > { %v1202_v58 = vpack.c.bf16 %v1170_v50, %v1170_v50  ;;  %2212 = vrcp.f32 %v1073_v26 }
 0x1b8   : > { %2214 = vrcp.f32 %v1076_v40  ;;  %v1203_v56 = vpack.c.bf16 %v1171_v57, %v1171_v57 }
 0x1b9   : > { %v1366_v2 = vunpack.c.l.b16 %v1202_v58 }
 0x1ba   : > { %v1367_v51 = vunpack.c.l.b16 %v1203_v56 }
 0x1bb   : > { %v2209_v0 = vpop.eup %2208 }
 0x1bc   : > { %v2211_v15 = vpop.eup %2210  ;;  %v1368_v53 = vpack.c.b16 %v1367_v51, %v1366_v2  ;;  %v1169_v62 = vmul.f32 %v2209_v0, %v2560_v28  ;;  %v1088_v61 = vpop.xlane.xlu0 %1087 }
 0x1bd   : > { %v2213_v14 = vpop.eup %2212  ;;  %v1172_v41 = vmul.f32 %v2211_v15, %v2557_v18  ;;  %v1079_v54 = vpop.xlane.xlu1 %1078  ;;  %v2107_v18 = vld [vmem:[%s2656_s24 + $0x48] sm:$0xff] }
 0x1be   : > { %v2215_v24 = vpop.eup %2214  ;;  %v1201_v19 = vpack.c.bf16 %v1169_v62, %v1169_v62  ;;  %v1173_v3 = vmul.f32 %v2213_v14, %v2562_v34  ;;  %2216 = vrcp.f32 %v1079_v54  ;;  %v1100_v17 = vpop.xlane.xlu2 %1099  ;;  %1497 = vmatpush.bf16.msra.mxu1 %v2107_v18  ;;  %v2111_v15 = vld [vmem:[%s2656_s24 + $0x68] sm:$0xff] }
 0x1bf   : > { %v1204_v11 = vpack.c.bf16 %v1172_v41, %v1172_v41  ;;  %2009 = vmatmul.msk.bf16.vlgmr.msrb.gmra.mxu1 %vm839_vm1, %v1368_v53  ;;  %v1174_v29 = vmul.f32 %v2215_v24, %v2545_v1  ;;  %2218 = vrcp.f32 %v1100_v17 }
 0x1c0   : > { %v1339_v38 = vunpack.c.l.b16 %v1201_v19  ;;  %v1205_v28 = vpack.c.bf16 %v1173_v3, %v1173_v3 }
 0x1c1   : > { %v1394_v40 = vunpack.c.l.b16 %v1204_v11  ;;  %v1206_v4 = vpack.c.bf16 %v1174_v29, %v1174_v29 }
 0x1c2   : > { %v1340_v36 = vpack.c.b16 %v1339_v38, %v1338_v10  ;;  %v1395_v37 = vunpack.c.l.b16 %v1205_v28  ;;  %1609 = vmatpush.bf16.msrb.mxu1 %v2111_v15 }
 0x1c3   : > { %v1422_v55 = vunpack.c.l.b16 %v1206_v4 }
 0x1c4   : > { %v2217_v27 = vpop.eup %2216  ;;  %v1396_v30 = vpack.c.b16 %v1395_v37, %v1394_v40  ;;  %2004 = vmatmul.msk.bf16.vlgmr.msrb.gmra.mxu0 %vm839_vm1, %v1340_v36  ;;  %v1094_v34 = vpop.xlane.xlu0 %1093 }
 0x1c5   : > { %v1175_v6 = vmul.f32 %v2217_v27, %v2572_v42  ;;  %v1082_v12 = vpop.xlane.xlu1 %1081  ;;  %v2219_v48 = vpop.eup %2218 }
 0x1c6   : > { %2220 = vrcp.f32 %v1082_v12  ;;  %2014 = vmatmul.msk.bf16.vlgmr.msrb.gmra.mxu2 %vm839_vm1, %v1396_v30  ;;  %v1085_v1 = vpop.xlane.xlu2 %1084  ;;  %v1182_v51 = vmul.f32 %v2219_v48, %v2577_v52 }
 0x1c7   : > { %v1207_v46 = vpack.c.bf16 %v1175_v6, %v1175_v6  ;;  %2222 = vrcp.f32 %v1085_v1  ;;  %1637 = vmatpush.bf16.msrb.mxu2 %v2112_v21 }
 0x1c8   : > { %2224 = vrcp.f32 %v1094_v34 }
 0x1c9   : > { %v1423_v20 = vunpack.c.l.b16 %v1207_v46 }
 0x1cb   : > { %v1424_v44 = vpack.c.b16 %v1423_v20, %v1422_v55 }
 0x1cc   : > { %v2221_v50 = vpop.eup %2220  ;;  %v1103_v23 = vpop.xlane.xlu0 %1102 }
 0x1cd   : > { %v2223_v57 = vpop.eup %2222  ;;  %v1176_v42 = vmul.f32 %v2221_v50, %v2587_v59  ;;  %2226 = vrcp.f32 %v1103_v23  ;;  %v1097_v26 = vpop.xlane.xlu1 %1096  ;;  %2019 = vmatmul.msk.bf16.vlgmr.msrb.gmra.mxu3 %vm839_vm1, %v1424_v44  ;;  %v2110_v59 = vld [vmem:[%s2656_s24 + $0x60] sm:$0xff] }
 0x1ce   : > { %v2225_v58 = vpop.eup %2224  ;;  %v1177_v13 = vmul.f32 %v2223_v57, %v2596_v16  ;;  %2228 = vrcp.f32 %v1097_v26  ;;  %1665 = vmatpush.bf16.msrb.mxu3 %v2113_v47  ;;  %1581 = vmatpush.bf16.msrb.mxu0 %v2110_v59  ;;  %v1214_v16 = vpack.c.bf16 %v1182_v51, %v1182_v51  ;;  %v1118_v24 = vpop.xlane.xlu2 %1117 }
 0x1cf   : > { %v1208_v56 = vpack.c.bf16 %v1176_v42, %v1176_v42  ;;  %2230 = vrcp.f32 %v1088_v61  ;;  %v1180_v7 = vmul.f32 %v2225_v58, %v2590_v60 }
 0x1d0   : > { %v1209_v2 = vpack.c.bf16 %v1177_v13, %v1177_v13 }
 0x1d1   : > { %v1450_v32 = vunpack.c.l.b16 %v1208_v56  ;;  %v1212_v54 = vpack.c.bf16 %v1180_v7, %v1180_v7 }
 0x1d2   : > { %v1451_v0 = vunpack.c.l.b16 %v1209_v2 }
 0x1d3   : > { %v2227_v63 = vpop.eup %2226  ;;  %v1506_v10 = vunpack.c.l.b16 %v1212_v54 }
 0x1d4   : > { %v2229_v53 = vpop.eup %2228  ;;  %v1452_v62 = vpack.c.b16 %v1451_v0, %v1450_v32  ;;  %v1183_v14 = vmul.f32 %v2227_v63, %v2604_v33  ;;  %v1106_v41 = vpop.xlane.xlu0 %1105  ;;  %v1534_v33 = vunpack.c.l.b16 %v1214_v16 }
 0x1d5   : > { %v1181_v61 = vmul.f32 %v2229_v53, %v2602_v22  ;;  %v1091_v52 = vpop.xlane.xlu1 %1090  ;;  %v2231_v19 = vpop.eup %2230 }
 0x1d6   : > { %v1215_v60 = vpack.c.bf16 %v1183_v14, %v1183_v14  ;;  %2232 = vrcp.f32 %v1091_v52  ;;  %2024 = vmatmul.msk.bf16.vlgmr.msra.gmra.mxu0 %vm839_vm1, %v1452_v62  ;;  %v1178_v11 = vmul.f32 %v2231_v19, %v2575_v45 }
 0x1d7   : > { %v1213_v3 = vpack.c.bf16 %v1181_v61, %v1181_v61  ;;  %2234 = vrcp.f32 %v1118_v24 }
 0x1d8   : > { %v1535_v17 = vunpack.c.l.b16 %v1215_v60  ;;  %v1210_v22 = vpack.c.bf16 %v1178_v11, %v1178_v11 }
 0x1d9   : > { %v1507_v38 = vunpack.c.l.b16 %v1213_v3 }
 0x1da   : > { %v1536_v28 = vpack.c.b16 %v1535_v17, %v1534_v33  ;;  %v1478_v34 = vunpack.c.l.b16 %v1210_v22 }
 0x1db   : > { %v1508_v29 = vpack.c.b16 %v1507_v38, %v1506_v10 }
 0x1dc   : > { %v2233_v40 = vpop.eup %2232  ;;  %v1121_v36 = vpop.xlane.xlu0 %1120 }
 0x1dd   : > { %v1179_v37 = vmul.f32 %v2233_v40, %v2618_v43  ;;  %2236 = vrcp.f32 %v1121_v36  ;;  %v1124_v18 = vpop.xlane.xlu1 %1123  ;;  %2034 = vmatmul.msk.bf16.vlgmr.msra.gmra.mxu2 %vm839_vm1, %v1508_v29  ;;  %2039 = vmatmul.msk.bf16.vlgmr.msra.gmra.mxu3 %vm839_vm1, %v1536_v28  ;;  %v2235_v27 = vpop.eup %2234 }
 0x1de   : > { %2238 = vrcp.f32 %v1124_v18  ;;  %v1127_v30 = vpop.xlane.xlu2 %1126  ;;  %v1188_v4 = vmul.f32 %v2235_v27, %v2606_v35 }
 0x1df   : > { %v1211_v45 = vpack.c.bf16 %v1179_v37, %v1179_v37  ;;  %2240 = vrcp.f32 %v1127_v30 }
 0x1e0   : > { %2242 = vrcp.f32 %v1106_v41  ;;  %v1220_v21 = vpack.c.bf16 %v1188_v4, %v1188_v4 }
 0x1e1   : > { %v1479_v6 = vunpack.c.l.b16 %v1211_v45 }
 0x1e3   : > { %v2237_v12 = vpop.eup %2236  ;;  %v1480_v1 = vpack.c.b16 %v1479_v6, %v1478_v34 }
 0x1e4   : > { %v2239_v46 = vpop.eup %2238  ;;  %v1189_v43 = vmul.f32 %v2237_v12, %v2630_v49  ;;  %v1115_v55 = vpop.xlane.xlu0 %1114  ;;  %v1618_v49 = vunpack.c.l.b16 %v1220_v21 }
 0x1e5   : > { %v2241_v20 = vpop.eup %2240  ;;  %v1190_v47 = vmul.f32 %v2239_v46, %v2628_v25  ;;  %2244 = vrcp.f32 %v1115_v55  ;;  %v1109_v48 = vpop.xlane.xlu1 %1108  ;;  %2029 = vmatmul.msk.bf16.vlgmr.msra.gmra.mxu1 %vm839_vm1, %v1480_v1 }
 0x1e6   : > { %v2243_v44 = vpop.eup %2242  ;;  %v1221_v50 = vpack.c.bf16 %v1189_v43, %v1189_v43  ;;  %v1191_v23 = vmul.f32 %v2241_v20, %v2634_v9  ;;  %2246 = vrcp.f32 %v1109_v48  ;;  %v1112_v35 = vpop.xlane.xlu2 %1111 }
 0x1e7   : > { %v1222_v57 = vpack.c.bf16 %v1190_v47, %v1190_v47  ;;  %2248 = vrcp.f32 %v1112_v35  ;;  %v1184_v58 = vmul.f32 %v2243_v44, %v2615_v39 }
 0x1e8   : > { %v1619_v42 = vunpack.c.l.b16 %v1221_v50  ;;  %v1223_v26 = vpack.c.bf16 %v1191_v23, %v1191_v23 }
 0x1e9   : > { %v1646_v13 = vunpack.c.l.b16 %v1222_v57  ;;  %v1216_v59 = vpack.c.bf16 %v1184_v58, %v1184_v58 }
 0x1ea   : > { %v1647_v56 = vunpack.c.l.b16 %v1223_v26  ;;  %v1620_v2 = vpack.c.b16 %v1619_v42, %v1618_v49 }
 0x1eb   : > { %v2245_v25 = vpop.eup %2244  ;;  %v1562_v62 = vunpack.c.l.b16 %v1216_v59 }
 0x1ec   : > { %v2247_v51 = vpop.eup %2246  ;;  %v1648_v7 = vpack.c.b16 %v1647_v56, %v1646_v13  ;;  %v1187_v32 = vmul.f32 %v2245_v25, %v2640_v5 }
 0x1ed   : > { %v2249_v0 = vpop.eup %2248  ;;  %v1185_v9 = vmul.f32 %v2247_v51, %v2642_v8  ;;  %2054 = vmatmul.msk.bf16.vlgmr.msrb.gmra.mxu2 %vm839_vm1, %v1620_v2 }
 0x1ee   : > { %v1219_v15 = vpack.c.bf16 %v1187_v32, %v1187_v32  ;;  %v1186_v63 = vmul.f32 %v2249_v0, %v2644_v31  ;;  %2059 = vmatmul.msk.bf16.vlgmr.msrb.gmra.mxu3 %vm839_vm1, %v1648_v7 }
 0x1ef   : > { %v1217_v39 = vpack.c.bf16 %v1185_v9, %v1185_v9 }
 0x1f0   : > { %v1218_v53 = vpack.c.bf16 %v1186_v63, %v1186_v63  ;;  %v1591_v41 = vunpack.c.l.b16 %v1219_v15 }
 0x1f1   : > { %v1563_v14 = vunpack.c.l.b16 %v1217_v39 }
 0x1f2   : > { %v1590_v16 = vunpack.c.l.b16 %v1218_v53 }
 0x1f3   : > { %v1564_v54 = vpack.c.b16 %v1563_v14, %v1562_v62 }
 0x1f4   : > { %v1592_v5 = vpack.c.b16 %v1591_v41, %v1590_v16 }
 0x1f5   : > { %2044 = vmatmul.msk.bf16.vlgmr.msrb.gmra.mxu0 %vm839_vm1, %v1564_v54 }
 0x1f6   : > { %2049 = vmatmul.msk.bf16.vlgmr.msrb.gmra.mxu1 %vm839_vm1, %v1592_v5 }
 0x22a   : > { %v1247_v8 = vpop.f32.mrf.mxu0 }
 0x22b   : > { %v1672_v31 = vpack.c.bf16 %v1247_v8, %v1247_v8 }
 0x22c   : > { %v1275_v61 = vpop.f32.mrf.mxu1 }
 0x22d   : > { %1705 = vst.msk [vmem:[%s2726_s27] sm:$0xf] %vm1704_vm2, %v1672_v31  ;;  %v1674_v24 = vpack.c.bf16 %v1275_v61, %v1275_v61 }
 0x22f   : > { %1707 = vst.msk [vmem:[%s2726_s27 + $0x8] sm:$0xf] %vm1704_vm2, %v1674_v24 }
 0x231   : > { %v1303_v52 = vpop.f32.mrf.mxu2 }
 0x232   : > { %v1676_v19 = vpack.c.bf16 %v1303_v52, %v1303_v52  ;;  %v1249_v60 = vpop.f32.mrf.mxu0 }
 0x233   : > { %v1673_v3 = vpack.c.bf16 %v1249_v60, %v1249_v60 }
 0x234   : > { %1709 = vst.msk [vmem:[%s2726_s27 + $0x10] sm:$0xf] %vm1704_vm2, %v1676_v19  ;;  %v1277_v17 = vpop.f32.mrf.mxu1 }
 0x235   : > { %1706 = vst.msk [vmem:[%s2726_s27 + $0x4] sm:$0xf] %vm1704_vm2, %v1673_v3  ;;  %v1675_v11 = vpack.c.bf16 %v1277_v17, %v1277_v17 }
 0x237   : > { %1708 = vst.msk [vmem:[%s2726_s27 + $0xc] sm:$0xf] %vm1704_vm2, %v1675_v11 }
 0x238   : > { %v1331_v33 = vpop.f32.mrf.mxu3 }
 0x239   : > { %v1305_v10 = vpop.f32.mrf.mxu2  ;;  %v1678_v38 = vpack.c.bf16 %v1331_v33, %v1331_v33 }
 0x23a   : > { %v1677_v28 = vpack.c.bf16 %v1305_v10, %v1305_v10 }
 0x23b   : > { %1711 = vst.msk [vmem:[%s2726_s27 + $0x18] sm:$0xf] %vm1704_vm2, %v1678_v38 }
 0x23c   : > { %1710 = vst.msk [vmem:[%s2726_s27 + $0x14] sm:$0xf] %vm1704_vm2, %v1677_v28  ;;  %v1387_v29 = vpop.f32.mrf.mxu1 }
 0x23d   : > { %v1682_v40 = vpack.c.bf16 %v1387_v29, %v1387_v29 }
 0x23f   : > { %1715 = vst.msk [vmem:[%s2726_s27 + $0x28] sm:$0xf] %vm1704_vm2, %v1682_v40 }
 0x240   : > { %v1333_v36 = vpop.f32.mrf.mxu3 }
 0x241   : > { %v1679_v22 = vpack.c.bf16 %v1333_v36, %v1333_v36  ;;  %v1359_v37 = vpop.f32.mrf.mxu0 }
 0x242   : > { %v1680_v18 = vpack.c.bf16 %v1359_v37, %v1359_v37 }
 0x243   : > { %1712 = vst.msk [vmem:[%s2726_s27 + $0x1c] sm:$0xf] %vm1704_vm2, %v1679_v22 }
 0x244   : > { %1713 = vst.msk [vmem:[%s2726_s27 + $0x20] sm:$0xf] %vm1704_vm2, %v1680_v18  ;;  %v1389_v27 = vpop.f32.mrf.mxu1 }
 0x245   : > { %v1683_v30 = vpack.c.bf16 %v1389_v27, %v1389_v27 }
 0x247   : > { %1716 = vst.msk [vmem:[%s2726_s27 + $0x2c] sm:$0xf] %vm1704_vm2, %v1683_v30 }
 0x249   : > { %v1361_v45 = vpop.f32.mrf.mxu0  ;;  %v1415_v34 = vpop.f32.mrf.mxu2 }
 0x24a   : > { %v1681_v4 = vpack.c.bf16 %v1361_v45, %v1361_v45  ;;  %v1684_v6 = vpack.c.bf16 %v1415_v34, %v1415_v34 }
 0x24c   : > { %1714 = vst.msk [vmem:[%s2726_s27 + $0x24] sm:$0xf] %vm1704_vm2, %v1681_v4 }
 0x24d   : > { %1717 = vst.msk [vmem:[%s2726_s27 + $0x30] sm:$0xf] %vm1704_vm2, %v1684_v6 }
 0x250   : > { %v1443_v12 = vpop.f32.mrf.mxu3 }
 0x251   : > { %v1417_v1 = vpop.f32.mrf.mxu2  ;;  %v1686_v46 = vpack.c.bf16 %v1443_v12, %v1443_v12 }
 0x252   : > { %v1685_v43 = vpack.c.bf16 %v1417_v1, %v1417_v1 }
 0x253   : > { %1719 = vst.msk [vmem:[%s2726_s27 + $0x38] sm:$0xf] %vm1704_vm2, %v1686_v46  ;;  %v1471_v55 = vpop.f32.mrf.mxu0 }
 0x254   : > { %1718 = vst.msk [vmem:[%s2726_s27 + $0x34] sm:$0xf] %vm1704_vm2, %v1685_v43  ;;  %v1688_v20 = vpack.c.bf16 %v1471_v55, %v1471_v55 }
 0x256   : > { %1721 = vst.msk [vmem:[%s2726_s27 + $0x40] sm:$0xf] %vm1704_vm2, %v1688_v20 }
 0x258   : > { %v1445_v21 = vpop.f32.mrf.mxu3 }
 0x259   : > { %v1687_v47 = vpack.c.bf16 %v1445_v21, %v1445_v21 }
 0x25b   : > { %1720 = vst.msk [vmem:[%s2726_s27 + $0x3c] sm:$0xf] %vm1704_vm2, %v1687_v47  ;;  %v1473_v48 = vpop.f32.mrf.mxu0 }
 0x25c   : > { %v1689_v44 = vpack.c.bf16 %v1473_v48, %v1473_v48 }
 0x25e   : > { %1722 = vst.msk [vmem:[%s2726_s27 + $0x44] sm:$0xf] %vm1704_vm2, %v1689_v44 }
 0x260   : > { %v1527_v50 = vpop.f32.mrf.mxu2  ;;  %v1555_v23 = vpop.f32.mrf.mxu3 }
 0x261   : > { %v1692_v35 = vpack.c.bf16 %v1527_v50, %v1527_v50  ;;  %v1694_v57 = vpack.c.bf16 %v1555_v23, %v1555_v23 }
 0x262   : > { %v1499_v42 = vpop.f32.mrf.mxu1 }
 0x263   : > { %1725 = vst.msk [vmem:[%s2726_s27 + $0x50] sm:$0xf] %vm1704_vm2, %v1692_v35  ;;  %v1690_v26 = vpack.c.bf16 %v1499_v42, %v1499_v42 }
 0x264   : > { %1727 = vst.msk [vmem:[%s2726_s27 + $0x58] sm:$0xf] %vm1704_vm2, %v1694_v57 }
 0x265   : > { %1723 = vst.msk [vmem:[%s2726_s27 + $0x48] sm:$0xf] %vm1704_vm2, %v1690_v26 }
 0x268   : > { %v1529_v49 = vpop.f32.mrf.mxu2  ;;  %v1557_v58 = vpop.f32.mrf.mxu3 }
 0x269   : > { %v1693_v13 = vpack.c.bf16 %v1529_v49, %v1529_v49  ;;  %v1695_v56 = vpack.c.bf16 %v1557_v58, %v1557_v58 }
 0x26a   : > { %v1501_v25 = vpop.f32.mrf.mxu1 }
 0x26b   : > { %1726 = vst.msk [vmem:[%s2726_s27 + $0x54] sm:$0xf] %vm1704_vm2, %v1693_v13  ;;  %v1691_v2 = vpack.c.bf16 %v1501_v25, %v1501_v25 }
 0x26c   : > { %1728 = vst.msk [vmem:[%s2726_s27 + $0x5c] sm:$0xf] %vm1704_vm2, %v1695_v56 }
 0x26d   : > { %1724 = vst.msk [vmem:[%s2726_s27 + $0x4c] sm:$0xf] %vm1704_vm2, %v1691_v2 }
 0x270   : > { %v1639_v51 = vpop.f32.mrf.mxu2 }
 0x271   : > { %v1700_v7 = vpack.c.bf16 %v1639_v51, %v1639_v51  ;;  %v1667_v32 = vpop.f32.mrf.mxu3 }
 0x272   : > { %v1702_v0 = vpack.c.bf16 %v1667_v32, %v1667_v32  ;;  %v1583_v59 = vpop.f32.mrf.mxu0 }
 0x273   : > { %1733 = vst.msk [vmem:[%s2726_s27 + $0x70] sm:$0xf] %vm1704_vm2, %v1700_v7  ;;  %v1696_v9 = vpack.c.bf16 %v1583_v59, %v1583_v59  ;;  %v1611_v15 = vpop.f32.mrf.mxu1 }
 0x274   : > { %1735 = vst.msk [vmem:[%s2726_s27 + $0x78] sm:$0xf] %vm1704_vm2, %v1702_v0  ;;  %v1698_v63 = vpack.c.bf16 %v1611_v15, %v1611_v15 }
 0x275   : > { %1729 = vst.msk [vmem:[%s2726_s27 + $0x60] sm:$0xf] %vm1704_vm2, %v1696_v9 }
 0x276   : > { %1731 = vst.msk [vmem:[%s2726_s27 + $0x68] sm:$0xf] %vm1704_vm2, %v1698_v63 }
 0x278   : > { %v1641_v39 = vpop.f32.mrf.mxu2 }
 0x279   : > { %v1701_v53 = vpack.c.bf16 %v1641_v39, %v1641_v39  ;;  %v1669_v62 = vpop.f32.mrf.mxu3 }
 0x27a   : > { %v1703_v14 = vpack.c.bf16 %v1669_v62, %v1669_v62  ;;  %v1585_v41 = vpop.f32.mrf.mxu0 }
 0x27b   : > { %1734 = vst.msk [vmem:[%s2726_s27 + $0x74] sm:$0xf] %vm1704_vm2, %v1701_v53  ;;  %v1697_v16 = vpack.c.bf16 %v1585_v41, %v1585_v41  ;;  %v1613_v54 = vpop.f32.mrf.mxu1 }
 0x27c   : > { %1736 = vst.msk [vmem:[%s2726_s27 + $0x7c] sm:$0xf] %vm1704_vm2, %v1703_v14  ;;  %v1699_v5 = vpack.c.bf16 %v1613_v54, %v1613_v54 }
 0x27d   : > { %1730 = vst.msk [vmem:[%s2726_s27 + $0x64] sm:$0xf] %vm1704_vm2, %v1697_v16 }
 0x27e   : > { %1732 = vst.msk [vmem:[%s2726_s27 + $0x6c] sm:$0xf] %vm1704_vm2, %v1699_v5 }
 0x27f PF: > { %s13_s12 = sadd.s32 1, %s2256_s12  }
 0x280   : > { %p10_p4 = scmp.ge.s32.totalorder %s13_s12, 4  }
 0x282   :  { %12 = sbr.rel (!%p10_p4) target bundleno = 1 (0x1), region = 68 }

// kernel: _lambda_.28
= control target key start
LH: loop header
LB: loop body
LE: loop exit
PB: predicated region body
PF: predicated region fallthrough
CT: control target
= control target key end

     0   :  { %s409_s12 = smov 0   ;;  %s444_s0 = inlined_call_operand.vmem [shape: bf16[128,16], index: 0, kind: input, shape index: {}]   ;;  %s445_s1 = inlined_call_operand.vmem [shape: bf16[16,16], index: 1, kind: input, shape index: {}]   ;;  %s446_s2 = inlined_call_operand.vmem [shape: f32[1,16], index: 2, kind: input, shape index: {}]   ;;  %s447_s3 = inlined_call_operand.vmem [shape: f32[128,16], index: 3, kind: output, shape index: {}]  }
   0x1 LB: > { %s329_s13 = sadd.s32 4294967295, %s387_s12   ;;  %p333_p0 = scmp.ge.s32.totalorder %s387_s12, 1  ;;  %s387_s12 = sphi %s409_s12, %s13_s12  }
   0x2   : > { %p138_p1 = scmp.lt.s32.totalorder %s387_s12, 3 }
   0x4   : > { %p139_p2 = pnand %p333_p0, %p138_p1 }
   0x5   : > { %s334_s16 = sshll.u32 (!%p139_p2), %s329_s13, 3 }
   0x6   : > { %142 = sbr.rel (%p139_p2) target bundleno = 162 (0xa2), region = 32  ;;  %p163_p3 = scmp.lt.s32.totalorder (!%p139_p2), %s334_s16, 15 }
   0xb   : > { %v368_v0 = vld [vmem:[%s445_s1] sm:$0xff]  ;;  %s449_s16 = smov (!%p163_p3, %s334_s16), 15  ;;  %vm215_vm0 = vcmask 130048  }
   0xc   : > { %235 = vmatpush.bf16.msra.mxu0 %v368_v0  ;;  %369 = vmatpush.bf16.msra.mxu1 %v368_v0  ;;  %s335_s17 = sshll.u32 %s449_s16, 2  ;;  %v380_v5 = vld [vmem:[%s446_s2] ss:$0 sm:$0xff]  ;;  %s337_s23 = sshll.u32 %s449_s16, 3 }
   0xd   : > { %370 = vmatpush.bf16.msra.mxu2 %v368_v0  ;;  %371 = vmatpush.bf16.msra.mxu3 %v368_v0  ;;  %s166_s20 = scalar_lea.vmem %s444_s0, %s335_s17  ;;  %s172_s26 = scalar_lea.vmem %s447_s3, %s337_s23 }
   0xe   : > { %v364_v1 = vld [vmem:[%s166_s20] sm:$0xff]  ;;  %v365_v2 = vld [vmem:[%s166_s20 + $0x8] sm:$0xff]  ;;  %v366_v3 = vld [vmem:[%s166_s20 + $0x10] sm:$0xff] }
   0xf   : > { %v367_v4 = vld [vmem:[%s166_s20 + $0x18] sm:$0xff]  ;;  %358 = vmatmul.msk.bf16.vlgmr.msra.gmra.mxu0 %vm215_vm0, %v364_v1  ;;  %359 = vmatmul.msk.bf16.vlgmr.msra.gmra.mxu1 %vm215_vm0, %v365_v2 }
  0x10   : > { %360 = vmatmul.msk.bf16.vlgmr.msra.gmra.mxu2 %vm215_vm0, %v366_v3  ;;  %361 = vmatmul.msk.bf16.vlgmr.msra.gmra.mxu3 %vm215_vm0, %v367_v4 }
  0x8c   : > { %v237_v6 = vpop.f32.mrf.mxu0  ;;  %v242_v7 = vpop.f32.mrf.mxu1 }
  0x8d   : > { %v238_v8 = vadd.f32 %v380_v5, %v237_v6  ;;  %v243_v9 = vadd.f32 %v380_v5, %v242_v7 }
  0x8f   : > { %v257_v10 = vmax.f32 %v238_v8, 0.0  ;;  %v259_v11 = vmax.f32 %v243_v9, 0.0 }
  0x91   : > { %265 = vst.msk [vmem:[%s172_s26] sm:$0xff] %vm215_vm0, %v257_v10 }
  0x92   : > { %267 = vst.msk [vmem:[%s172_s26 + $0x10] sm:$0xff] %vm215_vm0, %v259_v11 }
  0x93   : > { %v247_v12 = vpop.f32.mrf.mxu2  ;;  %v252_v13 = vpop.f32.mrf.mxu3 }
  0x94   : > { %v248_v14 = vadd.f32 %v380_v5, %v247_v12  ;;  %v253_v15 = vadd.f32 %v380_v5, %v252_v13  ;;  %v239_v16 = vpop.f32.mrf.mxu0  ;;  %v244_v17 = vpop.f32.mrf.mxu1 }
  0x95   : > { %v240_v18 = vadd.f32 %v380_v5, %v239_v16  ;;  %v245_v19 = vadd.f32 %v380_v5, %v244_v17 }
  0x96   : > { %v261_v20 = vmax.f32 %v248_v14, 0.0  ;;  %v263_v21 = vmax.f32 %v253_v15, 0.0 }
  0x97   : > { %v258_v22 = vmax.f32 %v240_v18, 0.0  ;;  %v260_v23 = vmax.f32 %v245_v19, 0.0 }
  0x98   : > { %269 = vst.msk [vmem:[%s172_s26 + $0x20] sm:$0xff] %vm215_vm0, %v261_v20 }
  0x99   : > { %271 = vst.msk [vmem:[%s172_s26 + $0x30] sm:$0xff] %vm215_vm0, %v263_v21 }
  0x9a   : > { %266 = vst.msk [vmem:[%s172_s26 + $0x8] sm:$0xff] %vm215_vm0, %v258_v22 }
  0x9b   : > { %268 = vst.msk [vmem:[%s172_s26 + $0x18] sm:$0xff] %vm215_vm0, %v260_v23  ;;  %v249_v24 = vpop.f32.mrf.mxu2  ;;  %v254_v25 = vpop.f32.mrf.mxu3 }
  0x9c   : > { %v250_v26 = vadd.f32 %v380_v5, %v249_v24  ;;  %v255_v27 = vadd.f32 %v380_v5, %v254_v25 }
  0x9e   : > { %v262_v28 = vmax.f32 %v250_v26, 0.0  ;;  %v264_v29 = vmax.f32 %v255_v27, 0.0 }
  0xa0   : > { %270 = vst.msk [vmem:[%s172_s26 + $0x28] sm:$0xff] %vm215_vm0, %v262_v28 }
  0xa1   : > { %272 = vst.msk [vmem:[%s172_s26 + $0x38] sm:$0xff] %vm215_vm0, %v264_v29 }
  0xa2 PF: > { %s13_s12 = sadd.s32 1, %s387_s12  }
  0xa3   : > { %p10_p4 = scmp.ge.s32.totalorder %s13_s12, 4  }
  0xa5   :  { %12 = sbr.rel (!%p10_p4) target bundleno = 1 (0x1), region = 62 }

// kernel: _lambda_.22
= control target key start
LH: loop header
LB: loop body
LE: loop exit
PB: predicated region body
PF: predicated region fallthrough
CT: control target
= control target key end

     0   :  { %s4393_s12 = smov 0   ;;  %s5847_s0 = inlined_call_operand.vmem [shape: bf16[128,4,4], index: 0, kind: input, shape index: {}]   ;;  %s5848_s1 = inlined_call_operand.vmem [shape: bf16[128,4,4], index: 1, kind: input, shape index: {}]   ;;  %s5849_s2 = inlined_call_operand.vmem [shape: bf16[128,4,4], index: 2, kind: input, shape index: {}]   ;;  %s5850_s3 = inlined_call_operand.vmem [shape: bf16[128,4,4], index: 3, kind: output, shape index: {}]  }
   0x1 LB: > { %s3958_s13 = sadd.s32 4294967295, %s4371_s12   ;;  %p3962_p0 = scmp.ge.s32.totalorder %s4371_s12, 1  ;;  %s4371_s12 = sphi %s4393_s12, %s13_s12  }
   0x2   : > { %p160_p1 = scmp.lt.s32.totalorder %s4371_s12, 3 }
   0x4   : > { %p161_p2 = pnand %p3962_p0, %p160_p1 }
   0x6   : > { %164 = sbr.rel (%p161_p2) target bundleno = 938 (0x3aa), region = 32 }
   0xb   : > { %s3963_s14 = sshll.u32 %s3958_s13, 6  ;;  %vm411_vm0 = vcmask 31744   ;;  %vm1763_vm2 = vcmask 27648   ;;  %vm2535_vm3 = vcmask 1041408   ;;  %vm3813_vm4 = vcmask 25600  }
   0xc   : > { %p195_p3 = scmp.lt.s32.totalorder %s3963_s14, 127 }
   0xe   : > { %s5866_s14 = smov (!%p195_p3, %s3963_s14), 127 }
   0xf   : > { %s4401_s15 = sshll.u32 %s5866_s14, 1 }
  0x10   : > { %s4407_s18 = scalar_lea.vmem %s5848_s1, %s4401_s15  ;;  %s4421_s21 = scalar_lea.vmem %s5847_s0, %s4401_s15 }
  0x11   : > { %v283_v0 = vld [vmem:[%s4407_s18] sm:$0x3]  ;;  %v284_v1 = vld [vmem:[%s4407_s18 + $0x2] sm:$0x3]  ;;  %v285_v2 = vld [vmem:[%s4407_s18 + $0x4] sm:$0x3]  ;;  %s5082_s24 = scalar_lea.vmem %s5849_s2, %s4401_s15  ;;  %s5508_s27 = scalar_lea.vmem %s5850_s3, %s4401_s15 }
  0x12   : > { %v416_v3 = vsel %vm411_vm0, %v283_v0, 0  ;;  %v435_v4 = vsel %vm411_vm0, %v284_v1, 0  ;;  %v454_v5 = vsel %vm411_vm0, %v285_v2, 0  ;;  %v286_v6 = vld [vmem:[%s4407_s18 + $0x6] sm:$0x3] }
  0x13   : > { %425 = vmatpush.bf16.xpose.msra.mxu0 %v416_v3  ;;  %444 = vmatpush.bf16.xpose.msra.mxu1 %v435_v4  ;;  %v473_v7 = vsel %vm411_vm0, %v286_v6, 0  ;;  %v289_v8 = vld [vmem:[%s4407_s18 + $0xc] sm:$0x3]  ;;  %v287_v10 = vld [vmem:[%s4407_s18 + $0x8] sm:$0x3] }
  0x14   : > { %463 = vmatpush.bf16.xpose.msra.mxu2 %v454_v5  ;;  %482 = vmatpush.bf16.xpose.msra.mxu3 %v473_v7  ;;  %v530_v9 = vsel %vm411_vm0, %v289_v8, 0  ;;  %v288_v11 = vld [vmem:[%s4407_s18 + $0xa] sm:$0x3]  ;;  %v219_v12 = vld [vmem:[%s4421_s21] sm:$0x3]  ;;  %v492_v13 = vsel %vm411_vm0, %v287_v10, 0 }
  0x15   : > { %v511_v14 = vsel %vm411_vm0, %v288_v11, 0  ;;  %v290_v15 = vld [vmem:[%s4407_s18 + $0xe] sm:$0x3]  ;;  %v220_v16 = vld [vmem:[%s4421_s21 + $0x2] sm:$0x3] }
  0x16   : > { %v221_v17 = vld [vmem:[%s4421_s21 + $0x4] sm:$0x3]  ;;  %v549_v18 = vsel %vm411_vm0, %v290_v15, 0  ;;  %v222_v19 = vld [vmem:[%s4421_s21 + $0x6] sm:$0x3] }
  0x17   : > { %v291_v20 = vld [vmem:[%s4407_s18 + $0x10] sm:$0x3]  ;;  %v292_v21 = vld [vmem:[%s4407_s18 + $0x12] sm:$0x3]  ;;  %v293_v24 = vld [vmem:[%s4407_s18 + $0x14] sm:$0x3] }
  0x18   : > { %v568_v22 = vsel %vm411_vm0, %v291_v20, 0  ;;  %v587_v23 = vsel %vm411_vm0, %v292_v21, 0  ;;  %v294_v25 = vld [vmem:[%s4407_s18 + $0x16] sm:$0x3]  ;;  %v606_v26 = vsel %vm411_vm0, %v293_v24, 0 }
  0x19   : > { %v625_v27 = vsel %vm411_vm0, %v294_v25, 0  ;;  %v223_v28 = vld [vmem:[%s4421_s21 + $0x8] sm:$0x3]  ;;  %v295_v29 = vld [vmem:[%s4407_s18 + $0x18] sm:$0x3] }
  0x1a   : > { %3971 = vmatmul.msk.bf16.vlgmr.msra.gmra.mxu0 %vm411_vm0, %v219_v12  ;;  %3972 = vmatmul.msk.bf16.vlgmr.msra.gmra.mxu1 %vm411_vm0, %v220_v16  ;;  %v297_v30 = vld [vmem:[%s4407_s18 + $0x1c] sm:$0x3]  ;;  %v224_v31 = vld [vmem:[%s4421_s21 + $0xa] sm:$0x3]  ;;  %v298_v32 = vld [vmem:[%s4407_s18 + $0x1e] sm:$0x3] }
  0x1b   : > { %501 = vmatpush.bf16.xpose.msrb.mxu0 %v492_v13  ;;  %520 = vmatpush.bf16.xpose.msrb.mxu1 %v511_v14  ;;  %v296_v33 = vld [vmem:[%s4407_s18 + $0x1a] sm:$0x3]  ;;  %v225_v34 = vld [vmem:[%s4421_s21 + $0xc] sm:$0x3]  ;;  %v226_v35 = vld [vmem:[%s4421_s21 + $0xe] sm:$0x3] }
  0x1c   : > { %539 = vmatpush.bf16.xpose.msrb.mxu2 %v530_v9  ;;  %558 = vmatpush.bf16.xpose.msrb.mxu3 %v549_v18  ;;  %v644_v36 = vsel %vm411_vm0, %v295_v29, 0  ;;  %v682_v37 = vsel %vm411_vm0, %v297_v30, 0  ;;  %v701_v38 = vsel %vm411_vm0, %v298_v32, 0  ;;  %v663_v39 = vsel %vm411_vm0, %v296_v33, 0  ;;  %v227_v40 = vld [vmem:[%s4421_s21 + $0x10] sm:$0x3] }
  0x1d   : > { %3973 = vmatmul.msk.bf16.vlgmr.msra.gmra.mxu2 %vm411_vm0, %v221_v17  ;;  %3974 = vmatmul.msk.bf16.vlgmr.msra.gmra.mxu3 %vm411_vm0, %v222_v19  ;;  %v299_v41 = vld [vmem:[%s4407_s18 + $0x20] sm:$0x3]  ;;  %v301_v42 = vld [vmem:[%s4407_s18 + $0x24] sm:$0x3]  ;;  %v228_v43 = vld [vmem:[%s4421_s21 + $0x12] sm:$0x3] }
  0x1e   : > { %v302_v44 = vld [vmem:[%s4407_s18 + $0x26] sm:$0x3]  ;;  %v300_v45 = vld [vmem:[%s4407_s18 + $0x22] sm:$0x3]  ;;  %v229_v46 = vld [vmem:[%s4421_s21 + $0x14] sm:$0x3] }
  0x1f   : > { %v230_v47 = vld [vmem:[%s4421_s21 + $0x16] sm:$0x3]  ;;  %v720_v48 = vsel %vm411_vm0, %v299_v41, 0  ;;  %v758_v49 = vsel %vm411_vm0, %v301_v42, 0  ;;  %v777_v50 = vsel %vm411_vm0, %v302_v44, 0  ;;  %v739_v51 = vsel %vm411_vm0, %v300_v45, 0 }
  0x20   : > { %v231_v52 = vld [vmem:[%s4421_s21 + $0x18] sm:$0x3]  ;;  %v303_v53 = vld [vmem:[%s4407_s18 + $0x28] sm:$0x3]  ;;  %v305_v54 = vld [vmem:[%s4407_s18 + $0x2c] sm:$0x3] }
  0x21   : > { %v232_v55 = vld [vmem:[%s4421_s21 + $0x1a] sm:$0x3]  ;;  %v306_v56 = vld [vmem:[%s4407_s18 + $0x2e] sm:$0x3]  ;;  %v304_v57 = vld [vmem:[%s4407_s18 + $0x2a] sm:$0x3] }
  0x22   : > { %v233_v58 = vld [vmem:[%s4421_s21 + $0x1c] sm:$0x3]  ;;  %v234_v59 = vld [vmem:[%s4421_s21 + $0x1e] sm:$0x3]  ;;  %v796_v60 = vsel %vm411_vm0, %v303_v53, 0  ;;  %v834_v61 = vsel %vm411_vm0, %v305_v54, 0 }
  0x23   : > { %577 = vmatpush.bf16.xpose.msra.mxu0 %v568_v22  ;;  %596 = vmatpush.bf16.xpose.msra.mxu1 %v587_v23  ;;  %v853_v62 = vsel %vm411_vm0, %v306_v56, 0  ;;  %v815_v63 = vsel %vm411_vm0, %v304_v57, 0  ;;  %v235_v0 = vld [vmem:[%s4421_s21 + $0x20] sm:$0x3]  ;;  %v307_v1 = vld [vmem:[%s4407_s18 + $0x30] sm:$0x3] }
  0x24   : > { %615 = vmatpush.bf16.xpose.msra.mxu2 %v606_v26  ;;  %634 = vmatpush.bf16.xpose.msra.mxu3 %v625_v27  ;;  %v309_v2 = vld [vmem:[%s4407_s18 + $0x34] sm:$0x3]  ;;  %v236_v3 = vld [vmem:[%s4421_s21 + $0x22] sm:$0x3]  ;;  %v310_v4 = vld [vmem:[%s4407_s18 + $0x36] sm:$0x3] }
  0x25   : > { %v308_v5 = vld [vmem:[%s4407_s18 + $0x32] sm:$0x3]  ;;  %v237_v6 = vld [vmem:[%s4421_s21 + $0x24] sm:$0x3]  ;;  %v238_v7 = vld [vmem:[%s4421_s21 + $0x26] sm:$0x3] }
  0x26   : > { %v872_v8 = vsel %vm411_vm0, %v307_v1, 0  ;;  %v910_v9 = vsel %vm411_vm0, %v309_v2, 0  ;;  %v929_v10 = vsel %vm411_vm0, %v310_v4, 0  ;;  %v891_v11 = vsel %vm411_vm0, %v308_v5, 0  ;;  %v239_v12 = vld [vmem:[%s4421_s21 + $0x28] sm:$0x3] }
  0x27   : > { %v311_v13 = vld [vmem:[%s4407_s18 + $0x38] sm:$0x3]  ;;  %v314_v14 = vld [vmem:[%s4407_s18 + $0x3e] sm:$0x3]  ;;  %v240_v15 = vld [vmem:[%s4421_s21 + $0x2a] sm:$0x3] }
  0x28   : > { %v312_v16 = vld [vmem:[%s4407_s18 + $0x3a] sm:$0x3]  ;;  %v313_v17 = vld [vmem:[%s4407_s18 + $0x3c] sm:$0x3]  ;;  %v241_v18 = vld [vmem:[%s4421_s21 + $0x2c] sm:$0x3] }
  0x29   : > { %v242_v19 = vld [vmem:[%s4421_s21 + $0x2e] sm:$0x3]  ;;  %v948_v20 = vsel %vm411_vm0, %v311_v13, 0  ;;  %v1005_v21 = vsel %vm411_vm0, %v314_v14, 0  ;;  %v967_v22 = vsel %vm411_vm0, %v312_v16, 0  ;;  %v986_v23 = vsel %vm411_vm0, %v313_v17, 0 }
  0x2a   : > { %3975 = vmatmul.msk.bf16.vlgmr.msrb.gmra.mxu0 %vm411_vm0, %v223_v28  ;;  %3976 = vmatmul.msk.bf16.vlgmr.msrb.gmra.mxu1 %vm411_vm0, %v224_v31  ;;  %v315_v24 = vld [vmem:[%s4407_s18 + $0x40] sm:$0x3]  ;;  %v243_v25 = vld [vmem:[%s4421_s21 + $0x30] sm:$0x3]  ;;  %v244_v26 = vld [vmem:[%s4421_s21 + $0x32] sm:$0x3] }
  0x2b   : > { %653 = vmatpush.bf16.xpose.msrb.mxu0 %v644_v36  ;;  %672 = vmatpush.bf16.xpose.msrb.mxu1 %v663_v39  ;;  %v245_v27 = vld [vmem:[%s4421_s21 + $0x34] sm:$0x3]  ;;  %v246_v28 = vld [vmem:[%s4421_s21 + $0x36] sm:$0x3]  ;;  %v316_v29 = vld [vmem:[%s4407_s18 + $0x42] sm:$0x3] }
  0x2c   : > { %v1024_v30 = vsel %vm411_vm0, %v315_v24, 0  ;;  %v1043_v31 = vsel %vm411_vm0, %v316_v29, 0  ;;  %v317_v32 = vld [vmem:[%s4407_s18 + $0x44] sm:$0x3]  ;;  %v318_v33 = vld [vmem:[%s4407_s18 + $0x46] sm:$0x3] }
  0x2d   : > { %3977 = vmatmul.msk.bf16.vlgmr.msrb.gmra.mxu2 %vm411_vm0, %v225_v34  ;;  %3978 = vmatmul.msk.bf16.vlgmr.msrb.gmra.mxu3 %vm411_vm0, %v226_v35  ;;  %v1062_v34 = vsel %vm411_vm0, %v317_v32, 0  ;;  %v1081_v35 = vsel %vm411_vm0, %v318_v33, 0  ;;  %v247_v36 = vld [vmem:[%s4421_s21 + $0x38] sm:$0x3]  ;;  %v250_v39 = vld [vmem:[%s4421_s21 + $0x3e] sm:$0x3] }
  0x2e   : > { %691 = vmatpush.bf16.xpose.msrb.mxu2 %v682_v37  ;;  %710 = vmatpush.bf16.xpose.msrb.mxu3 %v701_v38  ;;  %v248_v37 = vld [vmem:[%s4421_s21 + $0x3a] sm:$0x3]  ;;  %v249_v38 = vld [vmem:[%s4421_s21 + $0x3c] sm:$0x3]  ;;  %v322_v41 = vld [vmem:[%s4407_s18 + $0x4e] sm:$0x3] }
  0x2f   : > { %v319_v44 = vld [vmem:[%s4407_s18 + $0x48] sm:$0x3]  ;;  %v252_v53 = vld [vmem:[%s4421_s21 + $0x42] sm:$0x3]  ;;  %v253_v54 = vld [vmem:[%s4421_s21 + $0x44] sm:$0x3] }
  0x30   : > { %v1100_v45 = vsel %vm411_vm0, %v319_v44, 0  ;;  %v254_v56 = vld [vmem:[%s4421_s21 + $0x46] sm:$0x3]  ;;  %v326_v57 = vld [vmem:[%s4407_s18 + $0x56] sm:$0x3] }
  0x31   : > { %v255_v17 = vld [vmem:[%s4421_s21 + $0x48] sm:$0x3]  ;;  %v323_v44 = vld [vmem:[%s4407_s18 + $0x50] sm:$0x3] }
  0x3a   : > { %3979 = vmatmul.msk.bf16.vlgmr.msra.gmra.mxu0 %vm411_vm0, %v227_v40  ;;  %3980 = vmatmul.msk.bf16.vlgmr.msra.gmra.mxu1 %vm411_vm0, %v228_v43  ;;  %v321_v40 = vld [vmem:[%s4407_s18 + $0x4c] sm:$0x3]  ;;  %v1157_v43 = vsel %vm411_vm0, %v322_v41, 0  ;;  %v261_v41 = vld [vmem:[%s4421_s21 + $0x54] sm:$0x3] }
  0x3b   : > { %729 = vmatpush.bf16.xpose.msra.mxu0 %v720_v48  ;;  %748 = vmatpush.bf16.xpose.msra.mxu1 %v739_v51  ;;  %v1138_v42 = vsel %vm411_vm0, %v321_v40, 0  ;;  %v251_v51 = vld [vmem:[%s4421_s21 + $0x40] sm:$0x3] }
  0x3d   : > { %3981 = vmatmul.msk.bf16.vlgmr.msra.gmra.mxu2 %vm411_vm0, %v229_v46  ;;  %3982 = vmatmul.msk.bf16.vlgmr.msra.gmra.mxu3 %vm411_vm0, %v230_v47  ;;  %v1692_v46 = vlaneseq }
  0x3e   : > { %767 = vmatpush.bf16.xpose.msra.mxu2 %v758_v49  ;;  %786 = vmatpush.bf16.xpose.msra.mxu3 %v777_v50 }
  0x3f   : > { %v1693_v47 = vshrl.u32 %v1692_v46, 7  ;;  %v1695_v48 = vand.u32 127, %v1692_v46 }
  0x41   : > { %vm4558_vm1 = vcmp.le.s32.totalorder %v1695_v48, %v1693_v47  ;;  %v262_v47 = vld [vmem:[%s4421_s21 + $0x56] sm:$0x3]  ;;  %v1176_v48 = vsel %vm411_vm0, %v323_v44, 0 }
  0x4a   : > { %3983 = vmatmul.msk.bf16.vlgmr.msrb.gmra.mxu0 %vm411_vm0, %v231_v52  ;;  %3984 = vmatmul.msk.bf16.vlgmr.msrb.gmra.mxu1 %vm411_vm0, %v232_v55 }
  0x4b   : > { %805 = vmatpush.bf16.xpose.msrb.mxu0 %v796_v60  ;;  %824 = vmatpush.bf16.xpose.msrb.mxu1 %v815_v63  ;;  %v320_v60 = vld [vmem:[%s4407_s18 + $0x4a] sm:$0x3] }
  0x4d   : > { %3985 = vmatmul.msk.bf16.vlgmr.msrb.gmra.mxu2 %vm411_vm0, %v233_v58  ;;  %3986 = vmatmul.msk.bf16.vlgmr.msrb.gmra.mxu3 %vm411_vm0, %v234_v59  ;;  %v1233_v58 = vsel %vm411_vm0, %v326_v57, 0 }
  0x4e   : > { %843 = vmatpush.bf16.xpose.msrb.mxu2 %v834_v61  ;;  %862 = vmatpush.bf16.xpose.msrb.mxu3 %v853_v62  ;;  %v1119_v62 = vsel %vm411_vm0, %v320_v60, 0 }
  0x5a   : > { %3987 = vmatmul.msk.bf16.vlgmr.msra.gmra.mxu0 %vm411_vm0, %v235_v0  ;;  %3988 = vmatmul.msk.bf16.vlgmr.msra.gmra.mxu1 %vm411_vm0, %v236_v3 }
  0x5b   : > { %881 = vmatpush.bf16.xpose.msra.mxu0 %v872_v8  ;;  %900 = vmatpush.bf16.xpose.msra.mxu1 %v891_v11 }
  0x5d   : > { %3989 = vmatmul.msk.bf16.vlgmr.msra.gmra.mxu2 %vm411_vm0, %v237_v6  ;;  %3990 = vmatmul.msk.bf16.vlgmr.msra.gmra.mxu3 %vm411_vm0, %v238_v7 }
  0x5e   : > { %919 = vmatpush.bf16.xpose.msra.mxu2 %v910_v9  ;;  %938 = vmatpush.bf16.xpose.msra.mxu3 %v929_v10  ;;  %v325_v10 = vld [vmem:[%s4407_s18 + $0x54] sm:$0x3] }
  0x6a   : > { %3991 = vmatmul.msk.bf16.vlgmr.msrb.gmra.mxu0 %vm411_vm0, %v239_v12  ;;  %3992 = vmatmul.msk.bf16.vlgmr.msrb.gmra.mxu1 %vm411_vm0, %v240_v15  ;;  %v1214_v12 = vsel %vm411_vm0, %v325_v10, 0 }
  0x6b   : > { %957 = vmatpush.bf16.xpose.msrb.mxu0 %v948_v20  ;;  %976 = vmatpush.bf16.xpose.msrb.mxu1 %v967_v22 }
  0x6d   : > { %3993 = vmatmul.msk.bf16.vlgmr.msrb.gmra.mxu2 %vm411_vm0, %v241_v18  ;;  %3994 = vmatmul.msk.bf16.vlgmr.msrb.gmra.mxu3 %vm411_vm0, %v242_v19  ;;  %v256_v18 = vld [vmem:[%s4421_s21 + $0x4a] sm:$0x3] }
  0x6e   : > { %1014 = vmatpush.bf16.xpose.msrb.mxu3 %v1005_v21  ;;  %995 = vmatpush.bf16.xpose.msrb.mxu2 %v986_v23  ;;  %v257_v21 = vld [vmem:[%s4421_s21 + $0x4c] sm:$0x3]  ;;  %v258_v23 = vld [vmem:[%s4421_s21 + $0x4e] sm:$0x3] }
  0x7a   : > { %3995 = vmatmul.msk.bf16.vlgmr.msra.gmra.mxu0 %vm411_vm0, %v243_v25  ;;  %3996 = vmatmul.msk.bf16.vlgmr.msra.gmra.mxu1 %vm411_vm0, %v244_v26 }
  0x7b   : > { %1033 = vmatpush.bf16.xpose.msra.mxu0 %v1024_v30  ;;  %1052 = vmatpush.bf16.xpose.msra.mxu1 %v1043_v31 }
  0x7d   : > { %3997 = vmatmul.msk.bf16.vlgmr.msra.gmra.mxu2 %vm411_vm0, %v245_v27  ;;  %3998 = vmatmul.msk.bf16.vlgmr.msra.gmra.mxu3 %vm411_vm0, %v246_v28 }
  0x7e   : > { %1071 = vmatpush.bf16.xpose.msra.mxu2 %v1062_v34  ;;  %1090 = vmatpush.bf16.xpose.msra.mxu3 %v1081_v35 }
  0x8a   : > { %3999 = vmatmul.msk.bf16.vlgmr.msrb.gmra.mxu0 %vm411_vm0, %v247_v36  ;;  %4000 = vmatmul.msk.bf16.vlgmr.msrb.gmra.mxu1 %vm411_vm0, %v248_v37 }
  0x8b   : > { %1109 = vmatpush.bf16.xpose.msrb.mxu0 %v1100_v45  ;;  %1128 = vmatpush.bf16.xpose.msrb.mxu1 %v1119_v62  ;;  %v324_v45 = vld [vmem:[%s4407_s18 + $0x52] sm:$0x3]  ;;  %v259_v62 = vld [vmem:[%s4421_s21 + $0x50] sm:$0x3] }
  0x8d   : > { %4001 = vmatmul.msk.bf16.vlgmr.msrb.gmra.mxu2 %vm411_vm0, %v249_v38  ;;  %4002 = vmatmul.msk.bf16.vlgmr.msrb.gmra.mxu3 %vm411_vm0, %v250_v39 }
  0x8e   : > { %1147 = vmatpush.bf16.xpose.msrb.mxu2 %v1138_v42  ;;  %1166 = vmatpush.bf16.xpose.msrb.mxu3 %v1157_v43 }
  0x97   : > { %v427_v49 = vpop.f32.mrf.mxu0  ;;  %v446_v50 = vpop.f32.mrf.mxu1 }
  0x98   : > { %v1628_v55 = vmul.f32 0.5, %v427_v49  ;;  %v1629_v63 = vmul.f32 0.5, %v446_v50  ;;  %v1195_v49 = vsel %vm411_vm0, %v324_v45, 0 }
  0x9a   : > { %4003 = vmatmul.msk.bf16.vlgmr.msra.gmra.mxu0 %vm411_vm0, %v251_v51  ;;  %v4570_v59 = vsel %vm4558_vm1, %v1628_v55, -32767.0  ;;  %4004 = vmatmul.msk.bf16.vlgmr.msra.gmra.mxu1 %vm411_vm0, %v252_v53  ;;  %v4581_v5 = vsel %vm4558_vm1, %v1629_v63, -32767.0  ;;  %v329_v53 = vld [vmem:[%s4407_s18 + $0x5c] sm:$0x3] }
  0x9b   : > { %v1764_v61 = vsel %vm1763_vm2, %v4570_v59, -inf  ;;  %v1767_v9 = vsel %vm1763_vm2, %v4581_v5, -inf  ;;  %1185 = vmatpush.bf16.xpose.msra.mxu0 %v1176_v48  ;;  %1204 = vmatpush.bf16.xpose.msra.mxu1 %v1195_v49  ;;  %v1290_v55 = vsel %vm411_vm0, %v329_v53, 0  ;;  %v260_v63 = vld [vmem:[%s4421_s21 + $0x52] sm:$0x3] }
  0x9c   : > { %1765 = vmax.xlane.f32.xlu1 %v1764_v61  ;;  %v263_v48 = vld [vmem:[%s4421_s21 + $0x58] sm:$0x3] }
  0x9d   : > { %4005 = vmatmul.msk.bf16.vlgmr.msra.gmra.mxu2 %vm411_vm0, %v253_v54  ;;  %4006 = vmatmul.msk.bf16.vlgmr.msra.gmra.mxu3 %vm411_vm0, %v254_v56 }
  0x9e   : > { %1242 = vmatpush.bf16.xpose.msra.mxu3 %v1233_v58  ;;  %1223 = vmatpush.bf16.xpose.msra.mxu2 %v1214_v12 }
  0x9f   : > { %v429_v3 = vpop.f32.mrf.mxu0  ;;  %v448_v4 = vpop.f32.mrf.mxu1 }
  0xa0   : > { %v465_v0 = vpop.f32.mrf.mxu2  ;;  %v484_v1 = vpop.f32.mrf.mxu3  ;;  %v330_v4 = vld [vmem:[%s4407_s18 + $0x5e] sm:$0x3] }
  0xa1   : > { %v1630_v2 = vmul.f32 0.5, %v465_v0  ;;  %v1631_v6 = vmul.f32 0.5, %v484_v1 }
  0xa3   : > { %v4585_v7 = vsel %vm4558_vm1, %v1630_v2, -32767.0  ;;  %v4594_v11 = vsel %vm4558_vm1, %v1631_v6, -32767.0 }
  0xa4   : > { %v1770_v8 = vsel %vm1763_vm2, %v4585_v7, -inf  ;;  %1768 = vmax.xlane.f32.xlu1 %v1767_v9  ;;  %v1773_v20 = vsel %vm1763_vm2, %v4594_v11, -inf }
  0xa5   : > { %1771 = vmax.xlane.f32.xlu0 %v1770_v8  ;;  %v1309_v8 = vsel %vm411_vm0, %v330_v4, 0 }
  0xa7   : > { %v503_v15 = vpop.f32.mrf.mxu0  ;;  %v522_v16 = vpop.f32.mrf.mxu1 }
  0xa8   : > { %v467_v13 = vpop.f32.mrf.mxu2  ;;  %v486_v14 = vpop.f32.mrf.mxu3  ;;  %v1633_v19 = vmul.f32 0.5, %v522_v16  ;;  %v1632_v22 = vmul.f32 0.5, %v503_v15  ;;  %v265_v16 = vld [vmem:[%s4421_s21 + $0x5c] sm:$0x3] }
  0xaa   : > { %v4605_v24 = vsel %vm4558_vm1, %v1633_v19, -32767.0  ;;  %4007 = vmatmul.msk.bf16.vlgmr.msrb.gmra.mxu0 %vm411_vm0, %v255_v17  ;;  %4008 = vmatmul.msk.bf16.vlgmr.msrb.gmra.mxu1 %vm411_vm0, %v256_v18  ;;  %v4615_v26 = vsel %vm4558_vm1, %v1632_v22, -32767.0  ;;  %v328_v17 = vld [vmem:[%s4407_s18 + $0x5a] sm:$0x3] }
  0xab   : > { %v1779_v25 = vsel %vm1763_vm2, %v4605_v24, -inf  ;;  %v1776_v32 = vsel %vm1763_vm2, %v4615_v26, -inf  ;;  %v1271_v19 = vsel %vm411_vm0, %v328_v17, 0 }
  0xac   : > { %1780 = vmax.xlane.f32.xlu1 %v1779_v25  ;;  %1280 = vmatpush.bf16.xpose.msrb.mxu1 %v1271_v19 }
  0xad   : > { %1774 = vmax.xlane.f32.xlu0 %v1773_v20  ;;  %4009 = vmatmul.msk.bf16.vlgmr.msrb.gmra.mxu2 %vm411_vm0, %v257_v21  ;;  %v266_v21 = vld [vmem:[%s4421_s21 + $0x5e] sm:$0x3] }
  0xae   : > { %4010 = vmatmul.msk.bf16.vlgmr.msrb.gmra.mxu3 %vm411_vm0, %v258_v23  ;;  %1299 = vmatpush.bf16.xpose.msrb.mxu2 %v1290_v55 }
  0xaf   : > { %v505_v30 = vpop.f32.mrf.mxu0  ;;  %v524_v31 = vpop.f32.mrf.mxu1  ;;  %1318 = vmatpush.bf16.xpose.msrb.mxu3 %v1309_v8 }
  0xb0   : > { %v541_v27 = vpop.f32.mrf.mxu2  ;;  %v560_v28 = vpop.f32.mrf.mxu3 }
  0xb1   : > { %v1634_v29 = vmul.f32 0.5, %v541_v27  ;;  %v1635_v33 = vmul.f32 0.5, %v560_v28 }
  0xb3   : > { %v4621_v34 = vsel %vm4558_vm1, %v1634_v29, -32767.0  ;;  %v4627_v36 = vsel %vm4558_vm1, %v1635_v33, -32767.0 }
  0xb4   : > { %v1782_v35 = vsel %vm1763_vm2, %v4621_v34, -inf  ;;  %v1785_v43 = vsel %vm1763_vm2, %v4627_v36, -inf }
  0xb5   : > { %1783 = vmax.xlane.f32.xlu2 %v1782_v35  ;;  %1777 = vmax.xlane.f32.xlu0 %v1776_v32  ;;  %v264_v32 = vld [vmem:[%s4421_s21 + $0x5a] sm:$0x3] }
  0xb7   : > { %v579_v39 = vpop.f32.mrf.mxu0  ;;  %v598_v40 = vpop.f32.mrf.mxu1 }
  0xb8   : > { %v543_v37 = vpop.f32.mrf.mxu2  ;;  %v562_v38 = vpop.f32.mrf.mxu3  ;;  %v1636_v42 = vmul.f32 0.5, %v579_v39  ;;  %v1637_v46 = vmul.f32 0.5, %v598_v40  ;;  %v327_v40 = vld [vmem:[%s4407_s18 + $0x58] sm:$0x3] }
  0xba   : > { %v4639_v50 = vsel %vm4558_vm1, %v1636_v42, -32767.0  ;;  %v4648_v54 = vsel %vm4558_vm1, %v1637_v46, -32767.0  ;;  %4011 = vmatmul.msk.bf16.vlgmr.msra.gmra.mxu0 %vm411_vm0, %v259_v62  ;;  %4012 = vmatmul.msk.bf16.vlgmr.msra.gmra.mxu1 %vm411_vm0, %v260_v63  ;;  %v333_v63 = vld [vmem:[%s4407_s18 + $0x64] sm:$0x3] }
  0xbb   : > { %v1788_v51 = vsel %vm1763_vm2, %v4639_v50, -inf  ;;  %v1791_v0 = vsel %vm1763_vm2, %v4648_v54, -inf }
  0xbc   : > { %1789 = vmax.xlane.f32.xlu1 %v1788_v51 }
  0xbd   : > { %1786 = vmax.xlane.f32.xlu2 %v1785_v43  ;;  %4013 = vmatmul.msk.bf16.vlgmr.msra.gmra.mxu2 %vm411_vm0, %v261_v41  ;;  %v1252_v41 = vsel %vm411_vm0, %v327_v40, 0 }
  0xbe   : > { %4014 = vmatmul.msk.bf16.vlgmr.msra.gmra.mxu3 %vm411_vm0, %v262_v47  ;;  %1261 = vmatpush.bf16.xpose.msrb.mxu0 %v1252_v41 }
  0xbf   : > { %v581_v60 = vpop.f32.mrf.mxu0  ;;  %v600_v61 = vpop.f32.mrf.mxu1 }
  0xc0   : > { %v617_v56 = vpop.f32.mrf.mxu2  ;;  %v636_v57 = vpop.f32.mrf.mxu3 }
  0xc1   : > { %v1639_v58 = vmul.f32 0.5, %v636_v57  ;;  %v1638_v1 = vmul.f32 0.5, %v617_v56 }
  0xc3   : > { %v4657_v2 = vsel %vm4558_vm1, %v1639_v58, -32767.0  ;;  %v4666_v6 = vsel %vm4558_vm1, %v1638_v1, -32767.0 }
  0xc4   : > { %v1797_v3 = vsel %vm1763_vm2, %v4657_v2, -inf  ;;  %v1794_v15 = vsel %vm1763_vm2, %v4666_v6, -inf }
  0xc5   : > { %1792 = vmax.xlane.f32.xlu2 %v1791_v0  ;;  %1798 = vmax.xlane.f32.xlu0 %v1797_v3  ;;  %v1366_v0 = vsel %vm411_vm0, %v333_v63, 0 }
  0xc6   : > { %1375 = vmatpush.bf16.xpose.msra.mxu2 %v1366_v0 }
  0xc7   : > { %v655_v12 = vpop.f32.mrf.mxu0  ;;  %v674_v13 = vpop.f32.mrf.mxu1 }
  0xc8   : > { %v619_v9 = vpop.f32.mrf.mxu2  ;;  %v638_v10 = vpop.f32.mrf.mxu3  ;;  %v1640_v14 = vmul.f32 0.5, %v655_v12  ;;  %v1641_v18 = vmul.f32 0.5, %v674_v13 }
  0xc9   : > { %v334_v9 = vld [vmem:[%s4407_s18 + $0x66] sm:$0x3] }
  0xca   : > { %v4676_v20 = vsel %vm4558_vm1, %v1640_v14, -32767.0  ;;  %v4684_v23 = vsel %vm4558_vm1, %v1641_v18, -32767.0  ;;  %4016 = vmatmul.msk.bf16.vlgmr.msrb.gmra.mxu1 %vm411_vm0, %v264_v32  ;;  %4015 = vmatmul.msk.bf16.vlgmr.msrb.gmra.mxu0 %vm411_vm0, %v263_v48  ;;  %v1385_v10 = vsel %vm411_vm0, %v334_v9, 0 }
  0xcb   : > { %v1800_v22 = vsel %vm1763_vm2, %v4676_v20, -inf  ;;  %v1803_v33 = vsel %vm1763_vm2, %v4684_v23, -inf  ;;  %1394 = vmatpush.bf16.xpose.msra.mxu3 %v1385_v10  ;;  %v269_v18 = vld [vmem:[%s4421_s21 + $0x64] sm:$0x3] }
  0xcc   : > { %1801 = vmax.xlane.f32.xlu1 %v1800_v22  ;;  %v270_v22 = vld [vmem:[%s4421_s21 + $0x66] sm:$0x3] }
  0xcd   : > { %1795 = vmax.xlane.f32.xlu2 %v1794_v15  ;;  %4017 = vmatmul.msk.bf16.vlgmr.msrb.gmra.mxu2 %vm411_vm0, %v265_v16 }
  0xce   : > { %4018 = vmatmul.msk.bf16.vlgmr.msrb.gmra.mxu3 %vm411_vm0, %v266_v21 }
  0xcf   : > { %v657_v30 = vpop.f32.mrf.mxu0  ;;  %v676_v31 = vpop.f32.mrf.mxu1 }
  0xd0   : > { %v693_v25 = vpop.f32.mrf.mxu2  ;;  %v712_v27 = vpop.f32.mrf.mxu3 }
  0xd1   : > { %v1642_v28 = vmul.f32 0.5, %v693_v25  ;;  %v1643_v29 = vmul.f32 0.5, %v712_v27 }
  0xd3   : > { %v4692_v35 = vsel %vm4558_vm1, %v1642_v28, -32767.0  ;;  %v4696_v37 = vsel %vm4558_vm1, %v1643_v29, -32767.0 }
  0xd4   : > { %v1806_v38 = vsel %vm1763_vm2, %v4692_v35, -inf  ;;  %v1809_v39 = vsel %vm1763_vm2, %v4696_v37, -inf }
  0xd5   : > { %1804 = vmax.xlane.f32.xlu2 %v1803_v33  ;;  %1807 = vmax.xlane.f32.xlu0 %v1806_v38 }
  0xd6   : > { %1810 = vmax.xlane.f32.xlu1 %v1809_v39 }
  0xd7   : > { %v731_v44 = vpop.f32.mrf.mxu0  ;;  %v750_v45 = vpop.f32.mrf.mxu1 }
  0xd8   : > { %v695_v42 = vpop.f32.mrf.mxu2  ;;  %v714_v43 = vpop.f32.mrf.mxu3  ;;  %v1644_v46 = vmul.f32 0.5, %v731_v44  ;;  %v1645_v47 = vmul.f32 0.5, %v750_v45 }
  0xd9   : > { %v331_v42 = vld [vmem:[%s4407_s18 + $0x60] sm:$0x3] }
  0xda   : > { %v4708_v49 = vsel %vm4558_vm1, %v1645_v47, -32767.0  ;;  %v4712_v51 = vsel %vm4558_vm1, %v1644_v46, -32767.0  ;;  %v1328_v43 = vsel %vm411_vm0, %v331_v42, 0 }
  0xdb   : > { %v1815_v53 = vsel %vm1763_vm2, %v4708_v49, -inf  ;;  %v1812_v55 = vsel %vm1763_vm2, %v4712_v51, -inf  ;;  %1337 = vmatpush.bf16.xpose.msra.mxu0 %v1328_v43 }
  0xdd   : > { %1813 = vmax.xlane.f32.xlu0 %v1812_v55  ;;  %4021 = vmatmul.msk.bf16.vlgmr.msra.gmra.mxu2 %vm411_vm0, %v269_v18 }
  0xde   : > { %1816 = vmax.xlane.f32.xlu1 %v1815_v53  ;;  %4022 = vmatmul.msk.bf16.vlgmr.msra.gmra.mxu3 %vm411_vm0, %v270_v22 }
  0xdf   : > { %v733_v61 = vpop.f32.mrf.mxu0  ;;  %v752_v62 = vpop.f32.mrf.mxu1 }
  0xe0   : > { %v769_v56 = vpop.f32.mrf.mxu2  ;;  %v788_v57 = vpop.f32.mrf.mxu3  ;;  %v332_v61 = vld [vmem:[%s4407_s18 + $0x62] sm:$0x3]  ;;  %v338_v62 = vld [vmem:[%s4407_s18 + $0x6e] sm:$0x3] }
  0xe1   : > { %v1646_v58 = vmul.f32 0.5, %v769_v56  ;;  %v1647_v60 = vmul.f32 0.5, %v788_v57  ;;  %v267_v57 = vld [vmem:[%s4421_s21 + $0x60] sm:$0x3]  ;;  %v1347_v63 = vsel %vm411_vm0, %v332_v61, 0  ;;  %v1461_v0 = vsel %vm411_vm0, %v338_v62, 0 }
  0xe2   : > { %4019 = vmatmul.msk.bf16.vlgmr.msra.gmra.mxu0 %vm411_vm0, %v267_v57  ;;  %1356 = vmatpush.bf16.xpose.msra.mxu1 %v1347_v63 }
  0xe3   : > { %v4723_v1 = vsel %vm4558_vm1, %v1646_v58, -32767.0  ;;  %v4727_v3 = vsel %vm4558_vm1, %v1647_v60, -32767.0  ;;  %1470 = vmatpush.bf16.xpose.msrb.mxu3 %v1461_v0 }
  0xe4   : > { %v1818_v4 = vsel %vm1763_vm2, %v4723_v1, -inf  ;;  %v1821_v8 = vsel %vm1763_vm2, %v4727_v3, -inf }
  0xe5   : > { %1819 = vmax.xlane.f32.xlu2 %v1818_v4  ;;  %1822 = vmax.xlane.f32.xlu0 %v1821_v8  ;;  %v337_v4 = vld [vmem:[%s4407_s18 + $0x6c] sm:$0x3] }
  0xe6   : > { %v1442_v8 = vsel %vm411_vm0, %v337_v4, 0 }
  0xe7   : > { %v807_v14 = vpop.f32.mrf.mxu0  ;;  %v826_v15 = vpop.f32.mrf.mxu1  ;;  %1451 = vmatpush.bf16.xpose.msrb.mxu2 %v1442_v8 }
  0xe8   : > { %v771_v12 = vpop.f32.mrf.mxu2  ;;  %v790_v13 = vpop.f32.mrf.mxu3  ;;  %v1648_v16 = vmul.f32 0.5, %v807_v14  ;;  %v1649_v17 = vmul.f32 0.5, %v826_v15 }
  0xea   : > { %v4739_v19 = vsel %vm4558_vm1, %v1649_v17, -32767.0  ;;  %v4743_v21 = vsel %vm4558_vm1, %v1648_v16, -32767.0 }
  0xeb   : > { %v1827_v25 = vsel %vm1763_vm2, %v4739_v19, -inf  ;;  %v1824_v27 = vsel %vm1763_vm2, %v4743_v21, -inf }
  0xed   : > { %1828 = vmax.xlane.f32.xlu0 %v1827_v25  ;;  %1825 = vmax.xlane.f32.xlu2 %v1824_v27  ;;  %v268_v25 = vld [vmem:[%s4421_s21 + $0x62] sm:$0x3]  ;;  %v274_v27 = vld [vmem:[%s4421_s21 + $0x6e] sm:$0x3] }
  0xee   : > { %4020 = vmatmul.msk.bf16.vlgmr.msra.gmra.mxu1 %vm411_vm0, %v268_v25  ;;  %4026 = vmatmul.msk.bf16.vlgmr.msrb.gmra.mxu3 %vm411_vm0, %v274_v27 }
  0xef   : > { %v809_v32 = vpop.f32.mrf.mxu0  ;;  %v828_v33 = vpop.f32.mrf.mxu1 }
  0xf0   : > { %v845_v28 = vpop.f32.mrf.mxu2  ;;  %v864_v29 = vpop.f32.mrf.mxu3 }
  0xf1   : > { %v1650_v30 = vmul.f32 0.5, %v845_v28  ;;  %v1651_v31 = vmul.f32 0.5, %v864_v29  ;;  %v273_v28 = vld [vmem:[%s4421_s21 + $0x6c] sm:$0x3] }
  0xf2   : > { %4025 = vmatmul.msk.bf16.vlgmr.msrb.gmra.mxu2 %vm411_vm0, %v273_v28 }
  0xf3   : > { %v4753_v38 = vsel %vm4558_vm1, %v1650_v30, -32767.0  ;;  %v4757_v39 = vsel %vm4558_vm1, %v1651_v31, -32767.0 }
  0xf4   : > { %v1830_v40 = vsel %vm1763_vm2, %v4753_v38, -inf  ;;  %v1833_v41 = vsel %vm1763_vm2, %v4757_v39, -inf }
  0xf5   : > { %1831 = vmax.xlane.f32.xlu1 %v1830_v40  ;;  %1834 = vmax.xlane.f32.xlu2 %v1833_v41 }
  0xf7   : > { %v883_v46 = vpop.f32.mrf.mxu0  ;;  %v902_v47 = vpop.f32.mrf.mxu1 }
  0xf8   : > { %v847_v44 = vpop.f32.mrf.mxu2  ;;  %v866_v45 = vpop.f32.mrf.mxu3  ;;  %v1652_v48 = vmul.f32 0.5, %v883_v46  ;;  %v1653_v53 = vmul.f32 0.5, %v902_v47 }
  0xfa   : > { %v4767_v55 = vsel %vm4558_vm1, %v1653_v53, -32767.0  ;;  %v4771_v56 = vsel %vm4558_vm1, %v1652_v48, -32767.0 }
  0xfb   : > { %v1839_v58 = vsel %vm1763_vm2, %v4767_v55, -inf  ;;  %v1836_v60 = vsel %vm1763_vm2, %v4771_v56, -inf }
  0xfd   : > { %1840 = vmax.xlane.f32.xlu2 %v1839_v58  ;;  %1837 = vmax.xlane.f32.xlu1 %v1836_v60 }
  0xff   : > { %v885_v14 = vpop.f32.mrf.mxu0  ;;  %v904_v15 = vpop.f32.mrf.mxu1 }
 0x100   : > { %v921_v9 = vpop.f32.mrf.mxu2  ;;  %v940_v10 = vpop.f32.mrf.mxu3 }
 0x101   : > { %v1654_v12 = vmul.f32 0.5, %v921_v9  ;;  %v1655_v13 = vmul.f32 0.5, %v940_v10 }
 0x103   : > { %v4787_v16 = vsel %vm4558_vm1, %v1654_v12, -32767.0  ;;  %v4791_v17 = vsel %vm4558_vm1, %v1655_v13, -32767.0 }
 0x104   : > { %v1842_v18 = vsel %vm1763_vm2, %v4787_v16, -inf  ;;  %v1845_v22 = vsel %vm1763_vm2, %v4791_v17, -inf }
 0x105   : > { %1843 = vmax.xlane.f32.xlu0 %v1842_v18  ;;  %1846 = vmax.xlane.f32.xlu1 %v1845_v22 }
 0x107   : > { %v959_v31 = vpop.f32.mrf.mxu0  ;;  %v978_v32 = vpop.f32.mrf.mxu1 }
 0x108   : > { %v923_v29 = vpop.f32.mrf.mxu2  ;;  %v942_v30 = vpop.f32.mrf.mxu3  ;;  %v1656_v33 = vmul.f32 0.5, %v959_v31  ;;  %v1657_v40 = vmul.f32 0.5, %v978_v32 }
 0x10a   : > { %v4805_v41 = vsel %vm4558_vm1, %v1657_v40, -32767.0  ;;  %v4809_v42 = vsel %vm4558_vm1, %v1656_v33, -32767.0 }
 0x10b   : > { %v1851_v43 = vsel %vm1763_vm2, %v4805_v41, -inf  ;;  %v1848_v44 = vsel %vm1763_vm2, %v4809_v42, -inf }
 0x10d   : > { %1852 = vmax.xlane.f32.xlu1 %v1851_v43  ;;  %1849 = vmax.xlane.f32.xlu0 %v1848_v44 }
 0x10f   : > { %v1766_v53 = vpop.xlane.xlu1 %1765  ;;  %v961_v57 = vpop.f32.mrf.mxu0 }
 0x110   : > { %v997_v45 = vpop.f32.mrf.mxu2  ;;  %v1016_v46 = vpop.f32.mrf.mxu3  ;;  %v1956_v58 = vsub.f32 %v4570_v59, %v1766_v53 }
 0x111   : > { %v1658_v47 = vmul.f32 0.5, %v997_v45  ;;  %v1659_v48 = vmul.f32 0.5, %v1016_v46  ;;  %v980_v60 = vpop.f32.mrf.mxu1 }
 0x112   : > { %v2020_v63 = vmul.f32 1.442695, %v1956_v58 }
 0x113   : > { %v4818_v61 = vsel %vm4558_vm1, %v1658_v47, -32767.0  ;;  %v4822_v62 = vsel %vm4558_vm1, %v1659_v48, -32767.0 }
 0x114   : > { %v1854_v0 = vsel %vm1763_vm2, %v4818_v61, -inf  ;;  %v1857_v4 = vsel %vm1763_vm2, %v4822_v62, -inf  ;;  %4109 = vpow2.f32 %v2020_v63  ;;  %v335_v63 = vld [vmem:[%s4407_s18 + $0x68] sm:$0x3] }
 0x115   : > { %1855 = vmax.xlane.f32.xlu2 %v1854_v0  ;;  %1858 = vmax.xlane.f32.xlu0 %v1857_v4  ;;  %v1404_v4 = vsel %vm411_vm0, %v335_v63, 0 }
 0x116   : > { %1413 = vmatpush.bf16.xpose.msrb.mxu0 %v1404_v4 }
 0x117   : > { %v1769_v10 = vpop.xlane.xlu1 %1768  ;;  %v1035_v12 = vpop.f32.mrf.mxu0 }
 0x118   : > { %v1018_v59 = vpop.f32.mrf.mxu3  ;;  %v1772_v8 = vpop.xlane.xlu0 %1771  ;;  %v1957_v13 = vsub.f32 %v4581_v5, %v1769_v10  ;;  %v1660_v14 = vmul.f32 0.5, %v1035_v12 }
 0x119   : > { %v1958_v9 = vsub.f32 %v4585_v7, %v1772_v8  ;;  %v999_v15 = vpop.f32.mrf.mxu2  ;;  %v1054_v18 = vpop.f32.mrf.mxu1  ;;  %v336_v59 = vld [vmem:[%s4407_s18 + $0x6a] sm:$0x3] }
 0x11a   : > { %v4830_v25 = vpop.eup %4109  ;;  %v2022_v27 = vmul.f32 1.442695, %v1957_v13  ;;  %v4834_v28 = vsel %vm4558_vm1, %v1660_v14, -32767.0  ;;  %v1661_v29 = vmul.f32 0.5, %v1054_v18  ;;  %v1423_v8 = vsel %vm411_vm0, %v336_v59, 0 }
 0x11b   : > { %v2024_v22 = vmul.f32 1.442695, %v1958_v9  ;;  %v2148_v7 = vsel %vm1763_vm2, %v4830_v25, 0.0  ;;  %v1860_v30 = vsel %vm1763_vm2, %v4834_v28, -inf  ;;  %1432 = vmatpush.bf16.xpose.msrb.mxu1 %v1423_v8 }
 0x11c   : > { %v4842_v31 = vsel %vm4558_vm1, %v1661_v29, -32767.0 }
 0x11d   : > { %4111 = vpow2.f32 %v2024_v22  ;;  %2149 = vadd.xlane.f32.xlu0 %v2148_v7  ;;  %1861 = vmax.xlane.f32.xlu2 %v1860_v30  ;;  %v1863_v48 = vsel %vm1763_vm2, %v4842_v31, -inf }
 0x11e   : > { %4113 = vpow2.f32 %v2022_v27 }
 0x11f   : > { %v1781_v40 = vpop.xlane.xlu1 %1780  ;;  %v1037_v43 = vpop.f32.mrf.mxu0 }
 0x120   : > { %v1775_v5 = vpop.xlane.xlu0 %1774  ;;  %v1092_v32 = vpop.f32.mrf.mxu3  ;;  %v1961_v57 = vsub.f32 %v4605_v24, %v1781_v40  ;;  %v341_v24 = vld [vmem:[%s4407_s18 + $0x74] sm:$0x3] }
 0x121   : > { %v1959_v33 = vsub.f32 %v4594_v11, %v1775_v5  ;;  %v1056_v44 = vpop.f32.mrf.mxu1  ;;  %v1073_v45 = vpop.f32.mrf.mxu2  ;;  %v1663_v60 = vmul.f32 0.5, %v1092_v32  ;;  %v1518_v14 = vsel %vm411_vm0, %v341_v24, 0 }
 0x122   : > { %v1662_v58 = vmul.f32 0.5, %v1073_v45  ;;  %v2030_v9 = vmul.f32 1.442695, %v1961_v57  ;;  %1527 = vmatpush.bf16.xpose.msra.mxu2 %v1518_v14  ;;  %v271_v44 = vld [vmem:[%s4421_s21 + $0x68] sm:$0x3] }
 0x123   : > { %v4845_v46 = vpop.eup %4111  ;;  %v2026_v47 = vmul.f32 1.442695, %v1959_v33  ;;  %v4869_v18 = vsel %vm4558_vm1, %v1663_v60, -32767.0  ;;  %v272_v45 = vld [vmem:[%s4421_s21 + $0x6a] sm:$0x3]  ;;  %4023 = vmatmul.msk.bf16.vlgmr.msrb.gmra.mxu0 %vm411_vm0, %v271_v44 }
 0x124   : > { %v4849_v53 = vpop.eup %4113  ;;  %v2154_v0 = vsel %vm1763_vm2, %v4845_v46, 0.0  ;;  %v4863_v13 = vsel %vm4558_vm1, %v1662_v58, -32767.0  ;;  %v1869_v33 = vsel %vm1763_vm2, %v4869_v18, -inf  ;;  %4024 = vmatmul.msk.bf16.vlgmr.msrb.gmra.mxu1 %vm411_vm0, %v272_v45 }
 0x125   : > { %4115 = vpow2.f32 %v2026_v47  ;;  %v2151_v11 = vsel %vm1763_vm2, %v4849_v53, 0.0  ;;  %1864 = vmax.xlane.f32.xlu0 %v1863_v48  ;;  %2155 = vadd.xlane.f32.xlu2 %v2154_v0  ;;  %v1866_v5 = vsel %vm1763_vm2, %v4863_v13, -inf  ;;  %v277_v47 = vld [vmem:[%s4421_s21 + $0x74] sm:$0x3] }
 0x126   : > { %2152 = vadd.xlane.f32.xlu1 %v2151_v11  ;;  %4117 = vpow2.f32 %v2030_v9 }
 0x127   : > { %v1111_v27 = vpop.f32.mrf.mxu0 }
 0x128   : > { %v1784_v10 = vpop.xlane.xlu2 %1783  ;;  %v1778_v12 = vpop.xlane.xlu0 %1777  ;;  %v1664_v40 = vmul.f32 0.5, %v1111_v27 }
 0x129   : > { %v1960_v15 = vsub.f32 %v4615_v26, %v1778_v12  ;;  %v1094_v22 = vpop.f32.mrf.mxu3  ;;  %v1075_v29 = vpop.f32.mrf.mxu2  ;;  %v1962_v26 = vsub.f32 %v4621_v34, %v1784_v10  ;;  %4029 = vmatmul.msk.bf16.vlgmr.msra.gmra.mxu2 %vm411_vm0, %v277_v47 }
 0x12a   : > { %v1130_v32 = vpop.f32.mrf.mxu1  ;;  %v4886_v34 = vsel %vm4558_vm1, %v1664_v40, -32767.0 }
 0x12b   : > { %v4871_v7 = vpop.eup %4115  ;;  %v2028_v30 = vmul.f32 1.442695, %v1960_v15  ;;  %v2032_v48 = vmul.f32 1.442695, %v1962_v26  ;;  %v1872_v59 = vsel %vm1763_vm2, %v4886_v34, -inf }
 0x12c   : > { %v2157_v43 = vsel %vm1763_vm2, %v4871_v7, 0.0  ;;  %v4891_v60 = vpop.eup %4117 }
 0x12d   : > { %4119 = vpow2.f32 %v2028_v30  ;;  %2158 = vadd.xlane.f32.xlu0 %v2157_v43  ;;  %1870 = vmax.xlane.f32.xlu2 %v1869_v33  ;;  %v2163_v10 = vsel %vm1763_vm2, %v4891_v60, 0.0  ;;  %v1665_v43 = vmul.f32 0.5, %v1130_v32 }
 0x12e   : > { %1867 = vmax.xlane.f32.xlu1 %v1866_v5  ;;  %4121 = vpow2.f32 %v2032_v48 }
 0x12f   : > { %v1113_v0 = vpop.f32.mrf.mxu0  ;;  %v1790_v12 = vpop.xlane.xlu1 %1789 }
 0x130   : > { %v1787_v57 = vpop.xlane.xlu2 %1786  ;;  %v1964_v5 = vsub.f32 %v4639_v50, %v1790_v12 }
 0x131   : > { %v1963_v58 = vsub.f32 %v4627_v36, %v1787_v57  ;;  %v1168_v11 = vpop.f32.mrf.mxu3  ;;  %v1149_v63 = vpop.f32.mrf.mxu2 }
 0x132   : > { %v1132_v8 = vpop.f32.mrf.mxu1  ;;  %v1666_v9 = vmul.f32 0.5, %v1149_v63  ;;  %v1667_v44 = vmul.f32 0.5, %v1168_v11  ;;  %v2036_v47 = vmul.f32 1.442695, %v1964_v5 }
 0x133   : > { %v2034_v4 = vmul.f32 1.442695, %v1963_v58  ;;  %v4895_v24 = vpop.eup %4119 }
 0x134   : > { %v2160_v36 = vsel %vm1763_vm2, %v4895_v24, 0.0  ;;  %v4903_v15 = vsel %vm4558_vm1, %v1666_v9, -32767.0  ;;  %v4905_v27 = vpop.eup %4121  ;;  %v4926_v11 = vsel %vm4558_vm1, %v1667_v44, -32767.0 }
 0x135   : > { %4123 = vpow2.f32 %v2034_v4  ;;  %2164 = vadd.xlane.f32.xlu0 %v2163_v10  ;;  %2161 = vadd.xlane.f32.xlu2 %v2160_v36  ;;  %v1878_v26 = vsel %vm1763_vm2, %v4903_v15, -inf  ;;  %v2166_v40 = vsel %vm1763_vm2, %v4905_v27, 0.0  ;;  %v1881_v9 = vsel %vm1763_vm2, %v4926_v11, -inf  ;;  %v340_v10 = vld [vmem:[%s4407_s18 + $0x72] sm:$0x3] }
 0x136   : > { %1873 = vmax.xlane.f32.xlu1 %v1872_v59  ;;  %4125 = vpow2.f32 %v2036_v47  ;;  %v1499_v12 = vsel %vm411_vm0, %v340_v10, 0 }
 0x137   : > { %v4922_v32 = vpop.f32.mrf.mxu0  ;;  %1508 = vmatpush.bf16.xpose.msra.mxu1 %v1499_v12 }
 0x138   : > { %v1793_v14 = vpop.xlane.xlu2 %1792  ;;  %v1799_v57 = vpop.xlane.xlu0 %1798 }
 0x139   : > { %v1170_v22 = vpop.f32.mrf.mxu3  ;;  %v1151_v29 = vpop.f32.mrf.mxu2  ;;  %v1965_v33 = vsub.f32 %v4648_v54, %v1793_v14  ;;  %v4920_v54 = vsel %vm4558_vm1, %v1665_v43, -32767.0  ;;  %v1967_v8 = vsub.f32 %v4657_v2, %v1799_v57 }
 0x13a   : > { %v4928_v4 = vpop.f32.mrf.mxu1 }
 0x13b   : > { %v4907_v30 = vpop.eup %4123  ;;  %v2038_v48 = vmul.f32 1.442695, %v1965_v33  ;;  %v2042_v14 = vmul.f32 1.442695, %v1967_v8  ;;  %v276_v8 = vld [vmem:[%s4421_s21 + $0x72] sm:$0x3] }
 0x13c   : > { %v2169_v45 = vsel %vm1763_vm2, %v4907_v30, 0.0  ;;  %v4937_v29 = vpop.eup %4125 }
 0x13d   : > { %1879 = vmax.xlane.f32.xlu0 %v1878_v26  ;;  %2170 = vadd.xlane.f32.xlu2 %v2169_v45  ;;  %4127 = vpow2.f32 %v2038_v48 }
 0x13e   : > { %2167 = vadd.xlane.f32.xlu1 %v2166_v40  ;;  %4028 = vmatmul.msk.bf16.vlgmr.msra.gmra.mxu1 %vm411_vm0, %v276_v8  ;;  %v281_v8 = vld [vmem:[%s4421_s21 + $0x7c] sm:$0x3] }
 0x13f   : > { %v1802_v36 = vpop.xlane.xlu1 %1801  ;;  %v1189_v47 = vpop.f32.mrf.mxu0 }
 0x140   : > { %v1796_v50 = vpop.xlane.xlu2 %1795  ;;  %v1968_v44 = vsub.f32 %v4676_v20, %v1802_v36 }
 0x141   : > { %v1966_v58 = vsub.f32 %v4666_v6, %v1796_v50  ;;  %v1244_v63 = vpop.f32.mrf.mxu3  ;;  %v1225_v0 = vpop.f32.mrf.mxu2  ;;  %v1875_v6 = vsel %vm1763_vm2, %v4920_v54, -inf }
 0x142   : > { %v1208_v40 = vpop.f32.mrf.mxu1  ;;  %v1671_v45 = vmul.f32 0.5, %v1244_v63  ;;  %v2044_v63 = vmul.f32 1.442695, %v1968_v44 }
 0x143   : > { %v2040_v59 = vmul.f32 1.442695, %v1966_v58  ;;  %v4939_v26 = vpop.eup %4127  ;;  %v2172_v58 = vsel %vm1763_vm2, %v4937_v29, 0.0 }
 0x144   : > { %v2175_v20 = vsel %vm1763_vm2, %v4939_v26, 0.0 }
 0x145   : > { %4129 = vpow2.f32 %v2040_v59  ;;  %1876 = vmax.xlane.f32.xlu2 %v1875_v6  ;;  %v1670_v59 = vmul.f32 0.5, %v1225_v0  ;;  %v342_v6 = vld [vmem:[%s4407_s18 + $0x76] sm:$0x3] }
 0x146   : > { %1882 = vmax.xlane.f32.xlu1 %v1881_v9  ;;  %4131 = vpow2.f32 %v2042_v14  ;;  %v345_v9 = vld [vmem:[%s4407_s18 + $0x7c] sm:$0x3] }
 0x147   : > { %v1594_v36 = vsel %vm411_vm0, %v345_v9, 0  ;;  %4133 = vpow2.f32 %v2044_v63 }
 0x148   : > { %v1805_v22 = vpop.xlane.xlu2 %1804  ;;  %v1808_v5 = vpop.xlane.xlu0 %1807  ;;  %1603 = vmatpush.bf16.xpose.msrb.mxu2 %v1594_v36 }
 0x149   : > { %v1246_v2 = vpop.f32.mrf.mxu3  ;;  %v1227_v33 = vpop.f32.mrf.mxu2  ;;  %v1969_v48 = vsub.f32 %v4684_v23, %v1805_v22  ;;  %v1970_v50 = vsub.f32 %v4692_v35, %v1808_v5  ;;  %v1537_v23 = vsel %vm411_vm0, %v342_v6, 0  ;;  %v4958_v35 = vsel %vm4558_vm1, %v1671_v45, -32767.0 }
 0x14a   : > { %1546 = vmatpush.bf16.xpose.msra.mxu3 %v1537_v23  ;;  %v1811_v0 = vpop.xlane.xlu1 %1810  ;;  %v4964_v22 = vsel %vm4558_vm1, %v1670_v59, -32767.0  ;;  %v1893_v2 = vsel %vm1763_vm2, %v4958_v35, -inf  ;;  %v4970_v40 = vpop.f32.mrf.mxu1 }
 0x14b   : > { %v4941_v43 = vpop.eup %4129  ;;  %v2046_v10 = vmul.f32 1.442695, %v1969_v48  ;;  %v2048_v12 = vmul.f32 1.442695, %v1970_v50  ;;  %v1971_v44 = vsub.f32 %v4696_v37, %v1811_v0  ;;  %v1890_v47 = vsel %vm1763_vm2, %v4964_v22, -inf  ;;  %v4992_v0 = vpop.f32.mrf.mxu0 }
 0x14c   : > { %v2178_v57 = vsel %vm1763_vm2, %v4941_v43, 0.0  ;;  %v4966_v5 = vpop.eup %4131  ;;  %v278_v50 = vld [vmem:[%s4421_s21 + $0x76] sm:$0x3] }
 0x14d   : > { %2179 = vadd.xlane.f32.xlu0 %v2178_v57  ;;  %2176 = vadd.xlane.f32.xlu2 %v2175_v20  ;;  %4135 = vpow2.f32 %v2046_v10  ;;  %v2181_v57 = vsel %vm1763_vm2, %v4966_v5, 0.0  ;;  %v2050_v59 = vmul.f32 1.442695, %v1971_v44  ;;  %v4986_v6 = vpop.eup %4133 }
 0x14e   : > { %2173 = vadd.xlane.f32.xlu1 %v2172_v58  ;;  %4137 = vpow2.f32 %v2048_v12  ;;  %v339_v58 = vld [vmem:[%s4407_s18 + $0x70] sm:$0x3]  ;;  %v2184_v12 = vsel %vm1763_vm2, %v4986_v6, 0.0 }
 0x14f   : > { %v1480_v37 = vsel %vm411_vm0, %v339_v58, 0  ;;  %4033 = vmatmul.msk.bf16.vlgmr.msrb.gmra.mxu2 %vm411_vm0, %v281_v8  ;;  %4139 = vpow2.f32 %v2050_v59  ;;  %v1668_v8 = vmul.f32 0.5, %v4922_v32 }
 0x150   : > { %v1814_v14 = vpop.xlane.xlu0 %1813  ;;  %1489 = vmatpush.bf16.xpose.msra.mxu0 %v1480_v37 }
 0x151   : > { %v1301_v33 = vpop.f32.mrf.mxu2  ;;  %v4973_v45 = vpop.f32.mrf.mxu3  ;;  %v1972_v48 = vsub.f32 %v4712_v51, %v1814_v14  ;;  %4030 = vmatmul.msk.bf16.vlgmr.msra.gmra.mxu3 %vm411_vm0, %v278_v50  ;;  %v1669_v14 = vmul.f32 0.5, %v4928_v4  ;;  %v346_v50 = vld [vmem:[%s4407_s18 + $0x7e] sm:$0x3] }
 0x152   : > { %v1284_v63 = vpop.f32.mrf.mxu1  ;;  %v1817_v58 = vpop.xlane.xlu1 %1816 }
 0x153   : > { %v2052_v51 = vmul.f32 1.442695, %v1972_v48  ;;  %v4988_v23 = vpop.eup %4135  ;;  %v5007_v4 = vsel %vm4558_vm1, %v1669_v14, -32767.0  ;;  %v1674_v14 = vmul.f32 0.5, %v1301_v33 }
 0x154   : > { %v4990_v10 = vpop.eup %4137  ;;  %v1887_v63 = vsel %vm1763_vm2, %v5007_v4, -inf }
 0x155   : > { %1894 = vmax.xlane.f32.xlu0 %v1893_v2  ;;  %1891 = vmax.xlane.f32.xlu2 %v1890_v47  ;;  %4141 = vpow2.f32 %v2052_v51  ;;  %v2187_v47 = vsel %vm1763_vm2, %v4988_v23, 0.0  ;;  %v2190_v48 = vsel %vm1763_vm2, %v4990_v10, 0.0  ;;  %v5010_v59 = vpop.eup %4139  ;;  %v5032_v33 = vsel %vm4558_vm1, %v1674_v14, -32767.0 }
 0x156   : > { %2182 = vadd.xlane.f32.xlu1 %v2181_v57  ;;  %v275_v57 = vld [vmem:[%s4421_s21 + $0x70] sm:$0x3] }
 0x157   : > { %4027 = vmatmul.msk.bf16.vlgmr.msra.gmra.mxu0 %vm411_vm0, %v275_v57 }
 0x158   : > { %v1823_v20 = vpop.xlane.xlu0 %1822  ;;  %v1820_v2 = vpop.xlane.xlu2 %1819 }
 0x159   : > { %v1303_v9 = vpop.f32.mrf.mxu2  ;;  %v1322_v36 = vpop.f32.mrf.mxu3  ;;  %v1975_v44 = vsub.f32 %v4727_v3, %v1823_v20  ;;  %v1613_v3 = vsel %vm411_vm0, %v346_v50, 0  ;;  %v1973_v20 = vsub.f32 %v4708_v49, %v1817_v58  ;;  %v5025_v49 = vsel %vm4558_vm1, %v1668_v8, -32767.0 }
 0x15a   : > { %1622 = vmatpush.bf16.xpose.msrb.mxu3 %v1613_v3  ;;  %v1265_v9 = vpop.f32.mrf.mxu0  ;;  %v1974_v36 = vsub.f32 %v4723_v1, %v1820_v2  ;;  %v282_v2 = vld [vmem:[%s4421_s21 + $0x7e] sm:$0x3]  ;;  %v1884_v50 = vsel %vm1763_vm2, %v5025_v49, -inf  ;;  %v1902_v3 = vsel %vm1763_vm2, %v5032_v33, -inf  ;;  %v1675_v8 = vmul.f32 0.5, %v4973_v45 }
 0x15b   : > { %v2058_v37 = vmul.f32 1.442695, %v1975_v44  ;;  %v5013_v51 = vpop.eup %4141  ;;  %v279_v9 = vld [vmem:[%s4421_s21 + $0x78] sm:$0x3] }
 0x15c   : > { %v2196_v32 = vsel %vm1763_vm2, %v5013_v51, 0.0  ;;  %v2056_v57 = vmul.f32 1.442695, %v1974_v36  ;;  %v344_v36 = vld [vmem:[%s4407_s18 + $0x7a] sm:$0x3] }
 0x15d   : > { %2185 = vadd.xlane.f32.xlu0 %v2184_v12  ;;  %2191 = vadd.xlane.f32.xlu2 %v2190_v48  ;;  %v2193_v12 = vsel %vm1763_vm2, %v5010_v59, 0.0  ;;  %4143 = vpow2.f32 %v2058_v37  ;;  %v2054_v48 = vmul.f32 1.442695, %v1973_v20  ;;  %v1575_v14 = vsel %vm411_vm0, %v344_v36, 0 }
 0x15e   : > { %2188 = vadd.xlane.f32.xlu1 %v2187_v47  ;;  %v343_v47 = vld [vmem:[%s4407_s18 + $0x78] sm:$0x3]  ;;  %1584 = vmatpush.bf16.xpose.msrb.mxu1 %v1575_v14 }
 0x15f   : > { %v1556_v1 = vsel %vm411_vm0, %v343_v47, 0  ;;  %4145 = vpow2.f32 %v2054_v48 }
 0x160   : > { %v1826_v44 = vpop.xlane.xlu2 %1825  ;;  %1565 = vmatpush.bf16.xpose.msrb.mxu0 %v1556_v1  ;;  %4147 = vpow2.f32 %v2056_v57  ;;  %v1829_v45 = vpop.xlane.xlu0 %1828  ;;  %v1673_v57 = vmul.f32 0.5, %v4970_v40  ;;  %v280_v40 = vld [vmem:[%s4421_s21 + $0x7a] sm:$0x3] }
 0x161   : > { %4034 = vmatmul.msk.bf16.vlgmr.msrb.gmra.mxu3 %vm411_vm0, %v282_v2  ;;  %v1976_v37 = vsub.f32 %v4743_v21, %v1826_v44  ;;  %v5055_v44 = vsel %vm4558_vm1, %v1675_v8, -32767.0  ;;  %v5059_v1 = vpop.f32.mrf.mxu3  ;;  %v1977_v8 = vsub.f32 %v4739_v19, %v1829_v45 }
 0x163   : > { %v5037_v58 = vpop.eup %4143  ;;  %v2060_v47 = vmul.f32 1.442695, %v1976_v37  ;;  %v1905_v37 = vsel %vm1763_vm2, %v5055_v44, -inf }
 0x165   : > { %2194 = vadd.xlane.f32.xlu0 %v2193_v12  ;;  %2197 = vadd.xlane.f32.xlu2 %v2196_v32  ;;  %v5049_v32 = vpop.f32.mrf.mxu2  ;;  %v5051_v21 = vpop.eup %4145  ;;  %4149 = vpow2.f32 %v2060_v47 }
 0x166   : > { %1888 = vmax.xlane.f32.xlu1 %v1887_v63  ;;  %v2205_v63 = vsel %vm1763_vm2, %v5037_v58, 0.0  ;;  %v5057_v48 = vpop.eup %4147  ;;  %4032 = vmatmul.msk.bf16.vlgmr.msrb.gmra.mxu1 %vm411_vm0, %v280_v40 }
 0x167   : > { %4031 = vmatmul.msk.bf16.vlgmr.msrb.gmra.mxu0 %vm411_vm0, %v279_v9 }
 0x168   : > { %v1832_v20 = vpop.xlane.xlu1 %1831  ;;  %v1835_v12 = vpop.xlane.xlu2 %1834 }
 0x169   : > { %v1978_v2 = vsub.f32 %v4753_v38, %v1832_v20  ;;  %v1672_v38 = vmul.f32 0.5, %v4992_v0  ;;  %v2062_v0 = vmul.f32 1.442695, %v1977_v8 }
 0x16b   : > { %v2064_v9 = vmul.f32 1.442695, %v1978_v2  ;;  %v5086_v47 = vsel %vm4558_vm1, %v1672_v38, -32767.0  ;;  %v5088_v45 = vpop.eup %4149 }
 0x16c   : > { %v1896_v38 = vsel %vm1763_vm2, %v5086_v47, -inf }
 0x16d   : > { %1885 = vmax.xlane.f32.xlu0 %v1884_v50  ;;  %2206 = vadd.xlane.f32.xlu2 %v2205_v63  ;;  %v1979_v50 = vsub.f32 %v4757_v39, %v1835_v12  ;;  %v2202_v63 = vsel %vm1763_vm2, %v5057_v48, 0.0  ;;  %v5075_v39 = vsel %vm4558_vm1, %v1673_v57, -32767.0  ;;  %v1379_v36 = vpop.f32.mrf.mxu2  ;;  %v347_v57 = vld [vmem:[%s5082_s24] sm:$0x3]  ;;  %4151 = vpow2.f32 %v2064_v9 }
 0x16e   : > { %1903 = vmax.xlane.f32.xlu1 %v1902_v3  ;;  %v2199_v3 = vsel %vm1763_vm2, %v5051_v21, 0.0  ;;  %v1899_v2 = vsel %vm1763_vm2, %v5075_v39, -inf }
 0x16f   : > { %v2066_v19 = vmul.f32 1.442695, %v1979_v50  ;;  %v2537_v50 = vsel %vm2535_vm3, %v347_v57, 0 }
 0x170   : > { %v1838_v20 = vpop.xlane.xlu1 %1837  ;;  %v1841_v12 = vpop.xlane.xlu2 %1840  ;;  %2546 = vmatpush.bf16.msra.mxu0 %v2537_v50  ;;  %v349_v50 = vld [vmem:[%s5082_s24 + $0x4] sm:$0x3] }
 0x171   : > { %4153 = vpow2.f32 %v2066_v19  ;;  %v1981_v8 = vsub.f32 %v4767_v55, %v1841_v12 }
 0x172   : > { %4155 = vpow2.f32 %v2062_v0 }
 0x173   : > { %v2070_v9 = vmul.f32 1.442695, %v1981_v8  ;;  %v5103_v19 = vpop.eup %4151 }
 0x175   : > { %2200 = vadd.xlane.f32.xlu0 %v2199_v3  ;;  %1906 = vmax.xlane.f32.xlu2 %v1905_v37  ;;  %v1398_v3 = vpop.f32.mrf.mxu3  ;;  %v1980_v37 = vsub.f32 %v4771_v56, %v1838_v20  ;;  %v2208_v56 = vsel %vm1763_vm2, %v5088_v45, 0.0 }
 0x176   : > { %2203 = vadd.xlane.f32.xlu1 %v2202_v63  ;;  %v5094_v63 = vpop.f32.mrf.mxu0  ;;  %v348_v3 = vld [vmem:[%s5082_s24 + $0x2] sm:$0x3] }
 0x177   : > { %v2068_v20 = vmul.f32 1.442695, %v1980_v37  ;;  %v5105_v57 = vpop.eup %4153  ;;  %v2575_v37 = vsel %vm2535_vm3, %v349_v50, 0 }
 0x178   : > { %v1844_v14 = vpop.xlane.xlu0 %1843  ;;  %v1847_v36 = vpop.xlane.xlu1 %1846  ;;  %2584 = vmatpush.bf16.msra.mxu2 %v2575_v37 }
 0x179   : > { %v1982_v40 = vsub.f32 %v4787_v16, %v1844_v14  ;;  %v5109_v0 = vpop.eup %4155  ;;  %4157 = vpow2.f32 %v2068_v20  ;;  %v1983_v16 = vsub.f32 %v4791_v17, %v1847_v36  ;;  %v5112_v14 = vpop.f32.mrf.mxu1  ;;  %v2217_v17 = vsel %vm1763_vm2, %v5105_v57, 0.0 }
 0x17a   : > { %5857 = vst [vmem:[#allocation2_spill] sm:$0xff] %v5109_v0  ;;  %4159 = vpow2.f32 %v2070_v9  ;;  %v5132_v37 = vpop.f32.mrf.mxu2 }
 0x17b   : > { %v2072_v55 = vmul.f32 1.442695, %v1982_v40  ;;  %v2074_v20 = vmul.f32 1.442695, %v1983_v16 }
 0x17d   : > { %1900 = vmax.xlane.f32.xlu0 %v1899_v2  ;;  %1897 = vmax.xlane.f32.xlu2 %v1896_v38  ;;  %v2556_v2 = vsel %vm2535_vm3, %v348_v3, 0  ;;  %v2214_v38 = vsel %vm1763_vm2, %v5103_v19, 0.0  ;;  %4161 = vpow2.f32 %v2072_v55  ;;  %v5127_v55 = vpop.f32.mrf.mxu3 }
 0x17e   : > { %2209 = vadd.xlane.f32.xlu1 %v2208_v56  ;;  %v1341_v8 = vpop.f32.mrf.mxu0  ;;  %2565 = vmatpush.bf16.msra.mxu1 %v2556_v2  ;;  %v2211_v56 = vsel %vm1763_vm2, %v5109_v0, 0.0  ;;  %4163 = vpow2.f32 %v2074_v20 }
 0x17f   : > { %v5123_v9 = vpop.eup %4157 }
 0x180   : > { %v1850_v12 = vpop.xlane.xlu0 %1849  ;;  %5858 = vst [vmem:[#allocation3_spill] sm:$0xff] %v5123_v9  ;;  %v5125_v2 = vpop.eup %4159  ;;  %v2220_v16 = vsel %vm1763_vm2, %v5123_v9, 0.0 }
 0x181   : > { %v1984_v40 = vsub.f32 %v4809_v42, %v1850_v12  ;;  %5859 = vst [vmem:[#allocation4_spill] sm:$0xff] %v5125_v2  ;;  %v350_v42 = vld [vmem:[%s5082_s24 + $0x6] sm:$0x3]  ;;  %v1853_v20 = vpop.xlane.xlu1 %1852 }
 0x182   : > { %v2594_v8 = vsel %vm2535_vm3, %v350_v42, 0 }
 0x183   : > { %v2076_v36 = vmul.f32 1.442695, %v1984_v40  ;;  %v5130_v12 = vpop.eup %4161  ;;  %v1679_v40 = vmul.f32 0.5, %v5059_v1  ;;  %2603 = vmatpush.bf16.msra.mxu3 %v2594_v8 }
 0x184   : > { %5860 = vst [vmem:[#allocation5_spill] sm:$0xff] %v5130_v12  ;;  %v2226_v42 = vsel %vm1763_vm2, %v5130_v12, 0.0  ;;  %v5147_v1 = vpop.eup %4163 }
 0x185   : > { %2215 = vadd.xlane.f32.xlu0 %v2214_v38  ;;  %2212 = vadd.xlane.f32.xlu2 %v2211_v56  ;;  %v1360_v38 = vpop.f32.mrf.mxu1  ;;  %4165 = vpow2.f32 %v2076_v36  ;;  %v2223_v56 = vsel %vm1763_vm2, %v5125_v2, 0.0  ;;  %v1985_v36 = vsub.f32 %v4805_v41, %v1853_v20  ;;  %v351_v2 = vld [vmem:[%s5082_s24 + $0x8] sm:$0x3]  ;;  %v1474_v9 = vpop.f32.mrf.mxu3 }
 0x186   : > { %2218 = vadd.xlane.f32.xlu1 %v2217_v17  ;;  %v5145_v38 = vsel %vm4558_vm1, %v1679_v40, -32767.0  ;;  %v1676_v40 = vmul.f32 0.5, %v5094_v63  ;;  %v2613_v12 = vsel %vm2535_vm3, %v351_v2, 0 }
 0x187   : > { %2622 = vmatpush.bf16.msrb.mxu0 %v2613_v12  ;;  %v2078_v9 = vmul.f32 1.442695, %v1985_v36 }
 0x188   : > { %v1856_v3 = vpop.xlane.xlu2 %1855  ;;  %v1859_v50 = vpop.xlane.xlu0 %1858 }
 0x189   : > { %v1987_v17 = vsub.f32 %v4822_v62, %v1859_v50  ;;  %v1986_v20 = vsub.f32 %v4818_v61, %v1856_v3  ;;  %v5171_v61 = vsel %vm4558_vm1, %v1676_v40, -32767.0 }
 0x18b   : > { %v2082_v62 = vmul.f32 1.442695, %v1987_v17  ;;  %v5153_v0 = vpop.eup %4165  ;;  %v1455_v17 = vpop.f32.mrf.mxu2  ;;  %v2080_v12 = vmul.f32 1.442695, %v1986_v20 }
 0x18c   : > { %v2232_v63 = vsel %vm1763_vm2, %v5153_v0, 0.0  ;;  %v354_v17 = vld [vmem:[%s5082_s24 + $0xe] sm:$0x3] }
 0x18d   : > { %2221 = vadd.xlane.f32.xlu0 %v2220_v16  ;;  %2227 = vadd.xlane.f32.xlu2 %v2226_v42  ;;  %v1678_v16 = vmul.f32 0.5, %v5049_v32  ;;  %v1917_v42 = vsel %vm1763_vm2, %v5145_v38, -inf  ;;  %v2229_v32 = vsel %vm1763_vm2, %v5147_v1, 0.0 }
 0x18e   : > { %2224 = vadd.xlane.f32.xlu1 %v2223_v56  ;;  %v352_v56 = vld [vmem:[%s5082_s24 + $0xa] sm:$0x3] }
 0x18f   : > { %v2632_v41 = vsel %vm2535_vm3, %v352_v56, 0  ;;  %v5167_v2 = vsel %vm4558_vm1, %v1678_v16, -32767.0  ;;  %v1908_v16 = vsel %vm1763_vm2, %v5171_v61, -inf }
 0x190   : > { %v2150_v50 = vpop.xlane.xlu0 %2149  ;;  %v1862_v8 = vpop.xlane.xlu2 %1861  ;;  %2641 = vmatpush.bf16.msrb.mxu1 %v2632_v41  ;;  %v353_v41 = vld [vmem:[%s5082_s24 + $0xc] sm:$0x3] }
 0x191   : > { %4167 = vrcp.f32 %v2150_v50  ;;  %v2651_v20 = vsel %vm2535_vm3, %v353_v41, 0  ;;  %v1683_v41 = vmul.f32 0.5, %v5127_v55 }
 0x192   : > { %4169 = vpow2.f32 %v2082_v62  ;;  %2660 = vmatpush.bf16.msrb.mxu2 %v2651_v20 }
 0x193   : > { %4171 = vpow2.f32 %v2078_v9  ;;  %v1988_v9 = vsub.f32 %v4834_v28, %v1862_v8 }
 0x195   : > { %2230 = vadd.xlane.f32.xlu0 %v2229_v32  ;;  %2233 = vadd.xlane.f32.xlu2 %v2232_v63  ;;  %v1677_v63 = vmul.f32 0.5, %v5112_v14 }
 0x196   : > { %1918 = vmax.xlane.f32.xlu1 %v1917_v42  ;;  %v1914_v42 = vsel %vm1763_vm2, %v5167_v2, -inf }
 0x197   : > { %v4168_v3 = vpop.eup %4167 }
 0x198   : > { %v2404_v36 = vmul.f32 %v4168_v3, %v4830_v25  ;;  %v1865_v50 = vpop.xlane.xlu0 %1864  ;;  %v2156_v56 = vpop.xlane.xlu2 %2155  ;;  %v2670_v25 = vsel %vm2535_vm3, %v354_v17, 0 }
 0x199   : > { %v2153_v62 = vpop.xlane.xlu1 %2152  ;;  %v5180_v32 = vpop.eup %4169  ;;  %2679 = vmatpush.bf16.msrb.mxu3 %v2670_v25 }
 0x19a   : > { %4173 = vrcp.f32 %v2153_v62  ;;  %v2468_v40 = vpack.c.bf16 %v2404_v36, %v2404_v36  ;;  %v2241_v3 = vsel %vm1763_vm2, %v5180_v32, 0.0  ;;  %v5189_v36 = vpop.eup %4171 }
 0x19b   : > { %4175 = vrcp.f32 %v2156_v56  ;;  %v2084_v56 = vmul.f32 1.442695, %v1988_v9  ;;  %v2235_v55 = vsel %vm1763_vm2, %v5189_v36, 0.0 }
 0x19c   : > { %4177 = vpow2.f32 %v2080_v12  ;;  %4035 = vmatmul.msk.bf16.vlgmr.msra.gmra.mxu0 %vm411_vm0, %v2468_v40  ;;  %v5193_v12 = vsel %vm4558_vm1, %v1677_v63, -32767.0  ;;  %v1682_v63 = vmul.f32 0.5, %v5132_v37 }
 0x19d   : > { %1915 = vmax.xlane.f32.xlu0 %v1914_v42  ;;  %2242 = vadd.xlane.f32.xlu2 %v2241_v3  ;;  %v1911_v9 = vsel %vm1763_vm2, %v5193_v12, -inf }
 0x19e   : > { %1909 = vmax.xlane.f32.xlu1 %v1908_v16 }
 0x1a0   : > { %v4174_v62 = vpop.eup %4173  ;;  %v2159_v42 = vpop.xlane.xlu0 %2158 }
 0x1a1   : > { %v4176_v28 = vpop.eup %4175  ;;  %v2405_v14 = vmul.f32 %v4174_v62, %v4849_v53  ;;  %v1868_v8 = vpop.xlane.xlu1 %1867  ;;  %4179 = vrcp.f32 %v2159_v42  ;;  %v1989_v62 = vsub.f32 %v4842_v31, %v1865_v50  ;;  %v5221_v42 = vsel %vm4558_vm1, %v1682_v63, -32767.0 }
 0x1a2   : > { %v5197_v17 = vpop.eup %4177  ;;  %v2406_v16 = vmul.f32 %v4176_v28, %v4845_v46  ;;  %v1990_v40 = vsub.f32 %v4863_v13, %v1868_v8  ;;  %v1871_v20 = vpop.xlane.xlu2 %1870  ;;  %4181 = vpow2.f32 %v2084_v56  ;;  %v5213_v28 = vsel %vm4558_vm1, %v1683_v41, -32767.0 }
 0x1a3   : > { %v2469_v25 = vpack.c.bf16 %v2405_v14, %v2405_v14  ;;  %v1991_v3 = vsub.f32 %v4869_v18, %v1871_v20  ;;  %v2238_v13 = vsel %vm1763_vm2, %v5197_v17, 0.0  ;;  %v1929_v37 = vsel %vm1763_vm2, %v5213_v28, -inf  ;;  %v355_v20 = vld [vmem:[%s5082_s24 + $0x10] sm:$0x3] }
 0x1a4   : > { %v2470_v53 = vpack.c.bf16 %v2406_v16, %v2406_v16  ;;  %v2088_v46 = vmul.f32 1.442695, %v1990_v40  ;;  %v2086_v50 = vmul.f32 1.442695, %v1989_v62  ;;  %v1926_v63 = vsel %vm1763_vm2, %v5221_v42, -inf }
 0x1a5   : > { %2236 = vadd.xlane.f32.xlu0 %v2235_v55  ;;  %4036 = vmatmul.msk.bf16.vlgmr.msra.gmra.mxu1 %vm411_vm0, %v2469_v25  ;;  %v2090_v31 = vmul.f32 1.442695, %v1991_v3  ;;  %v356_v25 = vld [vmem:[%s5082_s24 + $0x12] sm:$0x3]  ;;  %v2689_v3 = vsel %vm2535_vm3, %v355_v20, 0  ;;  %v5233_v55 = vpop.f32.mrf.mxu0 }
 0x1a6   : > { %4037 = vmatmul.msk.bf16.vlgmr.msra.gmra.mxu2 %vm411_vm0, %v2470_v53  ;;  %2239 = vadd.xlane.f32.xlu1 %v2238_v13  ;;  %4183 = vpow2.f32 %v2088_v46  ;;  %v5239_v13 = vpop.f32.mrf.mxu1 }
 0x1a7   : > { %1912 = vmax.xlane.f32.xlu2 %v1911_v9  ;;  %v4180_v18 = vpop.eup %4179  ;;  %v357_v9 = vld [vmem:[%s5082_s24 + $0x14] sm:$0x3]  ;;  %2698 = vmatpush.bf16.msra.mxu0 %v2689_v3 }
 0x1a8   : > { %v2407_v56 = vmul.f32 %v4180_v18, %v4871_v7  ;;  %v2165_v14 = vpop.xlane.xlu0 %2164  ;;  %v5223_v41 = vpop.eup %4181  ;;  %v2708_v7 = vsel %vm2535_vm3, %v356_v25, 0  ;;  %v2727_v62 = vsel %vm2535_vm3, %v357_v9, 0  ;;  %v358_v25 = vld [vmem:[%s5082_s24 + $0x16] sm:$0x3] }
 0x1a9   : > { %v1874_v8 = vpop.xlane.xlu1 %1873  ;;  %4185 = vrcp.f32 %v2165_v14  ;;  %2717 = vmatpush.bf16.msra.mxu1 %v2708_v7  ;;  %v2244_v46 = vsel %vm1763_vm2, %v5223_v41, 0.0  ;;  %2736 = vmatpush.bf16.msra.mxu2 %v2727_v62 }
 0x1aa   : > { %v2162_v16 = vpop.xlane.xlu2 %2161  ;;  %v1992_v40 = vsub.f32 %v4886_v34, %v1874_v8  ;;  %v2471_v53 = vpack.c.bf16 %v2407_v56, %v2407_v56 }
 0x1ab   : > { %4187 = vrcp.f32 %v2162_v16 }
 0x1ac   : > { %4189 = vpow2.f32 %v2090_v31  ;;  %v2092_v34 = vmul.f32 1.442695, %v1992_v40  ;;  %4038 = vmatmul.msk.bf16.vlgmr.msra.gmra.mxu3 %vm411_vm0, %v2471_v53  ;;  %v5241_v18 = vpop.eup %4183  ;;  %v5251_v3 = vpop.f32.mrf.mxu2 }
 0x1ad   : > { %4191 = vpow2.f32 %v2086_v50  ;;  %1930 = vmax.xlane.f32.xlu0 %v1929_v37  ;;  %v2250_v62 = vsel %vm1763_vm2, %v5241_v18, 0.0 }
 0x1ae   : > { %2245 = vadd.xlane.f32.xlu1 %v2244_v46  ;;  %4193 = vpow2.f32 %v2092_v34  ;;  %v1436_v34 = vpop.f32.mrf.mxu1 }
 0x1af   : > { %1927 = vmax.xlane.f32.xlu2 %v1926_v63  ;;  %v4186_v31 = vpop.eup %4185 }
 0x1b0   : > { %v2409_v14 = vmul.f32 %v4186_v31, %v4891_v60  ;;  %v1880_v50 = vpop.xlane.xlu0 %1879  ;;  %v2746_v60 = vsel %vm2535_vm3, %v358_v25, 0  ;;  %v359_v25 = vld [vmem:[%s5082_s24 + $0x18] sm:$0x3] }
 0x1b1   : > { %v4188_v56 = vpop.eup %4187  ;;  %v2168_v37 = vpop.xlane.xlu1 %2167  ;;  %v1994_v40 = vsub.f32 %v4903_v15, %v1880_v50  ;;  %2755 = vmatpush.bf16.msra.mxu3 %v2746_v60  ;;  %v361_v60 = vld [vmem:[%s5082_s24 + $0x1c] sm:$0x3] }
 0x1b2   : > { %v5244_v8 = vpop.eup %4189  ;;  %v2408_v16 = vmul.f32 %v4188_v56, %v4895_v24  ;;  %v2171_v20 = vpop.xlane.xlu2 %2170  ;;  %4195 = vrcp.f32 %v2168_v37  ;;  %v2473_v53 = vpack.c.bf16 %v2409_v14, %v2409_v14 }
 0x1b3   : > { %v5249_v9 = vpop.eup %4191  ;;  %4197 = vrcp.f32 %v2171_v20  ;;  %v2096_v63 = vmul.f32 1.442695, %v1994_v40  ;;  %v1417_v24 = vpop.f32.mrf.mxu0  ;;  %v2253_v15 = vsel %vm1763_vm2, %v5244_v8, 0.0 }
 0x1b4   : > { %v2472_v7 = vpack.c.bf16 %v2408_v16, %v2408_v16  ;;  %v2247_v46 = vsel %vm1763_vm2, %v5249_v9, 0.0  ;;  %v5262_v31 = vpop.eup %4193 }
 0x1b5   : > { %2251 = vadd.xlane.f32.xlu0 %v2250_v62  ;;  %4040 = vmatmul.msk.bf16.vlgmr.msrb.gmra.mxu1 %vm411_vm0, %v2473_v53  ;;  %4199 = vpow2.f32 %v2096_v63  ;;  %v360_v53 = vld [vmem:[%s5082_s24 + $0x1a] sm:$0x3]  ;;  %v2765_v62 = vsel %vm2535_vm3, %v359_v25, 0  ;;  %v1680_v25 = vmul.f32 0.5, %v5233_v55 }
 0x1b6   : > { %4039 = vmatmul.msk.bf16.vlgmr.msrb.gmra.mxu0 %vm411_vm0, %v2472_v7  ;;  %2254 = vadd.xlane.f32.xlu1 %v2253_v15  ;;  %v2784_v24 = vsel %vm2535_vm3, %v360_v53, 0  ;;  %v1531_v15 = vpop.f32.mrf.mxu2 }
 0x1b7   : > { %2248 = vadd.xlane.f32.xlu2 %v2247_v46  ;;  %2774 = vmatpush.bf16.msrb.mxu0 %v2765_v62  ;;  %v5299_v55 = vsel %vm4558_vm1, %v1680_v25, -32767.0  ;;  %v1686_v25 = vmul.f32 0.5, %v5251_v3 }
 0x1b8   : > { %v4196_v56 = vpop.eup %4195  ;;  %2793 = vmatpush.bf16.msrb.mxu1 %v2784_v24 }
 0x1b9   : > { %v4198_v14 = vpop.eup %4197  ;;  %v2410_v50 = vmul.f32 %v4196_v56, %v4905_v27  ;;  %v1883_v37 = vpop.xlane.xlu1 %1882  ;;  %v5322_v3 = vsel %vm4558_vm1, %v1686_v25, -32767.0 }
 0x1ba   : > { %v2411_v16 = vmul.f32 %v4198_v14, %v4907_v30  ;;  %v1877_v40 = vpop.xlane.xlu2 %1876  ;;  %v1995_v20 = vsub.f32 %v4926_v11, %v1883_v37  ;;  %v2256_v30 = vsel %vm1763_vm2, %v5262_v31, 0.0  ;;  %v2803_v11 = vsel %vm2535_vm3, %v361_v60, 0 }
 0x1bb   : > { %v2474_v7 = vpack.c.bf16 %v2410_v50, %v2410_v50  ;;  %v1993_v63 = vsub.f32 %v4920_v54, %v1877_v40  ;;  %v5273_v34 = vpop.eup %4199 }
 0x1bc   : > { %v2475_v27 = vpack.c.bf16 %v2411_v16, %v2411_v16  ;;  %v2098_v46 = vmul.f32 1.442695, %v1995_v20  ;;  %v2262_v54 = vsel %vm1763_vm2, %v5273_v34, 0.0  ;;  %v362_v16 = vld [vmem:[%s5082_s24 + $0x1e] sm:$0x3] }
 0x1bd   : > { %v2094_v56 = vmul.f32 1.442695, %v1993_v63  ;;  %2257 = vadd.xlane.f32.xlu0 %v2256_v30  ;;  %4041 = vmatmul.msk.bf16.vlgmr.msrb.gmra.mxu2 %vm411_vm0, %v2474_v7  ;;  %v2822_v40 = vsel %vm2535_vm3, %v362_v16, 0  ;;  %v1681_v7 = vmul.f32 0.5, %v5239_v13  ;;  %v5310_v16 = vpop.f32.mrf.mxu1 }
 0x1be   : > { %4201 = vpow2.f32 %v2098_v46  ;;  %4042 = vmatmul.msk.bf16.vlgmr.msrb.gmra.mxu3 %vm411_vm0, %v2475_v27  ;;  %2812 = vmatpush.bf16.msrb.mxu2 %v2803_v11 }
 0x1bf   : > { %4203 = vpow2.f32 %v2094_v56  ;;  %2263 = vadd.xlane.f32.xlu2 %v2262_v54  ;;  %2831 = vmatpush.bf16.msrb.mxu3 %v2822_v40  ;;  %v5304_v11 = vsel %vm4558_vm1, %v1681_v7, -32767.0 }
 0x1c0   : > { %v2180_v14 = vpop.xlane.xlu0 %2179 }
 0x1c1   : > { %4205 = vrcp.f32 %v2180_v14  ;;  %v2174_v50 = vpop.xlane.xlu1 %2173  ;;  %v363_v14 = vld [vmem:[%s5082_s24 + $0x20] sm:$0x3] }
 0x1c2   : > { %v2177_v37 = vpop.xlane.xlu2 %2176  ;;  %4207 = vrcp.f32 %v2174_v50 }
 0x1c3   : > { %4209 = vrcp.f32 %v2177_v37  ;;  %v1920_v37 = vsel %vm1763_vm2, %v5299_v55, -inf }
 0x1c4   : > { %v5284_v20 = vpop.eup %4201 }
 0x1c5   : > { %v5287_v53 = vpop.eup %4203  ;;  %v2265_v60 = vsel %vm1763_vm2, %v5284_v20, 0.0 }
 0x1c6   : > { %2266 = vadd.xlane.f32.xlu0 %v2265_v60  ;;  %v2259_v63 = vsel %vm1763_vm2, %v5287_v53, 0.0  ;;  %v2841_v60 = vsel %vm2535_vm3, %v363_v14, 0 }
 0x1c7   : > { %v4206_v62 = vpop.eup %4205  ;;  %2260 = vadd.xlane.f32.xlu1 %v2259_v63 }
 0x1c8   : > { %v4208_v24 = vpop.eup %4207  ;;  %v2414_v15 = vmul.f32 %v4206_v62, %v4941_v43  ;;  %v5295_v27 = vpop.xlane.xlu0 %1894  ;;  %v364_v62 = vld [vmem:[%s5082_s24 + $0x22] sm:$0x3] }
 0x1c9   : > { %v4210_v46 = vpop.eup %4209  ;;  %v2412_v30 = vmul.f32 %v4208_v24, %v4937_v29  ;;  %v2183_v13 = vpop.xlane.xlu1 %2182  ;;  %v1923_v29 = vsel %vm1763_vm2, %v5304_v11, -inf }
 0x1ca   : > { %v2413_v56 = vmul.f32 %v4210_v46, %v4939_v26  ;;  %v1892_v54 = vpop.xlane.xlu2 %1891  ;;  %4211 = vrcp.f32 %v2183_v13  ;;  %v2478_v43 = vpack.c.bf16 %v2414_v15, %v2414_v15  ;;  %v2860_v46 = vsel %vm2535_vm3, %v364_v62, 0  ;;  %v365_v13 = vld [vmem:[%s5082_s24 + $0x24] sm:$0x3] }
 0x1cb   : > { %v2476_v50 = vpack.c.bf16 %v2412_v30, %v2412_v30  ;;  %v1998_v26 = vsub.f32 %v4964_v22, %v1892_v54  ;;  %v2879_v14 = vsel %vm2535_vm3, %v365_v13, 0 }
 0x1cc   : > { %v2477_v40 = vpack.c.bf16 %v2413_v56, %v2413_v56  ;;  %v366_v56 = vld [vmem:[%s5082_s24 + $0x26] sm:$0x3] }
 0x1cd   : > { %4043 = vmatmul.msk.bf16.vlgmr.msra.gmra.mxu0 %vm411_vm0, %v2476_v50  ;;  %4045 = vmatmul.msk.bf16.vlgmr.msra.gmra.mxu2 %vm411_vm0, %v2478_v43  ;;  %v2104_v24 = vmul.f32 1.442695, %v1998_v26  ;;  %v2898_v43 = vsel %vm2535_vm3, %v366_v56, 0  ;;  %v1512_v50 = vpop.f32.mrf.mxu1 }
 0x1ce   : > { %4044 = vmatmul.msk.bf16.vlgmr.msra.gmra.mxu1 %vm411_vm0, %v2477_v40  ;;  %1921 = vmax.xlane.f32.xlu0 %v1920_v37  ;;  %v1938_v37 = vsel %vm1763_vm2, %v5322_v3, -inf }
 0x1cf   : > { %1924 = vmax.xlane.f32.xlu1 %v1923_v29  ;;  %2850 = vmatpush.bf16.msra.mxu0 %v2841_v60 }
 0x1d0   : > { %v4212_v7 = vpop.eup %4211  ;;  %v2186_v63 = vpop.xlane.xlu0 %2185  ;;  %2869 = vmatpush.bf16.msra.mxu1 %v2860_v46  ;;  %2888 = vmatpush.bf16.msra.mxu2 %v2879_v14 }
 0x1d1   : > { %v2415_v22 = vmul.f32 %v4212_v7, %v4966_v5  ;;  %4213 = vrcp.f32 %v2186_v63  ;;  %v2189_v15 = vpop.xlane.xlu1 %2188 }
 0x1d2   : > { %v2192_v30 = vpop.xlane.xlu2 %2191  ;;  %4215 = vrcp.f32 %v2189_v15  ;;  %v367_v15 = vld [vmem:[%s5082_s24 + $0x28] sm:$0x3]  ;;  %v5343_v56 = vpop.f32.mrf.mxu2 }
 0x1d3   : > { %v2479_v54 = vpack.c.bf16 %v2415_v22, %v2415_v22  ;;  %4217 = vrcp.f32 %v2192_v30 }
 0x1d4   : > { %4219 = vpow2.f32 %v2104_v24  ;;  %v5336_v63 = vpop.f32.mrf.mxu3  ;;  %v5345_v14 = vpop.f32.mrf.mxu0 }
 0x1d5   : > { %4046 = vmatmul.msk.bf16.vlgmr.msra.gmra.mxu3 %vm411_vm0, %v2479_v54 }
 0x1d6   : > { %2907 = vmatpush.bf16.msra.mxu3 %v2898_v43 }
 0x1d7   : > { %v4214_v5 = vpop.eup %4213  ;;  %1939 = vmax.xlane.f32.xlu1 %v1938_v37 }
 0x1d8   : > { %v4216_v40 = vpop.eup %4215  ;;  %v2416_v29 = vmul.f32 %v4214_v5, %v4986_v6  ;;  %v2195_v25 = vpop.xlane.xlu0 %2194 }
 0x1d9   : > { %v4218_v60 = vpop.eup %4217  ;;  %v2417_v26 = vmul.f32 %v4216_v40, %v4988_v23  ;;  %4221 = vrcp.f32 %v2195_v25  ;;  %v1889_v7 = vpop.xlane.xlu1 %1888  ;;  %v2917_v23 = vsel %vm2535_vm3, %v367_v15, 0 }
 0x1da   : > { %v2418_v62 = vmul.f32 %v4218_v60, %v4990_v10  ;;  %v2198_v24 = vpop.xlane.xlu2 %2197  ;;  %v1997_v22 = vsub.f32 %v5007_v4, %v1889_v7  ;;  %v5341_v46 = vpop.eup %4219  ;;  %v2480_v30 = vpack.c.bf16 %v2416_v29, %v2416_v29  ;;  %v1999_v29 = vsub.f32 %v4958_v35, %v5295_v27  ;;  %v368_v60 = vld [vmem:[%s5082_s24 + $0x2a] sm:$0x3] }
 0x1db   : > { %v2481_v13 = vpack.c.bf16 %v2417_v26, %v2417_v26  ;;  %4223 = vrcp.f32 %v2198_v24  ;;  %v2274_v10 = vsel %vm1763_vm2, %v5341_v46, 0.0  ;;  %v369_v26 = vld [vmem:[%s5082_s24 + $0x2c] sm:$0x3] }
 0x1dc   : > { %v2482_v6 = vpack.c.bf16 %v2418_v62, %v2418_v62  ;;  %v2102_v54 = vmul.f32 1.442695, %v1997_v22  ;;  %v1550_v40 = vpop.f32.mrf.mxu3  ;;  %v2936_v22 = vsel %vm2535_vm3, %v368_v60, 0  ;;  %v2955_v15 = vsel %vm2535_vm3, %v369_v26, 0 }
 0x1dd   : > { %4047 = vmatmul.msk.bf16.vlgmr.msrb.gmra.mxu0 %vm411_vm0, %v2480_v30  ;;  %v370_v30 = vld [vmem:[%s5082_s24 + $0x2e] sm:$0x3] }
 0x1de   : > { %4225 = vpow2.f32 %v2102_v54  ;;  %4048 = vmatmul.msk.bf16.vlgmr.msrb.gmra.mxu1 %vm411_vm0, %v2481_v13  ;;  %4049 = vmatmul.msk.bf16.vlgmr.msrb.gmra.mxu2 %vm411_vm0, %v2482_v6  ;;  %v1685_v6 = vmul.f32 0.5, %v5310_v16  ;;  %v1493_v54 = vpop.f32.mrf.mxu0  ;;  %v2974_v35 = vsel %vm2535_vm3, %v370_v30, 0 }
 0x1df   : > { %v4222_v4 = vpop.eup %4221  ;;  %2275 = vadd.xlane.f32.xlu1 %v2274_v10  ;;  %2926 = vmatpush.bf16.msrb.mxu0 %v2917_v23  ;;  %v2106_v23 = vmul.f32 1.442695, %v1999_v29 }
 0x1e0   : > { %v2419_v43 = vmul.f32 %v4222_v4, %v5010_v59  ;;  %v1886_v50 = vpop.xlane.xlu0 %1885  ;;  %v1607_v59 = vpop.f32.mrf.mxu2  ;;  %2945 = vmatpush.bf16.msrb.mxu1 %v2936_v22  ;;  %2964 = vmatpush.bf16.msrb.mxu2 %v2955_v15  ;;  %v5373_v4 = vsel %vm4558_vm1, %v1685_v6, -32767.0 }
 0x1e1   : > { %v1996_v37 = vsub.f32 %v5025_v49, %v1886_v50  ;;  %v1904_v5 = vpop.xlane.xlu1 %1903  ;;  %v4224_v7 = vpop.eup %4223  ;;  %v1935_v29 = vsel %vm1763_vm2, %v5373_v4, -inf }
 0x1e2   : > { %v2207_v25 = vpop.xlane.xlu2 %2206  ;;  %v2483_v62 = vpack.c.bf16 %v2419_v43, %v2419_v43  ;;  %v2002_v49 = vsub.f32 %v5032_v33, %v1904_v5  ;;  %v2420_v10 = vmul.f32 %v4224_v7, %v5013_v51 }
 0x1e3   : > { %v2100_v24 = vmul.f32 1.442695, %v1996_v37  ;;  %v371_v37 = vld [vmem:[%s5082_s24 + $0x30] sm:$0x3] }
 0x1e4   : > { %v5362_v13 = vpop.eup %4225  ;;  %v2112_v33 = vmul.f32 1.442695, %v2002_v49  ;;  %v2484_v40 = vpack.c.bf16 %v2420_v10, %v2420_v10  ;;  %v5380_v51 = vpop.f32.mrf.mxu3  ;;  %v373_v10 = vld [vmem:[%s5082_s24 + $0x34] sm:$0x3] }
 0x1e5   : > { %4227 = vpow2.f32 %v2100_v24  ;;  %4050 = vmatmul.msk.bf16.vlgmr.msrb.gmra.mxu3 %vm411_vm0, %v2483_v62  ;;  %v2271_v27 = vsel %vm1763_vm2, %v5362_v13, 0.0 }
 0x1e6   : > { %2272 = vadd.xlane.f32.xlu0 %v2271_v27  ;;  %2983 = vmatpush.bf16.msrb.mxu3 %v2974_v35  ;;  %4229 = vrcp.f32 %v2207_v25  ;;  %v2993_v25 = vsel %vm2535_vm3, %v371_v37, 0  ;;  %v5385_v26 = vpop.f32.mrf.mxu0 }
 0x1e8   : > { %v2201_v16 = vpop.xlane.xlu0 %2200 }
 0x1e9   : > { %4231 = vrcp.f32 %v2201_v16  ;;  %v2204_v43 = vpop.xlane.xlu1 %2203 }
 0x1ea   : > { %v1907_v50 = vpop.xlane.xlu2 %1906  ;;  %4233 = vrcp.f32 %v2204_v43  ;;  %v1690_v43 = vmul.f32 0.5, %v5343_v56 }
 0x1eb   : > { %v5376_v5 = vpop.eup %4227  ;;  %4235 = vpow2.f32 %v2106_v23  ;;  %v372_v23 = vld [vmem:[%s5082_s24 + $0x32] sm:$0x3] }
 0x1ec   : > { %4237 = vpow2.f32 %v2112_v33  ;;  %v2268_v60 = vsel %vm1763_vm2, %v5376_v5, 0.0  ;;  %v4230_v7 = vpop.eup %4229  ;;  %v374_v33 = vld [vmem:[%s5082_s24 + $0x36] sm:$0x3]  ;;  %v1626_v37 = vpop.f32.mrf.mxu3 }
 0x1ed   : > { %2269 = vadd.xlane.f32.xlu2 %v2268_v60  ;;  %4051 = vmatmul.msk.bf16.vlgmr.msra.gmra.mxu0 %vm411_vm0, %v2484_v40  ;;  %v2423_v22 = vmul.f32 %v4230_v7, %v5037_v58  ;;  %v3012_v60 = vsel %vm2535_vm3, %v372_v23, 0  ;;  %v3031_v7 = vsel %vm2535_vm3, %v373_v10, 0  ;;  %v3050_v56 = vsel %vm2535_vm3, %v374_v33, 0  ;;  %v375_v33 = vld [vmem:[%s5082_s24 + $0x38] sm:$0x3] }
 0x1ee   : > { %1936 = vmax.xlane.f32.xlu0 %v1935_v29  ;;  %3002 = vmatpush.bf16.msra.mxu0 %v2993_v25  ;;  %v1569_v29 = vpop.f32.mrf.mxu0  ;;  %v5406_v25 = vpop.f32.mrf.mxu1 }
 0x1ef   : > { %v4232_v62 = vpop.eup %4231  ;;  %v2487_v40 = vpack.c.bf16 %v2423_v22, %v2423_v22 }
 0x1f0   : > { %v4234_v24 = vpop.eup %4233  ;;  %v2421_v15 = vmul.f32 %v4232_v62, %v5051_v21  ;;  %v5390_v30 = vpop.xlane.xlu0 %1900  ;;  %v1687_v21 = vmul.f32 0.5, %v5336_v63 }
 0x1f1   : > { %v5392_v59 = vpop.eup %4235  ;;  %v2422_v49 = vmul.f32 %v4234_v24, %v5057_v48  ;;  %v2210_v6 = vpop.xlane.xlu1 %2209 }
 0x1f2   : > { %v5395_v54 = vpop.eup %4237  ;;  %v2485_v35 = vpack.c.bf16 %v2421_v15, %v2421_v15  ;;  %4239 = vrcp.f32 %v2210_v6  ;;  %v1898_v27 = vpop.xlane.xlu2 %1897  ;;  %v2277_v48 = vsel %vm1763_vm2, %v5392_v59, 0.0  ;;  %v5418_v24 = vsel %vm4558_vm1, %v1687_v21, -32767.0 }
 0x1f3   : > { %v2486_v16 = vpack.c.bf16 %v2422_v49, %v2422_v49  ;;  %v2000_v58 = vsub.f32 %v5086_v47, %v1898_v27  ;;  %v2003_v47 = vsub.f32 %v5055_v44, %v1907_v50  ;;  %v2286_v63 = vsel %vm1763_vm2, %v5395_v54, 0.0 }
 0x1f4   : > { %4052 = vmatmul.msk.bf16.vlgmr.msra.gmra.mxu1 %vm411_vm0, %v2485_v35  ;;  %v5422_v44 = vsel %vm4558_vm1, %v1690_v43, -32767.0  ;;  %v1684_v27 = vmul.f32 0.5, %v5345_v14  ;;  %v1941_v23 = vsel %vm1763_vm2, %v5418_v24, -inf }
 0x1f5   : > { %v2108_v62 = vmul.f32 1.442695, %v2000_v58  ;;  %2278 = vadd.xlane.f32.xlu2 %v2277_v48  ;;  %4053 = vmatmul.msk.bf16.vlgmr.msra.gmra.mxu2 %vm411_vm0, %v2486_v16  ;;  %v2114_v15 = vmul.f32 1.442695, %v2003_v47  ;;  %v1950_v10 = vsel %vm1763_vm2, %v5422_v44, -inf  ;;  %v2001_v16 = vsub.f32 %v5075_v39, %v5390_v30 }
 0x1f6   : > { %4054 = vmatmul.msk.bf16.vlgmr.msra.gmra.mxu3 %vm411_vm0, %v2487_v40  ;;  %2287 = vadd.xlane.f32.xlu0 %v2286_v63  ;;  %v1588_v21 = vpop.f32.mrf.mxu1  ;;  %v5441_v37 = vsel %vm4558_vm1, %v1684_v27, -32767.0  ;;  %v5861_v63 = vld [vmem:[#allocation2_spill] sm:$0xff] }
 0x1f7   : > { %4241 = vpow2.f32 %v2108_v62  ;;  %3021 = vmatpush.bf16.msra.mxu1 %v3012_v60  ;;  %3040 = vmatpush.bf16.msra.mxu2 %v3031_v7  ;;  %v2110_v30 = vmul.f32 1.442695, %v2001_v16  ;;  %v1932_v62 = vsel %vm1763_vm2, %v5441_v37, -inf }
 0x1f8   : > { %v4240_v50 = vpop.eup %4239  ;;  %v2216_v22 = vpop.xlane.xlu0 %2215  ;;  %3059 = vmatpush.bf16.msra.mxu3 %v3050_v56 }
 0x1f9   : > { %v2424_v49 = vmul.f32 %v4240_v50, %v5088_v45  ;;  %4243 = vrcp.f32 %v2216_v22  ;;  %v2219_v6 = vpop.xlane.xlu1 %2218  ;;  %v3069_v45 = vsel %vm2535_vm3, %v375_v33, 0  ;;  %v376_v22 = vld [vmem:[%s5082_s24 + $0x3a] sm:$0x3] }
 0x1fa   : > { %4245 = vrcp.f32 %v2219_v6  ;;  %v2213_v35 = vpop.xlane.xlu2 %2212 }
 0x1fb   : > { %v2488_v58 = vpack.c.bf16 %v2424_v49, %v2424_v49  ;;  %4247 = vrcp.f32 %v2213_v35  ;;  %v378_v49 = vld [vmem:[%s5082_s24 + $0x3e] sm:$0x3] }
 0x1fc   : > { %4249 = vpow2.f32 %v2114_v15  ;;  %v377_v15 = vld [vmem:[%s5082_s24 + $0x3c] sm:$0x3]  ;;  %v3126_v33 = vsel %vm2535_vm3, %v378_v49, 0 }
 0x1fd   : > { %v5434_v43 = vpop.eup %4241  ;;  %1942 = vmax.xlane.f32.xlu2 %v1941_v23  ;;  %4055 = vmatmul.msk.bf16.vlgmr.msrb.gmra.mxu0 %vm411_vm0, %v2488_v58  ;;  %v3088_v23 = vsel %vm2535_vm3, %v376_v22, 0  ;;  %v1688_v22 = vmul.f32 0.5, %v5385_v26 }
 0x1fe   : > { %v2280_v14 = vsel %vm1763_vm2, %v5434_v43, 0.0  ;;  %1951 = vmax.xlane.f32.xlu0 %v1950_v10  ;;  %3078 = vmatpush.bf16.msrb.mxu0 %v3069_v45  ;;  %v3107_v10 = vsel %vm2535_vm3, %v377_v15, 0  ;;  %v5862_v45 = vld [vmem:[#allocation3_spill] sm:$0xff]  ;;  %v5863_v15 = vld [vmem:[#allocation5_spill] sm:$0xff] }
 0x1ff   : > { %v4244_v39 = vpop.eup %4243  ;;  %2281 = vadd.xlane.f32.xlu1 %v2280_v14 }
 0x200   : > { %v4246_v40 = vpop.eup %4245  ;;  %v2426_v48 = vmul.f32 %v4244_v39, %v5103_v19  ;;  %v2222_v29 = vpop.xlane.xlu0 %2221 }
 0x201   : > { %v4248_v60 = vpop.eup %4247  ;;  %v2427_v7 = vmul.f32 %v4246_v40, %v5105_v57  ;;  %4251 = vrcp.f32 %v2222_v29  ;;  %v2225_v47 = vpop.xlane.xlu1 %2224  ;;  %v1691_v57 = vmul.f32 0.5, %v5380_v51  ;;  %v379_v29 = vld [vmem:[%s5082_s24 + $0x40] sm:$0x3] }
 0x202   : > { %v2425_v56 = vmul.f32 %v4248_v60, %v5861_v63  ;;  %v2228_v50 = vpop.xlane.xlu2 %2227  ;;  %v5451_v6 = vpop.eup %4249  ;;  %4253 = vpow2.f32 %v2110_v30  ;;  %v2490_v35 = vpack.c.bf16 %v2426_v48, %v2426_v48 }
 0x203   : > { %v2491_v19 = vpack.c.bf16 %v2427_v7, %v2427_v7  ;;  %4255 = vrcp.f32 %v2228_v50  ;;  %v2289_v16 = vsel %vm1763_vm2, %v5451_v6, 0.0  ;;  %v5467_v30 = vsel %vm4558_vm1, %v1691_v57, -32767.0 }
 0x204   : > { %v2489_v27 = vpack.c.bf16 %v2425_v56, %v2425_v56  ;;  %4257 = vrcp.f32 %v2225_v47  ;;  %v3145_v7 = vsel %vm2535_vm3, %v379_v29, 0  ;;  %v1953_v56 = vsel %vm1763_vm2, %v5467_v30, -inf }
 0x205   : > { %1933 = vmax.xlane.f32.xlu2 %v1932_v62  ;;  %4057 = vmatmul.msk.bf16.vlgmr.msrb.gmra.mxu2 %vm411_vm0, %v2490_v35  ;;  %v5864_v35 = vld [vmem:[#allocation4_spill] sm:$0xff] }
 0x206   : > { %4056 = vmatmul.msk.bf16.vlgmr.msrb.gmra.mxu1 %vm411_vm0, %v2489_v27  ;;  %4058 = vmatmul.msk.bf16.vlgmr.msrb.gmra.mxu3 %vm411_vm0, %v2491_v19 }
 0x207   : > { %v4252_v58 = vpop.eup %4251  ;;  %2290 = vadd.xlane.f32.xlu1 %v2289_v16  ;;  %3097 = vmatpush.bf16.msrb.mxu1 %v3088_v23 }
 0x208   : > { %v2428_v21 = vmul.f32 %v4252_v58, %v5862_v45  ;;  %v2231_v51 = vpop.xlane.xlu0 %2230  ;;  %3116 = vmatpush.bf16.msrb.mxu2 %v3107_v10  ;;  %3135 = vmatpush.bf16.msrb.mxu3 %v3126_v33  ;;  %v5463_v14 = vpop.eup %4253  ;;  %v5484_v10 = vsel %vm4558_vm1, %v1688_v22, -32767.0  ;;  %v380_v58 = vld [vmem:[%s5082_s24 + $0x42] sm:$0x3]  ;;  %v381_v45 = vld [vmem:[%s5082_s24 + $0x44] sm:$0x3] }
 0x209   : > { %4259 = vrcp.f32 %v2231_v51  ;;  %v1919_v39 = vpop.xlane.xlu1 %1918  ;;  %v4256_v47 = vpop.eup %4255  ;;  %v2283_v63 = vsel %vm1763_vm2, %v5463_v14, 0.0  ;;  %v1689_v22 = vmul.f32 0.5, %v5406_v25 }
 0x20a   : > { %v2007_v40 = vsub.f32 %v5145_v38, %v1919_v39  ;;  %v2234_v48 = vpop.xlane.xlu2 %2233  ;;  %v2492_v60 = vpack.c.bf16 %v2428_v21, %v2428_v21  ;;  %v4258_v50 = vpop.eup %4257  ;;  %v2430_v49 = vmul.f32 %v4256_v47, %v5863_v15  ;;  %v3183_v47 = vsel %vm2535_vm3, %v381_v45, 0  ;;  %v383_v15 = vld [vmem:[%s5082_s24 + $0x48] sm:$0x3] }
 0x20b   : > { %4261 = vrcp.f32 %v2234_v48  ;;  %v2429_v19 = vmul.f32 %v4258_v50, %v5864_v35 }
 0x20c   : > { %v2122_v62 = vmul.f32 1.442695, %v2007_v40  ;;  %v2494_v51 = vpack.c.bf16 %v2430_v49, %v2430_v49  ;;  %v382_v40 = vld [vmem:[%s5082_s24 + $0x46] sm:$0x3] }
 0x20d   : > { %2284 = vadd.xlane.f32.xlu2 %v2283_v63  ;;  %4059 = vmatmul.msk.bf16.vlgmr.msra.gmra.mxu0 %vm411_vm0, %v2492_v60 }
 0x20e   : > { %4263 = vpow2.f32 %v2122_v62  ;;  %3154 = vmatpush.bf16.msra.mxu0 %v3145_v7  ;;  %v3164_v7 = vsel %vm2535_vm3, %v380_v58, 0  ;;  %v3202_v62 = vsel %vm2535_vm3, %v382_v40, 0 }
 0x20f   : > { %v4260_v38 = vpop.eup %4259  ;;  %1954 = vmax.xlane.f32.xlu1 %v1953_v56 }
 0x210   : > { %v2431_v27 = vmul.f32 %v4260_v38, %v5147_v1  ;;  %v1916_v23 = vpop.xlane.xlu0 %1915  ;;  %v2493_v1 = vpack.c.bf16 %v2429_v19, %v2429_v19 }
 0x211   : > { %v2006_v57 = vsub.f32 %v5167_v2, %v1916_v23  ;;  %v1910_v26 = vpop.xlane.xlu1 %1909  ;;  %v4262_v21 = vpop.eup %4261  ;;  %v1944_v2 = vsel %vm1763_vm2, %v5484_v10, -inf  ;;  %v3221_v23 = vsel %vm2535_vm3, %v383_v15, 0 }
 0x212   : > { %v2243_v33 = vpop.xlane.xlu2 %2242  ;;  %v2004_v16 = vsub.f32 %v5171_v61, %v1910_v26  ;;  %v2495_v29 = vpack.c.bf16 %v2431_v27, %v2431_v27  ;;  %v2432_v63 = vmul.f32 %v4262_v21, %v5153_v0 }
 0x213   : > { %v2120_v39 = vmul.f32 1.442695, %v2006_v57 }
 0x214   : > { %v5490_v48 = vpop.eup %4263  ;;  %v2116_v60 = vmul.f32 1.442695, %v2004_v16  ;;  %v2496_v35 = vpack.c.bf16 %v2432_v63, %v2432_v63 }
 0x215   : > { %4265 = vpow2.f32 %v2120_v39  ;;  %4061 = vmatmul.msk.bf16.vlgmr.msra.gmra.mxu2 %vm411_vm0, %v2494_v51  ;;  %v2301_v61 = vsel %vm1763_vm2, %v5490_v48, 0.0 }
 0x216   : > { %4267 = vpow2.f32 %v2116_v60  ;;  %4060 = vmatmul.msk.bf16.vlgmr.msra.gmra.mxu1 %vm411_vm0, %v2493_v1  ;;  %4062 = vmatmul.msk.bf16.vlgmr.msra.gmra.mxu3 %vm411_vm0, %v2495_v29 }
 0x217   : > { %4269 = vrcp.f32 %v2243_v33  ;;  %2302 = vadd.xlane.f32.xlu0 %v2301_v61  ;;  %1945 = vmax.xlane.f32.xlu1 %v1944_v2  ;;  %v384_v61 = vld [vmem:[%s5082_s24 + $0x4a] sm:$0x3] }
 0x218   : > { %v2237_v56 = vpop.xlane.xlu0 %2236  ;;  %3173 = vmatpush.bf16.msra.mxu1 %v3164_v7  ;;  %3192 = vmatpush.bf16.msra.mxu2 %v3183_v47  ;;  %v385_v7 = vld [vmem:[%s5082_s24 + $0x4c] sm:$0x3]  ;;  %v386_v47 = vld [vmem:[%s5082_s24 + $0x4e] sm:$0x3] }
 0x219   : > { %4271 = vrcp.f32 %v2237_v56  ;;  %v2240_v50 = vpop.xlane.xlu1 %2239  ;;  %3211 = vmatpush.bf16.msra.mxu3 %v3202_v62  ;;  %v2548_v0 = vpop.f32.mrf.mxu0  ;;  %v3278_v15 = vsel %vm2535_vm3, %v386_v47, 0 }
 0x21a   : > { %v1913_v38 = vpop.xlane.xlu2 %1912  ;;  %4273 = vrcp.f32 %v2240_v50  ;;  %v3749_v27 = vpack.c.bf16 %v2548_v0, %v2548_v0  ;;  %v3259_v0 = vsel %vm2535_vm3, %v385_v7, 0 }
 0x21b   : > { %v5511_v49 = vpop.eup %4265  ;;  %v2005_v19 = vsub.f32 %v5193_v12, %v1913_v38  ;;  %v5526_v12 = vsel %vm4558_vm1, %v1689_v22, -32767.0 }
 0x21c   : > { %v5515_v25 = vpop.eup %4267  ;;  %v2298_v57 = vsel %vm1763_vm2, %v5511_v49, 0.0  ;;  %3814 = vst.msk [vmem:[%s5508_s27] sm:$0x3] %vm3813_vm4, %v3749_v27  ;;  %v1947_v29 = vsel %vm1763_vm2, %v5526_v12, -inf }
 0x21d   : > { %v4270_v26 = vpop.eup %4269  ;;  %v2118_v33 = vmul.f32 1.442695, %v2005_v19  ;;  %2299 = vadd.xlane.f32.xlu2 %v2298_v57  ;;  %4063 = vmatmul.msk.bf16.vlgmr.msrb.gmra.mxu0 %vm411_vm0, %v2496_v35  ;;  %v2292_v16 = vsel %vm1763_vm2, %v5515_v25, 0.0 }
 0x21e   : > { %3230 = vmatpush.bf16.msrb.mxu0 %v3221_v23  ;;  %v2435_v21 = vmul.f32 %v4270_v26, %v5180_v32 }
 0x21f   : > { %v4272_v58 = vpop.eup %4271  ;;  %4275 = vpow2.f32 %v2118_v33  ;;  %2293 = vadd.xlane.f32.xlu0 %v2292_v16 }
 0x220   : > { %v4274_v45 = vpop.eup %4273  ;;  %v2433_v51 = vmul.f32 %v4272_v58, %v5189_v36  ;;  %v1931_v39 = vpop.xlane.xlu0 %1930  ;;  %v2499_v56 = vpack.c.bf16 %v2435_v21, %v2435_v21 }
 0x221   : > { %v2434_v40 = vmul.f32 %v4274_v45, %v5197_v17  ;;  %v2011_v1 = vsub.f32 %v5213_v28, %v1931_v39  ;;  %v2246_v52 = vpop.xlane.xlu1 %2245  ;;  %v2550_v2 = vpop.f32.mrf.mxu0  ;;  %v3240_v28 = vsel %vm2535_vm3, %v384_v61, 0 }
 0x222   : > { %v1928_v60 = vpop.xlane.xlu2 %1927  ;;  %4277 = vrcp.f32 %v2246_v52  ;;  %v2567_v63 = vpop.f32.mrf.mxu1  ;;  %v2497_v17 = vpack.c.bf16 %v2433_v51, %v2433_v51 }
 0x223   : > { %v2498_v62 = vpack.c.bf16 %v2434_v40, %v2434_v40  ;;  %v2130_v32 = vmul.f32 1.442695, %v2011_v1  ;;  %v2010_v36 = vsub.f32 %v5221_v42, %v1928_v60  ;;  %v3750_v50 = vpack.c.bf16 %v2567_v63, %v2567_v63 }
 0x225   : > { %v5539_v22 = vpop.eup %4275  ;;  %4279 = vpow2.f32 %v2130_v32  ;;  %v2128_v38 = vmul.f32 1.442695, %v2010_v36  ;;  %1948 = vmax.xlane.f32.xlu2 %v1947_v29  ;;  %4065 = vmatmul.msk.bf16.vlgmr.msrb.gmra.mxu2 %vm411_vm0, %v2498_v62  ;;  %3815 = vst.msk [vmem:[%s5508_s27 + $0x2] sm:$0x3] %vm3813_vm4, %v3750_v50 }
 0x226   : > { %4064 = vmatmul.msk.bf16.vlgmr.msrb.gmra.mxu1 %vm411_vm0, %v2497_v17  ;;  %4066 = vmatmul.msk.bf16.vlgmr.msrb.gmra.mxu3 %vm411_vm0, %v2499_v56  ;;  %v2295_v42 = vsel %vm1763_vm2, %v5539_v22, 0.0 }
 0x227   : > { %4281 = vpow2.f32 %v2128_v38  ;;  %2296 = vadd.xlane.f32.xlu1 %v2295_v42  ;;  %3249 = vmatpush.bf16.msrb.mxu1 %v3240_v28 }
 0x228   : > { %v4278_v35 = vpop.eup %4277  ;;  %v2252_v19 = vpop.xlane.xlu0 %2251  ;;  %3268 = vmatpush.bf16.msrb.mxu2 %v3259_v0  ;;  %3287 = vmatpush.bf16.msrb.mxu3 %v3278_v15  ;;  %v389_v15 = vld [vmem:[%s5082_s24 + $0x54] sm:$0x3] }
 0x229   : > { %v2436_v27 = vmul.f32 %v4278_v35, %v5223_v41  ;;  %4283 = vrcp.f32 %v2252_v19  ;;  %v2586_v23 = vpop.f32.mrf.mxu2  ;;  %v2255_v57 = vpop.xlane.xlu1 %2254 }
 0x22a   : > { %v3751_v26 = vpack.c.bf16 %v2586_v23, %v2586_v23  ;;  %v2249_v33 = vpop.xlane.xlu2 %2248  ;;  %4285 = vrcp.f32 %v2255_v57  ;;  %v2569_v45 = vpop.f32.mrf.mxu1 }
 0x22b   : > { %v5551_v16 = vpop.eup %4279  ;;  %v2500_v58 = vpack.c.bf16 %v2436_v27, %v2436_v27  ;;  %4287 = vrcp.f32 %v2249_v33  ;;  %v3335_v27 = vsel %vm2535_vm3, %v389_v15, 0 }
 0x22c   : > { %3816 = vst.msk [vmem:[%s5508_s27 + $0x4] sm:$0x3] %vm3813_vm4, %v3751_v26  ;;  %v2313_v21 = vsel %vm1763_vm2, %v5551_v16, 0.0 }
 0x22d   : > { %v5557_v51 = vpop.eup %4281  ;;  %2314 = vadd.xlane.f32.xlu0 %v2313_v21  ;;  %4067 = vmatmul.msk.bf16.vlgmr.msra.gmra.mxu0 %vm411_vm0, %v2500_v58 }
 0x22e   : > { %v2310_v41 = vsel %vm1763_vm2, %v5557_v51, 0.0 }
 0x22f   : > { %v4284_v39 = vpop.eup %4283  ;;  %2311 = vadd.xlane.f32.xlu2 %v2310_v41  ;;  %v2605_v29 = vpop.f32.mrf.mxu3 }
 0x230   : > { %v4286_v40 = vpop.eup %4285  ;;  %v2438_v1 = vmul.f32 %v4284_v39, %v5241_v18  ;;  %v2258_v52 = vpop.xlane.xlu0 %2257  ;;  %v3752_v7 = vpack.c.bf16 %v2605_v29, %v2605_v29  ;;  %v388_v29 = vld [vmem:[%s5082_s24 + $0x52] sm:$0x3] }
 0x231   : > { %v4288_v60 = vpop.eup %4287  ;;  %v2439_v2 = vmul.f32 %v4286_v40, %v5244_v8  ;;  %4289 = vrcp.f32 %v2258_v52  ;;  %v2588_v61 = vpop.f32.mrf.mxu2 }
 0x232   : > { %v2437_v47 = vmul.f32 %v4288_v60, %v5249_v9  ;;  %v2264_v62 = vpop.xlane.xlu2 %2263  ;;  %v2502_v32 = vpack.c.bf16 %v2438_v1, %v2438_v1  ;;  %3817 = vst.msk [vmem:[%s5508_s27 + $0x6] sm:$0x3] %vm3813_vm4, %v3752_v7  ;;  %v2643_v56 = vpop.f32.mrf.mxu1  ;;  %v3316_v61 = vsel %vm2535_vm3, %v388_v29, 0 }
 0x233   : > { %v2503_v36 = vpack.c.bf16 %v2439_v2, %v2439_v2  ;;  %v2624_v63 = vpop.f32.mrf.mxu0  ;;  %v3754_v50 = vpack.c.bf16 %v2643_v56, %v2643_v56  ;;  %4291 = vrcp.f32 %v2264_v62 }
 0x234   : > { %v2501_v18 = vpack.c.bf16 %v2437_v47, %v2437_v47  ;;  %v3753_v17 = vpack.c.bf16 %v2624_v63, %v2624_v63 }
 0x235   : > { %4069 = vmatmul.msk.bf16.vlgmr.msra.gmra.mxu2 %vm411_vm0, %v2502_v32  ;;  %3819 = vst.msk [vmem:[%s5508_s27 + $0xa] sm:$0x3] %vm3813_vm4, %v3754_v50 }
 0x236   : > { %3818 = vst.msk [vmem:[%s5508_s27 + $0x8] sm:$0x3] %vm3813_vm4, %v3753_v17  ;;  %4068 = vmatmul.msk.bf16.vlgmr.msra.gmra.mxu1 %vm411_vm0, %v2501_v18  ;;  %4070 = vmatmul.msk.bf16.vlgmr.msra.gmra.mxu3 %vm411_vm0, %v2503_v36 }
 0x237   : > { %v4290_v8 = vpop.eup %4289  ;;  %v2607_v28 = vpop.f32.mrf.mxu3  ;;  %3344 = vmatpush.bf16.msra.mxu2 %v3335_v27  ;;  %3325 = vmatpush.bf16.msra.mxu1 %v3316_v61  ;;  %v393_v27 = vld [vmem:[%s5082_s24 + $0x5c] sm:$0x3] }
 0x238   : > { %v2440_v9 = vmul.f32 %v4290_v8, %v5262_v31 }
 0x239   : > { %v2267_v38 = vpop.xlane.xlu0 %2266  ;;  %v4292_v23 = vpop.eup %4291 }
 0x23a   : > { %4293 = vrcp.f32 %v2267_v38  ;;  %v2261_v0 = vpop.xlane.xlu1 %2260  ;;  %v2504_v42 = vpack.c.bf16 %v2440_v9, %v2440_v9  ;;  %v2645_v19 = vpop.f32.mrf.mxu1  ;;  %v2442_v57 = vmul.f32 %v4292_v23, %v5273_v34 }
 0x23b   : > { %4295 = vrcp.f32 %v2261_v0  ;;  %v2626_v35 = vpop.f32.mrf.mxu0  ;;  %v390_v0 = vld [vmem:[%s5082_s24 + $0x56] sm:$0x3] }
 0x23c   : > { %v2506_v60 = vpack.c.bf16 %v2442_v57, %v2442_v57  ;;  %v3411_v57 = vsel %vm2535_vm3, %v393_v27, 0 }
 0x23d   : > { %4071 = vmatmul.msk.bf16.vlgmr.msrb.gmra.mxu0 %vm411_vm0, %v2504_v42  ;;  %v3354_v42 = vsel %vm2535_vm3, %v390_v0, 0 }
 0x23e   : > { %3363 = vmatpush.bf16.msra.mxu3 %v3354_v42 }
 0x240   : > { %v4294_v31 = vpop.eup %4293  ;;  %v2662_v26 = vpop.f32.mrf.mxu2 }
 0x241   : > { %v4296_v33 = vpop.eup %4295  ;;  %v2443_v58 = vmul.f32 %v4294_v31, %v5284_v20  ;;  %v3755_v45 = vpack.c.bf16 %v2662_v26, %v2662_v26  ;;  %v2681_v21 = vpop.f32.mrf.mxu3 }
 0x242   : > { %v1922_v41 = vpop.xlane.xlu0 %1921  ;;  %v2441_v39 = vmul.f32 %v4296_v33, %v5287_v53  ;;  %v3756_v40 = vpack.c.bf16 %v2681_v21, %v2681_v21  ;;  %v1925_v1 = vpop.xlane.xlu1 %1924 }
 0x243   : > { %v2008_v52 = vsub.f32 %v5299_v55, %v1922_v41  ;;  %v2507_v2 = vpack.c.bf16 %v2443_v58, %v2443_v58  ;;  %3820 = vst.msk [vmem:[%s5508_s27 + $0xc] sm:$0x3] %vm3813_vm4, %v3755_v45  ;;  %v2009_v34 = vsub.f32 %v5304_v11, %v1925_v1  ;;  %v387_v11 = vld [vmem:[%s5082_s24 + $0x50] sm:$0x3]  ;;  %v391_v1 = vld [vmem:[%s5082_s24 + $0x58] sm:$0x3] }
 0x244   : > { %v2505_v20 = vpack.c.bf16 %v2441_v39, %v2441_v39  ;;  %3821 = vst.msk [vmem:[%s5508_s27 + $0xe] sm:$0x3] %vm3813_vm4, %v3756_v40  ;;  %v3297_v62 = vsel %vm2535_vm3, %v387_v11, 0 }
 0x245   : > { %v2124_v7 = vmul.f32 1.442695, %v2008_v52  ;;  %v2126_v53 = vmul.f32 1.442695, %v2009_v34  ;;  %4073 = vmatmul.msk.bf16.vlgmr.msrb.gmra.mxu2 %vm411_vm0, %v2506_v60  ;;  %3306 = vmatpush.bf16.msra.mxu0 %v3297_v62  ;;  %v3373_v60 = vsel %vm2535_vm3, %v391_v1, 0 }
 0x246   : > { %4072 = vmatmul.msk.bf16.vlgmr.msrb.gmra.mxu1 %vm411_vm0, %v2505_v20  ;;  %4074 = vmatmul.msk.bf16.vlgmr.msrb.gmra.mxu3 %vm411_vm0, %v2507_v2 }
 0x247   : > { %4297 = vpow2.f32 %v2124_v7  ;;  %3420 = vmatpush.bf16.msrb.mxu2 %v3411_v57 }
 0x248   : > { %4299 = vpow2.f32 %v2126_v53  ;;  %v2664_v55 = vpop.f32.mrf.mxu2 }
 0x249   : > { %v2683_v47 = vpop.f32.mrf.mxu3  ;;  %3382 = vmatpush.bf16.msrb.mxu0 %v3373_v60 }
 0x24a   : > { %v1940_v32 = vpop.xlane.xlu1 %1939  ;;  %v2700_v36 = vpop.f32.mrf.mxu0 }
 0x24b   : > { %v2014_v63 = vsub.f32 %v5322_v3, %v1940_v32  ;;  %v3757_v56 = vpack.c.bf16 %v2700_v36, %v2700_v36  ;;  %v2719_v18 = vpop.f32.mrf.mxu1  ;;  %v394_v32 = vld [vmem:[%s5082_s24 + $0x5e] sm:$0x3] }
 0x24c   : > { %v3758_v50 = vpack.c.bf16 %v2719_v18, %v2719_v18 }
 0x24d   : > { %v5595_v17 = vpop.eup %4297  ;;  %v2136_v9 = vmul.f32 1.442695, %v2014_v63  ;;  %3822 = vst.msk [vmem:[%s5508_s27 + $0x10] sm:$0x3] %vm3813_vm4, %v3757_v56  ;;  %v3430_v56 = vsel %vm2535_vm3, %v394_v32, 0 }
 0x24e   : > { %v5597_v8 = vpop.eup %4299  ;;  %v2304_v28 = vsel %vm1763_vm2, %v5595_v17, 0.0  ;;  %3823 = vst.msk [vmem:[%s5508_s27 + $0x12] sm:$0x3] %vm3813_vm4, %v3758_v50  ;;  %3439 = vmatpush.bf16.msrb.mxu3 %v3430_v56  ;;  %v395_v56 = vld [vmem:[%s5082_s24 + $0x60] sm:$0x3] }
 0x24f   : > { %v2307_v3 = vsel %vm1763_vm2, %v5597_v8, 0.0  ;;  %2305 = vadd.xlane.f32.xlu1 %v2304_v28  ;;  %4301 = vpow2.f32 %v2136_v9  ;;  %v392_v28 = vld [vmem:[%s5082_s24 + $0x5a] sm:$0x3] }
 0x250   : > { %2308 = vadd.xlane.f32.xlu2 %v2307_v3  ;;  %v2738_v38 = vpop.f32.mrf.mxu2 }
 0x251   : > { %v3759_v15 = vpack.c.bf16 %v2738_v38, %v2738_v38 }
 0x252   : > { %v2276_v35 = vpop.xlane.xlu1 %2275  ;;  %v2702_v19 = vpop.f32.mrf.mxu0 }
 0x253   : > { %3824 = vst.msk [vmem:[%s5508_s27 + $0x14] sm:$0x3] %vm3813_vm4, %v3759_v15  ;;  %4303 = vrcp.f32 %v2276_v35  ;;  %v2721_v23 = vpop.f32.mrf.mxu1  ;;  %v3392_v15 = vsel %vm2535_vm3, %v392_v28, 0 }
 0x254   : > { %3401 = vmatpush.bf16.msrb.mxu1 %v3392_v15 }
 0x255   : > { %v5613_v31 = vpop.eup %4301 }
 0x256   : > { %v2322_v26 = vsel %vm1763_vm2, %v5613_v31, 0.0 }
 0x257   : > { %2323 = vadd.xlane.f32.xlu0 %v2322_v26 }
 0x258   : > { %v2740_v33 = vpop.f32.mrf.mxu2  ;;  %v2757_v58 = vpop.f32.mrf.mxu3 }
 0x259   : > { %v4304_v45 = vpop.eup %4303  ;;  %v3760_v21 = vpack.c.bf16 %v2757_v58, %v2757_v58  ;;  %v2273_v41 = vpop.xlane.xlu0 %2272 }
 0x25a   : > { %v2446_v39 = vmul.f32 %v4304_v45, %v5341_v46  ;;  %4305 = vrcp.f32 %v2273_v41  ;;  %v2776_v40 = vpop.f32.mrf.mxu0 }
 0x25b   : > { %3825 = vst.msk [vmem:[%s5508_s27 + $0x16] sm:$0x3] %vm3813_vm4, %v3760_v21  ;;  %v3761_v52 = vpack.c.bf16 %v2776_v40, %v2776_v40  ;;  %v2795_v29 = vpop.f32.mrf.mxu1 }
 0x25c   : > { %v2510_v2 = vpack.c.bf16 %v2446_v39, %v2446_v39  ;;  %v3762_v34 = vpack.c.bf16 %v2795_v29, %v2795_v29 }
 0x25d   : > { %3826 = vst.msk [vmem:[%s5508_s27 + $0x18] sm:$0x3] %vm3813_vm4, %v3761_v52 }
 0x25e   : > { %3827 = vst.msk [vmem:[%s5508_s27 + $0x1a] sm:$0x3] %vm3813_vm4, %v3762_v34  ;;  %4077 = vmatmul.msk.bf16.vlgmr.msra.gmra.mxu2 %vm411_vm0, %v2510_v2  ;;  %v398_v2 = vld [vmem:[%s5082_s24 + $0x66] sm:$0x3] }
 0x260   : > { %v4306_v46 = vpop.eup %4305  ;;  %v2270_v61 = vpop.xlane.xlu2 %2269 }
 0x261   : > { %v2759_v20 = vpop.f32.mrf.mxu3  ;;  %v2445_v7 = vmul.f32 %v4306_v46, %v5362_v13  ;;  %4307 = vrcp.f32 %v2270_v61  ;;  %v2814_v53 = vpop.f32.mrf.mxu2 }
 0x262   : > { %v1937_v55 = vpop.xlane.xlu0 %1936  ;;  %v3763_v11 = vpack.c.bf16 %v2814_v53, %v2814_v53  ;;  %v2778_v62 = vpop.f32.mrf.mxu0 }
 0x263   : > { %v2013_v47 = vsub.f32 %v5373_v4, %v1937_v55  ;;  %v2509_v36 = vpack.c.bf16 %v2445_v7, %v2445_v7  ;;  %v2797_v63 = vpop.f32.mrf.mxu1 }
 0x264   : > { %3828 = vst.msk [vmem:[%s5508_s27 + $0x1c] sm:$0x3] %vm3813_vm4, %v3763_v11 }
 0x265   : > { %v2134_v18 = vmul.f32 1.442695, %v2013_v47  ;;  %4076 = vmatmul.msk.bf16.vlgmr.msra.gmra.mxu1 %vm411_vm0, %v2509_v36 }
 0x267   : > { %4309 = vpow2.f32 %v2134_v18  ;;  %v4308_v13 = vpop.eup %4307 }
 0x268   : > { %v2444_v50 = vmul.f32 %v4308_v13, %v5376_v5  ;;  %v2279_v9 = vpop.xlane.xlu2 %2278 }
 0x269   : > { %v2833_v4 = vpop.f32.mrf.mxu3  ;;  %4311 = vrcp.f32 %v2279_v9  ;;  %v2816_v3 = vpop.f32.mrf.mxu2 }
 0x26a   : > { %v3764_v38 = vpack.c.bf16 %v2833_v4, %v2833_v4  ;;  %v2288_v0 = vpop.xlane.xlu0 %2287  ;;  %v2508_v42 = vpack.c.bf16 %v2444_v50, %v2444_v50  ;;  %v2852_v35 = vpop.f32.mrf.mxu0  ;;  %v3449_v50 = vsel %vm2535_vm3, %v395_v56, 0 }
 0x26b   : > { %4313 = vrcp.f32 %v2288_v0  ;;  %v3765_v19 = vpack.c.bf16 %v2852_v35, %v2852_v35 }
 0x26c   : > { %3829 = vst.msk [vmem:[%s5508_s27 + $0x1e] sm:$0x3] %vm3813_vm4, %v3764_v38  ;;  %4075 = vmatmul.msk.bf16.vlgmr.msra.gmra.mxu0 %vm411_vm0, %v2508_v42 }
 0x26d   : > { %v5639_v27 = vpop.eup %4309  ;;  %3830 = vst.msk [vmem:[%s5508_s27 + $0x20] sm:$0x3] %vm3813_vm4, %v3765_v19  ;;  %3458 = vmatpush.bf16.msra.mxu0 %v3449_v50  ;;  %v396_v19 = vld [vmem:[%s5082_s24 + $0x62] sm:$0x3] }
 0x26e   : > { %v2319_v5 = vsel %vm1763_vm2, %v5639_v27, 0.0 }
 0x26f   : > { %2320 = vadd.xlane.f32.xlu0 %v2319_v5  ;;  %v4312_v23 = vpop.eup %4311 }
 0x270   : > { %v2447_v26 = vmul.f32 %v4312_v23, %v5392_v59  ;;  %v1943_v33 = vpop.xlane.xlu2 %1942  ;;  %v3506_v59 = vsel %vm2535_vm3, %v398_v2, 0 }
 0x271   : > { %v4314_v57 = vpop.eup %4313  ;;  %v2835_v58 = vpop.f32.mrf.mxu3  ;;  %v2015_v21 = vsub.f32 %v5418_v24, %v1943_v33 }
 0x272   : > { %v2450_v45 = vmul.f32 %v4314_v57, %v5395_v54  ;;  %v2871_v41 = vpop.f32.mrf.mxu1  ;;  %v1952_v39 = vpop.xlane.xlu0 %1951  ;;  %v2511_v40 = vpack.c.bf16 %v2447_v26, %v2447_v26  ;;  %v3468_v26 = vsel %vm2535_vm3, %v396_v19, 0 }
 0x273   : > { %v3766_v1 = vpack.c.bf16 %v2871_v41, %v2871_v41  ;;  %v2282_v52 = vpop.xlane.xlu1 %2281  ;;  %v2018_v29 = vsub.f32 %v5422_v44, %v1952_v39  ;;  %v2854_v60 = vpop.f32.mrf.mxu0  ;;  %v2138_v46 = vmul.f32 1.442695, %v2015_v21  ;;  %v397_v44 = vld [vmem:[%s5082_s24 + $0x64] sm:$0x3]  ;;  %3477 = vmatpush.bf16.msra.mxu1 %v3468_v26 }
 0x274   : > { %v2514_v34 = vpack.c.bf16 %v2450_v45, %v2450_v45  ;;  %4315 = vrcp.f32 %v2282_v52  ;;  %4078 = vmatmul.msk.bf16.vlgmr.msra.gmra.mxu3 %vm411_vm0, %v2511_v40  ;;  %v3487_v47 = vsel %vm2535_vm3, %v397_v44, 0  ;;  %v402_v40 = vld [vmem:[%s5082_s24 + $0x6e] sm:$0x3] }
 0x275   : > { %3831 = vst.msk [vmem:[%s5508_s27 + $0x22] sm:$0x3] %vm3813_vm4, %v3766_v1  ;;  %4317 = vpow2.f32 %v2138_v46  ;;  %3515 = vmatpush.bf16.msra.mxu3 %v3506_v59  ;;  %v2144_v54 = vmul.f32 1.442695, %v2018_v29  ;;  %3496 = vmatpush.bf16.msra.mxu2 %v3487_v47  ;;  %v3582_v29 = vsel %vm2535_vm3, %v402_v40, 0 }
 0x276   : > { %4081 = vmatmul.msk.bf16.vlgmr.msrb.gmra.mxu2 %vm411_vm0, %v2514_v34  ;;  %v401_v59 = vld [vmem:[%s5082_s24 + $0x6c] sm:$0x3] }
 0x277   : > { %4319 = vpow2.f32 %v2144_v54 }
 0x278   : > { %v1934_v24 = vpop.xlane.xlu2 %1933  ;;  %v2890_v61 = vpop.f32.mrf.mxu2 }
 0x279   : > { %v2012_v7 = vsub.f32 %v5441_v37, %v1934_v24  ;;  %v3767_v55 = vpack.c.bf16 %v2890_v61, %v2890_v61  ;;  %v2909_v11 = vpop.f32.mrf.mxu3  ;;  %v3563_v61 = vsel %vm2535_vm3, %v401_v59, 0 }
 0x27a   : > { %v4316_v20 = vpop.eup %4315  ;;  %v2873_v53 = vpop.f32.mrf.mxu1  ;;  %v3768_v32 = vpack.c.bf16 %v2909_v11, %v2909_v11  ;;  %3572 = vmatpush.bf16.msrb.mxu2 %v3563_v61  ;;  %v399_v61 = vld [vmem:[%s5082_s24 + $0x68] sm:$0x3] }
 0x27b   : > { %v2448_v62 = vmul.f32 %v4316_v20, %v5434_v43  ;;  %v2291_v36 = vpop.xlane.xlu1 %2290  ;;  %v2928_v63 = vpop.f32.mrf.mxu0  ;;  %v2132_v13 = vmul.f32 1.442695, %v2012_v7  ;;  %3832 = vst.msk [vmem:[%s5508_s27 + $0x24] sm:$0x3] %vm3813_vm4, %v3767_v55 }
 0x27c   : > { %v5661_v18 = vpop.eup %4317  ;;  %4321 = vrcp.f32 %v2291_v36  ;;  %v3769_v37 = vpack.c.bf16 %v2928_v63, %v2928_v63  ;;  %3833 = vst.msk [vmem:[%s5508_s27 + $0x26] sm:$0x3] %vm3813_vm4, %v3768_v32 }
 0x27d   : > { %v2512_v9 = vpack.c.bf16 %v2448_v62, %v2448_v62  ;;  %v2325_v43 = vsel %vm1763_vm2, %v5661_v18, 0.0  ;;  %4323 = vpow2.f32 %v2132_v13  ;;  %v5673_v4 = vpop.eup %4319 }
 0x27e   : > { %3834 = vst.msk [vmem:[%s5508_s27 + $0x28] sm:$0x3] %vm3813_vm4, %v3769_v37  ;;  %2326 = vadd.xlane.f32.xlu1 %v2325_v43 }
 0x27f   : > { %4079 = vmatmul.msk.bf16.vlgmr.msrb.gmra.mxu0 %vm411_vm0, %v2512_v9 }
 0x280   : > { %v2285_v28 = vpop.xlane.xlu2 %2284  ;;  %v2892_v3 = vpop.f32.mrf.mxu2 }
 0x281   : > { %4325 = vrcp.f32 %v2285_v28  ;;  %v2911_v0 = vpop.f32.mrf.mxu3 }
 0x282   : > { %v4322_v38 = vpop.eup %4321 }
 0x283   : > { %v2451_v15 = vmul.f32 %v4322_v38, %v5451_v6  ;;  %v1955_v42 = vpop.xlane.xlu1 %1954  ;;  %v2930_v35 = vpop.f32.mrf.mxu0  ;;  %v2334_v6 = vsel %vm1763_vm2, %v5673_v4, 0.0 }
 0x284   : > { %v5677_v5 = vpop.eup %4323  ;;  %v2019_v23 = vsub.f32 %v5467_v30, %v1955_v42  ;;  %v2947_v57 = vpop.f32.mrf.mxu1 }
 0x285   : > { %v2515_v33 = vpack.c.bf16 %v2451_v15, %v2451_v15  ;;  %v3770_v58 = vpack.c.bf16 %v2947_v57, %v2947_v57  ;;  %v2316_v45 = vsel %vm1763_vm2, %v5677_v5, 0.0 }
 0x286   : > { %v2146_v21 = vmul.f32 1.442695, %v2019_v23  ;;  %2317 = vadd.xlane.f32.xlu2 %v2316_v45  ;;  %2335 = vadd.xlane.f32.xlu1 %v2334_v6 }
 0x287   : > { %3835 = vst.msk [vmem:[%s5508_s27 + $0x2a] sm:$0x3] %vm3813_vm4, %v3770_v58  ;;  %4082 = vmatmul.msk.bf16.vlgmr.msrb.gmra.mxu3 %vm411_vm0, %v2515_v33  ;;  %v4326_v30 = vpop.eup %4325 }
 0x288   : > { %4327 = vpow2.f32 %v2146_v21  ;;  %v2449_v41 = vmul.f32 %v4326_v30, %v5463_v14  ;;  %v2966_v39 = vpop.f32.mrf.mxu2  ;;  %3591 = vmatpush.bf16.msrb.mxu3 %v3582_v29 }
 0x289   : > { %v3771_v1 = vpack.c.bf16 %v2966_v39, %v2966_v39  ;;  %v2985_v52 = vpop.f32.mrf.mxu3 }
 0x28a   : > { %v2513_v60 = vpack.c.bf16 %v2449_v41, %v2449_v41  ;;  %v3772_v2 = vpack.c.bf16 %v2985_v52, %v2985_v52  ;;  %v2303_v34 = vpop.xlane.xlu0 %2302 }
 0x28b   : > { %v1946_v46 = vpop.xlane.xlu1 %1945  ;;  %3836 = vst.msk [vmem:[%s5508_s27 + $0x2c] sm:$0x3] %vm3813_vm4, %v3771_v1  ;;  %4329 = vrcp.f32 %v2303_v34  ;;  %v3004_v24 = vpop.f32.mrf.mxu0 }
 0x28c   : > { %v2016_v54 = vsub.f32 %v5484_v10, %v1946_v46  ;;  %v2949_v14 = vpop.f32.mrf.mxu1  ;;  %3837 = vst.msk [vmem:[%s5508_s27 + $0x2e] sm:$0x3] %vm3813_vm4, %v3772_v2  ;;  %v3773_v44 = vpack.c.bf16 %v3004_v24, %v3004_v24  ;;  %4080 = vmatmul.msk.bf16.vlgmr.msrb.gmra.mxu1 %vm411_vm0, %v2513_v60 }
 0x28e   : > { %v5699_v20 = vpop.eup %4327  ;;  %v2140_v7 = vmul.f32 1.442695, %v2016_v54  ;;  %3838 = vst.msk [vmem:[%s5508_s27 + $0x30] sm:$0x3] %vm3813_vm4, %v3773_v44  ;;  %v400_v44 = vld [vmem:[%s5082_s24 + $0x6a] sm:$0x3] }
 0x28f   : > { %v2337_v53 = vsel %vm1763_vm2, %v5699_v20, 0.0 }
 0x290   : > { %4331 = vpow2.f32 %v2140_v7  ;;  %2338 = vadd.xlane.f32.xlu2 %v2337_v53  ;;  %v2300_v10 = vpop.xlane.xlu2 %2299  ;;  %v2968_v55 = vpop.f32.mrf.mxu2 }
 0x291   : > { %v4330_v11 = vpop.eup %4329  ;;  %4333 = vrcp.f32 %v2300_v10  ;;  %v2987_v47 = vpop.f32.mrf.mxu3  ;;  %v3525_v10 = vsel %vm2535_vm3, %v399_v61, 0 }
 0x292   : > { %v2455_v62 = vmul.f32 %v4330_v11, %v5490_v48  ;;  %v2294_v32 = vpop.xlane.xlu0 %2293  ;;  %3534 = vmatpush.bf16.msrb.mxu0 %v3525_v10 }
 0x293   : > { %4335 = vrcp.f32 %v2294_v32  ;;  %v3006_v36 = vpop.f32.mrf.mxu0 }
 0x294   : > { %v3023_v63 = vpop.f32.mrf.mxu1  ;;  %v2519_v56 = vpack.c.bf16 %v2455_v62, %v2455_v62  ;;  %v405_v62 = vld [vmem:[%s5082_s24 + $0x74] sm:$0x3] }
 0x295   : > { %v3774_v13 = vpack.c.bf16 %v3023_v63, %v3023_v63  ;;  %v3639_v63 = vsel %vm2535_vm3, %v405_v62, 0 }
 0x296   : > { %v5706_v37 = vpop.eup %4331 }
 0x297   : > { %3839 = vst.msk [vmem:[%s5508_s27 + $0x32] sm:$0x3] %vm3813_vm4, %v3774_v13  ;;  %4086 = vmatmul.msk.bf16.vlgmr.msra.gmra.mxu3 %vm411_vm0, %v2519_v56  ;;  %v2328_v50 = vsel %vm1763_vm2, %v5706_v37, 0.0  ;;  %v4334_v9 = vpop.eup %4333 }
 0x298   : > { %2329 = vadd.xlane.f32.xlu0 %v2328_v50  ;;  %v2454_v48 = vmul.f32 %v4334_v9, %v5511_v49  ;;  %v1949_v43 = vpop.xlane.xlu2 %1948  ;;  %v3042_v28 = vpop.f32.mrf.mxu2 }
 0x299   : > { %v4336_v3 = vpop.eup %4335  ;;  %v2017_v38 = vsub.f32 %v5526_v12, %v1949_v43  ;;  %v3775_v0 = vpack.c.bf16 %v3042_v28, %v3042_v28  ;;  %v3061_v15 = vpop.f32.mrf.mxu3 }
 0x29a   : > { %v2518_v42 = vpack.c.bf16 %v2454_v48, %v2454_v48  ;;  %v2452_v35 = vmul.f32 %v4336_v3, %v5515_v25  ;;  %v3776_v19 = vpack.c.bf16 %v3061_v15, %v3061_v15  ;;  %v2297_v23 = vpop.xlane.xlu1 %2296 }
 0x29b   : > { %v2142_v57 = vmul.f32 1.442695, %v2017_v38  ;;  %3840 = vst.msk [vmem:[%s5508_s27 + $0x34] sm:$0x3] %vm3813_vm4, %v3775_v0  ;;  %4337 = vrcp.f32 %v2297_v23  ;;  %v3080_v49 = vpop.f32.mrf.mxu0 }
 0x29c   : > { %v3025_v26 = vpop.f32.mrf.mxu1  ;;  %v2516_v33 = vpack.c.bf16 %v2452_v35, %v2452_v35  ;;  %3841 = vst.msk [vmem:[%s5508_s27 + $0x36] sm:$0x3] %vm3813_vm4, %v3776_v19  ;;  %v3777_v58 = vpack.c.bf16 %v3080_v49, %v3080_v49  ;;  %4085 = vmatmul.msk.bf16.vlgmr.msra.gmra.mxu2 %vm411_vm0, %v2518_v42 }
 0x29d   : > { %4339 = vpow2.f32 %v2142_v57  ;;  %3648 = vmatpush.bf16.msra.mxu2 %v3639_v63  ;;  %v407_v63 = vld [vmem:[%s5082_s24 + $0x78] sm:$0x3] }
 0x29e   : > { %3842 = vst.msk [vmem:[%s5508_s27 + $0x38] sm:$0x3] %vm3813_vm4, %v3777_v58  ;;  %4083 = vmatmul.msk.bf16.vlgmr.msra.gmra.mxu0 %vm411_vm0, %v2516_v33 }
 0x2a0   : > { %v2315_v25 = vpop.xlane.xlu0 %2314  ;;  %v3044_v12 = vpop.f32.mrf.mxu2 }
 0x2a1   : > { %v4338_v45 = vpop.eup %4337  ;;  %4341 = vrcp.f32 %v2315_v25  ;;  %v3063_v6 = vpop.f32.mrf.mxu3 }
 0x2a2   : > { %v2453_v21 = vmul.f32 %v4338_v45, %v5539_v22  ;;  %v2312_v30 = vpop.xlane.xlu2 %2311 }
 0x2a3   : > { %v5725_v41 = vpop.eup %4339  ;;  %4343 = vrcp.f32 %v2312_v30  ;;  %v3082_v39 = vpop.f32.mrf.mxu0 }
 0x2a4   : > { %v3099_v40 = vpop.f32.mrf.mxu1  ;;  %v2517_v1 = vpack.c.bf16 %v2453_v21, %v2453_v21  ;;  %v2331_v29 = vsel %vm1763_vm2, %v5725_v41, 0.0  ;;  %v404_v21 = vld [vmem:[%s5082_s24 + $0x72] sm:$0x3] }
 0x2a5   : > { %v3778_v52 = vpack.c.bf16 %v3099_v40, %v3099_v40  ;;  %2332 = vadd.xlane.f32.xlu1 %v2331_v29  ;;  %v3620_v40 = vsel %vm2535_vm3, %v404_v21, 0 }
 0x2a6   : > { %4084 = vmatmul.msk.bf16.vlgmr.msra.gmra.mxu1 %vm411_vm0, %v2517_v1 }
 0x2a7   : > { %3843 = vst.msk [vmem:[%s5508_s27 + $0x3a] sm:$0x3] %vm3813_vm4, %v3778_v52  ;;  %v4342_v22 = vpop.eup %4341 }
 0x2a8   : > { %v2459_v60 = vmul.f32 %v4342_v22, %v5551_v16  ;;  %v3118_v2 = vpop.f32.mrf.mxu2  ;;  %v3544_v16 = vsel %vm2535_vm3, %v400_v44, 0 }
 0x2a9   : > { %v4344_v34 = vpop.eup %4343  ;;  %v3779_v46 = vpack.c.bf16 %v3118_v2, %v3118_v2  ;;  %v3137_v59 = vpop.f32.mrf.mxu3  ;;  %3553 = vmatpush.bf16.msrb.mxu1 %v3544_v16 }
 0x2aa   : > { %v2523_v54 = vpack.c.bf16 %v2459_v60, %v2459_v60  ;;  %v2458_v14 = vmul.f32 %v4344_v34, %v5557_v51  ;;  %v3780_v24 = vpack.c.bf16 %v3137_v59, %v3137_v59  ;;  %v406_v60 = vld [vmem:[%s5082_s24 + $0x76] sm:$0x3]  ;;  %v403_v34 = vld [vmem:[%s5082_s24 + $0x70] sm:$0x3] }
 0x2ab   : > { %3844 = vst.msk [vmem:[%s5508_s27 + $0x3c] sm:$0x3] %vm3813_vm4, %v3779_v46  ;;  %v3156_v53 = vpop.f32.mrf.mxu0  ;;  %v3658_v2 = vsel %vm2535_vm3, %v406_v60, 0  ;;  %v409_v46 = vld [vmem:[%s5082_s24 + $0x7c] sm:$0x3] }
 0x2ac   : > { %v3101_v7 = vpop.f32.mrf.mxu1  ;;  %v2522_v55 = vpack.c.bf16 %v2458_v14, %v2458_v14  ;;  %3845 = vst.msk [vmem:[%s5508_s27 + $0x3e] sm:$0x3] %vm3813_vm4, %v3780_v24  ;;  %v3781_v11 = vpack.c.bf16 %v3156_v53, %v3156_v53  ;;  %4090 = vmatmul.msk.bf16.vlgmr.msrb.gmra.mxu3 %vm411_vm0, %v2523_v54  ;;  %v3601_v14 = vsel %vm2535_vm3, %v403_v34, 0  ;;  %v3715_v24 = vsel %vm2535_vm3, %v409_v46, 0 }
 0x2ad   : > { %3629 = vmatpush.bf16.msra.mxu1 %v3620_v40  ;;  %3667 = vmatpush.bf16.msra.mxu3 %v3658_v2 }
 0x2ae   : > { %3846 = vst.msk [vmem:[%s5508_s27 + $0x40] sm:$0x3] %vm3813_vm4, %v3781_v11  ;;  %4089 = vmatmul.msk.bf16.vlgmr.msrb.gmra.mxu2 %vm411_vm0, %v2522_v55  ;;  %3610 = vmatpush.bf16.msra.mxu0 %v3601_v14 }
 0x2af   : > { %3724 = vmatpush.bf16.msrb.mxu2 %v3715_v24 }
 0x2b0   : > { %v3120_v51 = vpop.f32.mrf.mxu2 }
 0x2b1   : > { %v3139_v47 = vpop.f32.mrf.mxu3  ;;  %v410_v51 = vld [vmem:[%s5082_s24 + $0x7e] sm:$0x3] }
 0x2b2   : > { %v3734_v62 = vsel %vm2535_vm3, %v410_v51, 0 }
 0x2b3   : > { %v3158_v32 = vpop.f32.mrf.mxu0  ;;  %3743 = vmatpush.bf16.msrb.mxu3 %v3734_v62 }
 0x2b4   : > { %v3175_v36 = vpop.f32.mrf.mxu1 }
 0x2b5   : > { %v3782_v56 = vpack.c.bf16 %v3175_v36, %v3175_v36 }
 0x2b7   : > { %3847 = vst.msk [vmem:[%s5508_s27 + $0x42] sm:$0x3] %vm3813_vm4, %v3782_v56  ;;  %v408_v56 = vld [vmem:[%s5082_s24 + $0x7a] sm:$0x3] }
 0x2b8   : > { %v3194_v13 = vpop.f32.mrf.mxu2 }
 0x2b9   : > { %v3783_v50 = vpack.c.bf16 %v3194_v13, %v3194_v13  ;;  %v3213_v9 = vpop.f32.mrf.mxu3  ;;  %v3696_v13 = vsel %vm2535_vm3, %v408_v56, 0 }
 0x2ba   : > { %v3784_v48 = vpack.c.bf16 %v3213_v9, %v3213_v9 }
 0x2bb   : > { %3848 = vst.msk [vmem:[%s5508_s27 + $0x44] sm:$0x3] %vm3813_vm4, %v3783_v50  ;;  %v3232_v28 = vpop.f32.mrf.mxu0 }
 0x2bc   : > { %v3177_v43 = vpop.f32.mrf.mxu1  ;;  %3849 = vst.msk [vmem:[%s5508_s27 + $0x46] sm:$0x3] %vm3813_vm4, %v3784_v48  ;;  %v3785_v3 = vpack.c.bf16 %v3232_v28, %v3232_v28 }
 0x2be   : > { %3850 = vst.msk [vmem:[%s5508_s27 + $0x48] sm:$0x3] %vm3813_vm4, %v3785_v3 }
 0x2c0   : > { %v3196_v38 = vpop.f32.mrf.mxu2 }
 0x2c1   : > { %v3215_v0 = vpop.f32.mrf.mxu3 }
 0x2c2   : > { %v2306_v15 = vpop.xlane.xlu1 %2305 }
 0x2c3   : > { %v2309_v42 = vpop.xlane.xlu2 %2308  ;;  %4345 = vrcp.f32 %v2306_v15  ;;  %v3234_v35 = vpop.f32.mrf.mxu0 }
 0x2c4   : > { %4347 = vrcp.f32 %v2309_v42  ;;  %v3251_v19 = vpop.f32.mrf.mxu1 }
 0x2c5   : > { %v3786_v23 = vpack.c.bf16 %v3251_v19, %v3251_v19 }
 0x2c7   : > { %3851 = vst.msk [vmem:[%s5508_s27 + $0x4a] sm:$0x3] %vm3813_vm4, %v3786_v23 }
 0x2c8   : > { %v3270_v26 = vpop.f32.mrf.mxu2 }
 0x2c9   : > { %v4346_v57 = vpop.eup %4345  ;;  %v3787_v58 = vpack.c.bf16 %v3270_v26, %v3270_v26  ;;  %v3289_v25 = vpop.f32.mrf.mxu3 }
 0x2ca   : > { %v4348_v49 = vpop.eup %4347  ;;  %v2456_v33 = vmul.f32 %v4346_v57, %v5595_v17  ;;  %v3788_v45 = vpack.c.bf16 %v3289_v25, %v3289_v25  ;;  %v2324_v6 = vpop.xlane.xlu0 %2323 }
 0x2cb   : > { %v2457_v12 = vmul.f32 %v4348_v49, %v5597_v8  ;;  %3852 = vst.msk [vmem:[%s5508_s27 + $0x4c] sm:$0x3] %vm3813_vm4, %v3787_v58  ;;  %4349 = vrcp.f32 %v2324_v6 }
 0x2cc   : > { %v2520_v30 = vpack.c.bf16 %v2456_v33, %v2456_v33  ;;  %v3253_v39 = vpop.f32.mrf.mxu1  ;;  %3853 = vst.msk [vmem:[%s5508_s27 + $0x4e] sm:$0x3] %vm3813_vm4, %v3788_v45 }
 0x2cd   : > { %v2521_v1 = vpack.c.bf16 %v2457_v12, %v2457_v12 }
 0x2ce   : > { %4087 = vmatmul.msk.bf16.vlgmr.msrb.gmra.mxu0 %vm411_vm0, %v2520_v30 }
 0x2cf   : > { %4088 = vmatmul.msk.bf16.vlgmr.msrb.gmra.mxu1 %vm411_vm0, %v2521_v1 }
 0x2d0   : > { %v3272_v17 = vpop.f32.mrf.mxu2  ;;  %3705 = vmatpush.bf16.msrb.mxu1 %v3696_v13 }
 0x2d1   : > { %v4350_v8 = vpop.eup %4349  ;;  %v3291_v52 = vpop.f32.mrf.mxu3 }
 0x2d2   : > { %v2462_v29 = vmul.f32 %v4350_v8, %v5613_v31 }
 0x2d4   : > { %v2526_v22 = vpack.c.bf16 %v2462_v29, %v2462_v29 }
 0x2d6   : > { %4093 = vmatmul.msk.bf16.vlgmr.msra.gmra.mxu2 %vm411_vm0, %v2526_v22 }
 0x2e1   : > { %v3346_v59 = vpop.f32.mrf.mxu2 }
 0x2e2   : > { %v2321_v54 = vpop.xlane.xlu0 %2320  ;;  %v3791_v61 = vpack.c.bf16 %v3346_v59, %v3346_v59  ;;  %v3327_v31 = vpop.f32.mrf.mxu1 }
 0x2e3   : > { %4351 = vrcp.f32 %v2321_v54  ;;  %v3790_v44 = vpack.c.bf16 %v3327_v31, %v3327_v31 }
 0x2e4   : > { %3856 = vst.msk [vmem:[%s5508_s27 + $0x54] sm:$0x3] %vm3813_vm4, %v3791_v61 }
 0x2e5   : > { %3855 = vst.msk [vmem:[%s5508_s27 + $0x52] sm:$0x3] %vm3813_vm4, %v3790_v44 }
 0x2e9   : > { %v4352_v7 = vpop.eup %4351  ;;  %v3308_v10 = vpop.f32.mrf.mxu0 }
 0x2ea   : > { %v2461_v53 = vmul.f32 %v4352_v7, %v5639_v27  ;;  %v3348_v16 = vpop.f32.mrf.mxu2  ;;  %v3789_v55 = vpack.c.bf16 %v3308_v10, %v3308_v10  ;;  %v3329_v11 = vpop.f32.mrf.mxu1  ;;  %v3677_v27 = vsel %vm2535_vm3, %v407_v63, 0 }
 0x2eb   : > { %3686 = vmatpush.bf16.msrb.mxu0 %v3677_v27 }
 0x2ec   : > { %v2525_v47 = vpack.c.bf16 %v2461_v53, %v2461_v53  ;;  %3854 = vst.msk [vmem:[%s5508_s27 + $0x50] sm:$0x3] %vm3813_vm4, %v3789_v55 }
 0x2ee   : > { %4092 = vmatmul.msk.bf16.vlgmr.msra.gmra.mxu1 %vm411_vm0, %v2525_v47 }
 0x2f1   : > { %v2327_v32 = vpop.xlane.xlu1 %2326  ;;  %v3310_v36 = vpop.f32.mrf.mxu0 }
 0x2f2   : > { %4353 = vrcp.f32 %v2327_v32 }
 0x2f7   : > { %v3365_v9 = vpop.f32.mrf.mxu3 }
 0x2f8   : > { %v4354_v50 = vpop.eup %4353  ;;  %v3792_v43 = vpack.c.bf16 %v3365_v9, %v3365_v9 }
 0x2f9   : > { %v2463_v48 = vmul.f32 %v4354_v50, %v5661_v18  ;;  %v2318_v28 = vpop.xlane.xlu2 %2317  ;;  %v2336_v3 = vpop.xlane.xlu1 %2335 }
 0x2fa   : > { %4355 = vrcp.f32 %v2318_v28  ;;  %v3422_v38 = vpop.f32.mrf.mxu2  ;;  %3857 = vst.msk [vmem:[%s5508_s27 + $0x56] sm:$0x3] %vm3813_vm4, %v3792_v43 }
 0x2fb   : > { %v2527_v0 = vpack.c.bf16 %v2463_v48, %v2463_v48  ;;  %4357 = vrcp.f32 %v2336_v3  ;;  %v3795_v15 = vpack.c.bf16 %v3422_v38, %v3422_v38 }
 0x2fc   : > { %v3384_v42 = vpop.f32.mrf.mxu0 }
 0x2fd   : > { %3860 = vst.msk [vmem:[%s5508_s27 + $0x5c] sm:$0x3] %vm3813_vm4, %v3795_v15  ;;  %v3793_v35 = vpack.c.bf16 %v3384_v42, %v3384_v42  ;;  %4094 = vmatmul.msk.bf16.vlgmr.msra.gmra.mxu3 %vm411_vm0, %v2527_v0 }
 0x2ff   : > { %3858 = vst.msk [vmem:[%s5508_s27 + $0x58] sm:$0x3] %vm3813_vm4, %v3793_v35  ;;  %v3367_v18 = vpop.f32.mrf.mxu3 }
 0x300   : > { %v4356_v19 = vpop.eup %4355 }
 0x301   : > { %v4358_v23 = vpop.eup %4357  ;;  %v2460_v57 = vmul.f32 %v4356_v19, %v5677_v5 }
 0x302   : > { %v2466_v26 = vmul.f32 %v4358_v23, %v5673_v4  ;;  %v3424_v49 = vpop.f32.mrf.mxu2 }
 0x303   : > { %v2524_v33 = vpack.c.bf16 %v2460_v57, %v2460_v57  ;;  %v2339_v58 = vpop.xlane.xlu2 %2338 }
 0x304   : > { %v2530_v25 = vpack.c.bf16 %v2466_v26, %v2466_v26  ;;  %4359 = vrcp.f32 %v2339_v58  ;;  %v3386_v12 = vpop.f32.mrf.mxu0 }
 0x305   : > { %4091 = vmatmul.msk.bf16.vlgmr.msra.gmra.mxu0 %vm411_vm0, %v2524_v33 }
 0x306   : > { %4097 = vmatmul.msk.bf16.vlgmr.msrb.gmra.mxu2 %vm411_vm0, %v2530_v25 }
 0x309   : > { %v3403_v6 = vpop.f32.mrf.mxu1 }
 0x30a   : > { %v4360_v45 = vpop.eup %4359  ;;  %v3441_v21 = vpop.f32.mrf.mxu3  ;;  %v3794_v5 = vpack.c.bf16 %v3403_v6, %v3403_v6 }
 0x30b   : > { %v2467_v30 = vmul.f32 %v4360_v45, %v5699_v20  ;;  %v3796_v39 = vpack.c.bf16 %v3441_v21, %v3441_v21  ;;  %v2330_v4 = vpop.xlane.xlu0 %2329 }
 0x30c   : > { %4361 = vrcp.f32 %v2330_v4  ;;  %3859 = vst.msk [vmem:[%s5508_s27 + $0x5a] sm:$0x3] %vm3813_vm4, %v3794_v5 }
 0x30d   : > { %v2531_v40 = vpack.c.bf16 %v2467_v30, %v2467_v30  ;;  %3861 = vst.msk [vmem:[%s5508_s27 + $0x5e] sm:$0x3] %vm3813_vm4, %v3796_v39 }
 0x30f   : > { %4098 = vmatmul.msk.bf16.vlgmr.msrb.gmra.mxu3 %vm411_vm0, %v2531_v40 }
 0x311   : > { %v3405_v17 = vpop.f32.mrf.mxu1 }
 0x312   : > { %v4362_v1 = vpop.eup %4361  ;;  %v3443_v8 = vpop.f32.mrf.mxu3 }
 0x313   : > { %v2464_v52 = vmul.f32 %v4362_v1, %v5706_v37 }
 0x315   : > { %v2528_v29 = vpack.c.bf16 %v2464_v52, %v2464_v52 }
 0x317   : > { %4095 = vmatmul.msk.bf16.vlgmr.msrb.gmra.mxu0 %vm411_vm0, %v2528_v29 }
 0x318   : > { %v2333_v20 = vpop.xlane.xlu1 %2332 }
 0x319   : > { %4363 = vrcp.f32 %v2333_v20 }
 0x31a   : > { %v3517_v22 = vpop.f32.mrf.mxu3 }
 0x31b   : > { %v3800_v60 = vpack.c.bf16 %v3517_v22, %v3517_v22  ;;  %v3460_v2 = vpop.f32.mrf.mxu0 }
 0x31c   : > { %v3797_v34 = vpack.c.bf16 %v3460_v2, %v3460_v2 }
 0x31d   : > { %3865 = vst.msk [vmem:[%s5508_s27 + $0x66] sm:$0x3] %vm3813_vm4, %v3800_v60 }
 0x31e   : > { %3862 = vst.msk [vmem:[%s5508_s27 + $0x60] sm:$0x3] %vm3813_vm4, %v3797_v34 }
 0x31f   : > { %v4364_v46 = vpop.eup %4363  ;;  %v3498_v59 = vpop.f32.mrf.mxu2 }
 0x320   : > { %v2465_v37 = vmul.f32 %v4364_v46, %v5725_v41  ;;  %v3799_v54 = vpack.c.bf16 %v3498_v59, %v3498_v59 }
 0x322   : > { %v3519_v14 = vpop.f32.mrf.mxu3  ;;  %v2529_v24 = vpack.c.bf16 %v2465_v37, %v2465_v37  ;;  %3864 = vst.msk [vmem:[%s5508_s27 + $0x64] sm:$0x3] %vm3813_vm4, %v3799_v54 }
 0x323   : > { %v3462_v61 = vpop.f32.mrf.mxu0  ;;  %v3479_v31 = vpop.f32.mrf.mxu1 }
 0x324   : > { %v3798_v44 = vpack.c.bf16 %v3479_v31, %v3479_v31  ;;  %4096 = vmatmul.msk.bf16.vlgmr.msrb.gmra.mxu1 %vm411_vm0, %v2529_v24 }
 0x326   : > { %3863 = vst.msk [vmem:[%s5508_s27 + $0x62] sm:$0x3] %vm3813_vm4, %v3798_v44 }
 0x327   : > { %v3500_v7 = vpop.f32.mrf.mxu2 }
 0x32b   : > { %v3481_v53 = vpop.f32.mrf.mxu1 }
 0x32f   : > { %v3593_v10 = vpop.f32.mrf.mxu3 }
 0x330   : > { %v3804_v16 = vpack.c.bf16 %v3593_v10, %v3593_v10 }
 0x331   : > { %v3574_v41 = vpop.f32.mrf.mxu2 }
 0x332   : > { %3869 = vst.msk [vmem:[%s5508_s27 + $0x6e] sm:$0x3] %vm3813_vm4, %v3804_v16  ;;  %v3803_v55 = vpack.c.bf16 %v3574_v41, %v3574_v41 }
 0x334   : > { %3868 = vst.msk [vmem:[%s5508_s27 + $0x6c] sm:$0x3] %vm3813_vm4, %v3803_v55 }
 0x337   : > { %v3595_v11 = vpop.f32.mrf.mxu3 }
 0x339   : > { %v3576_v51 = vpop.f32.mrf.mxu2 }
 0x34b   : > { %v3536_v47 = vpop.f32.mrf.mxu0 }
 0x34c   : > { %v3801_v62 = vpack.c.bf16 %v3536_v47, %v3536_v47  ;;  %v3555_v32 = vpop.f32.mrf.mxu1 }
 0x34d   : > { %v3802_v36 = vpack.c.bf16 %v3555_v32, %v3555_v32 }
 0x34e   : > { %3866 = vst.msk [vmem:[%s5508_s27 + $0x68] sm:$0x3] %vm3813_vm4, %v3801_v62 }
 0x34f   : > { %3867 = vst.msk [vmem:[%s5508_s27 + $0x6a] sm:$0x3] %vm3813_vm4, %v3802_v36 }
 0x353   : > { %v3538_v63 = vpop.f32.mrf.mxu0 }
 0x354   : > { %v3557_v27 = vpop.f32.mrf.mxu1 }
 0x359   : > { %v3650_v56 = vpop.f32.mrf.mxu2 }
 0x35a   : > { %v3807_v13 = vpack.c.bf16 %v3650_v56, %v3650_v56 }
 0x35c   : > { %3872 = vst.msk [vmem:[%s5508_s27 + $0x74] sm:$0x3] %vm3813_vm4, %v3807_v13 }
 0x361   : > { %v3652_v50 = vpop.f32.mrf.mxu2 }
 0x36b   : > { %v3631_v9 = vpop.f32.mrf.mxu1 }
 0x36c   : > { %v3806_v48 = vpack.c.bf16 %v3631_v9, %v3631_v9 }
 0x36e   : > { %3871 = vst.msk [vmem:[%s5508_s27 + $0x72] sm:$0x3] %vm3813_vm4, %v3806_v48 }
 0x373   : > { %v3633_v43 = vpop.f32.mrf.mxu1 }
 0x380   : > { %v3669_v28 = vpop.f32.mrf.mxu3 }
 0x381   : > { %v3808_v3 = vpack.c.bf16 %v3669_v28, %v3669_v28 }
 0x382   : > { %v3612_v38 = vpop.f32.mrf.mxu0 }
 0x383   : > { %3873 = vst.msk [vmem:[%s5508_s27 + $0x76] sm:$0x3] %vm3813_vm4, %v3808_v3  ;;  %v3805_v0 = vpack.c.bf16 %v3612_v38, %v3612_v38 }
 0x385   : > { %3870 = vst.msk [vmem:[%s5508_s27 + $0x70] sm:$0x3] %vm3813_vm4, %v3805_v0 }
 0x388   : > { %v3671_v15 = vpop.f32.mrf.mxu3 }
 0x389   : > { %v3726_v42 = vpop.f32.mrf.mxu2 }
 0x38a   : > { %v3811_v35 = vpack.c.bf16 %v3726_v42, %v3726_v42  ;;  %v3614_v19 = vpop.f32.mrf.mxu0 }
 0x38c   : > { %3876 = vst.msk [vmem:[%s5508_s27 + $0x7c] sm:$0x3] %vm3813_vm4, %v3811_v35 }
 0x391   : > { %v3728_v18 = vpop.f32.mrf.mxu2 }
 0x392   : > { %v3745_v23 = vpop.f32.mrf.mxu3 }
 0x393   : > { %v3812_v57 = vpack.c.bf16 %v3745_v23, %v3745_v23 }
 0x394   : > { %v3688_v26 = vpop.f32.mrf.mxu0 }
 0x395   : > { %3877 = vst.msk [vmem:[%s5508_s27 + $0x7e] sm:$0x3] %vm3813_vm4, %v3812_v57  ;;  %v3809_v49 = vpack.c.bf16 %v3688_v26, %v3688_v26 }
 0x397   : > { %3874 = vst.msk [vmem:[%s5508_s27 + $0x78] sm:$0x3] %vm3813_vm4, %v3809_v49 }
 0x39a   : > { %v3747_v33 = vpop.f32.mrf.mxu3 }
 0x39c   : > { %v3690_v58 = vpop.f32.mrf.mxu0 }
 0x3a1   : > { %v3707_v25 = vpop.f32.mrf.mxu1 }
 0x3a2   : > { %v3810_v12 = vpack.c.bf16 %v3707_v25, %v3707_v25 }
 0x3a4   : > { %3875 = vst.msk [vmem:[%s5508_s27 + $0x7a] sm:$0x3] %vm3813_vm4, %v3810_v12 }
 0x3a9   : > { %v3709_v45 = vpop.f32.mrf.mxu1 }
 0x3aa PF: > { %s13_s12 = sadd.s32 1, %s4371_s12  }
 0x3ab   : > { %p10_p4 = scmp.ge.s32.totalorder %s13_s12, 4  }
 0x3ad   :  { %12 = sbr.rel (!%p10_p4) target bundleno = 1 (0x1), region = 68 }

// kernel: _lambda_.33
= control target key start
LH: loop header
LB: loop body
LE: loop exit
PB: predicated region body
PF: predicated region fallthrough
CT: control target
= control target key end

     0   :  { %s545_s20 = smov 0   ;;  %s591_s0 = inlined_call_operand.vmem [shape: bf16[128,16], index: 0, kind: input, shape index: {}]   ;;  %s592_s1 = inlined_call_operand.vmem [shape: bf16[16,16], index: 1, kind: input, shape index: {}]   ;;  %s593_s2 = inlined_call_operand.vmem [shape: f32[1,16], index: 2, kind: input, shape index: {}]   ;;  %s594_s3 = inlined_call_operand.vmem [shape: bf16[16,1], index: 3, kind: input, shape index: {}]   ;;  %s595_s4 = inlined_call_operand.<no memory space> [shape: f32[1,1], index: 4, kind: input, shape index: {}]   ;;  %s596_s5 = inlined_call_operand.vmem [shape: f32[128,1], index: 5, kind: output, shape index: {}]  }
   0x1   :  { %v10_v0 = vstv %s595_s4 }
   0x2   :  { %11 = vst [vmem:[#allocation2] sm:$0x1] %v10_v0 }
   0x3 LB: > { %s443_s21 = sadd.s32 4294967295, %s510_s20   ;;  %p447_p0 = scmp.ge.s32.totalorder %s510_s20, 1  ;;  %s510_s20 = sphi %s545_s20, %s17_s20  }
   0x4   : > { %p190_p1 = scmp.lt.s32.totalorder %s510_s20, 3 }
   0x6   : > { %p191_p2 = pnand %p447_p0, %p190_p1 }
   0x7   : > { %s448_s4 = sshll.u32 (!%p191_p2), %s443_s21, 3 }
   0x8   : > { %194 = sbr.rel (%p191_p2) target bundleno = 322 (0x142), region = 40  ;;  %p219_p3 = scmp.lt.s32.totalorder (!%p191_p2), %s448_s4, 15 }
   0xd   : > { %v490_v1 = vld [vmem:[%s592_s1] sm:$0xff]  ;;  %s598_s4 = smov (!%p219_p3, %s448_s4), 15  ;;  %vm271_vm0 = vcmask 130048   ;;  %vm378_vm1 = vcmask 7168  }
   0xe   : > { %291 = vmatpush.bf16.msra.mxu0 %v490_v1  ;;  %492 = vmatpush.bf16.msra.mxu2 %v490_v1  ;;  %s449_s24 = sshll.u32 %s598_s4, 2  ;;  %v491_v6 = vld [vmem:[%s594_s3] sm:$0xff]  ;;  %s451_s7 = sshll.u32 %s598_s4, 3 }
   0xf   : > { %s222_s27 = scalar_lea.vmem %s591_s0, %s449_s24  ;;  %356 = vmatpush.bf16.msra.mxu1 %v491_v6  ;;  %493 = vmatpush.bf16.msra.mxu3 %v491_v6  ;;  %v502_v8 = vld [vmem:[%s593_s2] ss:$0 sm:$0xff]  ;;  %s228_s10 = scalar_lea.vmem %s596_s5, %s451_s7 }
  0x10   : > { %v486_v2 = vld [vmem:[%s222_s27] sm:$0xff]  ;;  %v488_v3 = vld [vmem:[%s222_s27 + $0x10] sm:$0xff]  ;;  %v487_v4 = vld [vmem:[%s222_s27 + $0x8] sm:$0xff] }
  0x11   : > { %472 = vmatmul.msk.bf16.vlgmr.msra.gmra.mxu0 %vm271_vm0, %v486_v2  ;;  %474 = vmatmul.msk.bf16.vlgmr.msra.gmra.mxu2 %vm271_vm0, %v488_v3  ;;  %v489_v5 = vld [vmem:[%s222_s27 + $0x18] sm:$0xff]  ;;  %v503_v36 = vld [vmem:[#allocation2] ss:$0 sm:$0xff] }
  0x21   : > { %473 = vmatmul.msk.bf16.gmra.mxu0 %vm271_vm0, %v487_v4  ;;  %475 = vmatmul.msk.bf16.gmra.mxu2 %vm271_vm0, %v489_v5 }
  0x8e   : > { %v293_v7 = vpop.f32.mrf.mxu0 }
  0x8f   : > { %v294_v9 = vadd.f32 %v502_v8, %v293_v7 }
  0x91   : > { %v313_v12 = vmax.f32 %v294_v9, 0.0 }
  0x94   : > { %v303_v10 = vpop.f32.mrf.mxu2 }
  0x95   : > { %v304_v15 = vadd.f32 %v502_v8, %v303_v10 }
  0x96   : > { %v295_v11 = vpop.f32.mrf.mxu0 }
  0x97   : > { %v296_v13 = vadd.f32 %v502_v8, %v295_v11  ;;  %v317_v20 = vmax.f32 %v304_v15, 0.0 }
  0x99   : > { %v314_v14 = vmax.f32 %v296_v13, 0.0 }
  0x9b   : > { %v321_v16 = vpack.c.bf16 %v314_v14, %v313_v12 }
  0x9c   : > { %v305_v17 = vpop.f32.mrf.mxu2 }
  0x9d   : > { %v306_v18 = vadd.f32 %v502_v8, %v305_v17  ;;  %480 = vmatmul.msk.bf16.vlgmr.msra.gmra.mxu1 %vm271_vm0, %v321_v16 }
  0x9e   : > { %v298_v19 = vpop.f32.mrf.mxu0 }
  0x9f   : > { %v318_v21 = vmax.f32 %v306_v18, 0.0  ;;  %v299_v23 = vadd.f32 %v502_v8, %v298_v19 }
  0xa1   : > { %v323_v22 = vpack.c.bf16 %v318_v21, %v317_v20  ;;  %v315_v26 = vmax.f32 %v299_v23, 0.0 }
  0xa3   : > { %482 = vmatmul.msk.bf16.vlgmr.msra.gmra.mxu3 %vm271_vm0, %v323_v22 }
  0xa4   : > { %v308_v24 = vpop.f32.mrf.mxu2 }
  0xa5   : > { %v309_v29 = vadd.f32 %v502_v8, %v308_v24 }
  0xa6   : > { %v300_v25 = vpop.f32.mrf.mxu0 }
  0xa7   : > { %v301_v27 = vadd.f32 %v502_v8, %v300_v25  ;;  %v319_v33 = vmax.f32 %v309_v29, 0.0 }
  0xa9   : > { %v316_v28 = vmax.f32 %v301_v27, 0.0 }
  0xab   : > { %v322_v30 = vpack.c.bf16 %v316_v28, %v315_v26 }
  0xac   : > { %v310_v31 = vpop.f32.mrf.mxu2 }
  0xad   : > { %v311_v32 = vadd.f32 %v502_v8, %v310_v31  ;;  %481 = vmatmul.msk.bf16.gmra.mxu1 %vm271_vm0, %v322_v30 }
  0xaf   : > { %v320_v34 = vmax.f32 %v311_v32, 0.0 }
  0xb1   : > { %v324_v35 = vpack.c.bf16 %v320_v34, %v319_v33 }
  0xb3   : > { %483 = vmatmul.msk.bf16.gmra.mxu3 %vm271_vm0, %v324_v35 }
 0x11a   : > { %v358_v37 = vpop.f32.mrf.mxu1 }
 0x11b   : > { %v359_v38 = vadd.f32 %v503_v36, %v358_v37 }
 0x11d   : > { %379 = vst.msk [vmem:[%s228_s10] sm:$0xff] %vm378_vm1, %v359_v38 }
 0x122   : > { %v360_v39 = vpop.f32.mrf.mxu1 }
 0x123   : > { %v361_v40 = vadd.f32 %v503_v36, %v360_v39 }
 0x125   : > { %380 = vst.msk [vmem:[%s228_s10 + $0x8] sm:$0xff] %vm378_vm1, %v361_v40 }
 0x126   : > { %v368_v41 = vpop.f32.mrf.mxu3 }
 0x127   : > { %v369_v42 = vadd.f32 %v503_v36, %v368_v41 }
 0x129   : > { %383 = vst.msk [vmem:[%s228_s10 + $0x20] sm:$0xff] %vm378_vm1, %v369_v42 }
 0x12a   : > { %v363_v43 = vpop.f32.mrf.mxu1 }
 0x12b   : > { %v364_v44 = vadd.f32 %v503_v36, %v363_v43 }
 0x12d   : > { %381 = vst.msk [vmem:[%s228_s10 + $0x10] sm:$0xff] %vm378_vm1, %v364_v44 }
 0x12e   : > { %v370_v45 = vpop.f32.mrf.mxu3 }
 0x12f   : > { %v371_v46 = vadd.f32 %v503_v36, %v370_v45 }
 0x131   : > { %384 = vst.msk [vmem:[%s228_s10 + $0x28] sm:$0xff] %vm378_vm1, %v371_v46 }
 0x132   : > { %v365_v47 = vpop.f32.mrf.mxu1 }
 0x133   : > { %v366_v48 = vadd.f32 %v503_v36, %v365_v47 }
 0x135   : > { %382 = vst.msk [vmem:[%s228_s10 + $0x18] sm:$0xff] %vm378_vm1, %v366_v48 }
 0x136   : > { %v373_v49 = vpop.f32.mrf.mxu3 }
 0x137   : > { %v374_v50 = vadd.f32 %v503_v36, %v373_v49 }
 0x139   : > { %385 = vst.msk [vmem:[%s228_s10 + $0x30] sm:$0xff] %vm378_vm1, %v374_v50 }
 0x13e   : > { %v375_v51 = vpop.f32.mrf.mxu3 }
 0x13f   : > { %v376_v52 = vadd.f32 %v503_v36, %v375_v51 }
 0x141   : > { %386 = vst.msk [vmem:[%s228_s10 + $0x38] sm:$0xff] %vm378_vm1, %v376_v52 }
 0x142 PF: > { %s17_s20 = sadd.s32 1, %s510_s20  }
 0x143   : > { %p14_p4 = scmp.ge.s32.totalorder %s17_s20, 4  }
 0x145   :  { %16 = sbr.rel (!%p14_p4) target bundleno = 3 (0x3), region = 70 }

// kernel: _lambda_.27
= control target key start
LH: loop header
LB: loop body
LE: loop exit
PB: predicated region body
PF: predicated region fallthrough
CT: control target
= control target key end

     0   :  { %s4322_s12 = smov 0   ;;  %s5644_s0 = inlined_call_operand.vmem [shape: bf16[128,4,4], index: 0, kind: input, shape index: {}]   ;;  %s5645_s1 = inlined_call_operand.vmem [shape: bf16[128,4,4], index: 1, kind: input, shape index: {}]   ;;  %s5646_s2 = inlined_call_operand.vmem [shape: bf16[128,4,4], index: 2, kind: input, shape index: {}]   ;;  %s5647_s3 = inlined_call_operand.vmem [shape: bf16[128,4,4], index: 3, kind: output, shape index: {}]  }
   0x1 LB: > { %s3887_s13 = sadd.s32 4294967295, %s4300_s12   ;;  %p3891_p0 = scmp.ge.s32.totalorder %s4300_s12, 1  ;;  %s4300_s12 = sphi %s4322_s12, %s13_s12  }
   0x2   : > { %p160_p1 = scmp.lt.s32.totalorder %s4300_s12, 3 }
   0x4   : > { %p161_p2 = pnand %p3891_p0, %p160_p1 }
   0x6   : > { %164 = sbr.rel (%p161_p2) target bundleno = 937 (0x3a9), region = 32 }
   0xb   : > { %s3892_s14 = sshll.u32 %s3887_s13, 6  ;;  %vm411_vm0 = vcmask 31744   ;;  %vm1692_vm1 = vcmask 27648   ;;  %vm2464_vm2 = vcmask 1041408   ;;  %vm3742_vm3 = vcmask 25600  }
   0xc   : > { %p195_p3 = scmp.lt.s32.totalorder %s3892_s14, 127 }
   0xe   : > { %s5658_s14 = smov (!%p195_p3, %s3892_s14), 127 }
   0xf   : > { %s4330_s15 = sshll.u32 %s5658_s14, 1 }
  0x10   : > { %s4336_s18 = scalar_lea.vmem %s5645_s1, %s4330_s15  ;;  %s4350_s21 = scalar_lea.vmem %s5644_s0, %s4330_s15 }
  0x11   : > { %v283_v0 = vld [vmem:[%s4336_s18] sm:$0x3]  ;;  %v284_v1 = vld [vmem:[%s4336_s18 + $0x2] sm:$0x3]  ;;  %v285_v2 = vld [vmem:[%s4336_s18 + $0x4] sm:$0x3]  ;;  %s4918_s24 = scalar_lea.vmem %s5646_s2, %s4330_s15  ;;  %s5310_s27 = scalar_lea.vmem %s5647_s3, %s4330_s15 }
  0x12   : > { %v416_v3 = vsel %vm411_vm0, %v283_v0, 0  ;;  %v435_v4 = vsel %vm411_vm0, %v284_v1, 0  ;;  %v454_v5 = vsel %vm411_vm0, %v285_v2, 0  ;;  %v286_v6 = vld [vmem:[%s4336_s18 + $0x6] sm:$0x3] }
  0x13   : > { %425 = vmatpush.bf16.xpose.msra.mxu0 %v416_v3  ;;  %444 = vmatpush.bf16.xpose.msra.mxu1 %v435_v4  ;;  %v473_v7 = vsel %vm411_vm0, %v286_v6, 0  ;;  %v289_v8 = vld [vmem:[%s4336_s18 + $0xc] sm:$0x3]  ;;  %v287_v10 = vld [vmem:[%s4336_s18 + $0x8] sm:$0x3] }
  0x14   : > { %463 = vmatpush.bf16.xpose.msra.mxu2 %v454_v5  ;;  %482 = vmatpush.bf16.xpose.msra.mxu3 %v473_v7  ;;  %v530_v9 = vsel %vm411_vm0, %v289_v8, 0  ;;  %v288_v11 = vld [vmem:[%s4336_s18 + $0xa] sm:$0x3]  ;;  %v219_v12 = vld [vmem:[%s4350_s21] sm:$0x3]  ;;  %v492_v13 = vsel %vm411_vm0, %v287_v10, 0 }
  0x15   : > { %v511_v14 = vsel %vm411_vm0, %v288_v11, 0  ;;  %v290_v15 = vld [vmem:[%s4336_s18 + $0xe] sm:$0x3]  ;;  %v220_v16 = vld [vmem:[%s4350_s21 + $0x2] sm:$0x3] }
  0x16   : > { %v221_v17 = vld [vmem:[%s4350_s21 + $0x4] sm:$0x3]  ;;  %v549_v18 = vsel %vm411_vm0, %v290_v15, 0  ;;  %v222_v19 = vld [vmem:[%s4350_s21 + $0x6] sm:$0x3] }
  0x17   : > { %v291_v20 = vld [vmem:[%s4336_s18 + $0x10] sm:$0x3]  ;;  %v292_v21 = vld [vmem:[%s4336_s18 + $0x12] sm:$0x3]  ;;  %v293_v24 = vld [vmem:[%s4336_s18 + $0x14] sm:$0x3] }
  0x18   : > { %v568_v22 = vsel %vm411_vm0, %v291_v20, 0  ;;  %v587_v23 = vsel %vm411_vm0, %v292_v21, 0  ;;  %v294_v25 = vld [vmem:[%s4336_s18 + $0x16] sm:$0x3]  ;;  %v606_v26 = vsel %vm411_vm0, %v293_v24, 0 }
  0x19   : > { %v625_v27 = vsel %vm411_vm0, %v294_v25, 0  ;;  %v223_v28 = vld [vmem:[%s4350_s21 + $0x8] sm:$0x3]  ;;  %v295_v29 = vld [vmem:[%s4336_s18 + $0x18] sm:$0x3] }
  0x1a   : > { %3900 = vmatmul.msk.bf16.vlgmr.msra.gmra.mxu0 %vm411_vm0, %v219_v12  ;;  %3901 = vmatmul.msk.bf16.vlgmr.msra.gmra.mxu1 %vm411_vm0, %v220_v16  ;;  %v297_v30 = vld [vmem:[%s4336_s18 + $0x1c] sm:$0x3]  ;;  %v224_v31 = vld [vmem:[%s4350_s21 + $0xa] sm:$0x3]  ;;  %v298_v32 = vld [vmem:[%s4336_s18 + $0x1e] sm:$0x3] }
  0x1b   : > { %501 = vmatpush.bf16.xpose.msrb.mxu0 %v492_v13  ;;  %520 = vmatpush.bf16.xpose.msrb.mxu1 %v511_v14  ;;  %v296_v33 = vld [vmem:[%s4336_s18 + $0x1a] sm:$0x3]  ;;  %v225_v34 = vld [vmem:[%s4350_s21 + $0xc] sm:$0x3]  ;;  %v226_v35 = vld [vmem:[%s4350_s21 + $0xe] sm:$0x3] }
  0x1c   : > { %539 = vmatpush.bf16.xpose.msrb.mxu2 %v530_v9  ;;  %558 = vmatpush.bf16.xpose.msrb.mxu3 %v549_v18  ;;  %v644_v36 = vsel %vm411_vm0, %v295_v29, 0  ;;  %v682_v37 = vsel %vm411_vm0, %v297_v30, 0  ;;  %v701_v38 = vsel %vm411_vm0, %v298_v32, 0  ;;  %v663_v39 = vsel %vm411_vm0, %v296_v33, 0  ;;  %v227_v40 = vld [vmem:[%s4350_s21 + $0x10] sm:$0x3] }
  0x1d   : > { %3902 = vmatmul.msk.bf16.vlgmr.msra.gmra.mxu2 %vm411_vm0, %v221_v17  ;;  %3903 = vmatmul.msk.bf16.vlgmr.msra.gmra.mxu3 %vm411_vm0, %v222_v19  ;;  %v299_v41 = vld [vmem:[%s4336_s18 + $0x20] sm:$0x3]  ;;  %v301_v42 = vld [vmem:[%s4336_s18 + $0x24] sm:$0x3]  ;;  %v228_v43 = vld [vmem:[%s4350_s21 + $0x12] sm:$0x3] }
  0x1e   : > { %v302_v44 = vld [vmem:[%s4336_s18 + $0x26] sm:$0x3]  ;;  %v300_v45 = vld [vmem:[%s4336_s18 + $0x22] sm:$0x3]  ;;  %v229_v46 = vld [vmem:[%s4350_s21 + $0x14] sm:$0x3] }
  0x1f   : > { %v230_v47 = vld [vmem:[%s4350_s21 + $0x16] sm:$0x3]  ;;  %v720_v48 = vsel %vm411_vm0, %v299_v41, 0  ;;  %v758_v49 = vsel %vm411_vm0, %v301_v42, 0  ;;  %v777_v50 = vsel %vm411_vm0, %v302_v44, 0  ;;  %v739_v51 = vsel %vm411_vm0, %v300_v45, 0 }
  0x20   : > { %v231_v52 = vld [vmem:[%s4350_s21 + $0x18] sm:$0x3]  ;;  %v303_v53 = vld [vmem:[%s4336_s18 + $0x28] sm:$0x3]  ;;  %v305_v54 = vld [vmem:[%s4336_s18 + $0x2c] sm:$0x3] }
  0x21   : > { %v232_v55 = vld [vmem:[%s4350_s21 + $0x1a] sm:$0x3]  ;;  %v306_v56 = vld [vmem:[%s4336_s18 + $0x2e] sm:$0x3]  ;;  %v304_v57 = vld [vmem:[%s4336_s18 + $0x2a] sm:$0x3] }
  0x22   : > { %v233_v58 = vld [vmem:[%s4350_s21 + $0x1c] sm:$0x3]  ;;  %v234_v59 = vld [vmem:[%s4350_s21 + $0x1e] sm:$0x3]  ;;  %v796_v60 = vsel %vm411_vm0, %v303_v53, 0  ;;  %v834_v61 = vsel %vm411_vm0, %v305_v54, 0 }
  0x23   : > { %577 = vmatpush.bf16.xpose.msra.mxu0 %v568_v22  ;;  %596 = vmatpush.bf16.xpose.msra.mxu1 %v587_v23  ;;  %v853_v62 = vsel %vm411_vm0, %v306_v56, 0  ;;  %v815_v63 = vsel %vm411_vm0, %v304_v57, 0  ;;  %v235_v0 = vld [vmem:[%s4350_s21 + $0x20] sm:$0x3]  ;;  %v307_v1 = vld [vmem:[%s4336_s18 + $0x30] sm:$0x3] }
  0x24   : > { %615 = vmatpush.bf16.xpose.msra.mxu2 %v606_v26  ;;  %634 = vmatpush.bf16.xpose.msra.mxu3 %v625_v27  ;;  %v309_v2 = vld [vmem:[%s4336_s18 + $0x34] sm:$0x3]  ;;  %v236_v3 = vld [vmem:[%s4350_s21 + $0x22] sm:$0x3]  ;;  %v310_v4 = vld [vmem:[%s4336_s18 + $0x36] sm:$0x3] }
  0x25   : > { %v308_v5 = vld [vmem:[%s4336_s18 + $0x32] sm:$0x3]  ;;  %v237_v6 = vld [vmem:[%s4350_s21 + $0x24] sm:$0x3]  ;;  %v238_v7 = vld [vmem:[%s4350_s21 + $0x26] sm:$0x3] }
  0x26   : > { %v872_v8 = vsel %vm411_vm0, %v307_v1, 0  ;;  %v910_v9 = vsel %vm411_vm0, %v309_v2, 0  ;;  %v929_v10 = vsel %vm411_vm0, %v310_v4, 0  ;;  %v891_v11 = vsel %vm411_vm0, %v308_v5, 0  ;;  %v239_v12 = vld [vmem:[%s4350_s21 + $0x28] sm:$0x3] }
  0x27   : > { %v311_v13 = vld [vmem:[%s4336_s18 + $0x38] sm:$0x3]  ;;  %v314_v14 = vld [vmem:[%s4336_s18 + $0x3e] sm:$0x3]  ;;  %v240_v15 = vld [vmem:[%s4350_s21 + $0x2a] sm:$0x3] }
  0x28   : > { %v312_v16 = vld [vmem:[%s4336_s18 + $0x3a] sm:$0x3]  ;;  %v313_v17 = vld [vmem:[%s4336_s18 + $0x3c] sm:$0x3]  ;;  %v241_v18 = vld [vmem:[%s4350_s21 + $0x2c] sm:$0x3] }
  0x29   : > { %v242_v19 = vld [vmem:[%s4350_s21 + $0x2e] sm:$0x3]  ;;  %v948_v20 = vsel %vm411_vm0, %v311_v13, 0  ;;  %v1005_v21 = vsel %vm411_vm0, %v314_v14, 0  ;;  %v967_v22 = vsel %vm411_vm0, %v312_v16, 0  ;;  %v986_v23 = vsel %vm411_vm0, %v313_v17, 0 }
  0x2a   : > { %3904 = vmatmul.msk.bf16.vlgmr.msrb.gmra.mxu0 %vm411_vm0, %v223_v28  ;;  %3905 = vmatmul.msk.bf16.vlgmr.msrb.gmra.mxu1 %vm411_vm0, %v224_v31  ;;  %v315_v24 = vld [vmem:[%s4336_s18 + $0x40] sm:$0x3]  ;;  %v243_v25 = vld [vmem:[%s4350_s21 + $0x30] sm:$0x3]  ;;  %v244_v26 = vld [vmem:[%s4350_s21 + $0x32] sm:$0x3] }
  0x2b   : > { %653 = vmatpush.bf16.xpose.msrb.mxu0 %v644_v36  ;;  %672 = vmatpush.bf16.xpose.msrb.mxu1 %v663_v39  ;;  %v245_v27 = vld [vmem:[%s4350_s21 + $0x34] sm:$0x3]  ;;  %v246_v28 = vld [vmem:[%s4350_s21 + $0x36] sm:$0x3]  ;;  %v316_v29 = vld [vmem:[%s4336_s18 + $0x42] sm:$0x3] }
  0x2c   : > { %v1024_v30 = vsel %vm411_vm0, %v315_v24, 0  ;;  %v1043_v31 = vsel %vm411_vm0, %v316_v29, 0  ;;  %v317_v32 = vld [vmem:[%s4336_s18 + $0x44] sm:$0x3]  ;;  %v318_v33 = vld [vmem:[%s4336_s18 + $0x46] sm:$0x3] }
  0x2d   : > { %3906 = vmatmul.msk.bf16.vlgmr.msrb.gmra.mxu2 %vm411_vm0, %v225_v34  ;;  %3907 = vmatmul.msk.bf16.vlgmr.msrb.gmra.mxu3 %vm411_vm0, %v226_v35  ;;  %v1062_v34 = vsel %vm411_vm0, %v317_v32, 0  ;;  %v1081_v35 = vsel %vm411_vm0, %v318_v33, 0  ;;  %v247_v36 = vld [vmem:[%s4350_s21 + $0x38] sm:$0x3]  ;;  %v250_v39 = vld [vmem:[%s4350_s21 + $0x3e] sm:$0x3] }
  0x2e   : > { %691 = vmatpush.bf16.xpose.msrb.mxu2 %v682_v37  ;;  %710 = vmatpush.bf16.xpose.msrb.mxu3 %v701_v38  ;;  %v248_v37 = vld [vmem:[%s4350_s21 + $0x3a] sm:$0x3]  ;;  %v249_v38 = vld [vmem:[%s4350_s21 + $0x3c] sm:$0x3]  ;;  %v322_v41 = vld [vmem:[%s4336_s18 + $0x4e] sm:$0x3] }
  0x2f   : > { %v319_v42 = vld [vmem:[%s4336_s18 + $0x48] sm:$0x3]  ;;  %v1157_v44 = vsel %vm411_vm0, %v322_v41, 0  ;;  %v326_v54 = vld [vmem:[%s4336_s18 + $0x56] sm:$0x3] }
  0x30   : > { %v1100_v45 = vsel %vm411_vm0, %v319_v42, 0  ;;  %v1233_v56 = vsel %vm411_vm0, %v326_v54, 0  ;;  %v258_v13 = vld [vmem:[%s4350_s21 + $0x4e] sm:$0x3]  ;;  %v256_v14 = vld [vmem:[%s4350_s21 + $0x4a] sm:$0x3] }
  0x31   : > { %v323_v32 = vld [vmem:[%s4336_s18 + $0x50] sm:$0x3]  ;;  %v324_v33 = vld [vmem:[%s4336_s18 + $0x52] sm:$0x3] }
  0x3a   : > { %3908 = vmatmul.msk.bf16.vlgmr.msra.gmra.mxu0 %vm411_vm0, %v227_v40  ;;  %3909 = vmatmul.msk.bf16.vlgmr.msra.gmra.mxu1 %vm411_vm0, %v228_v43  ;;  %v321_v40 = vld [vmem:[%s4336_s18 + $0x4c] sm:$0x3] }
  0x3b   : > { %729 = vmatpush.bf16.xpose.msra.mxu0 %v720_v48  ;;  %748 = vmatpush.bf16.xpose.msra.mxu1 %v739_v51  ;;  %v1138_v43 = vsel %vm411_vm0, %v321_v40, 0  ;;  %v251_v48 = vld [vmem:[%s4350_s21 + $0x40] sm:$0x3]  ;;  %v253_v51 = vld [vmem:[%s4350_s21 + $0x44] sm:$0x3] }
  0x3d   : > { %3910 = vmatmul.msk.bf16.vlgmr.msra.gmra.mxu2 %vm411_vm0, %v229_v46  ;;  %3911 = vmatmul.msk.bf16.vlgmr.msra.gmra.mxu3 %vm411_vm0, %v230_v47 }
  0x3e   : > { %767 = vmatpush.bf16.xpose.msra.mxu2 %v758_v49  ;;  %786 = vmatpush.bf16.xpose.msra.mxu3 %v777_v50  ;;  %v252_v49 = vld [vmem:[%s4350_s21 + $0x42] sm:$0x3] }
  0x4a   : > { %3912 = vmatmul.msk.bf16.vlgmr.msrb.gmra.mxu0 %vm411_vm0, %v231_v52  ;;  %3913 = vmatmul.msk.bf16.vlgmr.msrb.gmra.mxu1 %vm411_vm0, %v232_v55  ;;  %v254_v52 = vld [vmem:[%s4350_s21 + $0x46] sm:$0x3]  ;;  %v320_v55 = vld [vmem:[%s4336_s18 + $0x4a] sm:$0x3] }
  0x4b   : > { %805 = vmatpush.bf16.xpose.msrb.mxu0 %v796_v60  ;;  %824 = vmatpush.bf16.xpose.msrb.mxu1 %v815_v63  ;;  %v1119_v57 = vsel %vm411_vm0, %v320_v55, 0 }
  0x4d   : > { %3914 = vmatmul.msk.bf16.vlgmr.msrb.gmra.mxu2 %vm411_vm0, %v233_v58  ;;  %3915 = vmatmul.msk.bf16.vlgmr.msrb.gmra.mxu3 %vm411_vm0, %v234_v59 }
  0x4e   : > { %843 = vmatpush.bf16.xpose.msrb.mxu2 %v834_v61  ;;  %862 = vmatpush.bf16.xpose.msrb.mxu3 %v853_v62 }
  0x5a   : > { %3916 = vmatmul.msk.bf16.vlgmr.msra.gmra.mxu0 %vm411_vm0, %v235_v0  ;;  %3917 = vmatmul.msk.bf16.vlgmr.msra.gmra.mxu1 %vm411_vm0, %v236_v3  ;;  %v325_v3 = vld [vmem:[%s4336_s18 + $0x54] sm:$0x3] }
  0x5b   : > { %881 = vmatpush.bf16.xpose.msra.mxu0 %v872_v8  ;;  %900 = vmatpush.bf16.xpose.msra.mxu1 %v891_v11  ;;  %v1214_v4 = vsel %vm411_vm0, %v325_v3, 0 }
  0x5d   : > { %3918 = vmatmul.msk.bf16.vlgmr.msra.gmra.mxu2 %vm411_vm0, %v237_v6  ;;  %3919 = vmatmul.msk.bf16.vlgmr.msra.gmra.mxu3 %vm411_vm0, %v238_v7 }
  0x5e   : > { %919 = vmatpush.bf16.xpose.msra.mxu2 %v910_v9  ;;  %938 = vmatpush.bf16.xpose.msra.mxu3 %v929_v10  ;;  %v255_v10 = vld [vmem:[%s4350_s21 + $0x48] sm:$0x3] }
  0x6a   : > { %3920 = vmatmul.msk.bf16.vlgmr.msrb.gmra.mxu0 %vm411_vm0, %v239_v12  ;;  %3921 = vmatmul.msk.bf16.vlgmr.msrb.gmra.mxu1 %vm411_vm0, %v240_v15  ;;  %v257_v12 = vld [vmem:[%s4350_s21 + $0x4c] sm:$0x3] }
  0x6b   : > { %957 = vmatpush.bf16.xpose.msrb.mxu0 %v948_v20  ;;  %976 = vmatpush.bf16.xpose.msrb.mxu1 %v967_v22 }
  0x6d   : > { %3922 = vmatmul.msk.bf16.vlgmr.msrb.gmra.mxu2 %vm411_vm0, %v241_v18  ;;  %3923 = vmatmul.msk.bf16.vlgmr.msrb.gmra.mxu3 %vm411_vm0, %v242_v19 }
  0x6e   : > { %1014 = vmatpush.bf16.xpose.msrb.mxu3 %v1005_v21  ;;  %995 = vmatpush.bf16.xpose.msrb.mxu2 %v986_v23 }
  0x7a   : > { %3924 = vmatmul.msk.bf16.vlgmr.msra.gmra.mxu0 %vm411_vm0, %v243_v25  ;;  %3925 = vmatmul.msk.bf16.vlgmr.msra.gmra.mxu1 %vm411_vm0, %v244_v26 }
  0x7b   : > { %1033 = vmatpush.bf16.xpose.msra.mxu0 %v1024_v30  ;;  %1052 = vmatpush.bf16.xpose.msra.mxu1 %v1043_v31  ;;  %v261_v30 = vld [vmem:[%s4350_s21 + $0x54] sm:$0x3] }
  0x7d   : > { %3926 = vmatmul.msk.bf16.vlgmr.msra.gmra.mxu2 %vm411_vm0, %v245_v27  ;;  %3927 = vmatmul.msk.bf16.vlgmr.msra.gmra.mxu3 %vm411_vm0, %v246_v28 }
  0x7e   : > { %1071 = vmatpush.bf16.xpose.msra.mxu2 %v1062_v34  ;;  %1090 = vmatpush.bf16.xpose.msra.mxu3 %v1081_v35  ;;  %v262_v34 = vld [vmem:[%s4350_s21 + $0x56] sm:$0x3]  ;;  %v1176_v35 = vsel %vm411_vm0, %v323_v32, 0 }
  0x8a   : > { %3928 = vmatmul.msk.bf16.vlgmr.msrb.gmra.mxu0 %vm411_vm0, %v247_v36  ;;  %3929 = vmatmul.msk.bf16.vlgmr.msrb.gmra.mxu1 %vm411_vm0, %v248_v37  ;;  %v1195_v36 = vsel %vm411_vm0, %v324_v33, 0 }
  0x8b   : > { %1109 = vmatpush.bf16.xpose.msrb.mxu0 %v1100_v45  ;;  %1128 = vmatpush.bf16.xpose.msrb.mxu1 %v1119_v57 }
  0x8d   : > { %3930 = vmatmul.msk.bf16.vlgmr.msrb.gmra.mxu2 %vm411_vm0, %v249_v38  ;;  %3931 = vmatmul.msk.bf16.vlgmr.msrb.gmra.mxu3 %vm411_vm0, %v250_v39  ;;  %v329_v39 = vld [vmem:[%s4336_s18 + $0x5c] sm:$0x3] }
  0x8e   : > { %1147 = vmatpush.bf16.xpose.msrb.mxu2 %v1138_v43  ;;  %1166 = vmatpush.bf16.xpose.msrb.mxu3 %v1157_v44  ;;  %v1290_v40 = vsel %vm411_vm0, %v329_v39, 0 }
  0x97   : > { %v427_v46 = vpop.f32.mrf.mxu0  ;;  %v446_v47 = vpop.f32.mrf.mxu1 }
  0x98   : > { %v4488_v50 = vmul.f32 0.5, %v427_v46  ;;  %v4502_v58 = vmul.f32 0.5, %v446_v47  ;;  %v259_v47 = vld [vmem:[%s4350_s21 + $0x50] sm:$0x3] }
  0x9a   : > { %3932 = vmatmul.msk.bf16.vlgmr.msra.gmra.mxu0 %vm411_vm0, %v251_v48  ;;  %v1693_v53 = vsel %vm1692_vm1, %v4488_v50, -inf  ;;  %3933 = vmatmul.msk.bf16.vlgmr.msra.gmra.mxu1 %vm411_vm0, %v252_v49  ;;  %v1696_v1 = vsel %vm1692_vm1, %v4502_v58, -inf  ;;  %v260_v48 = vld [vmem:[%s4350_s21 + $0x52] sm:$0x3] }
  0x9b   : > { %1694 = vmax.xlane.f32.xlu1 %v1693_v53  ;;  %1185 = vmatpush.bf16.xpose.msra.mxu0 %v1176_v35 }
  0x9c   : > { %1204 = vmatpush.bf16.xpose.msra.mxu1 %v1195_v36 }
  0x9d   : > { %3934 = vmatmul.msk.bf16.vlgmr.msra.gmra.mxu2 %vm411_vm0, %v253_v51  ;;  %3935 = vmatmul.msk.bf16.vlgmr.msra.gmra.mxu3 %vm411_vm0, %v254_v52  ;;  %v330_v52 = vld [vmem:[%s4336_s18 + $0x5e] sm:$0x3] }
  0x9e   : > { %1242 = vmatpush.bf16.xpose.msra.mxu3 %v1233_v56  ;;  %1223 = vmatpush.bf16.xpose.msra.mxu2 %v1214_v4  ;;  %v1309_v53 = vsel %vm411_vm0, %v330_v52, 0  ;;  %v266_v4 = vld [vmem:[%s4350_s21 + $0x5e] sm:$0x3] }
  0x9f   : > { %v429_v62 = vpop.f32.mrf.mxu0  ;;  %v448_v63 = vpop.f32.mrf.mxu1 }
  0xa0   : > { %v465_v59 = vpop.f32.mrf.mxu2  ;;  %v484_v60 = vpop.f32.mrf.mxu3  ;;  %v265_v62 = vld [vmem:[%s4350_s21 + $0x5c] sm:$0x3]  ;;  %v328_v63 = vld [vmem:[%s4336_s18 + $0x5a] sm:$0x3] }
  0xa1   : > { %v4504_v61 = vmul.f32 0.5, %v465_v59  ;;  %v4510_v2 = vmul.f32 0.5, %v484_v60 }
  0xa3   : > { %v1699_v0 = vsel %vm1692_vm1, %v4504_v61, -inf  ;;  %1697 = vmax.xlane.f32.xlu1 %v1696_v1  ;;  %v1702_v9 = vsel %vm1692_vm1, %v4510_v2, -inf }
  0xa4   : > { %1700 = vmax.xlane.f32.xlu0 %v1699_v0  ;;  %v1271_v0 = vsel %vm411_vm0, %v328_v63, 0 }
  0xa7   : > { %v503_v7 = vpop.f32.mrf.mxu0  ;;  %v522_v8 = vpop.f32.mrf.mxu1 }
  0xa8   : > { %v467_v5 = vpop.f32.mrf.mxu2  ;;  %v486_v6 = vpop.f32.mrf.mxu3  ;;  %v4517_v11 = vmul.f32 0.5, %v522_v8  ;;  %v4525_v16 = vmul.f32 0.5, %v503_v7 }
  0xaa   : > { %v1708_v15 = vsel %vm1692_vm1, %v4517_v11, -inf  ;;  %3936 = vmatmul.msk.bf16.vlgmr.msrb.gmra.mxu0 %vm411_vm0, %v255_v10  ;;  %3937 = vmatmul.msk.bf16.vlgmr.msrb.gmra.mxu1 %vm411_vm0, %v256_v14  ;;  %v1705_v22 = vsel %vm1692_vm1, %v4525_v16, -inf }
  0xab   : > { %1709 = vmax.xlane.f32.xlu1 %v1708_v15  ;;  %1280 = vmatpush.bf16.xpose.msrb.mxu1 %v1271_v0 }
  0xac   : > { %1703 = vmax.xlane.f32.xlu0 %v1702_v9 }
  0xad   : > { %3938 = vmatmul.msk.bf16.vlgmr.msrb.gmra.mxu2 %vm411_vm0, %v257_v12  ;;  %3939 = vmatmul.msk.bf16.vlgmr.msrb.gmra.mxu3 %vm411_vm0, %v258_v13  ;;  %v264_v13 = vld [vmem:[%s4350_s21 + $0x5a] sm:$0x3] }
  0xae   : > { %1299 = vmatpush.bf16.xpose.msrb.mxu2 %v1290_v40  ;;  %1318 = vmatpush.bf16.xpose.msrb.mxu3 %v1309_v53  ;;  %v333_v40 = vld [vmem:[%s4336_s18 + $0x64] sm:$0x3] }
  0xaf   : > { %v505_v20 = vpop.f32.mrf.mxu0  ;;  %v524_v21 = vpop.f32.mrf.mxu1  ;;  %v269_v53 = vld [vmem:[%s4350_s21 + $0x64] sm:$0x3] }
  0xb0   : > { %v541_v17 = vpop.f32.mrf.mxu2  ;;  %v560_v18 = vpop.f32.mrf.mxu3 }
  0xb1   : > { %v4530_v19 = vmul.f32 0.5, %v541_v17  ;;  %v4536_v24 = vmul.f32 0.5, %v560_v18  ;;  %v327_v17 = vld [vmem:[%s4336_s18 + $0x58] sm:$0x3] }
  0xb2   : > { %v1252_v18 = vsel %vm411_vm0, %v327_v17, 0 }
  0xb3   : > { %v1711_v23 = vsel %vm1692_vm1, %v4530_v19, -inf  ;;  %v1714_v29 = vsel %vm1692_vm1, %v4536_v24, -inf  ;;  %1261 = vmatpush.bf16.xpose.msrb.mxu0 %v1252_v18 }
  0xb4   : > { %1712 = vmax.xlane.f32.xlu2 %v1711_v23  ;;  %1706 = vmax.xlane.f32.xlu0 %v1705_v22 }
  0xb7   : > { %v579_v27 = vpop.f32.mrf.mxu0  ;;  %v598_v28 = vpop.f32.mrf.mxu1 }
  0xb8   : > { %v543_v25 = vpop.f32.mrf.mxu2  ;;  %v562_v26 = vpop.f32.mrf.mxu3  ;;  %v4541_v31 = vmul.f32 0.5, %v579_v27  ;;  %v4550_v38 = vmul.f32 0.5, %v598_v28  ;;  %v263_v27 = vld [vmem:[%s4350_s21 + $0x58] sm:$0x3] }
  0xba   : > { %v1717_v37 = vsel %vm1692_vm1, %v4541_v31, -inf  ;;  %v1720_v46 = vsel %vm1692_vm1, %v4550_v38, -inf  ;;  %3940 = vmatmul.msk.bf16.vlgmr.msra.gmra.mxu0 %vm411_vm0, %v259_v47  ;;  %3941 = vmatmul.msk.bf16.vlgmr.msra.gmra.mxu1 %vm411_vm0, %v260_v48 }
  0xbb   : > { %1718 = vmax.xlane.f32.xlu1 %v1717_v37 }
  0xbc   : > { %1715 = vmax.xlane.f32.xlu2 %v1714_v29 }
  0xbd   : > { %3942 = vmatmul.msk.bf16.vlgmr.msra.gmra.mxu2 %vm411_vm0, %v261_v30  ;;  %3943 = vmatmul.msk.bf16.vlgmr.msra.gmra.mxu3 %vm411_vm0, %v262_v34 }
  0xbf   : > { %v581_v44 = vpop.f32.mrf.mxu0  ;;  %v600_v45 = vpop.f32.mrf.mxu1 }
  0xc0   : > { %v617_v41 = vpop.f32.mrf.mxu2  ;;  %v636_v42 = vpop.f32.mrf.mxu3 }
  0xc1   : > { %v4556_v43 = vmul.f32 0.5, %v636_v42  ;;  %v4565_v51 = vmul.f32 0.5, %v617_v41  ;;  %v1366_v41 = vsel %vm411_vm0, %v333_v40, 0  ;;  %v334_v42 = vld [vmem:[%s4336_s18 + $0x66] sm:$0x3] }
  0xc2   : > { %1375 = vmatpush.bf16.xpose.msra.mxu2 %v1366_v41  ;;  %v1385_v44 = vsel %vm411_vm0, %v334_v42, 0 }
  0xc3   : > { %v1726_v49 = vsel %vm1692_vm1, %v4556_v43, -inf  ;;  %v1723_v59 = vsel %vm1692_vm1, %v4565_v51, -inf  ;;  %1394 = vmatpush.bf16.xpose.msra.mxu3 %v1385_v44  ;;  %v268_v44 = vld [vmem:[%s4350_s21 + $0x62] sm:$0x3] }
  0xc4   : > { %1721 = vmax.xlane.f32.xlu2 %v1720_v46  ;;  %1727 = vmax.xlane.f32.xlu0 %v1726_v49 }
  0xc7   : > { %v655_v56 = vpop.f32.mrf.mxu0  ;;  %v674_v57 = vpop.f32.mrf.mxu1 }
  0xc8   : > { %v619_v54 = vpop.f32.mrf.mxu2  ;;  %v638_v55 = vpop.f32.mrf.mxu3  ;;  %v4572_v60 = vmul.f32 0.5, %v655_v56  ;;  %v4579_v3 = vmul.f32 0.5, %v674_v57  ;;  %v270_v56 = vld [vmem:[%s4350_s21 + $0x66] sm:$0x3] }
  0xca   : > { %v1729_v1 = vsel %vm1692_vm1, %v4572_v60, -inf  ;;  %v1732_v12 = vsel %vm1692_vm1, %v4579_v3, -inf  ;;  %3945 = vmatmul.msk.bf16.vlgmr.msrb.gmra.mxu1 %vm411_vm0, %v264_v13  ;;  %3944 = vmatmul.msk.bf16.vlgmr.msrb.gmra.mxu0 %vm411_vm0, %v263_v27  ;;  %v338_v27 = vld [vmem:[%s4336_s18 + $0x6e] sm:$0x3] }
  0xcb   : > { %1730 = vmax.xlane.f32.xlu1 %v1729_v1 }
  0xcc   : > { %1724 = vmax.xlane.f32.xlu2 %v1723_v59 }
  0xcd   : > { %3946 = vmatmul.msk.bf16.vlgmr.msrb.gmra.mxu2 %vm411_vm0, %v265_v62  ;;  %3947 = vmatmul.msk.bf16.vlgmr.msrb.gmra.mxu3 %vm411_vm0, %v266_v4 }
  0xcf   : > { %v657_v9 = vpop.f32.mrf.mxu0  ;;  %v676_v10 = vpop.f32.mrf.mxu1 }
  0xd0   : > { %v693_v5 = vpop.f32.mrf.mxu2  ;;  %v712_v6 = vpop.f32.mrf.mxu3 }
  0xd1   : > { %v4584_v7 = vmul.f32 0.5, %v693_v5  ;;  %v4586_v8 = vmul.f32 0.5, %v712_v6  ;;  %v331_v6 = vld [vmem:[%s4336_s18 + $0x60] sm:$0x3] }
  0xd2   : > { %v1328_v9 = vsel %vm411_vm0, %v331_v6, 0 }
  0xd3   : > { %v1735_v14 = vsel %vm1692_vm1, %v4584_v7, -inf  ;;  %v1738_v15 = vsel %vm1692_vm1, %v4586_v8, -inf  ;;  %1337 = vmatpush.bf16.xpose.msra.mxu0 %v1328_v9 }
  0xd4   : > { %1733 = vmax.xlane.f32.xlu2 %v1732_v12  ;;  %1736 = vmax.xlane.f32.xlu0 %v1735_v14 }
  0xd5   : > { %1739 = vmax.xlane.f32.xlu1 %v1738_v15 }
  0xd7   : > { %v731_v22 = vpop.f32.mrf.mxu0  ;;  %v750_v23 = vpop.f32.mrf.mxu1 }
  0xd8   : > { %v695_v20 = vpop.f32.mrf.mxu2  ;;  %v714_v21 = vpop.f32.mrf.mxu3  ;;  %v4598_v25 = vmul.f32 0.5, %v731_v22  ;;  %v4600_v26 = vmul.f32 0.5, %v750_v23  ;;  %v332_v22 = vld [vmem:[%s4336_s18 + $0x62] sm:$0x3] }
  0xd9   : > { %v267_v21 = vld [vmem:[%s4350_s21 + $0x60] sm:$0x3]  ;;  %v1347_v23 = vsel %vm411_vm0, %v332_v22, 0 }
  0xda   : > { %v1744_v28 = vsel %vm1692_vm1, %v4600_v26, -inf  ;;  %v1741_v29 = vsel %vm1692_vm1, %v4598_v25, -inf  ;;  %3948 = vmatmul.msk.bf16.vlgmr.msra.gmra.mxu0 %vm411_vm0, %v267_v21  ;;  %1356 = vmatpush.bf16.xpose.msra.mxu1 %v1347_v23 }
  0xdc   : > { %1742 = vmax.xlane.f32.xlu0 %v1741_v29  ;;  %v337_v29 = vld [vmem:[%s4336_s18 + $0x6c] sm:$0x3] }
  0xdd   : > { %1745 = vmax.xlane.f32.xlu1 %v1744_v28  ;;  %3950 = vmatmul.msk.bf16.vlgmr.msra.gmra.mxu2 %vm411_vm0, %v269_v53  ;;  %v1461_v28 = vsel %vm411_vm0, %v338_v27, 0 }
  0xde   : > { %3951 = vmatmul.msk.bf16.vlgmr.msra.gmra.mxu3 %vm411_vm0, %v270_v56 }
  0xdf   : > { %v733_v35 = vpop.f32.mrf.mxu0  ;;  %v752_v36 = vpop.f32.mrf.mxu1  ;;  %1470 = vmatpush.bf16.xpose.msrb.mxu3 %v1461_v28 }
  0xe0   : > { %v769_v30 = vpop.f32.mrf.mxu2  ;;  %v788_v32 = vpop.f32.mrf.mxu3 }
  0xe1   : > { %v4608_v33 = vmul.f32 0.5, %v769_v30  ;;  %v4610_v34 = vmul.f32 0.5, %v788_v32  ;;  %v1442_v30 = vsel %vm411_vm0, %v337_v29, 0  ;;  %3949 = vmatmul.msk.bf16.vlgmr.msra.gmra.mxu1 %vm411_vm0, %v268_v44 }
  0xe2   : > { %1451 = vmatpush.bf16.xpose.msrb.mxu2 %v1442_v30 }
  0xe3   : > { %v1747_v37 = vsel %vm1692_vm1, %v4608_v33, -inf  ;;  %v1750_v39 = vsel %vm1692_vm1, %v4610_v34, -inf }
  0xe4   : > { %1748 = vmax.xlane.f32.xlu2 %v1747_v37  ;;  %1751 = vmax.xlane.f32.xlu0 %v1750_v39 }
  0xe7   : > { %v807_v47 = vpop.f32.mrf.mxu0  ;;  %v826_v48 = vpop.f32.mrf.mxu1 }
  0xe8   : > { %v771_v45 = vpop.f32.mrf.mxu2  ;;  %v790_v46 = vpop.f32.mrf.mxu3  ;;  %v4620_v49 = vmul.f32 0.5, %v807_v47  ;;  %v4622_v52 = vmul.f32 0.5, %v826_v48 }
  0xe9   : > { %v274_v45 = vld [vmem:[%s4350_s21 + $0x6e] sm:$0x3]  ;;  %v273_v46 = vld [vmem:[%s4350_s21 + $0x6c] sm:$0x3] }
  0xea   : > { %v1756_v54 = vsel %vm1692_vm1, %v4622_v52, -inf  ;;  %v1753_v55 = vsel %vm1692_vm1, %v4620_v49, -inf }
  0xec   : > { %1757 = vmax.xlane.f32.xlu0 %v1756_v54  ;;  %1754 = vmax.xlane.f32.xlu2 %v1753_v55 }
  0xed   : > { %3954 = vmatmul.msk.bf16.vlgmr.msrb.gmra.mxu2 %vm411_vm0, %v273_v46 }
  0xee   : > { %3955 = vmatmul.msk.bf16.vlgmr.msrb.gmra.mxu3 %vm411_vm0, %v274_v45 }
  0xef   : > { %v809_v0 = vpop.f32.mrf.mxu0  ;;  %v828_v1 = vpop.f32.mrf.mxu1 }
  0xf0   : > { %v845_v57 = vpop.f32.mrf.mxu2  ;;  %v864_v59 = vpop.f32.mrf.mxu3 }
  0xf1   : > { %v4632_v62 = vmul.f32 0.5, %v845_v57  ;;  %v4634_v63 = vmul.f32 0.5, %v864_v59 }
  0xf3   : > { %v1759_v4 = vsel %vm1692_vm1, %v4632_v62, -inf  ;;  %v1762_v5 = vsel %vm1692_vm1, %v4634_v63, -inf }
  0xf4   : > { %1760 = vmax.xlane.f32.xlu1 %v1759_v4  ;;  %1763 = vmax.xlane.f32.xlu2 %v1762_v5 }
  0xf7   : > { %v883_v13 = vpop.f32.mrf.mxu0  ;;  %v902_v14 = vpop.f32.mrf.mxu1 }
  0xf8   : > { %v847_v10 = vpop.f32.mrf.mxu2  ;;  %v866_v12 = vpop.f32.mrf.mxu3  ;;  %v4642_v15 = vmul.f32 0.5, %v883_v13  ;;  %v4644_v17 = vmul.f32 0.5, %v902_v14 }
  0xfa   : > { %v1768_v18 = vsel %vm1692_vm1, %v4644_v17, -inf  ;;  %v1765_v20 = vsel %vm1692_vm1, %v4642_v15, -inf }
  0xfc   : > { %1769 = vmax.xlane.f32.xlu2 %v1768_v18  ;;  %1766 = vmax.xlane.f32.xlu1 %v1765_v20 }
  0xff   : > { %v885_v39 = vpop.f32.mrf.mxu0  ;;  %v904_v40 = vpop.f32.mrf.mxu1 }
 0x100   : > { %v921_v32 = vpop.f32.mrf.mxu2  ;;  %v940_v35 = vpop.f32.mrf.mxu3 }
 0x101   : > { %v4658_v36 = vmul.f32 0.5, %v921_v32  ;;  %v4660_v37 = vmul.f32 0.5, %v940_v35 }
 0x103   : > { %v1771_v41 = vsel %vm1692_vm1, %v4658_v36, -inf  ;;  %v1774_v42 = vsel %vm1692_vm1, %v4660_v37, -inf }
 0x104   : > { %1772 = vmax.xlane.f32.xlu0 %v1771_v41  ;;  %1775 = vmax.xlane.f32.xlu1 %v1774_v42 }
 0x107   : > { %v959_v53 = vpop.f32.mrf.mxu0  ;;  %v978_v54 = vpop.f32.mrf.mxu1 }
 0x108   : > { %v923_v47 = vpop.f32.mrf.mxu2  ;;  %v942_v48 = vpop.f32.mrf.mxu3  ;;  %v4672_v55 = vmul.f32 0.5, %v959_v53  ;;  %v4674_v56 = vmul.f32 0.5, %v978_v54 }
 0x10a   : > { %v1780_v57 = vsel %vm1692_vm1, %v4674_v56, -inf  ;;  %v1777_v59 = vsel %vm1692_vm1, %v4672_v55, -inf }
 0x10c   : > { %1781 = vmax.xlane.f32.xlu1 %v1780_v57  ;;  %1778 = vmax.xlane.f32.xlu0 %v1777_v59 }
 0x10e   : > { %v1695_v6 = vpop.xlane.xlu1 %1694 }
 0x10f   : > { %v961_v9 = vpop.f32.mrf.mxu0  ;;  %v1885_v10 = vsub.f32 %v4488_v50, %v1695_v6  ;;  %v980_v12 = vpop.f32.mrf.mxu1  ;;  %v335_v6 = vld [vmem:[%s4336_s18 + $0x68] sm:$0x3] }
 0x110   : > { %v997_v0 = vpop.f32.mrf.mxu2  ;;  %v1016_v1 = vpop.f32.mrf.mxu3  ;;  %v336_v9 = vld [vmem:[%s4336_s18 + $0x6a] sm:$0x3]  ;;  %v1404_v12 = vsel %vm411_vm0, %v335_v6, 0 }
 0x111   : > { %v4680_v4 = vmul.f32 0.5, %v997_v0  ;;  %v4682_v5 = vmul.f32 0.5, %v1016_v1  ;;  %v1949_v18 = vmul.f32 1.442695, %v1885_v10  ;;  %1413 = vmatpush.bf16.xpose.msrb.mxu0 %v1404_v12 }
 0x113   : > { %v1783_v13 = vsel %vm1692_vm1, %v4680_v4, -inf  ;;  %v1786_v14 = vsel %vm1692_vm1, %v4682_v5, -inf  ;;  %4038 = vpow2.f32 %v1949_v18 }
 0x114   : > { %1784 = vmax.xlane.f32.xlu2 %v1783_v13  ;;  %1787 = vmax.xlane.f32.xlu0 %v1786_v14  ;;  %v1423_v13 = vsel %vm411_vm0, %v336_v9, 0 }
 0x115   : > { %1432 = vmatpush.bf16.xpose.msrb.mxu1 %v1423_v13 }
 0x116   : > { %v1698_v27 = vpop.xlane.xlu1 %1697 }
 0x117   : > { %v1701_v20 = vpop.xlane.xlu0 %1700  ;;  %v1035_v28 = vpop.f32.mrf.mxu0  ;;  %v1886_v50 = vsub.f32 %v4502_v58, %v1698_v27 }
 0x118   : > { %v1887_v21 = vsub.f32 %v4504_v61, %v1701_v20  ;;  %v1018_v22 = vpop.f32.mrf.mxu3  ;;  %v999_v23 = vpop.f32.mrf.mxu2  ;;  %v4691_v30 = vmul.f32 0.5, %v1035_v28  ;;  %v341_v20 = vld [vmem:[%s4336_s18 + $0x74] sm:$0x3] }
 0x119   : > { %v1054_v32 = vpop.f32.mrf.mxu1  ;;  %v4693_v35 = vpop.eup %4038  ;;  %v1951_v39 = vmul.f32 1.442695, %v1886_v50  ;;  %v1518_v27 = vsel %vm411_vm0, %v341_v20, 0 }
 0x11a   : > { %v1953_v29 = vmul.f32 1.442695, %v1887_v21  ;;  %v1789_v40 = vsel %vm1692_vm1, %v4691_v30, -inf  ;;  %v2077_v61 = vsel %vm1692_vm1, %v4693_v35, 0.0  ;;  %v4699_v42 = vmul.f32 0.5, %v1054_v32  ;;  %1527 = vmatpush.bf16.xpose.msra.mxu2 %v1518_v27 }
 0x11c   : > { %4040 = vpow2.f32 %v1953_v29  ;;  %1790 = vmax.xlane.f32.xlu2 %v1789_v40  ;;  %2078 = vadd.xlane.f32.xlu0 %v2077_v61  ;;  %v1792_v57 = vsel %vm1692_vm1, %v4699_v42, -inf }
 0x11d   : > { %4042 = vpow2.f32 %v1951_v39 }
 0x11e   : > { %v1710_v45 = vpop.xlane.xlu1 %1709 }
 0x11f   : > { %v1704_v41 = vpop.xlane.xlu0 %1703  ;;  %v1037_v46 = vpop.f32.mrf.mxu0  ;;  %v1890_v0 = vsub.f32 %v4517_v11, %v1710_v45  ;;  %v277_v45 = vld [vmem:[%s4350_s21 + $0x74] sm:$0x3] }
 0x120   : > { %v1888_v58 = vsub.f32 %v4510_v2, %v1704_v41  ;;  %v1073_v44 = vpop.f32.mrf.mxu2  ;;  %v1092_v54 = vpop.f32.mrf.mxu3 }
 0x121   : > { %v1056_v53 = vpop.f32.mrf.mxu1  ;;  %v4715_v10 = vmul.f32 0.5, %v1092_v54  ;;  %v4719_v18 = vmul.f32 0.5, %v1073_v44  ;;  %v1959_v21 = vmul.f32 1.442695, %v1890_v0  ;;  %v272_v44 = vld [vmem:[%s4350_s21 + $0x6a] sm:$0x3]  ;;  %3958 = vmatmul.msk.bf16.vlgmr.msra.gmra.mxu2 %vm411_vm0, %v277_v45 }
 0x122   : > { %v4702_v47 = vpop.eup %4040  ;;  %v1955_v48 = vmul.f32 1.442695, %v1888_v58  ;;  %v271_v58 = vld [vmem:[%s4350_s21 + $0x68] sm:$0x3]  ;;  %3953 = vmatmul.msk.bf16.vlgmr.msrb.gmra.mxu1 %vm411_vm0, %v272_v44 }
 0x123   : > { %v4706_v59 = vpop.eup %4042  ;;  %v2083_v2 = vsel %vm1692_vm1, %v4702_v47, 0.0  ;;  %v1798_v32 = vsel %vm1692_vm1, %v4715_v10, -inf  ;;  %3952 = vmatmul.msk.bf16.vlgmr.msrb.gmra.mxu0 %vm411_vm0, %v271_v58 }
 0x124   : > { %4044 = vpow2.f32 %v1955_v48  ;;  %v2080_v1 = vsel %vm1692_vm1, %v4706_v59, 0.0  ;;  %2084 = vadd.xlane.f32.xlu2 %v2083_v2  ;;  %1793 = vmax.xlane.f32.xlu0 %v1792_v57 }
 0x125   : > { %2081 = vadd.xlane.f32.xlu1 %v2080_v1  ;;  %4046 = vpow2.f32 %v1959_v21 }
 0x127   : > { %v1713_v14 = vpop.xlane.xlu2 %1712  ;;  %v1707_v11 = vpop.xlane.xlu0 %1706 }
 0x128   : > { %v1889_v22 = vsub.f32 %v4525_v16, %v1707_v11  ;;  %v1075_v23 = vpop.f32.mrf.mxu2  ;;  %v1111_v28 = vpop.f32.mrf.mxu0  ;;  %v1891_v40 = vsub.f32 %v4530_v19, %v1713_v14  ;;  %v1795_v16 = vsel %vm1692_vm1, %v4719_v18, -inf }
 0x129   : > { %v1094_v39 = vpop.f32.mrf.mxu3  ;;  %v1130_v61 = vpop.f32.mrf.mxu1  ;;  %v4736_v53 = vmul.f32 0.5, %v1111_v28 }
 0x12a   : > { %v4724_v29 = vpop.eup %4044  ;;  %v1957_v50 = vmul.f32 1.442695, %v1889_v22  ;;  %v1961_v46 = vmul.f32 1.442695, %v1891_v40 }
 0x12b   : > { %v2086_v41 = vsel %vm1692_vm1, %v4724_v29, 0.0  ;;  %v4742_v0 = vpop.eup %4046  ;;  %v1801_v9 = vsel %vm1692_vm1, %v4736_v53, -inf }
 0x12c   : > { %4048 = vpow2.f32 %v1957_v50  ;;  %1799 = vmax.xlane.f32.xlu2 %v1798_v32  ;;  %2087 = vadd.xlane.f32.xlu0 %v2086_v41  ;;  %v4766_v41 = vmul.f32 0.5, %v1130_v61 }
 0x12d   : > { %1796 = vmax.xlane.f32.xlu1 %v1795_v16  ;;  %4050 = vpow2.f32 %v1961_v46 }
 0x12e   : > { %v1719_v14 = vpop.xlane.xlu1 %1718 }
 0x12f   : > { %v1716_v48 = vpop.xlane.xlu2 %1715  ;;  %v1893_v27 = vsub.f32 %v4541_v31, %v1719_v14 }
 0x130   : > { %v1892_v19 = vsub.f32 %v4536_v24, %v1716_v48  ;;  %v1149_v54 = vpop.f32.mrf.mxu2  ;;  %v1113_v57 = vpop.f32.mrf.mxu0  ;;  %v2092_v24 = vsel %vm1692_vm1, %v4742_v0, 0.0 }
 0x131   : > { %v1168_v1 = vpop.f32.mrf.mxu3  ;;  %v1132_v12 = vpop.f32.mrf.mxu1  ;;  %v4752_v20 = vmul.f32 0.5, %v1149_v54  ;;  %v1965_v16 = vmul.f32 1.442695, %v1893_v27  ;;  %v1804_v54 = vsel %vm1692_vm1, %v4766_v41, -inf }
 0x132   : > { %v1963_v2 = vmul.f32 1.442695, %v1892_v19  ;;  %v4744_v6 = vpop.eup %4048  ;;  %v4769_v46 = vmul.f32 0.5, %v1168_v1  ;;  %v340_v1 = vld [vmem:[%s4336_s18 + $0x72] sm:$0x3] }
 0x133   : > { %v2089_v13 = vsel %vm1692_vm1, %v4744_v6, 0.0  ;;  %v4754_v22 = vpop.eup %4050  ;;  %v1807_v32 = vsel %vm1692_vm1, %v4752_v20, -inf  ;;  %v1499_v12 = vsel %vm411_vm0, %v340_v1, 0 }
 0x134   : > { %4052 = vpow2.f32 %v1963_v2  ;;  %2090 = vadd.xlane.f32.xlu2 %v2089_v13  ;;  %2093 = vadd.xlane.f32.xlu0 %v2092_v24  ;;  %v2095_v40 = vsel %vm1692_vm1, %v4754_v22, 0.0 }
 0x135   : > { %1802 = vmax.xlane.f32.xlu1 %v1801_v9  ;;  %4054 = vpow2.f32 %v1965_v16  ;;  %1508 = vmatpush.bf16.xpose.msra.mxu1 %v1499_v12 }
 0x137   : > { %v1722_v11 = vpop.xlane.xlu2 %1721  ;;  %v1728_v44 = vpop.xlane.xlu0 %1727 }
 0x138   : > { %v1151_v21 = vpop.f32.mrf.mxu2  ;;  %v1894_v50 = vsub.f32 %v4550_v38, %v1722_v11  ;;  %v4771_v48 = vpop.f32.mrf.mxu0  ;;  %v1896_v61 = vsub.f32 %v4556_v43, %v1728_v44 }
 0x139   : > { %v1170_v28 = vpop.f32.mrf.mxu3  ;;  %v4775_v2 = vpop.f32.mrf.mxu1 }
 0x13a   : > { %v4756_v23 = vpop.eup %4052  ;;  %v1967_v58 = vmul.f32 1.442695, %v1894_v50  ;;  %v1971_v24 = vmul.f32 1.442695, %v1896_v61  ;;  %v345_v61 = vld [vmem:[%s4336_s18 + $0x7c] sm:$0x3] }
 0x13b   : > { %v2098_v39 = vsel %vm1692_vm1, %v4756_v23, 0.0  ;;  %v4782_v13 = vpop.eup %4054 }
 0x13c   : > { %2099 = vadd.xlane.f32.xlu2 %v2098_v39  ;;  %1808 = vmax.xlane.f32.xlu0 %v1807_v32  ;;  %4056 = vpow2.f32 %v1967_v58 }
 0x13d   : > { %2096 = vadd.xlane.f32.xlu1 %v2095_v40 }
 0x13e   : > { %v1731_v9 = vpop.xlane.xlu1 %1730 }
 0x13f   : > { %v1725_v31 = vpop.xlane.xlu2 %1724  ;;  %v1897_v50 = vsub.f32 %v4572_v60, %v1731_v9  ;;  %v2101_v60 = vsel %vm1692_vm1, %v4782_v13, 0.0 }
 0x140   : > { %v1895_v38 = vsub.f32 %v4565_v51, %v1725_v31  ;;  %v1225_v45 = vpop.f32.mrf.mxu2  ;;  %v1810_v51 = vsel %vm1692_vm1, %v4769_v46, -inf  ;;  %v1189_v27 = vpop.f32.mrf.mxu0 }
 0x141   : > { %v1244_v57 = vpop.f32.mrf.mxu3  ;;  %v1208_v39 = vpop.f32.mrf.mxu1 }
 0x142   : > { %v1969_v19 = vmul.f32 1.442695, %v1895_v38  ;;  %v4784_v21 = vpop.eup %4056  ;;  %v4795_v44 = vmul.f32 0.5, %v1244_v57  ;;  %v276_v38 = vld [vmem:[%s4350_s21 + $0x72] sm:$0x3]  ;;  %v1594_v57 = vsel %vm411_vm0, %v345_v61, 0 }
 0x143   : > { %v2104_v31 = vsel %vm1692_vm1, %v4784_v21, 0.0  ;;  %3957 = vmatmul.msk.bf16.vlgmr.msra.gmra.mxu1 %vm411_vm0, %v276_v38  ;;  %1603 = vmatpush.bf16.xpose.msrb.mxu2 %v1594_v57 }
 0x144   : > { %4058 = vpow2.f32 %v1969_v19  ;;  %1805 = vmax.xlane.f32.xlu2 %v1804_v54  ;;  %v342_v19 = vld [vmem:[%s4336_s18 + $0x76] sm:$0x3]  ;;  %v4801_v54 = vmul.f32 0.5, %v1225_v45 }
 0x145   : > { %1811 = vmax.xlane.f32.xlu1 %v1810_v51  ;;  %4060 = vpow2.f32 %v1971_v24  ;;  %v1822_v24 = vsel %vm1692_vm1, %v4795_v44, -inf }
 0x147   : > { %v1737_v14 = vpop.xlane.xlu0 %1736  ;;  %v1734_v43 = vpop.xlane.xlu2 %1733 }
 0x148   : > { %v1227_v11 = vpop.f32.mrf.mxu2  ;;  %v1899_v40 = vsub.f32 %v4584_v7, %v1737_v14  ;;  %v1898_v58 = vsub.f32 %v4579_v3, %v1734_v43  ;;  %v1973_v7 = vmul.f32 1.442695, %v1897_v50  ;;  %v1537_v3 = vsel %vm411_vm0, %v342_v19, 0  ;;  %v1740_v51 = vpop.xlane.xlu1 %1739 }
 0x149   : > { %v1246_v32 = vpop.f32.mrf.mxu3  ;;  %1546 = vmatpush.bf16.xpose.msra.mxu3 %v1537_v3  ;;  %v1900_v11 = vsub.f32 %v4586_v8, %v1740_v51  ;;  %v1819_v43 = vsel %vm1692_vm1, %v4801_v54, -inf  ;;  %v4816_v27 = vpop.f32.mrf.mxu1 }
 0x14a   : > { %v4786_v28 = vpop.eup %4058  ;;  %v1977_v9 = vmul.f32 1.442695, %v1899_v40  ;;  %v1975_v1 = vmul.f32 1.442695, %v1898_v58  ;;  %4062 = vpow2.f32 %v1973_v7  ;;  %v278_v40 = vld [vmem:[%s4350_s21 + $0x76] sm:$0x3]  ;;  %v4838_v57 = vpop.f32.mrf.mxu0 }
 0x14b   : > { %v2107_v16 = vsel %vm1692_vm1, %v4786_v28, 0.0  ;;  %v4811_v14 = vpop.eup %4060  ;;  %v1979_v8 = vmul.f32 1.442695, %v1900_v11 }
 0x14c   : > { %2108 = vadd.xlane.f32.xlu0 %v2107_v16  ;;  %2105 = vadd.xlane.f32.xlu2 %v2104_v31  ;;  %4064 = vpow2.f32 %v1977_v9  ;;  %v2110_v39 = vsel %vm1692_vm1, %v4811_v14, 0.0  ;;  %v339_v16 = vld [vmem:[%s4336_s18 + $0x70] sm:$0x3]  ;;  %v281_v31 = vld [vmem:[%s4350_s21 + $0x7c] sm:$0x3] }
 0x14d   : > { %2102 = vadd.xlane.f32.xlu1 %v2101_v60  ;;  %4066 = vpow2.f32 %v1975_v1  ;;  %v1480_v58 = vsel %vm411_vm0, %v339_v16, 0  ;;  %3962 = vmatmul.msk.bf16.vlgmr.msrb.gmra.mxu2 %vm411_vm0, %v281_v31 }
 0x14e   : > { %1489 = vmatpush.bf16.xpose.msra.mxu0 %v1480_v58  ;;  %4068 = vpow2.f32 %v1979_v8 }
 0x14f   : > { %v1743_v12 = vpop.xlane.xlu0 %1742 }
 0x150   : > { %v4809_v45 = vpop.f32.mrf.mxu2  ;;  %v1901_v50 = vsub.f32 %v4598_v25, %v1743_v12  ;;  %3959 = vmatmul.msk.bf16.vlgmr.msra.gmra.mxu3 %vm411_vm0, %v278_v40  ;;  %v4829_v25 = vpop.eup %4062  ;;  %v4848_v40 = vmul.f32 0.5, %v4775_v2 }
 0x151   : > { %v4819_v32 = vpop.f32.mrf.mxu3  ;;  %v1284_v61 = vpop.f32.mrf.mxu1  ;;  %v2113_v51 = vsel %vm1692_vm1, %v4829_v25, 0.0 }
 0x152   : > { %v1981_v60 = vmul.f32 1.442695, %v1901_v50  ;;  %v4831_v19 = vpop.eup %4064  ;;  %v1746_v50 = vpop.xlane.xlu1 %1745 }
 0x153   : > { %v4833_v3 = vpop.eup %4066  ;;  %v2119_v12 = vsel %vm1692_vm1, %v4831_v19, 0.0  ;;  %v1902_v31 = vsub.f32 %v4600_v26, %v1746_v50  ;;  %v1265_v2 = vpop.f32.mrf.mxu0  ;;  %v343_v26 = vld [vmem:[%s4336_s18 + $0x78] sm:$0x3] }
 0x154   : > { %1823 = vmax.xlane.f32.xlu0 %v1822_v24  ;;  %1820 = vmax.xlane.f32.xlu2 %v1819_v43  ;;  %4070 = vpow2.f32 %v1981_v60  ;;  %v2116_v11 = vsel %vm1692_vm1, %v4833_v3, 0.0  ;;  %v275_v43 = vld [vmem:[%s4350_s21 + $0x70] sm:$0x3]  ;;  %v4851_v8 = vpop.eup %4068 }
 0x155   : > { %2111 = vadd.xlane.f32.xlu1 %v2110_v39  ;;  %3956 = vmatmul.msk.bf16.vlgmr.msra.gmra.mxu0 %vm411_vm0, %v275_v43  ;;  %v2122_v60 = vsel %vm1692_vm1, %v4851_v8, 0.0  ;;  %v4870_v43 = vmul.f32 0.5, %v4809_v45 }
 0x157   : > { %v1752_v38 = vpop.xlane.xlu0 %1751  ;;  %v1749_v24 = vpop.xlane.xlu2 %1748 }
 0x158   : > { %v1303_v7 = vpop.f32.mrf.mxu2  ;;  %v1904_v9 = vsub.f32 %v4610_v34, %v1752_v38  ;;  %v346_v34 = vld [vmem:[%s4336_s18 + $0x7e] sm:$0x3]  ;;  %v1816_v38 = vsel %vm1692_vm1, %v4848_v40, -inf }
 0x159   : > { %v1322_v1 = vpop.f32.mrf.mxu3  ;;  %v1613_v16 = vsel %vm411_vm0, %v346_v34, 0  ;;  %v1903_v7 = vsub.f32 %v4608_v33, %v1749_v24  ;;  %v1831_v34 = vsel %vm1692_vm1, %v4870_v43, -inf }
 0x15a   : > { %v1987_v39 = vmul.f32 1.442695, %v1904_v9  ;;  %1622 = vmatpush.bf16.xpose.msrb.mxu3 %v1613_v16  ;;  %v4853_v58 = vpop.eup %4070  ;;  %v4864_v9 = vmul.f32 0.5, %v4771_v48  ;;  %v1983_v1 = vmul.f32 1.442695, %v1902_v31 }
 0x15b   : > { %v2125_v61 = vsel %vm1692_vm1, %v4853_v58, 0.0  ;;  %v1985_v33 = vmul.f32 1.442695, %v1903_v7  ;;  %v279_v16 = vld [vmem:[%s4350_s21 + $0x78] sm:$0x3] }
 0x15c   : > { %2114 = vadd.xlane.f32.xlu0 %v2113_v51  ;;  %2120 = vadd.xlane.f32.xlu2 %v2119_v12  ;;  %4072 = vpow2.f32 %v1987_v39  ;;  %v1556_v12 = vsel %vm411_vm0, %v343_v26, 0  ;;  %v1813_v48 = vsel %vm1692_vm1, %v4864_v9, -inf  ;;  %v344_v31 = vld [vmem:[%s4336_s18 + $0x7a] sm:$0x3] }
 0x15d   : > { %2117 = vadd.xlane.f32.xlu1 %v2116_v11  ;;  %v282_v11 = vld [vmem:[%s4350_s21 + $0x7e] sm:$0x3]  ;;  %1565 = vmatpush.bf16.xpose.msrb.mxu0 %v1556_v12  ;;  %4074 = vpow2.f32 %v1983_v1 }
 0x15e   : > { %4076 = vpow2.f32 %v1985_v33 }
 0x15f   : > { %v1755_v51 = vpop.xlane.xlu2 %1754 }
 0x160   : > { %v1905_v50 = vsub.f32 %v4620_v49, %v1755_v51  ;;  %v1758_v49 = vpop.xlane.xlu0 %1757  ;;  %v4891_v51 = vpop.f32.mrf.mxu2 }
 0x161   : > { %3963 = vmatmul.msk.bf16.vlgmr.msrb.gmra.mxu3 %vm411_vm0, %v282_v11  ;;  %v1906_v12 = vsub.f32 %v4622_v52, %v1758_v49  ;;  %v4901_v33 = vpop.f32.mrf.mxu3  ;;  %v4911_v52 = vmul.f32 0.5, %v4838_v57  ;;  %v347_v49 = vld [vmem:[%s4918_s24] sm:$0x3] }
 0x162   : > { %v4873_v24 = vpop.eup %4072 }
 0x163   : > { %v2134_v45 = vsel %vm1692_vm1, %v4873_v24, 0.0  ;;  %v4889_v7 = vpop.eup %4074 }
 0x164   : > { %2123 = vadd.xlane.f32.xlu0 %v2122_v60  ;;  %2126 = vadd.xlane.f32.xlu2 %v2125_v61  ;;  %v4885_v60 = vmul.f32 0.5, %v4819_v32  ;;  %v1989_v61 = vmul.f32 1.442695, %v1905_v50  ;;  %v4893_v26 = vpop.eup %4076  ;;  %v2128_v11 = vsel %vm1692_vm1, %v4889_v7, 0.0 }
 0x165   : > { %1817 = vmax.xlane.f32.xlu1 %v1816_v38  ;;  %3960 = vmatmul.msk.bf16.vlgmr.msrb.gmra.mxu0 %vm411_vm0, %v279_v16  ;;  %v1575_v38 = vsel %vm411_vm0, %v344_v31, 0 }
 0x166   : > { %1584 = vmatpush.bf16.xpose.msrb.mxu1 %v1575_v38  ;;  %v1834_v32 = vsel %vm1692_vm1, %v4885_v60, -inf  ;;  %4078 = vpow2.f32 %v1989_v61 }
 0x167   : > { %v1761_v39 = vpop.xlane.xlu1 %1760  ;;  %v1764_v2 = vpop.xlane.xlu2 %1763 }
 0x168   : > { %v1907_v1 = vsub.f32 %v4632_v62, %v1761_v39  ;;  %v2131_v62 = vsel %vm1692_vm1, %v4893_v26, 0.0 }
 0x16a   : > { %v1993_v39 = vmul.f32 1.442695, %v1907_v1  ;;  %v1825_v1 = vsel %vm1692_vm1, %v4911_v52, -inf }
 0x16c   : > { %1814 = vmax.xlane.f32.xlu0 %v1813_v48  ;;  %2135 = vadd.xlane.f32.xlu2 %v2134_v45  ;;  %v1908_v48 = vsub.f32 %v4634_v63, %v1764_v2  ;;  %v280_v45 = vld [vmem:[%s4350_s21 + $0x7a] sm:$0x3]  ;;  %v1991_v63 = vmul.f32 1.442695, %v1906_v12  ;;  %v1379_v2 = vpop.f32.mrf.mxu2  ;;  %v4923_v57 = vpop.eup %4078  ;;  %4080 = vpow2.f32 %v1993_v39 }
 0x16d   : > { %1832 = vmax.xlane.f32.xlu1 %v1831_v34  ;;  %v4905_v34 = vmul.f32 0.5, %v4816_v27  ;;  %3961 = vmatmul.msk.bf16.vlgmr.msrb.gmra.mxu1 %vm411_vm0, %v280_v45 }
 0x16e   : > { %v1995_v27 = vmul.f32 1.442695, %v1908_v48  ;;  %4082 = vpow2.f32 %v1991_v63  ;;  %v1398_v48 = vpop.f32.mrf.mxu3 }
 0x16f   : > { %v1767_v50 = vpop.xlane.xlu1 %1766  ;;  %v1770_v31 = vpop.xlane.xlu2 %1769  ;;  %v1828_v38 = vsel %vm1692_vm1, %v4905_v34, -inf }
 0x170   : > { %v1909_v61 = vsub.f32 %v4642_v15, %v1767_v50  ;;  %4084 = vpow2.f32 %v1995_v27  ;;  %v2137_v15 = vsel %vm1692_vm1, %v4923_v57, 0.0 }
 0x172   : > { %v1997_v50 = vmul.f32 1.442695, %v1909_v61  ;;  %v4935_v63 = vpop.eup %4080 }
 0x174   : > { %2129 = vadd.xlane.f32.xlu0 %v2128_v11  ;;  %1835 = vmax.xlane.f32.xlu2 %v1834_v32  ;;  %v2466_v32 = vsel %vm2464_vm2, %v347_v49, 0  ;;  %v4930_v11 = vpop.f32.mrf.mxu0  ;;  %v4937_v2 = vpop.eup %4082  ;;  %v348_v49 = vld [vmem:[%s4918_s24 + $0x2] sm:$0x3]  ;;  %4086 = vpow2.f32 %v1997_v50 }
 0x175   : > { %2132 = vadd.xlane.f32.xlu1 %v2131_v62  ;;  %2475 = vmatpush.bf16.msra.mxu0 %v2466_v32  ;;  %v1910_v62 = vsub.f32 %v4644_v17, %v1770_v31  ;;  %v349_v32 = vld [vmem:[%s4918_s24 + $0x4] sm:$0x3]  ;;  %v2485_v31 = vsel %vm2464_vm2, %v348_v49, 0 }
 0x176   : > { %v4941_v27 = vpop.eup %4084  ;;  %2494 = vmatpush.bf16.msra.mxu1 %v2485_v31  ;;  %v4959_v49 = vpop.f32.mrf.mxu3 }
 0x177   : > { %v1773_v16 = vpop.xlane.xlu0 %1772  ;;  %v1776_v39 = vpop.xlane.xlu1 %1775 }
 0x178   : > { %v1911_v12 = vsub.f32 %v4658_v36, %v1773_v16  ;;  %v1999_v36 = vmul.f32 1.442695, %v1910_v62  ;;  %v1912_v17 = vsub.f32 %v4660_v37, %v1776_v39  ;;  %v2140_v37 = vsel %vm1692_vm1, %v4937_v2, 0.0 }
 0x179   : > { %v2146_v62 = vsel %vm1692_vm1, %v4941_v27, 0.0 }
 0x17a   : > { %v2001_v45 = vmul.f32 1.442695, %v1911_v12  ;;  %v4949_v12 = vpop.f32.mrf.mxu1  ;;  %v4955_v50 = vpop.eup %4086 }
 0x17b   : > { %5651 = vst [vmem:[#allocation2_spill] sm:$0xff] %v4955_v50 }
 0x17c   : > { %1829 = vmax.xlane.f32.xlu0 %v1828_v38  ;;  %1826 = vmax.xlane.f32.xlu2 %v1825_v1  ;;  %v2504_v38 = vsel %vm2464_vm2, %v349_v32, 0  ;;  %4088 = vpow2.f32 %v2001_v45  ;;  %v2143_v1 = vsel %vm1692_vm1, %v4935_v63, 0.0  ;;  %v1341_v48 = vpop.f32.mrf.mxu0 }
 0x17d   : > { %2138 = vadd.xlane.f32.xlu1 %v2137_v15  ;;  %2513 = vmatpush.bf16.msra.mxu2 %v2504_v38  ;;  %4090 = vpow2.f32 %v1999_v36  ;;  %v2003_v15 = vmul.f32 1.442695, %v1912_v17  ;;  %v350_v36 = vld [vmem:[%s4918_s24 + $0x6] sm:$0x3]  ;;  %v2149_v17 = vsel %vm1692_vm1, %v4955_v50, 0.0 }
 0x17e   : > { %v2523_v31 = vsel %vm2464_vm2, %v350_v36, 0  ;;  %v1474_v50 = vpop.f32.mrf.mxu3 }
 0x17f   : > { %v1779_v16 = vpop.xlane.xlu0 %1778  ;;  %4092 = vpow2.f32 %v2003_v15  ;;  %2532 = vmatpush.bf16.msra.mxu3 %v2523_v31  ;;  %v4975_v15 = vmul.f32 0.5, %v4901_v33 }
 0x180   : > { %v1913_v61 = vsub.f32 %v4672_v55, %v1779_v16 }
 0x182   : > { %v2005_v55 = vmul.f32 1.442695, %v1913_v61  ;;  %v4957_v16 = vpop.eup %4088  ;;  %v4968_v61 = vpop.f32.mrf.mxu2 }
 0x183   : > { %5652 = vst [vmem:[#allocation3_spill] sm:$0xff] %v4957_v16  ;;  %v4962_v32 = vpop.eup %4090  ;;  %v2155_v48 = vsel %vm1692_vm1, %v4957_v16, 0.0  ;;  %v352_v16 = vld [vmem:[%s4918_s24 + $0xa] sm:$0x3] }
 0x184   : > { %2144 = vadd.xlane.f32.xlu0 %v2143_v1  ;;  %2141 = vadd.xlane.f32.xlu2 %v2140_v37  ;;  %5653 = vst [vmem:[#allocation4_spill] sm:$0xff] %v4962_v32  ;;  %4094 = vpow2.f32 %v2005_v55  ;;  %v1360_v1 = vpop.f32.mrf.mxu1  ;;  %v1782_v37 = vpop.xlane.xlu1 %1781 }
 0x185   : > { %2147 = vadd.xlane.f32.xlu1 %v2146_v62  ;;  %v2152_v62 = vsel %vm1692_vm1, %v4962_v32, 0.0  ;;  %v4977_v55 = vpop.eup %4092  ;;  %v351_v1 = vld [vmem:[%s4918_s24 + $0x8] sm:$0x3] }
 0x186   : > { %v2542_v32 = vsel %vm2464_vm2, %v351_v1, 0  ;;  %v2158_v33 = vsel %vm1692_vm1, %v4977_v55, 0.0 }
 0x187   : > { %v1785_v45 = vpop.xlane.xlu2 %1784  ;;  %v1788_v39 = vpop.xlane.xlu0 %1787  ;;  %2551 = vmatpush.bf16.msrb.mxu0 %v2542_v32 }
 0x188   : > { %v1916_v38 = vsub.f32 %v4682_v5, %v1788_v39  ;;  %v1914_v39 = vsub.f32 %v4674_v56, %v1782_v37 }
 0x18a   : > { %v2011_v5 = vmul.f32 1.442695, %v1916_v38  ;;  %v4980_v31 = vpop.eup %4094  ;;  %v1846_v38 = vsel %vm1692_vm1, %v4975_v15, -inf  ;;  %v1455_v56 = vpop.f32.mrf.mxu2  ;;  %v2007_v37 = vmul.f32 1.442695, %v1914_v39 }
 0x18b   : > { %v2161_v50 = vsel %vm1692_vm1, %v4980_v31, 0.0  ;;  %v354_v56 = vld [vmem:[%s4918_s24 + $0xe] sm:$0x3] }
 0x18c   : > { %2150 = vadd.xlane.f32.xlu0 %v2149_v17  ;;  %2156 = vadd.xlane.f32.xlu2 %v2155_v48  ;;  %v2561_v48 = vsel %vm2464_vm2, %v352_v16, 0  ;;  %v4994_v16 = vmul.f32 0.5, %v4891_v51 }
 0x18d   : > { %2153 = vadd.xlane.f32.xlu1 %v2152_v62  ;;  %2570 = vmatpush.bf16.msrb.mxu1 %v2561_v48  ;;  %v1915_v62 = vsub.f32 %v4680_v4, %v1785_v45 }
 0x18e   : > { %v1843_v51 = vsel %vm1692_vm1, %v4994_v16, -inf }
 0x18f   : > { %v1791_v36 = vpop.xlane.xlu2 %1790  ;;  %v2079_v17 = vpop.xlane.xlu0 %2078 }
 0x190   : > { %4096 = vrcp.f32 %v2079_v17  ;;  %v2009_v17 = vmul.f32 1.442695, %v1915_v62 }
 0x191   : > { %4098 = vpow2.f32 %v2011_v5  ;;  %v4997_v5 = vmul.f32 0.5, %v4930_v11 }
 0x192   : > { %4100 = vpow2.f32 %v2007_v37 }
 0x193   : > { %v1837_v62 = vsel %vm1692_vm1, %v4997_v5, -inf }
 0x194   : > { %2159 = vadd.xlane.f32.xlu0 %v2158_v33  ;;  %2162 = vadd.xlane.f32.xlu2 %v2161_v50  ;;  %v353_v33 = vld [vmem:[%s4918_s24 + $0xc] sm:$0x3] }
 0x195   : > { %1847 = vmax.xlane.f32.xlu1 %v1846_v38  ;;  %v2580_v11 = vsel %vm2464_vm2, %v353_v33, 0  ;;  %v2599_v38 = vsel %vm2464_vm2, %v354_v56, 0 }
 0x196   : > { %v4097_v32 = vpop.eup %4096  ;;  %2589 = vmatpush.bf16.msrb.mxu2 %v2580_v11  ;;  %2608 = vmatpush.bf16.msrb.mxu3 %v2599_v38 }
 0x197   : > { %v2085_v39 = vpop.xlane.xlu2 %2084  ;;  %v4999_v1 = vpop.eup %4098  ;;  %v2333_v4 = vmul.f32 %v4097_v32, %v4693_v35  ;;  %v1917_v35 = vsub.f32 %v4691_v30, %v1791_v36 }
 0x198   : > { %v2082_v45 = vpop.xlane.xlu1 %2081  ;;  %v1794_v48 = vpop.xlane.xlu0 %1793  ;;  %4102 = vrcp.f32 %v2085_v39  ;;  %v2170_v50 = vsel %vm1692_vm1, %v4999_v1, 0.0  ;;  %v5017_v39 = vmul.f32 0.5, %v4949_v12 }
 0x199   : > { %4104 = vrcp.f32 %v2082_v45  ;;  %v2397_v37 = vpack.c.bf16 %v2333_v4, %v2333_v4  ;;  %v5014_v32 = vpop.eup %4100  ;;  %v2013_v33 = vmul.f32 1.442695, %v1917_v35  ;;  %v5030_v35 = vmul.f32 0.5, %v4959_v49 }
 0x19a   : > { %4106 = vpow2.f32 %v2009_v17  ;;  %v1840_v12 = vsel %vm1692_vm1, %v5017_v39, -inf }
 0x19b   : > { %3964 = vmatmul.msk.bf16.vlgmr.msra.gmra.mxu0 %vm411_vm0, %v2397_v37 }
 0x19c   : > { %1844 = vmax.xlane.f32.xlu0 %v1843_v51  ;;  %2171 = vadd.xlane.f32.xlu2 %v2170_v50  ;;  %v1918_v50 = vsub.f32 %v4699_v42, %v1794_v48 }
 0x19d   : > { %1838 = vmax.xlane.f32.xlu1 %v1837_v62 }
 0x19e   : > { %v4103_v4 = vpop.eup %4102  ;;  %v2015_v49 = vmul.f32 1.442695, %v1918_v50 }
 0x19f   : > { %v4105_v45 = vpop.eup %4104  ;;  %v2335_v17 = vmul.f32 %v4103_v4, %v4702_v47  ;;  %v1800_v56 = vpop.xlane.xlu2 %1799  ;;  %v2164_v47 = vsel %vm1692_vm1, %v5014_v32, 0.0 }
 0x1a0   : > { %v2334_v30 = vmul.f32 %v4105_v45, %v4706_v59  ;;  %v1797_v36 = vpop.xlane.xlu1 %1796  ;;  %v2088_v51 = vpop.xlane.xlu0 %2087  ;;  %v1920_v4 = vsub.f32 %v4715_v10, %v1800_v56 }
 0x1a1   : > { %v5021_v11 = vpop.eup %4106  ;;  %v2399_v38 = vpack.c.bf16 %v2335_v17, %v2335_v17  ;;  %v1919_v37 = vsub.f32 %v4719_v18, %v1797_v36  ;;  %4108 = vrcp.f32 %v2088_v51  ;;  %v5035_v18 = vmul.f32 0.5, %v4968_v61  ;;  %v355_v36 = vld [vmem:[%s4918_s24 + $0x10] sm:$0x3]  ;;  %v356_v51 = vld [vmem:[%s4918_s24 + $0x12] sm:$0x3] }
 0x1a2   : > { %v2398_v62 = vpack.c.bf16 %v2334_v30, %v2334_v30  ;;  %4110 = vpow2.f32 %v2013_v33  ;;  %v2167_v42 = vsel %vm1692_vm1, %v5021_v11, 0.0  ;;  %v2019_v10 = vmul.f32 1.442695, %v1920_v4  ;;  %v5054_v4 = vpop.f32.mrf.mxu0 }
 0x1a3   : > { %v2017_v59 = vmul.f32 1.442695, %v1919_v37  ;;  %3966 = vmatmul.msk.bf16.vlgmr.msra.gmra.mxu2 %vm411_vm0, %v2399_v38  ;;  %v1858_v33 = vsel %vm1692_vm1, %v5030_v35, -inf  ;;  %v1855_v61 = vsel %vm1692_vm1, %v5035_v18, -inf  ;;  %v357_v38 = vld [vmem:[%s4918_s24 + $0x14] sm:$0x3] }
 0x1a4   : > { %2165 = vadd.xlane.f32.xlu0 %v2164_v47  ;;  %3965 = vmatmul.msk.bf16.vlgmr.msra.gmra.mxu1 %vm411_vm0, %v2398_v62  ;;  %v2618_v62 = vsel %vm2464_vm2, %v355_v36, 0  ;;  %v2637_v50 = vsel %vm2464_vm2, %v356_v51, 0 }
 0x1a5   : > { %1841 = vmax.xlane.f32.xlu2 %v1840_v12  ;;  %2168 = vadd.xlane.f32.xlu1 %v2167_v42  ;;  %4112 = vpow2.f32 %v2017_v59  ;;  %v5056_v42 = vpop.f32.mrf.mxu1 }
 0x1a6   : > { %2627 = vmatpush.bf16.msra.mxu0 %v2618_v62  ;;  %2646 = vmatpush.bf16.msra.mxu1 %v2637_v50 }
 0x1a7   : > { %v4109_v48 = vpop.eup %4108  ;;  %v2091_v45 = vpop.xlane.xlu2 %2090 }
 0x1a8   : > { %v2336_v17 = vmul.f32 %v4109_v48, %v4724_v29  ;;  %v2094_v56 = vpop.xlane.xlu0 %2093  ;;  %4114 = vrcp.f32 %v2091_v45  ;;  %v1803_v30 = vpop.xlane.xlu1 %1802  ;;  %v2656_v29 = vsel %vm2464_vm2, %v357_v38, 0 }
 0x1a9   : > { %v5048_v37 = vpop.eup %4110  ;;  %4116 = vrcp.f32 %v2094_v56  ;;  %v1921_v12 = vsub.f32 %v4736_v53, %v1803_v30  ;;  %2665 = vmatpush.bf16.msra.mxu2 %v2656_v29 }
 0x1aa   : > { %4118 = vpow2.f32 %v2015_v49  ;;  %v2400_v47 = vpack.c.bf16 %v2336_v17, %v2336_v17  ;;  %v2173_v53 = vsel %vm1692_vm1, %v5048_v37, 0.0 }
 0x1ab   : > { %4120 = vpow2.f32 %v2019_v10  ;;  %v2021_v59 = vmul.f32 1.442695, %v1921_v12  ;;  %v5061_v49 = vpop.eup %4112 }
 0x1ac   : > { %1859 = vmax.xlane.f32.xlu0 %v1858_v33  ;;  %3967 = vmatmul.msk.bf16.vlgmr.msra.gmra.mxu3 %vm411_vm0, %v2400_v47  ;;  %v5074_v47 = vpop.f32.mrf.mxu2 }
 0x1ad   : > { %1856 = vmax.xlane.f32.xlu2 %v1855_v61  ;;  %2174 = vadd.xlane.f32.xlu1 %v2173_v53  ;;  %4122 = vpow2.f32 %v2021_v59  ;;  %v358_v61 = vld [vmem:[%s4918_s24 + $0x16] sm:$0x3]  ;;  %v1436_v59 = vpop.f32.mrf.mxu1 }
 0x1ae   : > { %v4115_v48 = vpop.eup %4114  ;;  %v2675_v62 = vsel %vm2464_vm2, %v358_v61, 0 }
 0x1af   : > { %v4117_v45 = vpop.eup %4116  ;;  %v2337_v10 = vmul.f32 %v4115_v48, %v4744_v6  ;;  %v2100_v33 = vpop.xlane.xlu2 %2099  ;;  %v2179_v6 = vsel %vm1692_vm1, %v5061_v49, 0.0  ;;  %2684 = vmatpush.bf16.msra.mxu3 %v2675_v62  ;;  %v361_v62 = vld [vmem:[%s4918_s24 + $0x1c] sm:$0x3] }
 0x1b0   : > { %v5064_v17 = vpop.eup %4118  ;;  %v2338_v56 = vmul.f32 %v4117_v45, %v4742_v0  ;;  %v1809_v30 = vpop.xlane.xlu0 %1808  ;;  %4124 = vrcp.f32 %v2100_v33 }
 0x1b1   : > { %v2097_v36 = vpop.xlane.xlu1 %2096  ;;  %v5068_v51 = vpop.eup %4120  ;;  %v2401_v38 = vpack.c.bf16 %v2337_v10, %v2337_v10  ;;  %v1923_v12 = vsub.f32 %v4752_v20, %v1809_v30  ;;  %v2176_v29 = vsel %vm1692_vm1, %v5064_v17, 0.0 }
 0x1b2   : > { %4126 = vrcp.f32 %v2097_v36  ;;  %v2402_v50 = vpack.c.bf16 %v2338_v56, %v2338_v56  ;;  %v1417_v20 = vpop.f32.mrf.mxu0  ;;  %v2182_v53 = vsel %vm1692_vm1, %v5068_v51, 0.0 }
 0x1b3   : > { %v2025_v0 = vmul.f32 1.442695, %v1923_v12  ;;  %3968 = vmatmul.msk.bf16.vlgmr.msrb.gmra.mxu0 %vm411_vm0, %v2401_v38  ;;  %v5082_v48 = vpop.eup %4122  ;;  %v359_v38 = vld [vmem:[%s4918_s24 + $0x18] sm:$0x3]  ;;  %v360_v12 = vld [vmem:[%s4918_s24 + $0x1a] sm:$0x3] }
 0x1b4   : > { %2180 = vadd.xlane.f32.xlu0 %v2179_v6  ;;  %3969 = vmatmul.msk.bf16.vlgmr.msrb.gmra.mxu1 %vm411_vm0, %v2402_v50 }
 0x1b5   : > { %2177 = vadd.xlane.f32.xlu2 %v2176_v29  ;;  %4128 = vpow2.f32 %v2025_v0  ;;  %2183 = vadd.xlane.f32.xlu1 %v2182_v53  ;;  %v2694_v29 = vsel %vm2464_vm2, %v359_v38, 0  ;;  %v2713_v0 = vsel %vm2464_vm2, %v360_v12, 0 }
 0x1b6   : > { %v4125_v45 = vpop.eup %4124  ;;  %2703 = vmatpush.bf16.msrb.mxu0 %v2694_v29  ;;  %2722 = vmatpush.bf16.msrb.mxu1 %v2713_v0 }
 0x1b7   : > { %v2340_v33 = vmul.f32 %v4125_v45, %v4756_v23  ;;  %v1806_v56 = vpop.xlane.xlu2 %1805  ;;  %v2185_v23 = vsel %vm1692_vm1, %v5082_v48, 0.0 }
 0x1b8   : > { %v4127_v10 = vpop.eup %4126  ;;  %v1922_v36 = vsub.f32 %v4766_v41, %v1806_v56  ;;  %v1531_v41 = vpop.f32.mrf.mxu2 }
 0x1b9   : > { %v2339_v30 = vmul.f32 %v4127_v10, %v4754_v22  ;;  %v1812_v61 = vpop.xlane.xlu1 %1811  ;;  %v2404_v50 = vpack.c.bf16 %v2340_v33, %v2340_v33  ;;  %v2732_v22 = vsel %vm2464_vm2, %v361_v62, 0 }
 0x1ba   : > { %v1924_v6 = vsub.f32 %v4769_v46, %v1812_v61  ;;  %v2023_v20 = vmul.f32 1.442695, %v1922_v36 }
 0x1bb   : > { %v2403_v59 = vpack.c.bf16 %v2339_v30, %v2339_v30  ;;  %v5096_v53 = vpop.eup %4128  ;;  %v362_v30 = vld [vmem:[%s4918_s24 + $0x1e] sm:$0x3] }
 0x1bc   : > { %v2027_v45 = vmul.f32 1.442695, %v1924_v6  ;;  %2186 = vadd.xlane.f32.xlu0 %v2185_v23  ;;  %4130 = vpow2.f32 %v2023_v20  ;;  %3971 = vmatmul.msk.bf16.vlgmr.msrb.gmra.mxu3 %vm411_vm0, %v2404_v50  ;;  %v2191_v46 = vsel %vm1692_vm1, %v5096_v53, 0.0  ;;  %v2751_v36 = vsel %vm2464_vm2, %v362_v30, 0 }
 0x1bd   : > { %3970 = vmatmul.msk.bf16.vlgmr.msrb.gmra.mxu2 %vm411_vm0, %v2403_v59  ;;  %2192 = vadd.xlane.f32.xlu2 %v2191_v46  ;;  %v5116_v59 = vmul.f32 0.5, %v5054_v4  ;;  %v5119_v20 = vmul.f32 0.5, %v5056_v42 }
 0x1be   : > { %4132 = vpow2.f32 %v2027_v45  ;;  %2741 = vmatpush.bf16.msrb.mxu2 %v2732_v22  ;;  %2760 = vmatpush.bf16.msrb.mxu3 %v2751_v36 }
 0x1bf   : > { %v2109_v10 = vpop.xlane.xlu0 %2108  ;;  %v2106_v33 = vpop.xlane.xlu2 %2105  ;;  %v1852_v4 = vsel %vm1692_vm1, %v5119_v20, -inf  ;;  %v1849_v42 = vsel %vm1692_vm1, %v5116_v59, -inf }
 0x1c0   : > { %4134 = vrcp.f32 %v2109_v10  ;;  %v363_v10 = vld [vmem:[%s4918_s24 + $0x20] sm:$0x3]  ;;  %v5128_v30 = vpop.f32.mrf.mxu1 }
 0x1c1   : > { %4136 = vrcp.f32 %v2106_v33  ;;  %v2103_v56 = vpop.xlane.xlu1 %2102 }
 0x1c2   : > { %4138 = vrcp.f32 %v2103_v56  ;;  %v5104_v61 = vpop.eup %4130 }
 0x1c3   : > { %v2188_v12 = vsel %vm1692_vm1, %v5104_v61, 0.0 }
 0x1c4   : > { %v5106_v38 = vpop.eup %4132  ;;  %2189 = vadd.xlane.f32.xlu1 %v2188_v12  ;;  %v5136_v12 = vmul.f32 0.5, %v5074_v47 }
 0x1c5   : > { %v2194_v62 = vsel %vm1692_vm1, %v5106_v38, 0.0 }
 0x1c6   : > { %v4135_v50 = vpop.eup %4134  ;;  %2195 = vadd.xlane.f32.xlu0 %v2194_v62  ;;  %v364_v62 = vld [vmem:[%s4918_s24 + $0x22] sm:$0x3] }
 0x1c7   : > { %v4137_v6 = vpop.eup %4136  ;;  %v2343_v29 = vmul.f32 %v4135_v50, %v4786_v28  ;;  %v5113_v0 = vpop.xlane.xlu0 %1823 }
 0x1c8   : > { %v4139_v23 = vpop.eup %4138  ;;  %v2342_v22 = vmul.f32 %v4137_v6, %v4784_v21  ;;  %v1821_v41 = vpop.xlane.xlu2 %1820 }
 0x1c9   : > { %v2341_v45 = vmul.f32 %v4139_v23, %v4782_v13  ;;  %v2112_v46 = vpop.xlane.xlu1 %2111  ;;  %v2407_v28 = vpack.c.bf16 %v2343_v29, %v2343_v29  ;;  %v1927_v21 = vsub.f32 %v4801_v54, %v1821_v41  ;;  %v2770_v13 = vsel %vm2464_vm2, %v363_v10, 0  ;;  %v365_v41 = vld [vmem:[%s4918_s24 + $0x24] sm:$0x3] }
 0x1ca   : > { %v2406_v33 = vpack.c.bf16 %v2342_v22, %v2342_v22  ;;  %4140 = vrcp.f32 %v2112_v46  ;;  %v2789_v29 = vsel %vm2464_vm2, %v364_v62, 0  ;;  %v2808_v46 = vsel %vm2464_vm2, %v365_v41, 0 }
 0x1cb   : > { %v2405_v56 = vpack.c.bf16 %v2341_v45, %v2341_v45  ;;  %v2033_v54 = vmul.f32 1.442695, %v1927_v21  ;;  %v366_v45 = vld [vmem:[%s4918_s24 + $0x26] sm:$0x3]  ;;  %v1867_v10 = vsel %vm1692_vm1, %v5136_v12, -inf }
 0x1cc   : > { %3973 = vmatmul.msk.bf16.vlgmr.msra.gmra.mxu1 %vm411_vm0, %v2406_v33  ;;  %1853 = vmax.xlane.f32.xlu1 %v1852_v4  ;;  %v2827_v33 = vsel %vm2464_vm2, %v366_v45, 0 }
 0x1cd   : > { %3972 = vmatmul.msk.bf16.vlgmr.msra.gmra.mxu0 %vm411_vm0, %v2405_v56  ;;  %3974 = vmatmul.msk.bf16.vlgmr.msra.gmra.mxu2 %vm411_vm0, %v2407_v28  ;;  %v1512_v28 = vpop.f32.mrf.mxu1 }
 0x1ce   : > { %1850 = vmax.xlane.f32.xlu0 %v1849_v42  ;;  %2779 = vmatpush.bf16.msra.mxu0 %v2770_v13 }
 0x1cf   : > { %v2115_v36 = vpop.xlane.xlu0 %2114  ;;  %2798 = vmatpush.bf16.msra.mxu1 %v2789_v29  ;;  %2817 = vmatpush.bf16.msra.mxu2 %v2808_v46 }
 0x1d0   : > { %v4141_v50 = vpop.eup %4140  ;;  %4142 = vrcp.f32 %v2115_v36  ;;  %v2121_v6 = vpop.xlane.xlu2 %2120 }
 0x1d1   : > { %v2344_v23 = vmul.f32 %v4141_v50, %v4811_v14  ;;  %4144 = vrcp.f32 %v2121_v6  ;;  %v2118_v22 = vpop.xlane.xlu1 %2117  ;;  %v5159_v46 = vpop.f32.mrf.mxu2 }
 0x1d2   : > { %4146 = vrcp.f32 %v2118_v22 }
 0x1d3   : > { %v2408_v47 = vpack.c.bf16 %v2344_v23, %v2344_v23  ;;  %4148 = vpow2.f32 %v2033_v54  ;;  %v5151_v6 = vpop.f32.mrf.mxu3  ;;  %v367_v54 = vld [vmem:[%s4918_s24 + $0x28] sm:$0x3] }
 0x1d4   : > { %1868 = vmax.xlane.f32.xlu1 %v1867_v10 }
 0x1d5   : > { %3975 = vmatmul.msk.bf16.vlgmr.msra.gmra.mxu3 %vm411_vm0, %v2408_v47  ;;  %v2846_v47 = vsel %vm2464_vm2, %v367_v54, 0 }
 0x1d6   : > { %v4143_v14 = vpop.eup %4142  ;;  %2836 = vmatpush.bf16.msra.mxu3 %v2827_v33 }
 0x1d7   : > { %v4145_v56 = vpop.eup %4144  ;;  %v2345_v4 = vmul.f32 %v4143_v14, %v4829_v25  ;;  %v2124_v42 = vpop.xlane.xlu0 %2123 }
 0x1d8   : > { %v4147_v21 = vpop.eup %4146  ;;  %v2347_v13 = vmul.f32 %v4145_v56, %v4831_v19  ;;  %4150 = vrcp.f32 %v2124_v42  ;;  %v2127_v36 = vpop.xlane.xlu2 %2126  ;;  %v1928_v56 = vsub.f32 %v4795_v44, %v5113_v0 }
 0x1d9   : > { %v2346_v62 = vmul.f32 %v4147_v21, %v4833_v3  ;;  %v1818_v50 = vpop.xlane.xlu1 %1817  ;;  %v5154_v29 = vpop.eup %4148  ;;  %v2409_v41 = vpack.c.bf16 %v2345_v4, %v2345_v4  ;;  %4152 = vrcp.f32 %v2127_v36  ;;  %v368_v21 = vld [vmem:[%s4918_s24 + $0x2a] sm:$0x3]  ;;  %v370_v36 = vld [vmem:[%s4918_s24 + $0x2e] sm:$0x3] }
 0x1da   : > { %v2411_v23 = vpack.c.bf16 %v2347_v13, %v2347_v13  ;;  %v1926_v22 = vsub.f32 %v4848_v40, %v1818_v50  ;;  %v5157_v25 = vpop.f32.mrf.mxu0  ;;  %v2203_v3 = vsel %vm1692_vm1, %v5154_v29, 0.0  ;;  %v369_v13 = vld [vmem:[%s4918_s24 + $0x2c] sm:$0x3]  ;;  %v2035_v0 = vmul.f32 1.442695, %v1928_v56 }
 0x1db   : > { %v2410_v45 = vpack.c.bf16 %v2346_v62, %v2346_v62  ;;  %v1550_v42 = vpop.f32.mrf.mxu3 }
 0x1dc   : > { %v2031_v19 = vmul.f32 1.442695, %v1926_v22  ;;  %2204 = vadd.xlane.f32.xlu1 %v2203_v3  ;;  %v2865_v22 = vsel %vm2464_vm2, %v368_v21, 0 }
 0x1dd   : > { %3976 = vmatmul.msk.bf16.vlgmr.msrb.gmra.mxu0 %vm411_vm0, %v2409_v41  ;;  %3977 = vmatmul.msk.bf16.vlgmr.msrb.gmra.mxu1 %vm411_vm0, %v2410_v45  ;;  %v2903_v41 = vsel %vm2464_vm2, %v370_v36, 0 }
 0x1de   : > { %v4151_v40 = vpop.eup %4150  ;;  %4154 = vpow2.f32 %v2031_v19  ;;  %3978 = vmatmul.msk.bf16.vlgmr.msrb.gmra.mxu2 %vm411_vm0, %v2411_v23  ;;  %2855 = vmatpush.bf16.msrb.mxu0 %v2846_v47 }
 0x1df   : > { %v2348_v10 = vmul.f32 %v4151_v40, %v4851_v8  ;;  %v1815_v33 = vpop.xlane.xlu0 %1814  ;;  %v4153_v50 = vpop.eup %4152  ;;  %v2884_v8 = vsel %vm2464_vm2, %v369_v13, 0  ;;  %2874 = vmatpush.bf16.msrb.mxu1 %v2865_v22  ;;  %v5185_v40 = vmul.f32 0.5, %v5128_v30 }
 0x1e0   : > { %v1925_v28 = vsub.f32 %v4864_v9, %v1815_v33  ;;  %v2136_v14 = vpop.xlane.xlu2 %2135  ;;  %v1607_v9 = vpop.f32.mrf.mxu2  ;;  %2893 = vmatpush.bf16.msrb.mxu2 %v2884_v8  ;;  %v2349_v47 = vmul.f32 %v4153_v50, %v4853_v58 }
 0x1e1   : > { %v1833_v4 = vpop.xlane.xlu1 %1832  ;;  %v2412_v54 = vpack.c.bf16 %v2348_v10, %v2348_v10  ;;  %v1864_v58 = vsel %vm1692_vm1, %v5185_v40, -inf }
 0x1e2   : > { %v2029_v62 = vmul.f32 1.442695, %v1925_v28  ;;  %v1493_v23 = vpop.f32.mrf.mxu0  ;;  %v1931_v44 = vsub.f32 %v4870_v43, %v1833_v4  ;;  %v371_v28 = vld [vmem:[%s4918_s24 + $0x30] sm:$0x3]  ;;  %v2413_v4 = vpack.c.bf16 %v2349_v47, %v2349_v47  ;;  %v373_v47 = vld [vmem:[%s4918_s24 + $0x34] sm:$0x3] }
 0x1e3   : > { %v2922_v30 = vsel %vm2464_vm2, %v371_v28, 0 }
 0x1e4   : > { %v5177_v45 = vpop.eup %4154  ;;  %4156 = vpow2.f32 %v2029_v62  ;;  %v2041_v10 = vmul.f32 1.442695, %v1931_v44  ;;  %v5197_v13 = vpop.f32.mrf.mxu3 }
 0x1e5   : > { %3979 = vmatmul.msk.bf16.vlgmr.msrb.gmra.mxu3 %vm411_vm0, %v2412_v54  ;;  %v2200_v19 = vsel %vm1692_vm1, %v5177_v45, 0.0  ;;  %4158 = vrcp.f32 %v2136_v14 }
 0x1e6   : > { %2201 = vadd.xlane.f32.xlu0 %v2200_v19  ;;  %2912 = vmatpush.bf16.msrb.mxu3 %v2903_v41  ;;  %v372_v19 = vld [vmem:[%s4918_s24 + $0x32] sm:$0x3] }
 0x1e7   : > { %v2130_v3 = vpop.xlane.xlu0 %2129 }
 0x1e8   : > { %4160 = vrcp.f32 %v2130_v3  ;;  %v1836_v43 = vpop.xlane.xlu2 %1835  ;;  %v374_v3 = vld [vmem:[%s4918_s24 + $0x36] sm:$0x3] }
 0x1e9   : > { %4162 = vpow2.f32 %v2035_v0  ;;  %v2133_v33 = vpop.xlane.xlu1 %2132 }
 0x1ea   : > { %v5188_v56 = vpop.eup %4156  ;;  %4164 = vrcp.f32 %v2133_v33  ;;  %v5194_v42 = vpop.f32.mrf.mxu0 }
 0x1eb   : > { %v2197_v14 = vsel %vm1692_vm1, %v5188_v56, 0.0  ;;  %v4159_v21 = vpop.eup %4158  ;;  %4166 = vpow2.f32 %v2041_v10 }
 0x1ec   : > { %2198 = vadd.xlane.f32.xlu2 %v2197_v14  ;;  %v2352_v50 = vmul.f32 %v4159_v21, %v4873_v24  ;;  %v5215_v14 = vpop.f32.mrf.mxu1  ;;  %v1626_v21 = vpop.f32.mrf.mxu3 }
 0x1ed   : > { %3980 = vmatmul.msk.bf16.vlgmr.msra.gmra.mxu0 %vm411_vm0, %v2413_v4 }
 0x1ee   : > { %v4161_v36 = vpop.eup %4160  ;;  %1865 = vmax.xlane.f32.xlu0 %v1864_v58  ;;  %2931 = vmatpush.bf16.msra.mxu0 %v2922_v30  ;;  %v2416_v33 = vpack.c.bf16 %v2352_v50, %v2352_v50  ;;  %v1932_v58 = vsub.f32 %v4885_v60, %v1836_v43  ;;  %v2979_v30 = vsel %vm2464_vm2, %v374_v3, 0  ;;  %v5225_v50 = vmul.f32 0.5, %v5151_v6  ;;  %v375_v6 = vld [vmem:[%s4918_s24 + $0x38] sm:$0x3] }
 0x1ef   : > { %v5200_v62 = vpop.eup %4162  ;;  %v2350_v54 = vmul.f32 %v4161_v36, %v4889_v7  ;;  %v1830_v23 = vpop.xlane.xlu0 %1829  ;;  %v2941_v7 = vsel %vm2464_vm2, %v372_v19, 0  ;;  %v5228_v43 = vmul.f32 0.5, %v5159_v46 }
 0x1f0   : > { %v4165_v22 = vpop.eup %4164  ;;  %v1827_v8 = vpop.xlane.xlu2 %1826  ;;  %v2206_v24 = vsel %vm1692_vm1, %v5200_v62, 0.0 }
 0x1f1   : > { %v2414_v41 = vpack.c.bf16 %v2350_v54, %v2350_v54  ;;  %v2351_v9 = vmul.f32 %v4165_v22, %v4893_v26  ;;  %v2139_v44 = vpop.xlane.xlu1 %2138  ;;  %v1929_v0 = vsub.f32 %v4911_v52, %v1827_v8  ;;  %v5209_v10 = vpop.eup %4166  ;;  %v2960_v52 = vsel %vm2464_vm2, %v373_v47, 0 }
 0x1f2   : > { %4168 = vrcp.f32 %v2139_v44  ;;  %v1569_v26 = vpop.f32.mrf.mxu0  ;;  %v2215_v36 = vsel %vm1692_vm1, %v5209_v10, 0.0  ;;  %v2043_v22 = vmul.f32 1.442695, %v1932_v58  ;;  %v1870_v44 = vsel %vm1692_vm1, %v5225_v50, -inf }
 0x1f3   : > { %v2415_v28 = vpack.c.bf16 %v2351_v9, %v2351_v9  ;;  %v2037_v4 = vmul.f32 1.442695, %v1929_v0  ;;  %3981 = vmatmul.msk.bf16.vlgmr.msra.gmra.mxu1 %vm411_vm0, %v2414_v41  ;;  %v1930_v0 = vsub.f32 %v4905_v34, %v1830_v23  ;;  %v1879_v47 = vsel %vm1692_vm1, %v5228_v43, -inf }
 0x1f4   : > { %2207 = vadd.xlane.f32.xlu2 %v2206_v24  ;;  %2950 = vmatpush.bf16.msra.mxu1 %v2941_v7  ;;  %v1588_v3 = vpop.f32.mrf.mxu1  ;;  %v2998_v24 = vsel %vm2464_vm2, %v375_v6, 0 }
 0x1f5   : > { %4170 = vpow2.f32 %v2037_v4  ;;  %3982 = vmatmul.msk.bf16.vlgmr.msra.gmra.mxu2 %vm411_vm0, %v2415_v28  ;;  %3983 = vmatmul.msk.bf16.vlgmr.msra.gmra.mxu3 %vm411_vm0, %v2416_v33  ;;  %v2039_v23 = vmul.f32 1.442695, %v1930_v0  ;;  %v5654_v0 = vld [vmem:[#allocation2_spill] sm:$0xff]  ;;  %v5266_v3 = vmul.f32 0.5, %v5197_v13 }
 0x1f6   : > { %2216 = vadd.xlane.f32.xlu0 %v2215_v36  ;;  %2969 = vmatpush.bf16.msra.mxu2 %v2960_v52  ;;  %v376_v36 = vld [vmem:[%s4918_s24 + $0x3a] sm:$0x3] }
 0x1f7   : > { %v2145_v60 = vpop.xlane.xlu0 %2144  ;;  %2988 = vmatpush.bf16.msra.mxu3 %v2979_v30 }
 0x1f8   : > { %v4169_v54 = vpop.eup %4168  ;;  %4172 = vrcp.f32 %v2145_v60  ;;  %v2142_v8 = vpop.xlane.xlu2 %2141  ;;  %v377_v60 = vld [vmem:[%s4918_s24 + $0x3c] sm:$0x3] }
 0x1f9   : > { %v2353_v41 = vmul.f32 %v4169_v54, %v4923_v57  ;;  %v2148_v9 = vpop.xlane.xlu1 %2147  ;;  %4174 = vrcp.f32 %v2142_v8  ;;  %v5241_v57 = vmul.f32 0.5, %v5157_v25  ;;  %v378_v54 = vld [vmem:[%s4918_s24 + $0x3e] sm:$0x3] }
 0x1fa   : > { %4176 = vrcp.f32 %v2148_v9  ;;  %v3017_v9 = vsel %vm2464_vm2, %v376_v36, 0  ;;  %v5656_v36 = vld [vmem:[#allocation3_spill] sm:$0xff] }
 0x1fb   : > { %v5235_v19 = vpop.eup %4170  ;;  %v2417_v46 = vpack.c.bf16 %v2353_v41, %v2353_v41  ;;  %4178 = vpow2.f32 %v2043_v22  ;;  %v1861_v58 = vsel %vm1692_vm1, %v5241_v57, -inf }
 0x1fc   : > { %1871 = vmax.xlane.f32.xlu2 %v1870_v44  ;;  %v2209_v7 = vsel %vm1692_vm1, %v5235_v19, 0.0  ;;  %v3055_v44 = vsel %vm2464_vm2, %v378_v54, 0 }
 0x1fd   : > { %3984 = vmatmul.msk.bf16.vlgmr.msrb.gmra.mxu0 %vm411_vm0, %v2417_v46  ;;  %2210 = vadd.xlane.f32.xlu1 %v2209_v7 }
 0x1fe   : > { %v4173_v34 = vpop.eup %4172  ;;  %1880 = vmax.xlane.f32.xlu0 %v1879_v47  ;;  %3007 = vmatpush.bf16.msrb.mxu0 %v2998_v24 }
 0x1ff   : > { %v4175_v33 = vpop.eup %4174  ;;  %v2355_v28 = vmul.f32 %v4173_v34, %v4935_v63  ;;  %v2151_v4 = vpop.xlane.xlu0 %2150 }
 0x200   : > { %v4177_v25 = vpop.eup %4176  ;;  %v2354_v26 = vmul.f32 %v4175_v33, %v4937_v2  ;;  %4180 = vrcp.f32 %v2151_v4  ;;  %v2157_v52 = vpop.xlane.xlu2 %2156  ;;  %v3036_v2 = vsel %vm2464_vm2, %v377_v60, 0 }
 0x201   : > { %v2356_v30 = vmul.f32 %v4177_v25, %v4941_v27  ;;  %v2154_v21 = vpop.xlane.xlu1 %2153  ;;  %v5254_v22 = vpop.eup %4178  ;;  %4182 = vpow2.f32 %v2039_v23  ;;  %v2419_v63 = vpack.c.bf16 %v2355_v28, %v2355_v28  ;;  %v379_v23 = vld [vmem:[%s4918_s24 + $0x40] sm:$0x3] }
 0x202   : > { %v2418_v8 = vpack.c.bf16 %v2354_v26, %v2354_v26  ;;  %4184 = vrcp.f32 %v2154_v21  ;;  %v2218_v27 = vsel %vm1692_vm1, %v5254_v22, 0.0  ;;  %v1882_v26 = vsel %vm1692_vm1, %v5266_v3, -inf }
 0x203   : > { %v2420_v41 = vpack.c.bf16 %v2356_v30, %v2356_v30  ;;  %4186 = vrcp.f32 %v2157_v52  ;;  %v3074_v13 = vsel %vm2464_vm2, %v379_v23, 0 }
 0x204   : > { %1862 = vmax.xlane.f32.xlu2 %v1861_v58  ;;  %3985 = vmatmul.msk.bf16.vlgmr.msrb.gmra.mxu1 %vm411_vm0, %v2418_v8  ;;  %v5282_v8 = vmul.f32 0.5, %v5194_v42 }
 0x205   : > { %3986 = vmatmul.msk.bf16.vlgmr.msrb.gmra.mxu2 %vm411_vm0, %v2419_v63  ;;  %3987 = vmatmul.msk.bf16.vlgmr.msrb.gmra.mxu3 %vm411_vm0, %v2420_v41 }
 0x206   : > { %v4181_v6 = vpop.eup %4180  ;;  %2219 = vadd.xlane.f32.xlu1 %v2218_v27  ;;  %3026 = vmatpush.bf16.msrb.mxu1 %v3017_v9  ;;  %v381_v27 = vld [vmem:[%s4918_s24 + $0x44] sm:$0x3] }
 0x207   : > { %v2357_v46 = vmul.f32 %v4181_v6, %v5654_v0  ;;  %v2160_v47 = vpop.xlane.xlu0 %2159  ;;  %3045 = vmatpush.bf16.msrb.mxu2 %v3036_v2  ;;  %3064 = vmatpush.bf16.msrb.mxu3 %v3055_v44  ;;  %v5268_v24 = vpop.eup %4182  ;;  %v380_v44 = vld [vmem:[%s4918_s24 + $0x42] sm:$0x3] }
 0x208   : > { %4188 = vrcp.f32 %v2160_v47  ;;  %v2163_v7 = vpop.xlane.xlu2 %2162  ;;  %v4185_v28 = vpop.eup %4184  ;;  %v2212_v25 = vsel %vm1692_vm1, %v5268_v24, 0.0  ;;  %v382_v47 = vld [vmem:[%s4918_s24 + $0x46] sm:$0x3] }
 0x209   : > { %v1848_v34 = vpop.xlane.xlu1 %1847  ;;  %v2421_v4 = vpack.c.bf16 %v2357_v46, %v2357_v46  ;;  %v4187_v52 = vpop.eup %4186  ;;  %4190 = vrcp.f32 %v2163_v7 }
 0x20a   : > { %v1936_v33 = vsub.f32 %v4975_v15, %v1848_v34  ;;  %v5655_v15 = vld [vmem:[#allocation4_spill] sm:$0xff]  ;;  %v2359_v60 = vmul.f32 %v4187_v52, %v5656_v36 }
 0x20b   : > { %v2358_v21 = vmul.f32 %v4185_v28, %v5655_v15  ;;  %v3112_v28 = vsel %vm2464_vm2, %v381_v27, 0 }
 0x20c   : > { %v2051_v58 = vmul.f32 1.442695, %v1936_v33  ;;  %2213 = vadd.xlane.f32.xlu2 %v2212_v25  ;;  %v2423_v34 = vpack.c.bf16 %v2359_v60, %v2359_v60 }
 0x20d   : > { %3988 = vmatmul.msk.bf16.vlgmr.msra.gmra.mxu0 %vm411_vm0, %v2421_v4  ;;  %v2422_v6 = vpack.c.bf16 %v2358_v21, %v2358_v21  ;;  %v3131_v4 = vsel %vm2464_vm2, %v382_v47, 0 }
 0x20e   : > { %v4189_v30 = vpop.eup %4188  ;;  %4192 = vpow2.f32 %v2051_v58  ;;  %1883 = vmax.xlane.f32.xlu1 %v1882_v26  ;;  %3083 = vmatpush.bf16.msra.mxu0 %v3074_v13 }
 0x20f   : > { %v2360_v54 = vmul.f32 %v4189_v30, %v4977_v55  ;;  %v1845_v63 = vpop.xlane.xlu0 %1844  ;;  %v4191_v7 = vpop.eup %4190  ;;  %v1873_v55 = vsel %vm1692_vm1, %v5282_v8, -inf  ;;  %v383_v30 = vld [vmem:[%s4918_s24 + $0x48] sm:$0x3] }
 0x210   : > { %v1935_v41 = vsub.f32 %v4994_v16, %v1845_v63  ;;  %v2172_v9 = vpop.xlane.xlu2 %2171  ;;  %v3093_v16 = vsel %vm2464_vm2, %v380_v44, 0  ;;  %v2361_v25 = vmul.f32 %v4191_v7, %v4980_v31  ;;  %v3150_v63 = vsel %vm2464_vm2, %v383_v30, 0 }
 0x211   : > { %v1839_v2 = vpop.xlane.xlu1 %1838  ;;  %v2424_v23 = vpack.c.bf16 %v2360_v54, %v2360_v54 }
 0x212   : > { %v2049_v0 = vmul.f32 1.442695, %v1935_v41  ;;  %v1933_v46 = vsub.f32 %v4997_v5, %v1839_v2  ;;  %v2425_v21 = vpack.c.bf16 %v2361_v25, %v2361_v25 }
 0x214   : > { %v5291_v42 = vpop.eup %4192  ;;  %4194 = vpow2.f32 %v2049_v0  ;;  %v2045_v33 = vmul.f32 1.442695, %v1933_v46  ;;  %3989 = vmatmul.msk.bf16.vlgmr.msra.gmra.mxu1 %vm411_vm0, %v2422_v6 }
 0x215   : > { %4196 = vrcp.f32 %v2172_v9  ;;  %3990 = vmatmul.msk.bf16.vlgmr.msra.gmra.mxu2 %vm411_vm0, %v2423_v34  ;;  %3991 = vmatmul.msk.bf16.vlgmr.msra.gmra.mxu3 %vm411_vm0, %v2424_v23  ;;  %v2230_v5 = vsel %vm1692_vm1, %v5291_v42, 0.0  ;;  %v5318_v9 = vmul.f32 0.5, %v5215_v14 }
 0x216   : > { %4198 = vpow2.f32 %v2045_v33  ;;  %2231 = vadd.xlane.f32.xlu0 %v2230_v5  ;;  %1874 = vmax.xlane.f32.xlu1 %v1873_v55  ;;  %v384_v33 = vld [vmem:[%s4918_s24 + $0x4a] sm:$0x3] }
 0x217   : > { %v2166_v26 = vpop.xlane.xlu0 %2165  ;;  %3102 = vmatpush.bf16.msra.mxu1 %v3093_v16  ;;  %3121 = vmatpush.bf16.msra.mxu2 %v3112_v28  ;;  %v1876_v7 = vsel %vm1692_vm1, %v5318_v9, -inf  ;;  %v385_v16 = vld [vmem:[%s4918_s24 + $0x4c] sm:$0x3] }
 0x218   : > { %4200 = vrcp.f32 %v2166_v26  ;;  %v1842_v13 = vpop.xlane.xlu2 %1841  ;;  %3140 = vmatpush.bf16.msra.mxu3 %v3131_v4  ;;  %v2477_v31 = vpop.f32.mrf.mxu0 }
 0x219   : > { %v1934_v52 = vsub.f32 %v5017_v39, %v1842_v13  ;;  %v2169_v58 = vpop.xlane.xlu1 %2168  ;;  %v3678_v54 = vpack.c.bf16 %v2477_v31, %v2477_v31 }
 0x21a   : > { %v5304_v15 = vpop.eup %4194  ;;  %4202 = vrcp.f32 %v2169_v58  ;;  %v3188_v58 = vsel %vm2464_vm2, %v385_v16, 0 }
 0x21b   : > { %v4197_v36 = vpop.eup %4196  ;;  %v2047_v60 = vmul.f32 1.442695, %v1934_v52  ;;  %v2227_v39 = vsel %vm1692_vm1, %v5304_v15, 0.0  ;;  %3743 = vst.msk [vmem:[%s5310_s27] sm:$0x3] %vm3742_vm3, %v3678_v54 }
 0x21c   : > { %v5315_v41 = vpop.eup %4198  ;;  %2228 = vadd.xlane.f32.xlu2 %v2227_v39  ;;  %v2364_v27 = vmul.f32 %v4197_v36, %v4999_v1  ;;  %v386_v1 = vld [vmem:[%s4918_s24 + $0x4e] sm:$0x3] }
 0x21d   : > { %4204 = vpow2.f32 %v2047_v60  ;;  %3992 = vmatmul.msk.bf16.vlgmr.msrb.gmra.mxu0 %vm411_vm0, %v2425_v21  ;;  %v2221_v2 = vsel %vm1692_vm1, %v5315_v41, 0.0  ;;  %v3207_v30 = vsel %vm2464_vm2, %v386_v1, 0 }
 0x21e   : > { %v4201_v44 = vpop.eup %4200  ;;  %2222 = vadd.xlane.f32.xlu0 %v2221_v2  ;;  %3159 = vmatpush.bf16.msrb.mxu0 %v3150_v63  ;;  %v2428_v28 = vpack.c.bf16 %v2364_v27, %v2364_v27 }
 0x21f   : > { %v2362_v14 = vmul.f32 %v4201_v44, %v5014_v32  ;;  %v1860_v6 = vpop.xlane.xlu0 %1859 }
 0x220   : > { %v4203_v0 = vpop.eup %4202  ;;  %v1940_v46 = vsub.f32 %v5030_v35, %v1860_v6  ;;  %v1857_v47 = vpop.xlane.xlu2 %1856 }
 0x221   : > { %v2363_v34 = vmul.f32 %v4203_v0, %v5021_v11  ;;  %v1939_v23 = vsub.f32 %v5035_v18, %v1857_v47  ;;  %v2175_v55 = vpop.xlane.xlu1 %2174  ;;  %v2426_v5 = vpack.c.bf16 %v2362_v14, %v2362_v14  ;;  %v2479_v32 = vpop.f32.mrf.mxu0  ;;  %v3169_v11 = vsel %vm2464_vm2, %v384_v33, 0 }
 0x222   : > { %v2059_v4 = vmul.f32 1.442695, %v1940_v46  ;;  %4206 = vrcp.f32 %v2175_v55  ;;  %v2496_v25 = vpop.f32.mrf.mxu1 }
 0x223   : > { %v5335_v35 = vpop.eup %4204  ;;  %v2427_v26 = vpack.c.bf16 %v2363_v34, %v2363_v34  ;;  %v2057_v13 = vmul.f32 1.442695, %v1939_v23  ;;  %v3679_v52 = vpack.c.bf16 %v2496_v25, %v2496_v25 }
 0x224   : > { %4208 = vpow2.f32 %v2059_v4  ;;  %1877 = vmax.xlane.f32.xlu2 %v1876_v7  ;;  %3993 = vmatmul.msk.bf16.vlgmr.msrb.gmra.mxu1 %vm411_vm0, %v2426_v5  ;;  %v2224_v18 = vsel %vm1692_vm1, %v5335_v35, 0.0 }
 0x225   : > { %4210 = vpow2.f32 %v2057_v13  ;;  %3744 = vst.msk [vmem:[%s5310_s27 + $0x2] sm:$0x3] %vm3742_vm3, %v3679_v52  ;;  %3994 = vmatmul.msk.bf16.vlgmr.msrb.gmra.mxu2 %vm411_vm0, %v2427_v26  ;;  %3995 = vmatmul.msk.bf16.vlgmr.msrb.gmra.mxu3 %vm411_vm0, %v2428_v28 }
 0x226   : > { %2225 = vadd.xlane.f32.xlu1 %v2224_v18  ;;  %3178 = vmatpush.bf16.msrb.mxu1 %v3169_v11  ;;  %v2515_v31 = vpop.f32.mrf.mxu2 }
 0x227   : > { %v2181_v21 = vpop.xlane.xlu0 %2180  ;;  %3197 = vmatpush.bf16.msrb.mxu2 %v3188_v58  ;;  %3216 = vmatpush.bf16.msrb.mxu3 %v3207_v30  ;;  %v3680_v60 = vpack.c.bf16 %v2515_v31, %v2515_v31  ;;  %v389_v30 = vld [vmem:[%s4918_s24 + $0x54] sm:$0x3] }
 0x228   : > { %v4207_v36 = vpop.eup %4206  ;;  %4212 = vrcp.f32 %v2181_v21  ;;  %v2178_v54 = vpop.xlane.xlu2 %2177  ;;  %v3264_v31 = vsel %vm2464_vm2, %v389_v30, 0 }
 0x229   : > { %v2365_v39 = vmul.f32 %v4207_v36, %v5048_v37  ;;  %4214 = vrcp.f32 %v2178_v54  ;;  %v2184_v63 = vpop.xlane.xlu1 %2183  ;;  %3745 = vst.msk [vmem:[%s5310_s27 + $0x4] sm:$0x3] %vm3742_vm3, %v3680_v60 }
 0x22a   : > { %v5348_v2 = vpop.eup %4208  ;;  %4216 = vrcp.f32 %v2184_v63  ;;  %v2498_v44 = vpop.f32.mrf.mxu1 }
 0x22b   : > { %v5352_v27 = vpop.eup %4210  ;;  %v2429_v14 = vpack.c.bf16 %v2365_v39, %v2365_v39  ;;  %v2242_v6 = vsel %vm1692_vm1, %v5348_v2, 0.0 }
 0x22c   : > { %2243 = vadd.xlane.f32.xlu0 %v2242_v6  ;;  %v2239_v0 = vsel %vm1692_vm1, %v5352_v27, 0.0 }
 0x22d   : > { %3996 = vmatmul.msk.bf16.vlgmr.msra.gmra.mxu0 %vm411_vm0, %v2429_v14  ;;  %2240 = vadd.xlane.f32.xlu2 %v2239_v0 }
 0x22e   : > { %v4213_v37 = vpop.eup %4212  ;;  %v2517_v34 = vpop.f32.mrf.mxu2 }
 0x22f   : > { %v4215_v46 = vpop.eup %4214  ;;  %v2367_v47 = vmul.f32 %v4213_v37, %v5061_v49  ;;  %v2187_v7 = vpop.xlane.xlu0 %2186 }
 0x230   : > { %v4217_v23 = vpop.eup %4216  ;;  %v2366_v55 = vmul.f32 %v4215_v46, %v5064_v17  ;;  %4218 = vrcp.f32 %v2187_v7  ;;  %v2534_v33 = vpop.f32.mrf.mxu3  ;;  %v388_v7 = vld [vmem:[%s4918_s24 + $0x52] sm:$0x3] }
 0x231   : > { %v2368_v16 = vmul.f32 %v4217_v23, %v5068_v51  ;;  %v3681_v1 = vpack.c.bf16 %v2534_v33, %v2534_v33  ;;  %v2553_v28 = vpop.f32.mrf.mxu0  ;;  %v2431_v25 = vpack.c.bf16 %v2367_v47, %v2367_v47  ;;  %v2193_v49 = vpop.xlane.xlu2 %2192 }
 0x232   : > { %v2430_v5 = vpack.c.bf16 %v2366_v55, %v2366_v55  ;;  %v3682_v4 = vpack.c.bf16 %v2553_v28, %v2553_v28  ;;  %v2572_v32 = vpop.f32.mrf.mxu1  ;;  %4220 = vrcp.f32 %v2193_v49  ;;  %v3245_v55 = vsel %vm2464_vm2, %v388_v7, 0 }
 0x233   : > { %v2432_v26 = vpack.c.bf16 %v2368_v16, %v2368_v16  ;;  %3746 = vst.msk [vmem:[%s5310_s27 + $0x6] sm:$0x3] %vm3742_vm3, %v3681_v1  ;;  %v3683_v13 = vpack.c.bf16 %v2572_v32, %v2572_v32 }
 0x234   : > { %3747 = vst.msk [vmem:[%s5310_s27 + $0x8] sm:$0x3] %vm3742_vm3, %v3682_v4  ;;  %3997 = vmatmul.msk.bf16.vlgmr.msra.gmra.mxu1 %vm411_vm0, %v2430_v5 }
 0x235   : > { %3748 = vst.msk [vmem:[%s5310_s27 + $0xa] sm:$0x3] %vm3742_vm3, %v3683_v13  ;;  %3998 = vmatmul.msk.bf16.vlgmr.msra.gmra.mxu2 %vm411_vm0, %v2431_v25  ;;  %3999 = vmatmul.msk.bf16.vlgmr.msra.gmra.mxu3 %vm411_vm0, %v2432_v26 }
 0x236   : > { %v4219_v17 = vpop.eup %4218  ;;  %3273 = vmatpush.bf16.msra.mxu2 %v3264_v31  ;;  %3254 = vmatpush.bf16.msra.mxu1 %v3245_v55 }
 0x237   : > { %v2369_v51 = vmul.f32 %v4219_v17, %v5082_v48  ;;  %v2190_v11 = vpop.xlane.xlu1 %2189 }
 0x238   : > { %v2536_v52 = vpop.f32.mrf.mxu3  ;;  %4222 = vrcp.f32 %v2190_v11  ;;  %v4221_v60 = vpop.eup %4220  ;;  %v390_v11 = vld [vmem:[%s4918_s24 + $0x56] sm:$0x3] }
 0x239   : > { %v2196_v18 = vpop.xlane.xlu0 %2195  ;;  %v2555_v58 = vpop.f32.mrf.mxu0  ;;  %v2433_v36 = vpack.c.bf16 %v2369_v51, %v2369_v51  ;;  %v2371_v39 = vmul.f32 %v4221_v60, %v5096_v53 }
 0x23a   : > { %4224 = vrcp.f32 %v2196_v18  ;;  %v2574_v21 = vpop.f32.mrf.mxu1  ;;  %v3283_v58 = vsel %vm2464_vm2, %v390_v11, 0 }
 0x23b   : > { %v2435_v33 = vpack.c.bf16 %v2371_v39, %v2371_v39  ;;  %3292 = vmatpush.bf16.msra.mxu3 %v3283_v58 }
 0x23d   : > { %4000 = vmatmul.msk.bf16.vlgmr.msrb.gmra.mxu0 %vm411_vm0, %v2433_v36  ;;  %v393_v36 = vld [vmem:[%s4918_s24 + $0x5c] sm:$0x3] }
 0x23e   : > { %v4223_v54 = vpop.eup %4222 }
 0x23f   : > { %v2370_v63 = vmul.f32 %v4223_v54, %v5104_v61  ;;  %v1854_v46 = vpop.xlane.xlu1 %1853  ;;  %v3340_v54 = vsel %vm2464_vm2, %v393_v36, 0 }
 0x240   : > { %v4225_v48 = vpop.eup %4224  ;;  %v2591_v44 = vpop.f32.mrf.mxu2  ;;  %v1938_v23 = vsub.f32 %v5119_v20, %v1854_v46  ;;  %v391_v46 = vld [vmem:[%s4918_s24 + $0x58] sm:$0x3] }
 0x241   : > { %v2610_v14 = vpop.f32.mrf.mxu3  ;;  %v2372_v6 = vmul.f32 %v4225_v48, %v5106_v38  ;;  %v3684_v0 = vpack.c.bf16 %v2591_v44, %v2591_v44  ;;  %v1851_v47 = vpop.xlane.xlu0 %1850  ;;  %v2434_v34 = vpack.c.bf16 %v2370_v63, %v2370_v63 }
 0x242   : > { %v3685_v37 = vpack.c.bf16 %v2610_v14, %v2610_v14  ;;  %v1937_v53 = vsub.f32 %v5116_v59, %v1851_v47  ;;  %v2055_v38 = vmul.f32 1.442695, %v1938_v23  ;;  %v387_v59 = vld [vmem:[%s4918_s24 + $0x50] sm:$0x3] }
 0x243   : > { %v2436_v61 = vpack.c.bf16 %v2372_v6, %v2372_v6  ;;  %3749 = vst.msk [vmem:[%s5310_s27 + $0xc] sm:$0x3] %vm3742_vm3, %v3684_v0  ;;  %v3226_v28 = vsel %vm2464_vm2, %v387_v59, 0 }
 0x244   : > { %3750 = vst.msk [vmem:[%s5310_s27 + $0xe] sm:$0x3] %vm3742_vm3, %v3685_v37  ;;  %v2053_v16 = vmul.f32 1.442695, %v1937_v53  ;;  %4001 = vmatmul.msk.bf16.vlgmr.msrb.gmra.mxu1 %vm411_vm0, %v2434_v34  ;;  %4226 = vpow2.f32 %v2055_v38  ;;  %3235 = vmatpush.bf16.msra.mxu0 %v3226_v28  ;;  %v3302_v34 = vsel %vm2464_vm2, %v391_v46, 0 }
 0x245   : > { %4002 = vmatmul.msk.bf16.vlgmr.msrb.gmra.mxu2 %vm411_vm0, %v2435_v33  ;;  %4003 = vmatmul.msk.bf16.vlgmr.msrb.gmra.mxu3 %vm411_vm0, %v2436_v61 }
 0x246   : > { %4228 = vpow2.f32 %v2053_v16  ;;  %3349 = vmatpush.bf16.msrb.mxu2 %v3340_v54 }
 0x247   : > { %v1869_v5 = vpop.xlane.xlu1 %1868 }
 0x248   : > { %v2593_v20 = vpop.f32.mrf.mxu2  ;;  %v1943_v32 = vsub.f32 %v5136_v12, %v1869_v5  ;;  %3311 = vmatpush.bf16.msrb.mxu0 %v3302_v34  ;;  %v398_v34 = vld [vmem:[%s4918_s24 + $0x66] sm:$0x3] }
 0x249   : > { %v2612_v1 = vpop.f32.mrf.mxu3  ;;  %v2648_v4 = vpop.f32.mrf.mxu1  ;;  %v394_v20 = vld [vmem:[%s4918_s24 + $0x5e] sm:$0x3] }
 0x24a   : > { %v2629_v25 = vpop.f32.mrf.mxu0  ;;  %v3687_v26 = vpack.c.bf16 %v2648_v4, %v2648_v4  ;;  %v5392_v13 = vpop.eup %4226  ;;  %v2065_v17 = vmul.f32 1.442695, %v1943_v32  ;;  %v3359_v32 = vsel %vm2464_vm2, %v394_v20, 0 }
 0x24b   : > { %v3686_v49 = vpack.c.bf16 %v2629_v25, %v2629_v25  ;;  %v2236_v52 = vsel %vm1692_vm1, %v5392_v13, 0.0  ;;  %3368 = vmatpush.bf16.msrb.mxu3 %v3359_v32 }
 0x24c   : > { %3752 = vst.msk [vmem:[%s5310_s27 + $0x12] sm:$0x3] %vm3742_vm3, %v3687_v26  ;;  %v5396_v51 = vpop.eup %4228  ;;  %4230 = vpow2.f32 %v2065_v17  ;;  %2237 = vadd.xlane.f32.xlu2 %v2236_v52  ;;  %v392_v52 = vld [vmem:[%s4918_s24 + $0x5a] sm:$0x3] }
 0x24d   : > { %3751 = vst.msk [vmem:[%s5310_s27 + $0x10] sm:$0x3] %vm3742_vm3, %v3686_v49  ;;  %v2233_v12 = vsel %vm1692_vm1, %v5396_v51, 0.0 }
 0x24e   : > { %2234 = vadd.xlane.f32.xlu1 %v2233_v12  ;;  %v3321_v12 = vsel %vm2464_vm2, %v392_v52, 0 }
 0x24f   : > { %v2205_v21 = vpop.xlane.xlu1 %2204  ;;  %3330 = vmatpush.bf16.msrb.mxu1 %v3321_v12 }
 0x250   : > { %v2667_v18 = vpop.f32.mrf.mxu2  ;;  %4232 = vrcp.f32 %v2205_v21 }
 0x251   : > { %v3688_v30 = vpack.c.bf16 %v2667_v18, %v2667_v18  ;;  %v2650_v31 = vpop.f32.mrf.mxu1 }
 0x252   : > { %v2631_v60 = vpop.f32.mrf.mxu0  ;;  %v5410_v39 = vpop.eup %4230 }
 0x253   : > { %3753 = vst.msk [vmem:[%s5310_s27 + $0x14] sm:$0x3] %vm3742_vm3, %v3688_v30  ;;  %v2251_v48 = vsel %vm1692_vm1, %v5410_v39, 0.0 }
 0x254   : > { %2252 = vadd.xlane.f32.xlu0 %v2251_v48 }
 0x256   : > { %v4233_v63 = vpop.eup %4232 }
 0x257   : > { %v2375_v6 = vmul.f32 %v4233_v63, %v5154_v29 }
 0x258   : > { %v2669_v44 = vpop.f32.mrf.mxu2  ;;  %v2686_v14 = vpop.f32.mrf.mxu3 }
 0x259   : > { %v3689_v0 = vpack.c.bf16 %v2686_v14, %v2686_v14  ;;  %v2202_v37 = vpop.xlane.xlu0 %2201  ;;  %v2439_v23 = vpack.c.bf16 %v2375_v6, %v2375_v6 }
 0x25a   : > { %4234 = vrcp.f32 %v2202_v37  ;;  %v2705_v47 = vpop.f32.mrf.mxu0  ;;  %v2724_v7 = vpop.f32.mrf.mxu1 }
 0x25b   : > { %3754 = vst.msk [vmem:[%s5310_s27 + $0x16] sm:$0x3] %vm3742_vm3, %v3689_v0  ;;  %v3690_v53 = vpack.c.bf16 %v2705_v47, %v2705_v47  ;;  %v3691_v55 = vpack.c.bf16 %v2724_v7, %v2724_v7  ;;  %4006 = vmatmul.msk.bf16.vlgmr.msra.gmra.mxu2 %vm411_vm0, %v2439_v23 }
 0x25d   : > { %3755 = vst.msk [vmem:[%s5310_s27 + $0x18] sm:$0x3] %vm3742_vm3, %v3690_v53 }
 0x25e   : > { %3756 = vst.msk [vmem:[%s5310_s27 + $0x1a] sm:$0x3] %vm3742_vm3, %v3691_v55  ;;  %v3435_v55 = vsel %vm2464_vm2, %v398_v34, 0 }
 0x25f   : > { %v2199_v29 = vpop.xlane.xlu2 %2198 }
 0x260   : > { %v4235_v33 = vpop.eup %4234  ;;  %4236 = vrcp.f32 %v2199_v29  ;;  %v2688_v61 = vpop.f32.mrf.mxu3 }
 0x261   : > { %v2374_v38 = vmul.f32 %v4235_v33, %v5177_v45  ;;  %v2743_v16 = vpop.f32.mrf.mxu2  ;;  %v1866_v59 = vpop.xlane.xlu0 %1865  ;;  %v397_v33 = vld [vmem:[%s4918_s24 + $0x64] sm:$0x3] }
 0x262   : > { %v3692_v1 = vpack.c.bf16 %v2743_v16, %v2743_v16  ;;  %v1942_v28 = vsub.f32 %v5185_v40, %v1866_v59  ;;  %v2707_v5 = vpop.f32.mrf.mxu0  ;;  %v2726_v4 = vpop.f32.mrf.mxu1  ;;  %v3416_v59 = vsel %vm2464_vm2, %v397_v33, 0 }
 0x263   : > { %v2438_v25 = vpack.c.bf16 %v2374_v38, %v2374_v38  ;;  %3425 = vmatpush.bf16.msra.mxu2 %v3416_v59  ;;  %v395_v4 = vld [vmem:[%s4918_s24 + $0x60] sm:$0x3] }
 0x264   : > { %3757 = vst.msk [vmem:[%s5310_s27 + $0x1c] sm:$0x3] %vm3742_vm3, %v3692_v1  ;;  %v2063_v26 = vmul.f32 1.442695, %v1942_v28 }
 0x265   : > { %4005 = vmatmul.msk.bf16.vlgmr.msra.gmra.mxu1 %vm411_vm0, %v2438_v25 }
 0x266   : > { %v4237_v45 = vpop.eup %4236  ;;  %4238 = vpow2.f32 %v2063_v26 }
 0x267   : > { %v2373_v49 = vmul.f32 %v4237_v45, %v5188_v56  ;;  %v2208_v17 = vpop.xlane.xlu2 %2207  ;;  %v3378_v45 = vsel %vm2464_vm2, %v395_v4, 0 }
 0x268   : > { %4240 = vrcp.f32 %v2208_v17  ;;  %v2762_v40 = vpop.f32.mrf.mxu3 }
 0x269   : > { %v2437_v11 = vpack.c.bf16 %v2373_v49, %v2373_v49  ;;  %v2745_v18 = vpop.f32.mrf.mxu2  ;;  %v3693_v58 = vpack.c.bf16 %v2762_v40, %v2762_v40  ;;  %v2217_v30 = vpop.xlane.xlu0 %2216 }
 0x26a   : > { %4242 = vrcp.f32 %v2217_v30  ;;  %v2781_v21 = vpop.f32.mrf.mxu0 }
 0x26b   : > { %3758 = vst.msk [vmem:[%s5310_s27 + $0x1e] sm:$0x3] %vm3742_vm3, %v3693_v58  ;;  %v3694_v31 = vpack.c.bf16 %v2781_v21, %v2781_v21  ;;  %4004 = vmatmul.msk.bf16.vlgmr.msra.gmra.mxu0 %vm411_vm0, %v2437_v11  ;;  %v396_v21 = vld [vmem:[%s4918_s24 + $0x62] sm:$0x3] }
 0x26c   : > { %v5437_v56 = vpop.eup %4238  ;;  %3387 = vmatpush.bf16.msra.mxu0 %v3378_v45 }
 0x26d   : > { %3759 = vst.msk [vmem:[%s5310_s27 + $0x20] sm:$0x3] %vm3742_vm3, %v3694_v31  ;;  %v2248_v36 = vsel %vm1692_vm1, %v5437_v56, 0.0 }
 0x26e   : > { %v4241_v60 = vpop.eup %4240  ;;  %2249 = vadd.xlane.f32.xlu0 %v2248_v36 }
 0x26f   : > { %v2376_v54 = vmul.f32 %v4241_v60, %v5200_v62  ;;  %v1872_v48 = vpop.xlane.xlu2 %1871 }
 0x270   : > { %v4243_v63 = vpop.eup %4242  ;;  %v1944_v44 = vsub.f32 %v5225_v50, %v1872_v48  ;;  %v2764_v14 = vpop.f32.mrf.mxu3  ;;  %v3397_v48 = vsel %vm2464_vm2, %v396_v21, 0 }
 0x271   : > { %v2800_v6 = vpop.f32.mrf.mxu1  ;;  %v2440_v0 = vpack.c.bf16 %v2376_v54, %v2376_v54  ;;  %v2379_v37 = vmul.f32 %v4243_v63, %v5209_v10  ;;  %v2211_v47 = vpop.xlane.xlu1 %2210  ;;  %3406 = vmatpush.bf16.msra.mxu1 %v3397_v48 }
 0x272   : > { %v3695_v46 = vpack.c.bf16 %v2800_v6, %v2800_v6  ;;  %v1881_v7 = vpop.xlane.xlu0 %1880  ;;  %v2067_v23 = vmul.f32 1.442695, %v1944_v44  ;;  %4244 = vrcp.f32 %v2211_v47  ;;  %v2783_v62 = vpop.f32.mrf.mxu0 }
 0x273   : > { %v1947_v53 = vsub.f32 %v5228_v43, %v1881_v7  ;;  %v2443_v29 = vpack.c.bf16 %v2379_v37, %v2379_v37  ;;  %4007 = vmatmul.msk.bf16.vlgmr.msra.gmra.mxu3 %vm411_vm0, %v2440_v0  ;;  %v402_v37 = vld [vmem:[%s4918_s24 + $0x6e] sm:$0x3]  ;;  %v401_v62 = vld [vmem:[%s4918_s24 + $0x6c] sm:$0x3] }
 0x274   : > { %3760 = vst.msk [vmem:[%s5310_s27 + $0x22] sm:$0x3] %vm3742_vm3, %v3695_v46  ;;  %4246 = vpow2.f32 %v2067_v23  ;;  %3444 = vmatpush.bf16.msra.mxu3 %v3435_v55  ;;  %v3511_v47 = vsel %vm2464_vm2, %v402_v37, 0 }
 0x275   : > { %v2073_v10 = vmul.f32 1.442695, %v1947_v53  ;;  %4010 = vmatmul.msk.bf16.vlgmr.msrb.gmra.mxu2 %vm411_vm0, %v2443_v29 }
 0x277   : > { %v1863_v50 = vpop.xlane.xlu2 %1862  ;;  %4248 = vpow2.f32 %v2073_v10 }
 0x278   : > { %v4245_v61 = vpop.eup %4244  ;;  %v1941_v38 = vsub.f32 %v5241_v57, %v1863_v50  ;;  %v2819_v16 = vpop.f32.mrf.mxu2  ;;  %v3492_v50 = vsel %vm2464_vm2, %v401_v62, 0 }
 0x279   : > { %v2802_v43 = vpop.f32.mrf.mxu1  ;;  %v2377_v20 = vmul.f32 %v4245_v61, %v5235_v19  ;;  %v3696_v1 = vpack.c.bf16 %v2819_v16, %v2819_v16  ;;  %v2838_v28 = vpop.f32.mrf.mxu3  ;;  %3501 = vmatpush.bf16.msrb.mxu2 %v3492_v50 }
 0x27a   : > { %v2220_v5 = vpop.xlane.xlu1 %2219  ;;  %v5458_v32 = vpop.eup %4246  ;;  %v2061_v25 = vmul.f32 1.442695, %v1941_v38  ;;  %v3697_v26 = vpack.c.bf16 %v2838_v28, %v2838_v28 }
 0x27b   : > { %4250 = vrcp.f32 %v2220_v5  ;;  %v2857_v57 = vpop.f32.mrf.mxu0  ;;  %v2441_v49 = vpack.c.bf16 %v2377_v20, %v2377_v20  ;;  %3761 = vst.msk [vmem:[%s5310_s27 + $0x24] sm:$0x3] %vm3742_vm3, %v3696_v1  ;;  %v2254_v17 = vsel %vm1692_vm1, %v5458_v32, 0.0 }
 0x27c   : > { %v3698_v19 = vpack.c.bf16 %v2857_v57, %v2857_v57  ;;  %4252 = vpow2.f32 %v2061_v25  ;;  %3762 = vst.msk [vmem:[%s5310_s27 + $0x26] sm:$0x3] %vm3742_vm3, %v3697_v26  ;;  %2255 = vadd.xlane.f32.xlu1 %v2254_v17 }
 0x27d   : > { %4008 = vmatmul.msk.bf16.vlgmr.msrb.gmra.mxu0 %vm411_vm0, %v2441_v49  ;;  %v5470_v52 = vpop.eup %4248 }
 0x27e   : > { %3763 = vst.msk [vmem:[%s5310_s27 + $0x28] sm:$0x3] %vm3742_vm3, %v3698_v19 }
 0x27f   : > { %v2214_v40 = vpop.xlane.xlu2 %2213 }
 0x280   : > { %4254 = vrcp.f32 %v2214_v40  ;;  %v2821_v11 = vpop.f32.mrf.mxu2 }
 0x281   : > { %v4251_v12 = vpop.eup %4250  ;;  %v2840_v58 = vpop.f32.mrf.mxu3 }
 0x282   : > { %v2380_v18 = vmul.f32 %v4251_v12, %v5254_v22  ;;  %v1884_v30 = vpop.xlane.xlu1 %1883  ;;  %v5474_v31 = vpop.eup %4252  ;;  %v2263_v22 = vsel %vm1692_vm1, %v5470_v52, 0.0 }
 0x283   : > { %v1948_v36 = vsub.f32 %v5266_v3, %v1884_v30  ;;  %v2859_v60 = vpop.f32.mrf.mxu0  ;;  %v2876_v54 = vpop.f32.mrf.mxu1  ;;  %v2245_v14 = vsel %vm1692_vm1, %v5474_v31, 0.0 }
 0x284   : > { %v2444_v63 = vpack.c.bf16 %v2380_v18, %v2380_v18  ;;  %v3699_v44 = vpack.c.bf16 %v2876_v54, %v2876_v54  ;;  %2246 = vadd.xlane.f32.xlu2 %v2245_v14  ;;  %2264 = vadd.xlane.f32.xlu1 %v2263_v22 }
 0x285   : > { %v2075_v6 = vmul.f32 1.442695, %v1948_v36 }
 0x286   : > { %3764 = vst.msk [vmem:[%s5310_s27 + $0x2a] sm:$0x3] %vm3742_vm3, %v3699_v44  ;;  %4011 = vmatmul.msk.bf16.vlgmr.msrb.gmra.mxu3 %vm411_vm0, %v2444_v63  ;;  %v4255_v3 = vpop.eup %4254 }
 0x287   : > { %4256 = vpow2.f32 %v2075_v6  ;;  %v2378_v0 = vmul.f32 %v4255_v3, %v5268_v24  ;;  %3520 = vmatpush.bf16.msrb.mxu3 %v3511_v47 }
 0x288   : > { %v2895_v46 = vpop.f32.mrf.mxu2 }
 0x289   : > { %v2442_v7 = vpack.c.bf16 %v2378_v0, %v2378_v0  ;;  %v3700_v34 = vpack.c.bf16 %v2895_v46, %v2895_v46  ;;  %v2914_v23 = vpop.f32.mrf.mxu3  ;;  %v2232_v53 = vpop.xlane.xlu0 %2231 }
 0x28a   : > { %v3701_v55 = vpack.c.bf16 %v2914_v23, %v2914_v23  ;;  %4258 = vrcp.f32 %v2232_v53  ;;  %v1875_v29 = vpop.xlane.xlu1 %1874 }
 0x28b   : > { %v2878_v10 = vpop.f32.mrf.mxu1  ;;  %3765 = vst.msk [vmem:[%s5310_s27 + $0x2c] sm:$0x3] %vm3742_vm3, %v3700_v34  ;;  %v1945_v24 = vsub.f32 %v5282_v8, %v1875_v29  ;;  %v2933_v33 = vpop.f32.mrf.mxu0  ;;  %4009 = vmatmul.msk.bf16.vlgmr.msrb.gmra.mxu1 %vm411_vm0, %v2442_v7 }
 0x28c   : > { %3766 = vst.msk [vmem:[%s5310_s27 + $0x2e] sm:$0x3] %vm3742_vm3, %v3701_v55  ;;  %v3702_v38 = vpack.c.bf16 %v2933_v33, %v2933_v33  ;;  %v400_v33 = vld [vmem:[%s4918_s24 + $0x6a] sm:$0x3] }
 0x28d   : > { %v5494_v61 = vpop.eup %4256  ;;  %v2069_v43 = vmul.f32 1.442695, %v1945_v24  ;;  %v399_v24 = vld [vmem:[%s4918_s24 + $0x68] sm:$0x3] }
 0x28e   : > { %v2266_v16 = vsel %vm1692_vm1, %v5494_v61, 0.0  ;;  %3767 = vst.msk [vmem:[%s5310_s27 + $0x30] sm:$0x3] %vm3742_vm3, %v3702_v38 }
 0x28f   : > { %2267 = vadd.xlane.f32.xlu2 %v2266_v16  ;;  %4260 = vpow2.f32 %v2069_v43  ;;  %v2229_v59 = vpop.xlane.xlu2 %2228 }
 0x290   : > { %v4259_v8 = vpop.eup %4258  ;;  %4262 = vrcp.f32 %v2229_v59  ;;  %v2897_v20 = vpop.f32.mrf.mxu2  ;;  %v3454_v59 = vsel %vm2464_vm2, %v399_v24, 0 }
 0x291   : > { %v2384_v1 = vmul.f32 %v4259_v8, %v5291_v42  ;;  %v2916_v28 = vpop.f32.mrf.mxu3  ;;  %v2223_v5 = vpop.xlane.xlu0 %2222  ;;  %v3473_v8 = vsel %vm2464_vm2, %v400_v33, 0  ;;  %3463 = vmatpush.bf16.msrb.mxu0 %v3454_v59 }
 0x292   : > { %4264 = vrcp.f32 %v2223_v5  ;;  %3482 = vmatpush.bf16.msrb.mxu1 %v3473_v8  ;;  %v405_v28 = vld [vmem:[%s4918_s24 + $0x74] sm:$0x3] }
 0x293   : > { %v2952_v4 = vpop.f32.mrf.mxu1  ;;  %v2448_v25 = vpack.c.bf16 %v2384_v1, %v2384_v1  ;;  %v2935_v26 = vpop.f32.mrf.mxu0 }
 0x294   : > { %v3703_v57 = vpack.c.bf16 %v2952_v4, %v2952_v4  ;;  %v3568_v4 = vsel %vm2464_vm2, %v405_v28, 0 }
 0x295   : > { %v5503_v45 = vpop.eup %4260 }
 0x296   : > { %3768 = vst.msk [vmem:[%s5310_s27 + $0x32] sm:$0x3] %vm3742_vm3, %v3703_v57  ;;  %4015 = vmatmul.msk.bf16.vlgmr.msra.gmra.mxu3 %vm411_vm0, %v2448_v25  ;;  %v4263_v49 = vpop.eup %4262  ;;  %v2257_v19 = vsel %vm1692_vm1, %v5503_v45, 0.0 }
 0x297   : > { %v2383_v17 = vmul.f32 %v4263_v49, %v5304_v15  ;;  %2258 = vadd.xlane.f32.xlu0 %v2257_v19  ;;  %v1878_v42 = vpop.xlane.xlu2 %1877 }
 0x298   : > { %v4265_v40 = vpop.eup %4264  ;;  %v1946_v12 = vsub.f32 %v5318_v9, %v1878_v42  ;;  %v2971_v11 = vpop.f32.mrf.mxu2 }
 0x299   : > { %v2447_v18 = vpack.c.bf16 %v2383_v17, %v2383_v17  ;;  %v2381_v58 = vmul.f32 %v4265_v40, %v5315_v41  ;;  %v3704_v30 = vpack.c.bf16 %v2971_v11, %v2971_v11  ;;  %v2990_v21 = vpop.f32.mrf.mxu3  ;;  %v2226_v36 = vpop.xlane.xlu1 %2225 }
 0x29a   : > { %v2071_v60 = vmul.f32 1.442695, %v1946_v12  ;;  %v3705_v54 = vpack.c.bf16 %v2990_v21, %v2990_v21  ;;  %4266 = vrcp.f32 %v2226_v36 }
 0x29b   : > { %v2954_v48 = vpop.f32.mrf.mxu1  ;;  %v2445_v15 = vpack.c.bf16 %v2381_v58, %v2381_v58  ;;  %3769 = vst.msk [vmem:[%s5310_s27 + $0x34] sm:$0x3] %vm3742_vm3, %v3704_v30  ;;  %v3009_v63 = vpop.f32.mrf.mxu0  ;;  %4014 = vmatmul.msk.bf16.vlgmr.msra.gmra.mxu2 %vm411_vm0, %v2447_v18 }
 0x29c   : > { %4268 = vpow2.f32 %v2071_v60  ;;  %3770 = vst.msk [vmem:[%s5310_s27 + $0x36] sm:$0x3] %vm3742_vm3, %v3705_v54  ;;  %v3706_v9 = vpack.c.bf16 %v3009_v63, %v3009_v63  ;;  %3577 = vmatpush.bf16.msra.mxu2 %v3568_v4 }
 0x29d   : > { %4012 = vmatmul.msk.bf16.vlgmr.msra.gmra.mxu0 %vm411_vm0, %v2445_v15 }
 0x29e   : > { %3771 = vst.msk [vmem:[%s5310_s27 + $0x38] sm:$0x3] %vm3742_vm3, %v3706_v9 }
 0x29f   : > { %v2244_v41 = vpop.xlane.xlu0 %2243 }
 0x2a0   : > { %v4267_v44 = vpop.eup %4266  ;;  %4270 = vrcp.f32 %v2244_v41  ;;  %v2973_v14 = vpop.f32.mrf.mxu2 }
 0x2a1   : > { %v2241_v22 = vpop.xlane.xlu2 %2240  ;;  %v2382_v6 = vmul.f32 %v4267_v44, %v5335_v35  ;;  %v2992_v3 = vpop.f32.mrf.mxu3  ;;  %v404_v14 = vld [vmem:[%s4918_s24 + $0x72] sm:$0x3] }
 0x2a2   : > { %4272 = vrcp.f32 %v2241_v22  ;;  %v5522_v0 = vpop.eup %4268 }
 0x2a3   : > { %v3028_v37 = vpop.f32.mrf.mxu1  ;;  %v2446_v46 = vpack.c.bf16 %v2382_v6, %v2382_v6  ;;  %v3011_v47 = vpop.f32.mrf.mxu0  ;;  %v2260_v34 = vsel %vm1692_vm1, %v5522_v0, 0.0 }
 0x2a4   : > { %v3707_v7 = vpack.c.bf16 %v3028_v37, %v3028_v37  ;;  %2261 = vadd.xlane.f32.xlu1 %v2260_v34  ;;  %v3549_v37 = vsel %vm2464_vm2, %v404_v14, 0 }
 0x2a5   : > { %4013 = vmatmul.msk.bf16.vlgmr.msra.gmra.mxu1 %vm411_vm0, %v2446_v46 }
 0x2a6   : > { %3772 = vst.msk [vmem:[%s5310_s27 + $0x3a] sm:$0x3] %vm3742_vm3, %v3707_v7  ;;  %v4271_v35 = vpop.eup %4270  ;;  %3558 = vmatpush.bf16.msra.mxu1 %v3549_v37 }
 0x2a7   : > { %v2388_v53 = vmul.f32 %v4271_v35, %v5348_v2 }
 0x2a8   : > { %v4273_v23 = vpop.eup %4272  ;;  %v3047_v55 = vpop.f32.mrf.mxu2 }
 0x2a9   : > { %v2387_v62 = vmul.f32 %v4273_v23, %v5352_v27  ;;  %v2452_v29 = vpack.c.bf16 %v2388_v53, %v2388_v53  ;;  %v3708_v10 = vpack.c.bf16 %v3047_v55, %v3047_v55  ;;  %v3066_v50 = vpop.f32.mrf.mxu3  ;;  %v406_v23 = vld [vmem:[%s4918_s24 + $0x76] sm:$0x3]  ;;  %v409_v55 = vld [vmem:[%s4918_s24 + $0x7c] sm:$0x3] }
 0x2aa   : > { %v3709_v43 = vpack.c.bf16 %v3066_v50, %v3066_v50  ;;  %v3587_v53 = vsel %vm2464_vm2, %v406_v23, 0  ;;  %v3644_v50 = vsel %vm2464_vm2, %v409_v55, 0 }
 0x2ab   : > { %v2451_v38 = vpack.c.bf16 %v2387_v62, %v2387_v62  ;;  %v3030_v16 = vpop.f32.mrf.mxu1  ;;  %3773 = vst.msk [vmem:[%s5310_s27 + $0x3c] sm:$0x3] %vm3742_vm3, %v3708_v10  ;;  %v3085_v2 = vpop.f32.mrf.mxu0  ;;  %4019 = vmatmul.msk.bf16.vlgmr.msrb.gmra.mxu3 %vm411_vm0, %v2452_v29  ;;  %v403_v62 = vld [vmem:[%s4918_s24 + $0x70] sm:$0x3] }
 0x2ac   : > { %3774 = vst.msk [vmem:[%s5310_s27 + $0x3e] sm:$0x3] %vm3742_vm3, %v3709_v43  ;;  %v3710_v27 = vpack.c.bf16 %v3085_v2, %v3085_v2  ;;  %3596 = vmatpush.bf16.msra.mxu3 %v3587_v53  ;;  %v3530_v10 = vsel %vm2464_vm2, %v403_v62, 0 }
 0x2ad   : > { %4018 = vmatmul.msk.bf16.vlgmr.msrb.gmra.mxu2 %vm411_vm0, %v2451_v38  ;;  %3539 = vmatpush.bf16.msra.mxu0 %v3530_v10 }
 0x2ae   : > { %3775 = vst.msk [vmem:[%s5310_s27 + $0x40] sm:$0x3] %vm3742_vm3, %v3710_v27  ;;  %3653 = vmatpush.bf16.msrb.mxu2 %v3644_v50  ;;  %v410_v27 = vld [vmem:[%s4918_s24 + $0x7e] sm:$0x3] }
 0x2b0   : > { %v3049_v20 = vpop.f32.mrf.mxu2 }
 0x2b1   : > { %v3068_v1 = vpop.f32.mrf.mxu3 }
 0x2b2   : > { %v3663_v1 = vsel %vm2464_vm2, %v410_v27, 0 }
 0x2b3   : > { %v3104_v5 = vpop.f32.mrf.mxu1  ;;  %v3087_v25 = vpop.f32.mrf.mxu0  ;;  %3672 = vmatpush.bf16.msrb.mxu3 %v3663_v1 }
 0x2b4   : > { %v3711_v26 = vpack.c.bf16 %v3104_v5, %v3104_v5  ;;  %v407_v25 = vld [vmem:[%s4918_s24 + $0x78] sm:$0x3] }
 0x2b6   : > { %3776 = vst.msk [vmem:[%s5310_s27 + $0x42] sm:$0x3] %vm3742_vm3, %v3711_v26  ;;  %v3606_v26 = vsel %vm2464_vm2, %v407_v25, 0 }
 0x2b8   : > { %v3123_v57 = vpop.f32.mrf.mxu2 }
 0x2b9   : > { %v3712_v49 = vpack.c.bf16 %v3123_v57, %v3123_v57  ;;  %v3142_v19 = vpop.f32.mrf.mxu3 }
 0x2ba   : > { %v3713_v17 = vpack.c.bf16 %v3142_v19, %v3142_v19 }
 0x2bb   : > { %v3106_v42 = vpop.f32.mrf.mxu1  ;;  %3777 = vst.msk [vmem:[%s5310_s27 + $0x44] sm:$0x3] %vm3742_vm3, %v3712_v49  ;;  %v3161_v40 = vpop.f32.mrf.mxu0 }
 0x2bc   : > { %3778 = vst.msk [vmem:[%s5310_s27 + $0x46] sm:$0x3] %vm3742_vm3, %v3713_v17  ;;  %v3714_v12 = vpack.c.bf16 %v3161_v40, %v3161_v40 }
 0x2be   : > { %3779 = vst.msk [vmem:[%s5310_s27 + $0x48] sm:$0x3] %vm3742_vm3, %v3714_v12 }
 0x2bf   : > { %v2238_v58 = vpop.xlane.xlu2 %2237 }
 0x2c0   : > { %v3125_v11 = vpop.f32.mrf.mxu2  ;;  %4274 = vrcp.f32 %v2238_v58 }
 0x2c1   : > { %v3144_v18 = vpop.f32.mrf.mxu3  ;;  %v2235_v30 = vpop.xlane.xlu1 %2234 }
 0x2c2   : > { %4276 = vrcp.f32 %v2235_v30 }
 0x2c3   : > { %v3180_v21 = vpop.f32.mrf.mxu1  ;;  %v3163_v36 = vpop.f32.mrf.mxu0 }
 0x2c4   : > { %v3715_v60 = vpack.c.bf16 %v3180_v21, %v3180_v21 }
 0x2c6   : > { %3780 = vst.msk [vmem:[%s5310_s27 + $0x4a] sm:$0x3] %vm3742_vm3, %v3715_v60  ;;  %v4275_v54 = vpop.eup %4274 }
 0x2c7   : > { %v2386_v63 = vmul.f32 %v4275_v54, %v5392_v13  ;;  %v2253_v44 = vpop.xlane.xlu0 %2252 }
 0x2c8   : > { %v3199_v48 = vpop.f32.mrf.mxu2  ;;  %v4277_v15 = vpop.eup %4276  ;;  %4278 = vrcp.f32 %v2253_v44 }
 0x2c9   : > { %v3716_v9 = vpack.c.bf16 %v3199_v48, %v3199_v48  ;;  %v3218_v41 = vpop.f32.mrf.mxu3  ;;  %v2385_v22 = vmul.f32 %v4277_v15, %v5396_v51  ;;  %v2450_v46 = vpack.c.bf16 %v2386_v63, %v2386_v63 }
 0x2ca   : > { %v3717_v6 = vpack.c.bf16 %v3218_v41, %v3218_v41 }
 0x2cb   : > { %v3182_v3 = vpop.f32.mrf.mxu1  ;;  %3781 = vst.msk [vmem:[%s5310_s27 + $0x4c] sm:$0x3] %vm3742_vm3, %v3716_v9  ;;  %v2449_v47 = vpack.c.bf16 %v2385_v22, %v2385_v22  ;;  %4017 = vmatmul.msk.bf16.vlgmr.msrb.gmra.mxu1 %vm411_vm0, %v2450_v46 }
 0x2cc   : > { %3782 = vst.msk [vmem:[%s5310_s27 + $0x4e] sm:$0x3] %vm3742_vm3, %v3717_v6 }
 0x2cd   : > { %4016 = vmatmul.msk.bf16.vlgmr.msrb.gmra.mxu0 %vm411_vm0, %v2449_v47 }
 0x2ce   : > { %v4279_v13 = vpop.eup %4278  ;;  %3615 = vmatpush.bf16.msrb.mxu0 %v3606_v26 }
 0x2cf   : > { %v2391_v7 = vmul.f32 %v4279_v13, %v5410_v39 }
 0x2d0   : > { %v3201_v51 = vpop.f32.mrf.mxu2 }
 0x2d1   : > { %v3220_v34 = vpop.f32.mrf.mxu3  ;;  %v2455_v35 = vpack.c.bf16 %v2391_v7, %v2391_v7 }
 0x2d3   : > { %4022 = vmatmul.msk.bf16.vlgmr.msra.gmra.mxu2 %vm411_vm0, %v2455_v35 }
 0x2de   : > { %v3275_v29 = vpop.f32.mrf.mxu2 }
 0x2df   : > { %v3720_v24 = vpack.c.bf16 %v3275_v29, %v3275_v29 }
 0x2e1   : > { %v2250_v39 = vpop.xlane.xlu0 %2249  ;;  %3785 = vst.msk [vmem:[%s5310_s27 + $0x54] sm:$0x3] %vm3742_vm3, %v3720_v24 }
 0x2e2   : > { %4280 = vrcp.f32 %v2250_v39  ;;  %v3256_v33 = vpop.f32.mrf.mxu1 }
 0x2e3   : > { %v3719_v38 = vpack.c.bf16 %v3256_v33, %v3256_v33 }
 0x2e5   : > { %3784 = vst.msk [vmem:[%s5310_s27 + $0x52] sm:$0x3] %vm3742_vm3, %v3719_v38 }
 0x2e6   : > { %v3277_v59 = vpop.f32.mrf.mxu2 }
 0x2e8   : > { %v4281_v43 = vpop.eup %4280  ;;  %v3237_v16 = vpop.f32.mrf.mxu0 }
 0x2e9   : > { %v2390_v8 = vmul.f32 %v4281_v43, %v5437_v56  ;;  %v3718_v2 = vpack.c.bf16 %v3237_v16, %v3237_v16  ;;  %v408_v56 = vld [vmem:[%s4918_s24 + $0x7a] sm:$0x3] }
 0x2ea   : > { %v3258_v20 = vpop.f32.mrf.mxu1  ;;  %v3625_v57 = vsel %vm2464_vm2, %v408_v56, 0 }
 0x2eb   : > { %v2454_v28 = vpack.c.bf16 %v2390_v8, %v2390_v8  ;;  %3783 = vst.msk [vmem:[%s5310_s27 + $0x50] sm:$0x3] %vm3742_vm3, %v3718_v2  ;;  %3634 = vmatpush.bf16.msrb.mxu1 %v3625_v57 }
 0x2ed   : > { %4021 = vmatmul.msk.bf16.vlgmr.msra.gmra.mxu1 %vm411_vm0, %v2454_v28 }
 0x2ef   : > { %v2256_v5 = vpop.xlane.xlu1 %2255 }
 0x2f0   : > { %4282 = vrcp.f32 %v2256_v5  ;;  %v3239_v4 = vpop.f32.mrf.mxu0 }
 0x2f6   : > { %v4283_v49 = vpop.eup %4282  ;;  %v3294_v19 = vpop.f32.mrf.mxu3 }
 0x2f7   : > { %v2392_v17 = vmul.f32 %v4283_v49, %v5458_v32  ;;  %v3721_v42 = vpack.c.bf16 %v3294_v19, %v3294_v19  ;;  %v2247_v40 = vpop.xlane.xlu2 %2246  ;;  %v2265_v12 = vpop.xlane.xlu1 %2264 }
 0x2f8   : > { %4284 = vrcp.f32 %v2247_v40  ;;  %v3351_v11 = vpop.f32.mrf.mxu2 }
 0x2f9   : > { %v2456_v18 = vpack.c.bf16 %v2392_v17, %v2392_v17  ;;  %3786 = vst.msk [vmem:[%s5310_s27 + $0x56] sm:$0x3] %vm3742_vm3, %v3721_v42  ;;  %4286 = vrcp.f32 %v2265_v12  ;;  %v3724_v58 = vpack.c.bf16 %v3351_v11, %v3351_v11 }
 0x2fa   : > { %v3313_v30 = vpop.f32.mrf.mxu0 }
 0x2fb   : > { %3789 = vst.msk [vmem:[%s5310_s27 + $0x5c] sm:$0x3] %vm3742_vm3, %v3724_v58  ;;  %v3722_v21 = vpack.c.bf16 %v3313_v30, %v3313_v30  ;;  %4023 = vmatmul.msk.bf16.vlgmr.msra.gmra.mxu3 %vm411_vm0, %v2456_v18 }
 0x2fd   : > { %3787 = vst.msk [vmem:[%s5310_s27 + $0x58] sm:$0x3] %vm3742_vm3, %v3722_v21 }
 0x2fe   : > { %v4285_v36 = vpop.eup %4284  ;;  %v3296_v32 = vpop.f32.mrf.mxu3 }
 0x2ff   : > { %v4287_v60 = vpop.eup %4286  ;;  %v2389_v54 = vmul.f32 %v4285_v36, %v5474_v31 }
 0x300   : > { %v2395_v48 = vmul.f32 %v4287_v60, %v5470_v52  ;;  %v3353_v15 = vpop.f32.mrf.mxu2 }
 0x301   : > { %v2453_v63 = vpack.c.bf16 %v2389_v54, %v2389_v54 }
 0x302   : > { %v2268_v9 = vpop.xlane.xlu2 %2267  ;;  %v2459_v41 = vpack.c.bf16 %v2395_v48, %v2395_v48  ;;  %v3315_v44 = vpop.f32.mrf.mxu0 }
 0x303   : > { %4288 = vrcp.f32 %v2268_v9  ;;  %4020 = vmatmul.msk.bf16.vlgmr.msra.gmra.mxu0 %vm411_vm0, %v2453_v63 }
 0x304   : > { %4026 = vmatmul.msk.bf16.vlgmr.msrb.gmra.mxu2 %vm411_vm0, %v2459_v41 }
 0x308   : > { %v3332_v22 = vpop.f32.mrf.mxu1 }
 0x309   : > { %v4289_v14 = vpop.eup %4288  ;;  %v3370_v6 = vpop.f32.mrf.mxu3  ;;  %v3723_v31 = vpack.c.bf16 %v3332_v22, %v3332_v22 }
 0x30a   : > { %v2396_v3 = vmul.f32 %v4289_v14, %v5494_v61  ;;  %v3725_v37 = vpack.c.bf16 %v3370_v6, %v3370_v6  ;;  %v2259_v52 = vpop.xlane.xlu0 %2258 }
 0x30b   : > { %3788 = vst.msk [vmem:[%s5310_s27 + $0x5a] sm:$0x3] %vm3742_vm3, %v3723_v31  ;;  %4290 = vrcp.f32 %v2259_v52 }
 0x30c   : > { %v2460_v46 = vpack.c.bf16 %v2396_v3, %v2396_v3  ;;  %3790 = vst.msk [vmem:[%s5310_s27 + $0x5e] sm:$0x3] %vm3742_vm3, %v3725_v37 }
 0x30e   : > { %4027 = vmatmul.msk.bf16.vlgmr.msrb.gmra.mxu3 %vm411_vm0, %v2460_v46 }
 0x310   : > { %v3334_v47 = vpop.f32.mrf.mxu1 }
 0x311   : > { %v3372_v13 = vpop.f32.mrf.mxu3  ;;  %v4291_v51 = vpop.eup %4290 }
 0x312   : > { %v2393_v7 = vmul.f32 %v4291_v51, %v5503_v45 }
 0x314   : > { %v2457_v34 = vpack.c.bf16 %v2393_v7, %v2393_v7 }
 0x316   : > { %4024 = vmatmul.msk.bf16.vlgmr.msrb.gmra.mxu0 %vm411_vm0, %v2457_v34 }
 0x317   : > { %v2262_v61 = vpop.xlane.xlu1 %2261 }
 0x318   : > { %4292 = vrcp.f32 %v2262_v61 }
 0x319   : > { %v3446_v35 = vpop.f32.mrf.mxu3 }
 0x31a   : > { %v3729_v23 = vpack.c.bf16 %v3446_v35, %v3446_v35  ;;  %v3389_v53 = vpop.f32.mrf.mxu0 }
 0x31b   : > { %v3726_v62 = vpack.c.bf16 %v3389_v53, %v3389_v53 }
 0x31c   : > { %3794 = vst.msk [vmem:[%s5310_s27 + $0x66] sm:$0x3] %vm3742_vm3, %v3729_v23 }
 0x31d   : > { %3791 = vst.msk [vmem:[%s5310_s27 + $0x60] sm:$0x3] %vm3742_vm3, %v3726_v62 }
 0x31e   : > { %v4293_v55 = vpop.eup %4292  ;;  %v3427_v29 = vpop.f32.mrf.mxu2 }
 0x31f   : > { %v2394_v10 = vmul.f32 %v4293_v55, %v5522_v0  ;;  %v3728_v45 = vpack.c.bf16 %v3427_v29, %v3427_v29 }
 0x321   : > { %v3448_v50 = vpop.f32.mrf.mxu3  ;;  %v2458_v24 = vpack.c.bf16 %v2394_v10, %v2394_v10  ;;  %3793 = vst.msk [vmem:[%s5310_s27 + $0x64] sm:$0x3] %vm3742_vm3, %v3728_v45 }
 0x322   : > { %v3391_v39 = vpop.f32.mrf.mxu0  ;;  %v3408_v33 = vpop.f32.mrf.mxu1 }
 0x323   : > { %v3727_v38 = vpack.c.bf16 %v3408_v33, %v3408_v33  ;;  %4025 = vmatmul.msk.bf16.vlgmr.msrb.gmra.mxu1 %vm411_vm0, %v2458_v24 }
 0x325   : > { %3792 = vst.msk [vmem:[%s5310_s27 + $0x62] sm:$0x3] %vm3742_vm3, %v3727_v38 }
 0x326   : > { %v3429_v43 = vpop.f32.mrf.mxu2 }
 0x32a   : > { %v3410_v16 = vpop.f32.mrf.mxu1 }
 0x32e   : > { %v3522_v59 = vpop.f32.mrf.mxu3 }
 0x32f   : > { %v3733_v0 = vpack.c.bf16 %v3522_v59, %v3522_v59 }
 0x330   : > { %v3503_v8 = vpop.f32.mrf.mxu2 }
 0x331   : > { %v3732_v2 = vpack.c.bf16 %v3503_v8, %v3503_v8  ;;  %3798 = vst.msk [vmem:[%s5310_s27 + $0x6e] sm:$0x3] %vm3742_vm3, %v3733_v0 }
 0x333   : > { %3797 = vst.msk [vmem:[%s5310_s27 + $0x6c] sm:$0x3] %vm3742_vm3, %v3732_v2 }
 0x336   : > { %v3524_v27 = vpop.f32.mrf.mxu3 }
 0x338   : > { %v3505_v20 = vpop.f32.mrf.mxu2 }
 0x348   : > { %v3484_v1 = vpop.f32.mrf.mxu1 }
 0x349   : > { %v3731_v5 = vpack.c.bf16 %v3484_v1, %v3484_v1 }
 0x34a   : > { %v3465_v28 = vpop.f32.mrf.mxu0 }
 0x34b   : > { %v3730_v4 = vpack.c.bf16 %v3465_v28, %v3465_v28  ;;  %3796 = vst.msk [vmem:[%s5310_s27 + $0x6a] sm:$0x3] %vm3742_vm3, %v3731_v5 }
 0x34d   : > { %3795 = vst.msk [vmem:[%s5310_s27 + $0x68] sm:$0x3] %vm3742_vm3, %v3730_v4 }
 0x350   : > { %v3486_v25 = vpop.f32.mrf.mxu1 }
 0x352   : > { %v3467_v26 = vpop.f32.mrf.mxu0 }
 0x356   : > { %v3579_v56 = vpop.f32.mrf.mxu2 }
 0x357   : > { %v3736_v57 = vpack.c.bf16 %v3579_v56, %v3579_v56 }
 0x359   : > { %3801 = vst.msk [vmem:[%s5310_s27 + $0x74] sm:$0x3] %vm3742_vm3, %v3736_v57 }
 0x35e   : > { %v3581_v49 = vpop.f32.mrf.mxu2 }
 0x36a   : > { %v3560_v19 = vpop.f32.mrf.mxu1 }
 0x36b   : > { %v3735_v17 = vpack.c.bf16 %v3560_v19, %v3560_v19 }
 0x36d   : > { %3800 = vst.msk [vmem:[%s5310_s27 + $0x72] sm:$0x3] %vm3742_vm3, %v3735_v17 }
 0x372   : > { %v3562_v42 = vpop.f32.mrf.mxu1 }
 0x37e   : > { %v3598_v40 = vpop.f32.mrf.mxu3 }
 0x37f   : > { %v3737_v12 = vpack.c.bf16 %v3598_v40, %v3598_v40 }
 0x380   : > { %v3541_v11 = vpop.f32.mrf.mxu0 }
 0x381   : > { %3802 = vst.msk [vmem:[%s5310_s27 + $0x76] sm:$0x3] %vm3742_vm3, %v3737_v12  ;;  %v3734_v18 = vpack.c.bf16 %v3541_v11, %v3541_v11 }
 0x383   : > { %3799 = vst.msk [vmem:[%s5310_s27 + $0x70] sm:$0x3] %vm3742_vm3, %v3734_v18 }
 0x386   : > { %v3600_v58 = vpop.f32.mrf.mxu3 }
 0x387   : > { %v3655_v30 = vpop.f32.mrf.mxu2 }
 0x388   : > { %v3740_v21 = vpack.c.bf16 %v3655_v30, %v3655_v30  ;;  %v3543_v36 = vpop.f32.mrf.mxu0 }
 0x38a   : > { %3805 = vst.msk [vmem:[%s5310_s27 + $0x7c] sm:$0x3] %vm3742_vm3, %v3740_v21 }
 0x38f   : > { %v3657_v32 = vpop.f32.mrf.mxu2 }
 0x391   : > { %v3674_v60 = vpop.f32.mrf.mxu3 }
 0x392   : > { %v3741_v54 = vpack.c.bf16 %v3674_v60, %v3674_v60 }
 0x393   : > { %v3617_v48 = vpop.f32.mrf.mxu0 }
 0x394   : > { %3806 = vst.msk [vmem:[%s5310_s27 + $0x7e] sm:$0x3] %vm3742_vm3, %v3741_v54  ;;  %v3738_v15 = vpack.c.bf16 %v3617_v48, %v3617_v48 }
 0x396   : > { %3803 = vst.msk [vmem:[%s5310_s27 + $0x78] sm:$0x3] %vm3742_vm3, %v3738_v15 }
 0x399   : > { %v3676_v63 = vpop.f32.mrf.mxu3 }
 0x39b   : > { %v3619_v9 = vpop.f32.mrf.mxu0 }
 0x3a0   : > { %v3636_v41 = vpop.f32.mrf.mxu1 }
 0x3a1   : > { %v3739_v44 = vpack.c.bf16 %v3636_v41, %v3636_v41 }
 0x3a3   : > { %3804 = vst.msk [vmem:[%s5310_s27 + $0x7a] sm:$0x3] %vm3742_vm3, %v3739_v44 }
 0x3a8   : > { %v3638_v14 = vpop.f32.mrf.mxu1 }
 0x3a9 PF: > { %s13_s12 = sadd.s32 1, %s4300_s12  }
 0x3aa   : > { %p10_p4 = scmp.ge.s32.totalorder %s13_s12, 4  }
 0x3ac   :  { %12 = sbr.rel (!%p10_p4) target bundleno = 1 (0x1), region = 68 }

</bundles_post_ra>
